<compile_context>
chip_gen: v5e
topology: v5e:2x2
jax: 0.10.0
libtpu: 0.0.40
codegen_flags: <defaults>
</compile_context>

<pallas_src>
import numpy as np
import jax
import jax.numpy as jnp
from jax.experimental import pallas as pl
from jax.experimental.pallas import tpu as pltpu

LATENT_DIM = 32            # module default is 768; kept small for the example
C_MID, H_MID, W_MID = 64, 7, 7
C_OUT, H_DC, W_DC = 2, 14, 14
H_OUT, W_OUT = 224, 224
SCALE = H_OUT // H_DC      # 16

N_MID = C_MID * H_MID * W_MID     # 3136
N_DC = C_OUT * H_DC * W_DC        # 392
N_ROWS = C_OUT * H_DC             # 28 decoded rows per element
W_PAD = 256                       # 224 padded to a lane-aligned 256-wide block
N_WIDE = N_ROWS * W_PAD           # 7168


# ---------------- fused Pallas kernel ----------------

def decoder_kernel(x_ref, w_ref, b_ref, out_ref):
    """One TB-row batch tile per grid step.

    x_ref  : (TB, latent)
    w_ref  : (latent, N_WIDE)  composed fc∘deconv∘width-upsample weight (256-padded row blocks)
    b_ref  : (1, N_WIDE)       matching composed bias
    out_ref: (TB, 2, 224, 224)
    """
    tb = out_ref.shape[0]

    # composed matmul: (TB, latent) @ (latent, 28*256) + bias
    y = jnp.dot(x_ref[...], w_ref[...], preferred_element_type=jnp.float32)
    y = y + b_ref[...]                                                   # (TB, N_WIDE)

    # height upsample 14 -> 224: every decoded (already width-upsampled) row is broadcast
    # over 16 output sublanes and stored directly into the output block.  All lane slices
    # start at multiples of 256 (aligned); no MXU / XLU relayout work needed.
    for b in range(tb):
        for c in range(C_OUT):
            for h in range(H_DC):
                r = c * H_DC + h
                seg = y[b:b + 1, r * W_PAD:r * W_PAD + W_OUT]            # (1, 224)
                out_ref[b, c, h * SCALE:(h + 1) * SCALE, :] = (
                    jnp.broadcast_to(seg, (SCALE, W_OUT)))


# ---------------- wrapper ----------------

def optical_flow_decoder(x, w_wide, b_wide, *, tb=8):
    """x: (B, latent) f32; w_wide: (latent, N_WIDE); b_wide: (1, N_WIDE) -> (B, 2, 224, 224)."""
    # tb should be a multiple of 8 (sublane tiling of the (tb, latent) x block).
    B = x.shape[0]
    n_steps = -(-B // tb)
    b_pad = n_steps * tb
    if b_pad != B:
        x = jnp.pad(x, ((0, b_pad - B), (0, 0)))   # padded rows are computed then sliced off

    out = pl.pallas_call(
        decoder_kernel,
        out_shape=jax.ShapeDtypeStruct((b_pad, C_OUT, H_OUT, W_OUT), jnp.float32),
        grid=(n_steps,),
        in_specs=[
            pl.BlockSpec((tb, LATENT_DIM), lambda i: (i, 0)),
            pl.BlockSpec((LATENT_DIM, N_WIDE), lambda i: (0, 0),
                         pipeline_mode=pl.Buffered(1)),       # constant block: single buffer
            pl.BlockSpec((1, N_WIDE), lambda i: (0, 0),
                         pipeline_mode=pl.Buffered(1)),
        ],
        out_specs=pl.BlockSpec((tb, C_OUT, H_OUT, W_OUT), lambda i: (i, 0, 0, 0)),
        compiler_params=pltpu.CompilerParams(
            dimension_semantics=("parallel",)),    # v7x: both TensorCores split the batch steps
    )(x, w_wide, b_wide)

    return out if b_pad == B else out[:B]


# ---------------- host-side parameter construction (offline glue) ----------------

def build_deconv_matrix(w_dc):
    """Dense M s.t. flat_NCHW(z) @ M == flat_NCHW(ConvTranspose2d(z)) (bias excluded).

    w_dc: (C_MID, C_OUT, 3, 3) -- PyTorch ConvTranspose2d weight layout.
    stride=2, padding=1, output_padding=1:  oh = 2*ih - 1 + kh,  ow = 2*iw - 1 + kw.
    """
    M = np.zeros((C_MID, H_MID, W_MID, C_OUT, H_DC, W_DC), np.float64)
    for kh in range(3):
        for kw in range(3):
            for ih in range(H_MID):
                oh = 2 * ih - 1 + kh
                if not 0 <= oh < H_DC:
                    continue
                for iw in range(W_MID):
                    ow = 2 * iw - 1 + kw
                    if not 0 <= ow < W_DC:
                        continue
                    M[:, ih, iw, :, oh, ow] += w_dc[:, :, kh, kw]
    return M.reshape(N_MID, N_DC)


def build_fused_params(w_fc, b_fc, w_dc, b_dc):
    """Compose fc ∘ deconv ∘ width-nearest-upsample into one weight/bias (f64 math).

    Returns w_wide (latent, 28*256) f32 and b_wide (1, 28*256) f32:  x @ w_wide + b_wide
    yields, per element, 28 decoded rows (2 channels x 14 heights) already width-upsampled
    to 224 and padded to lane-aligned 256-wide blocks (last 32 columns of each block are 0).
    """
    m = build_deconv_matrix(w_dc.astype(np.float64))                      # (3136, 392)
    w_comp = w_fc.astype(np.float64) @ m                                  # (latent, 392)
    b_comp = (b_fc.astype(np.float64) @ m
              + np.repeat(b_dc.astype(np.float64), H_DC * W_DC))          # (392,)

    w3 = np.repeat(w_comp.reshape(-1, N_ROWS, W_DC), SCALE, axis=2)       # (latent, 28, 224)
    b3 = np.repeat(b_comp.reshape(N_ROWS, W_DC), SCALE, axis=1)           # (28, 224)

    w_wide = np.zeros((w_comp.shape[0], N_ROWS, W_PAD), np.float32)
    b_wide = np.zeros((N_ROWS, W_PAD), np.float32)
    w_wide[:, :, :W_OUT] = w3
    b_wide[:, :W_OUT] = b3
    return w_wide.reshape(-1, N_WIDE), b_wide.reshape(1, N_WIDE)


# ---------------- pure-JAX reference of the PyTorch forward ----------------

def reference(x, w_fc, b_fc, w_dc, b_dc):
    B = x.shape[0]
    z = jnp.dot(x, w_fc, precision='highest') + b_fc
    z = z.reshape(B, C_MID, H_MID, W_MID)
    # ConvTranspose2d == lhs-dilated conv with spatially flipped, channel-swapped kernel
    k = jnp.flip(w_dc, axis=(2, 3)).transpose(1, 0, 2, 3)   # (O, I, kh, kw)
    y = jax.lax.conv_general_dilated(
        z, k, window_strides=(1, 1),
        padding=((1, 2), (1, 2)),            # (k-1-p, k-1-p+output_padding)
        lhs_dilation=(2, 2),
        dimension_numbers=("NCHW", "OIHW", "NCHW"),
        precision='highest')
    y = y + b_dc.reshape(1, C_OUT, 1, 1)
    # nn.Upsample(size=(224, 224)) default mode='nearest'
    return jnp.repeat(jnp.repeat(y, SCALE, axis=2), SCALE, axis=3)


if __name__ == "__main__":
    key = jax.random.PRNGKey(0)
    k_x, k_wfc, k_bfc, k_wdc, k_bdc = jax.random.split(key, 5)

    B = 12                                   # pads to 16 -> 2 grid steps, exercises the tail path
    x = jax.random.normal(k_x, (B, LATENT_DIM), jnp.float32)

    # fc weight stored (in, out) == torch Linear.weight.T
    w_fc = jax.random.normal(k_wfc, (LATENT_DIM, N_MID), jnp.float32) * 0.05
    b_fc = jax.random.normal(k_bfc, (N_MID,), jnp.float32) * 0.05
    # ConvTranspose2d weight: (in_channels, out_channels, kH, kW)
    w_dc = jax.random.normal(k_wdc, (C_MID, C_OUT, 3, 3), jnp.float32) * 0.05
    b_dc = jax.random.normal(k_bdc, (C_OUT,), jnp.float32) * 0.05

    w_wide, b_wide = build_fused_params(np.asarray(w_fc), np.asarray(b_fc),
                                        np.asarray(w_dc), np.asarray(b_dc))

    out = optical_flow_decoder(x, jnp.asarray(w_wide), jnp.asarray(b_wide), tb=8)
    out = jax.block_until_ready(out)

    ref = jax.block_until_ready(reference(x, w_fc, b_fc, w_dc, b_dc))
    assert out.shape == (B, C_OUT, H_OUT, W_OUT), out.shape

    # Both paths are f32; the kernel matmul uses the MXU's default f32 path while the
    # reference runs at precision='highest', so allow 2e-3 (observed error is far smaller;
    # a HIGHEST-precision in-kernel matmul would allow ~1e-5).  Nearest-neighbour replication
    # itself is bit-exact by construction.
    np.testing.assert_allclose(np.asarray(out), np.asarray(ref), rtol=2e-3, atol=2e-3)

    print("KERNEL_OK")
</pallas_src>

<mosaic_0001>
module attributes {stable_mosaic.version = 11 : i64} {
  func.func @decoder_kernel(%arg0: i32, %arg1: memref<8x32xf32, #tpu.memory_space<vmem>>, %arg2: memref<32x7168xf32, #tpu.memory_space<vmem>>, %arg3: memref<1x7168xf32, #tpu.memory_space<vmem>>, %arg4: memref<8x2x224x224xf32, #tpu.memory_space<vmem>>) attributes {dimension_semantics = [#tpu.dimension_semantics<parallel>], iteration_bounds = array<i64: 2>, scalar_prefetch = 0 : i64, scratch_operands = 0 : i64, tpu.core_type = #tpu.core_type<tc>, window_params = [{transform_indices = @transform_0, window_bounds = array<i64: 8, 32>}, {pipeline_mode = #tpu.pipeline_mode<synchronous>, transform_indices = @transform_1, window_bounds = array<i64: 32, 7168>}, {pipeline_mode = #tpu.pipeline_mode<synchronous>, transform_indices = @transform_2, window_bounds = array<i64: 1, 7168>}, {transform_indices = @transform_3, window_bounds = array<i64: 8, 2, 224, 224>}]} {
    %c0 = arith.constant 0 : index
    %c0_0 = arith.constant 0 : index
    %0 = vector.load %arg1[%c0, %c0_0] : memref<8x32xf32, #tpu.memory_space<vmem>>, vector<8x32xf32>
    %c0_1 = arith.constant 0 : index
    %c0_2 = arith.constant 0 : index
    %1 = vector.load %arg2[%c0_1, %c0_2] : memref<32x7168xf32, #tpu.memory_space<vmem>>, vector<32x7168xf32>
    %cst = arith.constant dense<0.000000e+00> : vector<8x7168xf32>
    %2 = tpu.matmul %0, %1, %cst {dimension_numbers = #tpu.dot_dimension_numbers<[1], [0], [0], [1], [0, 0, 1, 1], [], []>} : vector<8x32xf32>, vector<32x7168xf32>, vector<8x7168xf32> -> vector<8x7168xf32>
    %c0_3 = arith.constant 0 : index
    %c0_4 = arith.constant 0 : index
    %3 = vector.load %arg3[%c0_3, %c0_4] : memref<1x7168xf32, #tpu.memory_space<vmem>>, vector<1x7168xf32>
    %4 = vector.broadcast %3 : vector<1x7168xf32> to vector<8x7168xf32>
    %5 = arith.addf %2, %4 : vector<8x7168xf32>
    %6 = vector.extract_strided_slice %5 {offsets = [0, 0], sizes = [1, 224], strides = [1, 1]} : vector<8x7168xf32> to vector<1x224xf32>
    %7 = vector.shape_cast %6 : vector<1x224xf32> to vector<1x224xf32>
    %8 = vector.broadcast %7 : vector<1x224xf32> to vector<16x224xf32>
    %c0_5 = arith.constant 0 : index
    %c0_6 = arith.constant 0 : index
    %c0_7 = arith.constant 0 : index
    %c0_8 = arith.constant 0 : index
    %9 = vector.load %arg4[%c0_5, %c0_6, %c0_7, %c0_8] : memref<8x2x224x224xf32, #tpu.memory_space<vmem>>, vector<1x1x16x224xf32>
    %10 = vector.shape_cast %9 : vector<1x1x16x224xf32> to vector<16x224xf32>
    %11 = vector.shape_cast %8 : vector<16x224xf32> to vector<1x1x16x224xf32>
    tpu.vector_store %arg4[%c0_5, %c0_6, %c0_7, %c0_8], %11 {strides = array<i32>} : memref<8x2x224x224xf32, #tpu.memory_space<vmem>>, vector<1x1x16x224xf32>,
    %12 = vector.extract_strided_slice %5 {offsets = [0, 256], sizes = [1, 224], strides = [1, 1]} : vector<8x7168xf32> to vector<1x224xf32>
    %13 = vector.shape_cast %12 : vector<1x224xf32> to vector<1x224xf32>
    %14 = vector.broadcast %13 : vector<1x224xf32> to vector<16x224xf32>
    %c0_9 = arith.constant 0 : index
    %c0_10 = arith.constant 0 : index
    %c16 = arith.constant 16 : index
    %c0_11 = arith.constant 0 : index
    %15 = vector.load %arg4[%c0_9, %c0_10, %c16, %c0_11] : memref<8x2x224x224xf32, #tpu.memory_space<vmem>>, vector<1x1x16x224xf32>
    %16 = vector.shape_cast %15 : vector<1x1x16x224xf32> to vector<16x224xf32>
    %17 = vector.shape_cast %14 : vector<16x224xf32> to vector<1x1x16x224xf32>
    tpu.vector_store %arg4[%c0_9, %c0_10, %c16, %c0_11], %17 {strides = array<i32>} : memref<8x2x224x224xf32, #tpu.memory_space<vmem>>, vector<1x1x16x224xf32>,
    %18 = vector.extract_strided_slice %5 {offsets = [0, 512], sizes = [1, 224], strides = [1, 1]} : vector<8x7168xf32> to vector<1x224xf32>
    %19 = vector.shape_cast %18 : vector<1x224xf32> to vector<1x224xf32>
    %20 = vector.broadcast %19 : vector<1x224xf32> to vector<16x224xf32>
    %c0_12 = arith.constant 0 : index
    %c0_13 = arith.constant 0 : index
    %c32 = arith.constant 32 : index
    %c0_14 = arith.constant 0 : index
    %21 = vector.load %arg4[%c0_12, %c0_13, %c32, %c0_14] : memref<8x2x224x224xf32, #tpu.memory_space<vmem>>, vector<1x1x16x224xf32>
    %22 = vector.shape_cast %21 : vector<1x1x16x224xf32> to vector<16x224xf32>
    %23 = vector.shape_cast %20 : vector<16x224xf32> to vector<1x1x16x224xf32>
    tpu.vector_store %arg4[%c0_12, %c0_13, %c32, %c0_14], %23 {strides = array<i32>} : memref<8x2x224x224xf32, #tpu.memory_space<vmem>>, vector<1x1x16x224xf32>,
    %24 = vector.extract_strided_slice %5 {offsets = [0, 768], sizes = [1, 224], strides = [1, 1]} : vector<8x7168xf32> to vector<1x224xf32>
    %25 = vector.shape_cast %24 : vector<1x224xf32> to vector<1x224xf32>
    %26 = vector.broadcast %25 : vector<1x224xf32> to vector<16x224xf32>
    %c0_15 = arith.constant 0 : index
    %c0_16 = arith.constant 0 : index
    %c48 = arith.constant 48 : index
    %c0_17 = arith.constant 0 : index
    %27 = vector.load %arg4[%c0_15, %c0_16, %c48, %c0_17] : memref<8x2x224x224xf32, #tpu.memory_space<vmem>>, vector<1x1x16x224xf32>
    %28 = vector.shape_cast %27 : vector<1x1x16x224xf32> to vector<16x224xf32>
    %29 = vector.shape_cast %26 : vector<16x224xf32> to vector<1x1x16x224xf32>
    tpu.vector_store %arg4[%c0_15, %c0_16, %c48, %c0_17], %29 {strides = array<i32>} : memref<8x2x224x224xf32, #tpu.memory_space<vmem>>, vector<1x1x16x224xf32>,
    %30 = vector.extract_strided_slice %5 {offsets = [0, 1024], sizes = [1, 224], strides = [1, 1]} : vector<8x7168xf32> to vector<1x224xf32>
    %31 = vector.shape_cast %30 : vector<1x224xf32> to vector<1x224xf32>
    %32 = vector.broadcast %31 : vector<1x224xf32> to vector<16x224xf32>
    %c0_18 = arith.constant 0 : index
    %c0_19 = arith.constant 0 : index
    %c64 = arith.constant 64 : index
    %c0_20 = arith.constant 0 : index
    %33 = vector.load %arg4[%c0_18, %c0_19, %c64, %c0_20] : memref<8x2x224x224xf32, #tpu.memory_space<vmem>>, vector<1x1x16x224xf32>
    %34 = vector.shape_cast %33 : vector<1x1x16x224xf32> to vector<16x224xf32>
    %35 = vector.shape_cast %32 : vector<16x224xf32> to vector<1x1x16x224xf32>
    tpu.vector_store %arg4[%c0_18, %c0_19, %c64, %c0_20], %35 {strides = array<i32>} : memref<8x2x224x224xf32, #tpu.memory_space<vmem>>, vector<1x1x16x224xf32>,
    %36 = vector.extract_strided_slice %5 {offsets = [0, 1280], sizes = [1, 224], strides = [1, 1]} : vector<8x7168xf32> to vector<1x224xf32>
    %37 = vector.shape_cast %36 : vector<1x224xf32> to vector<1x224xf32>
    %38 = vector.broadcast %37 : vector<1x224xf32> to vector<16x224xf32>
    %c0_21 = arith.constant 0 : index
    %c0_22 = arith.constant 0 : index
    %c80 = arith.constant 80 : index
    %c0_23 = arith.constant 0 : index
    %39 = vector.load %arg4[%c0_21, %c0_22, %c80, %c0_23] : memref<8x2x224x224xf32, #tpu.memory_space<vmem>>, vector<1x1x16x224xf32>
    %40 = vector.shape_cast %39 : vector<1x1x16x224xf32> to vector<16x224xf32>
    %41 = vector.shape_cast %38 : vector<16x224xf32> to vector<1x1x16x224xf32>
    tpu.vector_store %arg4[%c0_21, %c0_22, %c80, %c0_23], %41 {strides = array<i32>} : memref<8x2x224x224xf32, #tpu.memory_space<vmem>>, vector<1x1x16x224xf32>,
    %42 = vector.extract_strided_slice %5 {offsets = [0, 1536], sizes = [1, 224], strides = [1, 1]} : vector<8x7168xf32> to vector<1x224xf32>
    %43 = vector.shape_cast %42 : vector<1x224xf32> to vector<1x224xf32>
    %44 = vector.broadcast %43 : vector<1x224xf32> to vector<16x224xf32>
    %c0_24 = arith.constant 0 : index
    %c0_25 = arith.constant 0 : index
    %c96 = arith.constant 96 : index
    %c0_26 = arith.constant 0 : index
    %45 = vector.load %arg4[%c0_24, %c0_25, %c96, %c0_26] : memref<8x2x224x224xf32, #tpu.memory_space<vmem>>, vector<1x1x16x224xf32>
    %46 = vector.shape_cast %45 : vector<1x1x16x224xf32> to vector<16x224xf32>
    %47 = vector.shape_cast %44 : vector<16x224xf32> to vector<1x1x16x224xf32>
    tpu.vector_store %arg4[%c0_24, %c0_25, %c96, %c0_26], %47 {strides = array<i32>} : memref<8x2x224x224xf32, #tpu.memory_space<vmem>>, vector<1x1x16x224xf32>,
    %48 = vector.extract_strided_slice %5 {offsets = [0, 1792], sizes = [1, 224], strides = [1, 1]} : vector<8x7168xf32> to vector<1x224xf32>
    %49 = vector.shape_cast %48 : vector<1x224xf32> to vector<1x224xf32>
    %50 = vector.broadcast %49 : vector<1x224xf32> to vector<16x224xf32>
    %c0_27 = arith.constant 0 : index
    %c0_28 = arith.constant 0 : index
    %c112 = arith.constant 112 : index
    %c0_29 = arith.constant 0 : index
    %51 = vector.load %arg4[%c0_27, %c0_28, %c112, %c0_29] : memref<8x2x224x224xf32, #tpu.memory_space<vmem>>, vector<1x1x16x224xf32>
    %52 = vector.shape_cast %51 : vector<1x1x16x224xf32> to vector<16x224xf32>
    %53 = vector.shape_cast %50 : vector<16x224xf32> to vector<1x1x16x224xf32>
    tpu.vector_store %arg4[%c0_27, %c0_28, %c112, %c0_29], %53 {strides = array<i32>} : memref<8x2x224x224xf32, #tpu.memory_space<vmem>>, vector<1x1x16x224xf32>,
    %54 = vector.extract_strided_slice %5 {offsets = [0, 2048], sizes = [1, 224], strides = [1, 1]} : vector<8x7168xf32> to vector<1x224xf32>
    %55 = vector.shape_cast %54 : vector<1x224xf32> to vector<1x224xf32>
    %56 = vector.broadcast %55 : vector<1x224xf32> to vector<16x224xf32>
    %c0_30 = arith.constant 0 : index
    %c0_31 = arith.constant 0 : index
    %c128 = arith.constant 128 : index
    %c0_32 = arith.constant 0 : index
    %57 = vector.load %arg4[%c0_30, %c0_31, %c128, %c0_32] : memref<8x2x224x224xf32, #tpu.memory_space<vmem>>, vector<1x1x16x224xf32>
    %58 = vector.shape_cast %57 : vector<1x1x16x224xf32> to vector<16x224xf32>
    %59 = vector.shape_cast %56 : vector<16x224xf32> to vector<1x1x16x224xf32>
    tpu.vector_store %arg4[%c0_30, %c0_31, %c128, %c0_32], %59 {strides = array<i32>} : memref<8x2x224x224xf32, #tpu.memory_space<vmem>>, vector<1x1x16x224xf32>,
    %60 = vector.extract_strided_slice %5 {offsets = [0, 2304], sizes = [1, 224], strides = [1, 1]} : vector<8x7168xf32> to vector<1x224xf32>
    %61 = vector.shape_cast %60 : vector<1x224xf32> to vector<1x224xf32>
    %62 = vector.broadcast %61 : vector<1x224xf32> to vector<16x224xf32>
    %c0_33 = arith.constant 0 : index
    %c0_34 = arith.constant 0 : index
    %c144 = arith.constant 144 : index
    %c0_35 = arith.constant 0 : index
    %63 = vector.load %arg4[%c0_33, %c0_34, %c144, %c0_35] : memref<8x2x224x224xf32, #tpu.memory_space<vmem>>, vector<1x1x16x224xf32>
    %64 = vector.shape_cast %63 : vector<1x1x16x224xf32> to vector<16x224xf32>
    %65 = vector.shape_cast %62 : vector<16x224xf32> to vector<1x1x16x224xf32>
    tpu.vector_store %arg4[%c0_33, %c0_34, %c144, %c0_35], %65 {strides = array<i32>} : memref<8x2x224x224xf32, #tpu.memory_space<vmem>>, vector<1x1x16x224xf32>,
    %66 = vector.extract_strided_slice %5 {offsets = [0, 2560], sizes = [1, 224], strides = [1, 1]} : vector<8x7168xf32> to vector<1x224xf32>
    %67 = vector.shape_cast %66 : vector<1x224xf32> to vector<1x224xf32>
    %68 = vector.broadcast %67 : vector<1x224xf32> to vector<16x224xf32>
    %c0_36 = arith.constant 0 : index
    %c0_37 = arith.constant 0 : index
    %c160 = arith.constant 160 : index
    %c0_38 = arith.constant 0 : index
    %69 = vector.load %arg4[%c0_36, %c0_37, %c160, %c0_38] : memref<8x2x224x224xf32, #tpu.memory_space<vmem>>, vector<1x1x16x224xf32>
    %70 = vector.shape_cast %69 : vector<1x1x16x224xf32> to vector<16x224xf32>
    %71 = vector.shape_cast %68 : vector<16x224xf32> to vector<1x1x16x224xf32>
    tpu.vector_store %arg4[%c0_36, %c0_37, %c160, %c0_38], %71 {strides = array<i32>} : memref<8x2x224x224xf32, #tpu.memory_space<vmem>>, vector<1x1x16x224xf32>,
    %72 = vector.extract_strided_slice %5 {offsets = [0, 2816], sizes = [1, 224], strides = [1, 1]} : vector<8x7168xf32> to vector<1x224xf32>
    %73 = vector.shape_cast %72 : vector<1x224xf32> to vector<1x224xf32>
    %74 = vector.broadcast %73 : vector<1x224xf32> to vector<16x224xf32>
    %c0_39 = arith.constant 0 : index
    %c0_40 = arith.constant 0 : index
    %c176 = arith.constant 176 : index
    %c0_41 = arith.constant 0 : index
    %75 = vector.load %arg4[%c0_39, %c0_40, %c176, %c0_41] : memref<8x2x224x224xf32, #tpu.memory_space<vmem>>, vector<1x1x16x224xf32>
    %76 = vector.shape_cast %75 : vector<1x1x16x224xf32> to vector<16x224xf32>
    %77 = vector.shape_cast %74 : vector<16x224xf32> to vector<1x1x16x224xf32>
    tpu.vector_store %arg4[%c0_39, %c0_40, %c176, %c0_41], %77 {strides = array<i32>} : memref<8x2x224x224xf32, #tpu.memory_space<vmem>>, vector<1x1x16x224xf32>,
    %78 = vector.extract_strided_slice %5 {offsets = [0, 3072], sizes = [1, 224], strides = [1, 1]} : vector<8x7168xf32> to vector<1x224xf32>
    %79 = vector.shape_cast %78 : vector<1x224xf32> to vector<1x224xf32>
    %80 = vector.broadcast %79 : vector<1x224xf32> to vector<16x224xf32>
    %c0_42 = arith.constant 0 : index
    %c0_43 = arith.constant 0 : index
    %c192 = arith.constant 192 : index
    %c0_44 = arith.constant 0 : index
    %81 = vector.load %arg4[%c0_42, %c0_43, %c192, %c0_44] : memref<8x2x224x224xf32, #tpu.memory_space<vmem>>, vector<1x1x16x224xf32>
    %82 = vector.shape_cast %81 : vector<1x1x16x224xf32> to vector<16x224xf32>
    %83 = vector.shape_cast %80 : vector<16x224xf32> to vector<1x1x16x224xf32>
    tpu.vector_store %arg4[%c0_42, %c0_43, %c192, %c0_44], %83 {strides = array<i32>} : memref<8x2x224x224xf32, #tpu.memory_space<vmem>>, vector<1x1x16x224xf32>,
    %84 = vector.extract_strided_slice %5 {offsets = [0, 3328], sizes = [1, 224], strides = [1, 1]} : vector<8x7168xf32> to vector<1x224xf32>
    %85 = vector.shape_cast %84 : vector<1x224xf32> to vector<1x224xf32>
    %86 = vector.broadcast %85 : vector<1x224xf32> to vector<16x224xf32>
    %c0_45 = arith.constant 0 : index
    %c0_46 = arith.constant 0 : index
    %c208 = arith.constant 208 : index
    %c0_47 = arith.constant 0 : index
    %87 = vector.load %arg4[%c0_45, %c0_46, %c208, %c0_47] : memref<8x2x224x224xf32, #tpu.memory_space<vmem>>, vector<1x1x16x224xf32>
    %88 = vector.shape_cast %87 : vector<1x1x16x224xf32> to vector<16x224xf32>
    %89 = vector.shape_cast %86 : vector<16x224xf32> to vector<1x1x16x224xf32>
    tpu.vector_store %arg4[%c0_45, %c0_46, %c208, %c0_47], %89 {strides = array<i32>} : memref<8x2x224x224xf32, #tpu.memory_space<vmem>>, vector<1x1x16x224xf32>,
    %90 = vector.extract_strided_slice %5 {offsets = [0, 3584], sizes = [1, 224], strides = [1, 1]} : vector<8x7168xf32> to vector<1x224xf32>
    %91 = vector.shape_cast %90 : vector<1x224xf32> to vector<1x224xf32>
    %92 = vector.broadcast %91 : vector<1x224xf32> to vector<16x224xf32>
    %c0_48 = arith.constant 0 : index
    %c1 = arith.constant 1 : index
    %c0_49 = arith.constant 0 : index
    %c0_50 = arith.constant 0 : index
    %93 = vector.load %arg4[%c0_48, %c1, %c0_49, %c0_50] : memref<8x2x224x224xf32, #tpu.memory_space<vmem>>, vector<1x1x16x224xf32>
    %94 = vector.shape_cast %93 : vector<1x1x16x224xf32> to vector<16x224xf32>
    %95 = vector.shape_cast %92 : vector<16x224xf32> to vector<1x1x16x224xf32>
    tpu.vector_store %arg4[%c0_48, %c1, %c0_49, %c0_50], %95 {strides = array<i32>} : memref<8x2x224x224xf32, #tpu.memory_space<vmem>>, vector<1x1x16x224xf32>,
    %96 = vector.extract_strided_slice %5 {offsets = [0, 3840], sizes = [1, 224], strides = [1, 1]} : vector<8x7168xf32> to vector<1x224xf32>
    %97 = vector.shape_cast %96 : vector<1x224xf32> to vector<1x224xf32>
    %98 = vector.broadcast %97 : vector<1x224xf32> to vector<16x224xf32>
    %c0_51 = arith.constant 0 : index
    %c1_52 = arith.constant 1 : index
    %c16_53 = arith.constant 16 : index
    %c0_54 = arith.constant 0 : index
    %99 = vector.load %arg4[%c0_51, %c1_52, %c16_53, %c0_54] : memref<8x2x224x224xf32, #tpu.memory_space<vmem>>, vector<1x1x16x224xf32>
    %100 = vector.shape_cast %99 : vector<1x1x16x224xf32> to vector<16x224xf32>
    %101 = vector.shape_cast %98 : vector<16x224xf32> to vector<1x1x16x224xf32>
    tpu.vector_store %arg4[%c0_51, %c1_52, %c16_53, %c0_54], %101 {strides = array<i32>} : memref<8x2x224x224xf32, #tpu.memory_space<vmem>>, vector<1x1x16x224xf32>,
    %102 = vector.extract_strided_slice %5 {offsets = [0, 4096], sizes = [1, 224], strides = [1, 1]} : vector<8x7168xf32> to vector<1x224xf32>
    %103 = vector.shape_cast %102 : vector<1x224xf32> to vector<1x224xf32>
    %104 = vector.broadcast %103 : vector<1x224xf32> to vector<16x224xf32>
    %c0_55 = arith.constant 0 : index
    %c1_56 = arith.constant 1 : index
    %c32_57 = arith.constant 32 : index
    %c0_58 = arith.constant 0 : index
    %105 = vector.load %arg4[%c0_55, %c1_56, %c32_57, %c0_58] : memref<8x2x224x224xf32, #tpu.memory_space<vmem>>, vector<1x1x16x224xf32>
    %106 = vector.shape_cast %105 : vector<1x1x16x224xf32> to vector<16x224xf32>
    %107 = vector.shape_cast %104 : vector<16x224xf32> to vector<1x1x16x224xf32>
    tpu.vector_store %arg4[%c0_55, %c1_56, %c32_57, %c0_58], %107 {strides = array<i32>} : memref<8x2x224x224xf32, #tpu.memory_space<vmem>>, vector<1x1x16x224xf32>,
    %108 = vector.extract_strided_slice %5 {offsets = [0, 4352], sizes = [1, 224], strides = [1, 1]} : vector<8x7168xf32> to vector<1x224xf32>
    %109 = vector.shape_cast %108 : vector<1x224xf32> to vector<1x224xf32>
    %110 = vector.broadcast %109 : vector<1x224xf32> to vector<16x224xf32>
    %c0_59 = arith.constant 0 : index
    %c1_60 = arith.constant 1 : index
    %c48_61 = arith.constant 48 : index
    %c0_62 = arith.constant 0 : index
    %111 = vector.load %arg4[%c0_59, %c1_60, %c48_61, %c0_62] : memref<8x2x224x224xf32, #tpu.memory_space<vmem>>, vector<1x1x16x224xf32>
    %112 = vector.shape_cast %111 : vector<1x1x16x224xf32> to vector<16x224xf32>
    %113 = vector.shape_cast %110 : vector<16x224xf32> to vector<1x1x16x224xf32>
    tpu.vector_store %arg4[%c0_59, %c1_60, %c48_61, %c0_62], %113 {strides = array<i32>} : memref<8x2x224x224xf32, #tpu.memory_space<vmem>>, vector<1x1x16x224xf32>,
    %114 = vector.extract_strided_slice %5 {offsets = [0, 4608], sizes = [1, 224], strides = [1, 1]} : vector<8x7168xf32> to vector<1x224xf32>
    %115 = vector.shape_cast %114 : vector<1x224xf32> to vector<1x224xf32>
    %116 = vector.broadcast %115 : vector<1x224xf32> to vector<16x224xf32>
    %c0_63 = arith.constant 0 : index
    %c1_64 = arith.constant 1 : index
    %c64_65 = arith.constant 64 : index
    %c0_66 = arith.constant 0 : index
    %117 = vector.load %arg4[%c0_63, %c1_64, %c64_65, %c0_66] : memref<8x2x224x224xf32, #tpu.memory_space<vmem>>, vector<1x1x16x224xf32>
    %118 = vector.shape_cast %117 : vector<1x1x16x224xf32> to vector<16x224xf32>
    %119 = vector.shape_cast %116 : vector<16x224xf32> to vector<1x1x16x224xf32>
    tpu.vector_store %arg4[%c0_63, %c1_64, %c64_65, %c0_66], %119 {strides = array<i32>} : memref<8x2x224x224xf32, #tpu.memory_space<vmem>>, vector<1x1x16x224xf32>,
    %120 = vector.extract_strided_slice %5 {offsets = [0, 4864], sizes = [1, 224], strides = [1, 1]} : vector<8x7168xf32> to vector<1x224xf32>
    %121 = vector.shape_cast %120 : vector<1x224xf32> to vector<1x224xf32>
    %122 = vector.broadcast %121 : vector<1x224xf32> to vector<16x224xf32>
    %c0_67 = arith.constant 0 : index
    %c1_68 = arith.constant 1 : index
    %c80_69 = arith.constant 80 : index
    %c0_70 = arith.constant 0 : index
    %123 = vector.load %arg4[%c0_67, %c1_68, %c80_69, %c0_70] : memref<8x2x224x224xf32, #tpu.memory_space<vmem>>, vector<1x1x16x224xf32>
    %124 = vector.shape_cast %123 : vector<1x1x16x224xf32> to vector<16x224xf32>
    %125 = vector.shape_cast %122 : vector<16x224xf32> to vector<1x1x16x224xf32>
    tpu.vector_store %arg4[%c0_67, %c1_68, %c80_69, %c0_70], %125 {strides = array<i32>} : memref<8x2x224x224xf32, #tpu.memory_space<vmem>>, vector<1x1x16x224xf32>,
    %126 = vector.extract_strided_slice %5 {offsets = [0, 5120], sizes = [1, 224], strides = [1, 1]} : vector<8x7168xf32> to vector<1x224xf32>
    %127 = vector.shape_cast %126 : vector<1x224xf32> to vector<1x224xf32>
    %128 = vector.broadcast %127 : vector<1x224xf32> to vector<16x224xf32>
    %c0_71 = arith.constant 0 : index
    %c1_72 = arith.constant 1 : index
    %c96_73 = arith.constant 96 : index
    %c0_74 = arith.constant 0 : index
    %129 = vector.load %arg4[%c0_71, %c1_72, %c96_73, %c0_74] : memref<8x2x224x224xf32, #tpu.memory_space<vmem>>, vector<1x1x16x224xf32>
    %130 = vector.shape_cast %129 : vector<1x1x16x224xf32> to vector<16x224xf32>
    %131 = vector.shape_cast %128 : vector<16x224xf32> to vector<1x1x16x224xf32>
    tpu.vector_store %arg4[%c0_71, %c1_72, %c96_73, %c0_74], %131 {strides = array<i32>} : memref<8x2x224x224xf32, #tpu.memory_space<vmem>>, vector<1x1x16x224xf32>,
    %132 = vector.extract_strided_slice %5 {offsets = [0, 5376], sizes = [1, 224], strides = [1, 1]} : vector<8x7168xf32> to vector<1x224xf32>
    %133 = vector.shape_cast %132 : vector<1x224xf32> to vector<1x224xf32>
    %134 = vector.broadcast %133 : vector<1x224xf32> to vector<16x224xf32>
    %c0_75 = arith.constant 0 : index
    %c1_76 = arith.constant 1 : index
    %c112_77 = arith.constant 112 : index
    %c0_78 = arith.constant 0 : index
    %135 = vector.load %arg4[%c0_75, %c1_76, %c112_77, %c0_78] : memref<8x2x224x224xf32, #tpu.memory_space<vmem>>, vector<1x1x16x224xf32>
    %136 = vector.shape_cast %135 : vector<1x1x16x224xf32> to vector<16x224xf32>
    %137 = vector.shape_cast %134 : vector<16x224xf32> to vector<1x1x16x224xf32>
    tpu.vector_store %arg4[%c0_75, %c1_76, %c112_77, %c0_78], %137 {strides = array<i32>} : memref<8x2x224x224xf32, #tpu.memory_space<vmem>>, vector<1x1x16x224xf32>,
    %138 = vector.extract_strided_slice %5 {offsets = [0, 5632], sizes = [1, 224], strides = [1, 1]} : vector<8x7168xf32> to vector<1x224xf32>
    %139 = vector.shape_cast %138 : vector<1x224xf32> to vector<1x224xf32>
    %140 = vector.broadcast %139 : vector<1x224xf32> to vector<16x224xf32>
    %c0_79 = arith.constant 0 : index
    %c1_80 = arith.constant 1 : index
    %c128_81 = arith.constant 128 : index
    %c0_82 = arith.constant 0 : index
    %141 = vector.load %arg4[%c0_79, %c1_80, %c128_81, %c0_82] : memref<8x2x224x224xf32, #tpu.memory_space<vmem>>, vector<1x1x16x224xf32>
    %142 = vector.shape_cast %141 : vector<1x1x16x224xf32> to vector<16x224xf32>
    %143 = vector.shape_cast %140 : vector<16x224xf32> to vector<1x1x16x224xf32>
    tpu.vector_store %arg4[%c0_79, %c1_80, %c128_81, %c0_82], %143 {strides = array<i32>} : memref<8x2x224x224xf32, #tpu.memory_space<vmem>>, vector<1x1x16x224xf32>,
    %144 = vector.extract_strided_slice %5 {offsets = [0, 5888], sizes = [1, 224], strides = [1, 1]} : vector<8x7168xf32> to vector<1x224xf32>
    %145 = vector.shape_cast %144 : vector<1x224xf32> to vector<1x224xf32>
    %146 = vector.broadcast %145 : vector<1x224xf32> to vector<16x224xf32>
    %c0_83 = arith.constant 0 : index
    %c1_84 = arith.constant 1 : index
    %c144_85 = arith.constant 144 : index
    %c0_86 = arith.constant 0 : index
    %147 = vector.load %arg4[%c0_83, %c1_84, %c144_85, %c0_86] : memref<8x2x224x224xf32, #tpu.memory_space<vmem>>, vector<1x1x16x224xf32>
    %148 = vector.shape_cast %147 : vector<1x1x16x224xf32> to vector<16x224xf32>
    %149 = vector.shape_cast %146 : vector<16x224xf32> to vector<1x1x16x224xf32>
    tpu.vector_store %arg4[%c0_83, %c1_84, %c144_85, %c0_86], %149 {strides = array<i32>} : memref<8x2x224x224xf32, #tpu.memory_space<vmem>>, vector<1x1x16x224xf32>,
    %150 = vector.extract_strided_slice %5 {offsets = [0, 6144], sizes = [1, 224], strides = [1, 1]} : vector<8x7168xf32> to vector<1x224xf32>
    %151 = vector.shape_cast %150 : vector<1x224xf32> to vector<1x224xf32>
    %152 = vector.broadcast %151 : vector<1x224xf32> to vector<16x224xf32>
    %c0_87 = arith.constant 0 : index
    %c1_88 = arith.constant 1 : index
    %c160_89 = arith.constant 160 : index
    %c0_90 = arith.constant 0 : index
    %153 = vector.load %arg4[%c0_87, %c1_88, %c160_89, %c0_90] : memref<8x2x224x224xf32, #tpu.memory_space<vmem>>, vector<1x1x16x224xf32>
    %154 = vector.shape_cast %153 : vector<1x1x16x224xf32> to vector<16x224xf32>
    %155 = vector.shape_cast %152 : vector<16x224xf32> to vector<1x1x16x224xf32>
    tpu.vector_store %arg4[%c0_87, %c1_88, %c160_89, %c0_90], %155 {strides = array<i32>} : memref<8x2x224x224xf32, #tpu.memory_space<vmem>>, vector<1x1x16x224xf32>,
    %156 = vector.extract_strided_slice %5 {offsets = [0, 6400], sizes = [1, 224], strides = [1, 1]} : vector<8x7168xf32> to vector<1x224xf32>
    %157 = vector.shape_cast %156 : vector<1x224xf32> to vector<1x224xf32>
    %158 = vector.broadcast %157 : vector<1x224xf32> to vector<16x224xf32>
    %c0_91 = arith.constant 0 : index
    %c1_92 = arith.constant 1 : index
    %c176_93 = arith.constant 176 : index
    %c0_94 = arith.constant 0 : index
    %159 = vector.load %arg4[%c0_91, %c1_92, %c176_93, %c0_94] : memref<8x2x224x224xf32, #tpu.memory_space<vmem>>, vector<1x1x16x224xf32>
    %160 = vector.shape_cast %159 : vector<1x1x16x224xf32> to vector<16x224xf32>
    %161 = vector.shape_cast %158 : vector<16x224xf32> to vector<1x1x16x224xf32>
    tpu.vector_store %arg4[%c0_91, %c1_92, %c176_93, %c0_94], %161 {strides = array<i32>} : memref<8x2x224x224xf32, #tpu.memory_space<vmem>>, vector<1x1x16x224xf32>,
    %162 = vector.extract_strided_slice %5 {offsets = [0, 6656], sizes = [1, 224], strides = [1, 1]} : vector<8x7168xf32> to vector<1x224xf32>
    %163 = vector.shape_cast %162 : vector<1x224xf32> to vector<1x224xf32>
    %164 = vector.broadcast %163 : vector<1x224xf32> to vector<16x224xf32>
    %c0_95 = arith.constant 0 : index
    %c1_96 = arith.constant 1 : index
    %c192_97 = arith.constant 192 : index
    %c0_98 = arith.constant 0 : index
    %165 = vector.load %arg4[%c0_95, %c1_96, %c192_97, %c0_98] : memref<8x2x224x224xf32, #tpu.memory_space<vmem>>, vector<1x1x16x224xf32>
    %166 = vector.shape_cast %165 : vector<1x1x16x224xf32> to vector<16x224xf32>
    %167 = vector.shape_cast %164 : vector<16x224xf32> to vector<1x1x16x224xf32>
    tpu.vector_store %arg4[%c0_95, %c1_96, %c192_97, %c0_98], %167 {strides = array<i32>} : memref<8x2x224x224xf32, #tpu.memory_space<vmem>>, vector<1x1x16x224xf32>,
    %168 = vector.extract_strided_slice %5 {offsets = [0, 6912], sizes = [1, 224], strides = [1, 1]} : vector<8x7168xf32> to vector<1x224xf32>
    %169 = vector.shape_cast %168 : vector<1x224xf32> to vector<1x224xf32>
    %170 = vector.broadcast %169 : vector<1x224xf32> to vector<16x224xf32>
    %c0_99 = arith.constant 0 : index
    %c1_100 = arith.constant 1 : index
    %c208_101 = arith.constant 208 : index
    %c0_102 = arith.constant 0 : index
    %171 = vector.load %arg4[%c0_99, %c1_100, %c208_101, %c0_102] : memref<8x2x224x224xf32, #tpu.memory_space<vmem>>, vector<1x1x16x224xf32>
    %172 = vector.shape_cast %171 : vector<1x1x16x224xf32> to vector<16x224xf32>
    %173 = vector.shape_cast %170 : vector<16x224xf32> to vector<1x1x16x224xf32>
    tpu.vector_store %arg4[%c0_99, %c1_100, %c208_101, %c0_102], %173 {strides = array<i32>} : memref<8x2x224x224xf32, #tpu.memory_space<vmem>>, vector<1x1x16x224xf32>,
    %174 = vector.extract_strided_slice %5 {offsets = [1, 0], sizes = [1, 224], strides = [1, 1]} : vector<8x7168xf32> to vector<1x224xf32>
    %175 = vector.shape_cast %174 : vector<1x224xf32> to vector<1x224xf32>
    %176 = vector.broadcast %175 : vector<1x224xf32> to vector<16x224xf32>
    %c1_103 = arith.constant 1 : index
    %c0_104 = arith.constant 0 : index
    %c0_105 = arith.constant 0 : index
    %c0_106 = arith.constant 0 : index
    %177 = vector.load %arg4[%c1_103, %c0_104, %c0_105, %c0_106] : memref<8x2x224x224xf32, #tpu.memory_space<vmem>>, vector<1x1x16x224xf32>
    %178 = vector.shape_cast %177 : vector<1x1x16x224xf32> to vector<16x224xf32>
    %179 = vector.shape_cast %176 : vector<16x224xf32> to vector<1x1x16x224xf32>
    tpu.vector_store %arg4[%c1_103, %c0_104, %c0_105, %c0_106], %179 {strides = array<i32>} : memref<8x2x224x224xf32, #tpu.memory_space<vmem>>, vector<1x1x16x224xf32>,
    %180 = vector.extract_strided_slice %5 {offsets = [1, 256], sizes = [1, 224], strides = [1, 1]} : vector<8x7168xf32> to vector<1x224xf32>
    %181 = vector.shape_cast %180 : vector<1x224xf32> to vector<1x224xf32>
    %182 = vector.broadcast %181 : vector<1x224xf32> to vector<16x224xf32>
    %c1_107 = arith.constant 1 : index
    %c0_108 = arith.constant 0 : index
    %c16_109 = arith.constant 16 : index
    %c0_110 = arith.constant 0 : index
    %183 = vector.load %arg4[%c1_107, %c0_108, %c16_109, %c0_110] : memref<8x2x224x224xf32, #tpu.memory_space<vmem>>, vector<1x1x16x224xf32>
    %184 = vector.shape_cast %183 : vector<1x1x16x224xf32> to vector<16x224xf32>
    %185 = vector.shape_cast %182 : vector<16x224xf32> to vector<1x1x16x224xf32>
    tpu.vector_store %arg4[%c1_107, %c0_108, %c16_109, %c0_110], %185 {strides = array<i32>} : memref<8x2x224x224xf32, #tpu.memory_space<vmem>>, vector<1x1x16x224xf32>,
    %186 = vector.extract_strided_slice %5 {offsets = [1, 512], sizes = [1, 224], strides = [1, 1]} : vector<8x7168xf32> to vector<1x224xf32>
    %187 = vector.shape_cast %186 : vector<1x224xf32> to vector<1x224xf32>
    %188 = vector.broadcast %187 : vector<1x224xf32> to vector<16x224xf32>
    %c1_111 = arith.constant 1 : index
    %c0_112 = arith.constant 0 : index
    %c32_113 = arith.constant 32 : index
    %c0_114 = arith.constant 0 : index
    %189 = vector.load %arg4[%c1_111, %c0_112, %c32_113, %c0_114] : memref<8x2x224x224xf32, #tpu.memory_space<vmem>>, vector<1x1x16x224xf32>
    %190 = vector.shape_cast %189 : vector<1x1x16x224xf32> to vector<16x224xf32>
    %191 = vector.shape_cast %188 : vector<16x224xf32> to vector<1x1x16x224xf32>
    tpu.vector_store %arg4[%c1_111, %c0_112, %c32_113, %c0_114], %191 {strides = array<i32>} : memref<8x2x224x224xf32, #tpu.memory_space<vmem>>, vector<1x1x16x224xf32>,
    %192 = vector.extract_strided_slice %5 {offsets = [1, 768], sizes = [1, 224], strides = [1, 1]} : vector<8x7168xf32> to vector<1x224xf32>
    %193 = vector.shape_cast %192 : vector<1x224xf32> to vector<1x224xf32>
    %194 = vector.broadcast %193 : vector<1x224xf32> to vector<16x224xf32>
    %c1_115 = arith.constant 1 : index
    %c0_116 = arith.constant 0 : index
    %c48_117 = arith.constant 48 : index
    %c0_118 = arith.constant 0 : index
    %195 = vector.load %arg4[%c1_115, %c0_116, %c48_117, %c0_118] : memref<8x2x224x224xf32, #tpu.memory_space<vmem>>, vector<1x1x16x224xf32>
    %196 = vector.shape_cast %195 : vector<1x1x16x224xf32> to vector<16x224xf32>
    %197 = vector.shape_cast %194 : vector<16x224xf32> to vector<1x1x16x224xf32>
    tpu.vector_store %arg4[%c1_115, %c0_116, %c48_117, %c0_118], %197 {strides = array<i32>} : memref<8x2x224x224xf32, #tpu.memory_space<vmem>>, vector<1x1x16x224xf32>,
    %198 = vector.extract_strided_slice %5 {offsets = [1, 1024], sizes = [1, 224], strides = [1, 1]} : vector<8x7168xf32> to vector<1x224xf32>
    %199 = vector.shape_cast %198 : vector<1x224xf32> to vector<1x224xf32>
    %200 = vector.broadcast %199 : vector<1x224xf32> to vector<16x224xf32>
    %c1_119 = arith.constant 1 : index
    %c0_120 = arith.constant 0 : index
    %c64_121 = arith.constant 64 : index
    %c0_122 = arith.constant 0 : index
    %201 = vector.load %arg4[%c1_119, %c0_120, %c64_121, %c0_122] : memref<8x2x224x224xf32, #tpu.memory_space<vmem>>, vector<1x1x16x224xf32>
    %202 = vector.shape_cast %201 : vector<1x1x16x224xf32> to vector<16x224xf32>
    %203 = vector.shape_cast %200 : vector<16x224xf32> to vector<1x1x16x224xf32>
    tpu.vector_store %arg4[%c1_119, %c0_120, %c64_121, %c0_122], %203 {strides = array<i32>} : memref<8x2x224x224xf32, #tpu.memory_space<vmem>>, vector<1x1x16x224xf32>,
    %204 = vector.extract_strided_slice %5 {offsets = [1, 1280], sizes = [1, 224], strides = [1, 1]} : vector<8x7168xf32> to vector<1x224xf32>
    %205 = vector.shape_cast %204 : vector<1x224xf32> to vector<1x224xf32>
    %206 = vector.broadcast %205 : vector<1x224xf32> to vector<16x224xf32>
    %c1_123 = arith.constant 1 : index
    %c0_124 = arith.constant 0 : index
    %c80_125 = arith.constant 80 : index
    %c0_126 = arith.constant 0 : index
    %207 = vector.load %arg4[%c1_123, %c0_124, %c80_125, %c0_126] : memref<8x2x224x224xf32, #tpu.memory_space<vmem>>, vector<1x1x16x224xf32>
    %208 = vector.shape_cast %207 : vector<1x1x16x224xf32> to vector<16x224xf32>
    %209 = vector.shape_cast %206 : vector<16x224xf32> to vector<1x1x16x224xf32>
    tpu.vector_store %arg4[%c1_123, %c0_124, %c80_125, %c0_126], %209 {strides = array<i32>} : memref<8x2x224x224xf32, #tpu.memory_space<vmem>>, vector<1x1x16x224xf32>,
    %210 = vector.extract_strided_slice %5 {offsets = [1, 1536], sizes = [1, 224], strides = [1, 1]} : vector<8x7168xf32> to vector<1x224xf32>
    %211 = vector.shape_cast %210 : vector<1x224xf32> to vector<1x224xf32>
    %212 = vector.broadcast %211 : vector<1x224xf32> to vector<16x224xf32>
    %c1_127 = arith.constant 1 : index
    %c0_128 = arith.constant 0 : index
    %c96_129 = arith.constant 96 : index
    %c0_130 = arith.constant 0 : index
    %213 = vector.load %arg4[%c1_127, %c0_128, %c96_129, %c0_130] : memref<8x2x224x224xf32, #tpu.memory_space<vmem>>, vector<1x1x16x224xf32>
    %214 = vector.shape_cast %213 : vector<1x1x16x224xf32> to vector<16x224xf32>
    %215 = vector.shape_cast %212 : vector<16x224xf32> to vector<1x1x16x224xf32>
    tpu.vector_store %arg4[%c1_127, %c0_128, %c96_129, %c0_130], %215 {strides = array<i32>} : memref<8x2x224x224xf32, #tpu.memory_space<vmem>>, vector<1x1x16x224xf32>,
    %216 = vector.extract_strided_slice %5 {offsets = [1, 1792], sizes = [1, 224], strides = [1, 1]} : vector<8x7168xf32> to vector<1x224xf32>
    %217 = vector.shape_cast %216 : vector<1x224xf32> to vector<1x224xf32>
    %218 = vector.broadcast %217 : vector<1x224xf32> to vector<16x224xf32>
    %c1_131 = arith.constant 1 : index
    %c0_132 = arith.constant 0 : index
    %c112_133 = arith.constant 112 : index
    %c0_134 = arith.constant 0 : index
    %219 = vector.load %arg4[%c1_131, %c0_132, %c112_133, %c0_134] : memref<8x2x224x224xf32, #tpu.memory_space<vmem>>, vector<1x1x16x224xf32>
    %220 = vector.shape_cast %219 : vector<1x1x16x224xf32> to vector<16x224xf32>
    %221 = vector.shape_cast %218 : vector<16x224xf32> to vector<1x1x16x224xf32>
    tpu.vector_store %arg4[%c1_131, %c0_132, %c112_133, %c0_134], %221 {strides = array<i32>} : memref<8x2x224x224xf32, #tpu.memory_space<vmem>>, vector<1x1x16x224xf32>,
    %222 = vector.extract_strided_slice %5 {offsets = [1, 2048], sizes = [1, 224], strides = [1, 1]} : vector<8x7168xf32> to vector<1x224xf32>
    %223 = vector.shape_cast %222 : vector<1x224xf32> to vector<1x224xf32>
    %224 = vector.broadcast %223 : vector<1x224xf32> to vector<16x224xf32>
    %c1_135 = arith.constant 1 : index
    %c0_136 = arith.constant 0 : index
    %c128_137 = arith.constant 128 : index
    %c0_138 = arith.constant 0 : index
    %225 = vector.load %arg4[%c1_135, %c0_136, %c128_137, %c0_138] : memref<8x2x224x224xf32, #tpu.memory_space<vmem>>, vector<1x1x16x224xf32>
    %226 = vector.shape_cast %225 : vector<1x1x16x224xf32> to vector<16x224xf32>
    %227 = vector.shape_cast %224 : vector<16x224xf32> to vector<1x1x16x224xf32>
    tpu.vector_store %arg4[%c1_135, %c0_136, %c128_137, %c0_138], %227 {strides = array<i32>} : memref<8x2x224x224xf32, #tpu.memory_space<vmem>>, vector<1x1x16x224xf32>,
    %228 = vector.extract_strided_slice %5 {offsets = [1, 2304], sizes = [1, 224], strides = [1, 1]} : vector<8x7168xf32> to vector<1x224xf32>
    %229 = vector.shape_cast %228 : vector<1x224xf32> to vector<1x224xf32>
    %230 = vector.broadcast %229 : vector<1x224xf32> to vector<16x224xf32>
    %c1_139 = arith.constant 1 : index
    %c0_140 = arith.constant 0 : index
    %c144_141 = arith.constant 144 : index
    %c0_142 = arith.constant 0 : index
    %231 = vector.load %arg4[%c1_139, %c0_140, %c144_141, %c0_142] : memref<8x2x224x224xf32, #tpu.memory_space<vmem>>, vector<1x1x16x224xf32>
    %232 = vector.shape_cast %231 : vector<1x1x16x224xf32> to vector<16x224xf32>
    %233 = vector.shape_cast %230 : vector<16x224xf32> to vector<1x1x16x224xf32>
    tpu.vector_store %arg4[%c1_139, %c0_140, %c144_141, %c0_142], %233 {strides = array<i32>} : memref<8x2x224x224xf32, #tpu.memory_space<vmem>>, vector<1x1x16x224xf32>,
    %234 = vector.extract_strided_slice %5 {offsets = [1, 2560], sizes = [1, 224], strides = [1, 1]} : vector<8x7168xf32> to vector<1x224xf32>
    %235 = vector.shape_cast %234 : vector<1x224xf32> to vector<1x224xf32>
    %236 = vector.broadcast %235 : vector<1x224xf32> to vector<16x224xf32>
    %c1_143 = arith.constant 1 : index
    %c0_144 = arith.constant 0 : index
    %c160_145 = arith.constant 160 : index
    %c0_146 = arith.constant 0 : index
    %237 = vector.load %arg4[%c1_143, %c0_144, %c160_145, %c0_146] : memref<8x2x224x224xf32, #tpu.memory_space<vmem>>, vector<1x1x16x224xf32>
    %238 = vector.shape_cast %237 : vector<1x1x16x224xf32> to vector<16x224xf32>
    %239 = vector.shape_cast %236 : vector<16x224xf32> to vector<1x1x16x224xf32>
    tpu.vector_store %arg4[%c1_143, %c0_144, %c160_145, %c0_146], %239 {strides = array<i32>} : memref<8x2x224x224xf32, #tpu.memory_space<vmem>>, vector<1x1x16x224xf32>,
    %240 = vector.extract_strided_slice %5 {offsets = [1, 2816], sizes = [1, 224], strides = [1, 1]} : vector<8x7168xf32> to vector<1x224xf32>
    %241 = vector.shape_cast %240 : vector<1x224xf32> to vector<1x224xf32>
    %242 = vector.broadcast %241 : vector<1x224xf32> to vector<16x224xf32>
    %c1_147 = arith.constant 1 : index
    %c0_148 = arith.constant 0 : index
    %c176_149 = arith.constant 176 : index
    %c0_150 = arith.constant 0 : index
    %243 = vector.load %arg4[%c1_147, %c0_148, %c176_149, %c0_150] : memref<8x2x224x224xf32, #tpu.memory_space<vmem>>, vector<1x1x16x224xf32>
    %244 = vector.shape_cast %243 : vector<1x1x16x224xf32> to vector<16x224xf32>
    %245 = vector.shape_cast %242 : vector<16x224xf32> to vector<1x1x16x224xf32>
    tpu.vector_store %arg4[%c1_147, %c0_148, %c176_149, %c0_150], %245 {strides = array<i32>} : memref<8x2x224x224xf32, #tpu.memory_space<vmem>>, vector<1x1x16x224xf32>,
    %246 = vector.extract_strided_slice %5 {offsets = [1, 3072], sizes = [1, 224], strides = [1, 1]} : vector<8x7168xf32> to vector<1x224xf32>
    %247 = vector.shape_cast %246 : vector<1x224xf32> to vector<1x224xf32>
    %248 = vector.broadcast %247 : vector<1x224xf32> to vector<16x224xf32>
    %c1_151 = arith.constant 1 : index
    %c0_152 = arith.constant 0 : index
    %c192_153 = arith.constant 192 : index
    %c0_154 = arith.constant 0 : index
    %249 = vector.load %arg4[%c1_151, %c0_152, %c192_153, %c0_154] : memref<8x2x224x224xf32, #tpu.memory_space<vmem>>, vector<1x1x16x224xf32>
    %250 = vector.shape_cast %249 : vector<1x1x16x224xf32> to vector<16x224xf32>
    %251 = vector.shape_cast %248 : vector<16x224xf32> to vector<1x1x16x224xf32>
    tpu.vector_store %arg4[%c1_151, %c0_152, %c192_153, %c0_154], %251 {strides = array<i32>} : memref<8x2x224x224xf32, #tpu.memory_space<vmem>>, vector<1x1x16x224xf32>,
    %252 = vector.extract_strided_slice %5 {offsets = [1, 3328], sizes = [1, 224], strides = [1, 1]} : vector<8x7168xf32> to vector<1x224xf32>
    %253 = vector.shape_cast %252 : vector<1x224xf32> to vector<1x224xf32>
    %254 = vector.broadcast %253 : vector<1x224xf32> to vector<16x224xf32>
    %c1_155 = arith.constant 1 : index
    %c0_156 = arith.constant 0 : index
    %c208_157 = arith.constant 208 : index
    %c0_158 = arith.constant 0 : index
    %255 = vector.load %arg4[%c1_155, %c0_156, %c208_157, %c0_158] : memref<8x2x224x224xf32, #tpu.memory_space<vmem>>, vector<1x1x16x224xf32>
    %256 = vector.shape_cast %255 : vector<1x1x16x224xf32> to vector<16x224xf32>
    %257 = vector.shape_cast %254 : vector<16x224xf32> to vector<1x1x16x224xf32>
    tpu.vector_store %arg4[%c1_155, %c0_156, %c208_157, %c0_158], %257 {strides = array<i32>} : memref<8x2x224x224xf32, #tpu.memory_space<vmem>>, vector<1x1x16x224xf32>,
    %258 = vector.extract_strided_slice %5 {offsets = [1, 3584], sizes = [1, 224], strides = [1, 1]} : vector<8x7168xf32> to vector<1x224xf32>
    %259 = vector.shape_cast %258 : vector<1x224xf32> to vector<1x224xf32>
    %260 = vector.broadcast %259 : vector<1x224xf32> to vector<16x224xf32>
    %c1_159 = arith.constant 1 : index
    %c1_160 = arith.constant 1 : index
    %c0_161 = arith.constant 0 : index
    %c0_162 = arith.constant 0 : index
    %261 = vector.load %arg4[%c1_159, %c1_160, %c0_161, %c0_162] : memref<8x2x224x224xf32, #tpu.memory_space<vmem>>, vector<1x1x16x224xf32>
    %262 = vector.shape_cast %261 : vector<1x1x16x224xf32> to vector<16x224xf32>
    %263 = vector.shape_cast %260 : vector<16x224xf32> to vector<1x1x16x224xf32>
    tpu.vector_store %arg4[%c1_159, %c1_160, %c0_161, %c0_162], %263 {strides = array<i32>} : memref<8x2x224x224xf32, #tpu.memory_space<vmem>>, vector<1x1x16x224xf32>,
    %264 = vector.extract_strided_slice %5 {offsets = [1, 3840], sizes = [1, 224], strides = [1, 1]} : vector<8x7168xf32> to vector<1x224xf32>
    %265 = vector.shape_cast %264 : vector<1x224xf32> to vector<1x224xf32>
    %266 = vector.broadcast %265 : vector<1x224xf32> to vector<16x224xf32>
    %c1_163 = arith.constant 1 : index
    %c1_164 = arith.constant 1 : index
    %c16_165 = arith.constant 16 : index
    %c0_166 = arith.constant 0 : index
    %267 = vector.load %arg4[%c1_163, %c1_164, %c16_165, %c0_166] : memref<8x2x224x224xf32, #tpu.memory_space<vmem>>, vector<1x1x16x224xf32>
    %268 = vector.shape_cast %267 : vector<1x1x16x224xf32> to vector<16x224xf32>
    %269 = vector.shape_cast %266 : vector<16x224xf32> to vector<1x1x16x224xf32>
    tpu.vector_store %arg4[%c1_163, %c1_164, %c16_165, %c0_166], %269 {strides = array<i32>} : memref<8x2x224x224xf32, #tpu.memory_space<vmem>>, vector<1x1x16x224xf32>,
    %270 = vector.extract_strided_slice %5 {offsets = [1, 4096], sizes = [1, 224], strides = [1, 1]} : vector<8x7168xf32> to vector<1x224xf32>
    %271 = vector.shape_cast %270 : vector<1x224xf32> to vector<1x224xf32>
    %272 = vector.broadcast %271 : vector<1x224xf32> to vector<16x224xf32>
    %c1_167 = arith.constant 1 : index
    %c1_168 = arith.constant 1 : index
    %c32_169 = arith.constant 32 : index
    %c0_170 = arith.constant 0 : index
    %273 = vector.load %arg4[%c1_167, %c1_168, %c32_169, %c0_170] : memref<8x2x224x224xf32, #tpu.memory_space<vmem>>, vector<1x1x16x224xf32>
    %274 = vector.shape_cast %273 : vector<1x1x16x224xf32> to vector<16x224xf32>
    %275 = vector.shape_cast %272 : vector<16x224xf32> to vector<1x1x16x224xf32>
    tpu.vector_store %arg4[%c1_167, %c1_168, %c32_169, %c0_170], %275 {strides = array<i32>} : memref<8x2x224x224xf32, #tpu.memory_space<vmem>>, vector<1x1x16x224xf32>,
    %276 = vector.extract_strided_slice %5 {offsets = [1, 4352], sizes = [1, 224], strides = [1, 1]} : vector<8x7168xf32> to vector<1x224xf32>
    %277 = vector.shape_cast %276 : vector<1x224xf32> to vector<1x224xf32>
    %278 = vector.broadcast %277 : vector<1x224xf32> to vector<16x224xf32>
    %c1_171 = arith.constant 1 : index
    %c1_172 = arith.constant 1 : index
    %c48_173 = arith.constant 48 : index
    %c0_174 = arith.constant 0 : index
    %279 = vector.load %arg4[%c1_171, %c1_172, %c48_173, %c0_174] : memref<8x2x224x224xf32, #tpu.memory_space<vmem>>, vector<1x1x16x224xf32>
    %280 = vector.shape_cast %279 : vector<1x1x16x224xf32> to vector<16x224xf32>
    %281 = vector.shape_cast %278 : vector<16x224xf32> to vector<1x1x16x224xf32>
    tpu.vector_store %arg4[%c1_171, %c1_172, %c48_173, %c0_174], %281 {strides = array<i32>} : memref<8x2x224x224xf32, #tpu.memory_space<vmem>>, vector<1x1x16x224xf32>,
    %282 = vector.extract_strided_slice %5 {offsets = [1, 4608], sizes = [1, 224], strides = [1, 1]} : vector<8x7168xf32> to vector<1x224xf32>
    %283 = vector.shape_cast %282 : vector<1x224xf32> to vector<1x224xf32>
    %284 = vector.broadcast %283 : vector<1x224xf32> to vector<16x224xf32>
    %c1_175 = arith.constant 1 : index
    %c1_176 = arith.constant 1 : index
    %c64_177 = arith.constant 64 : index
    %c0_178 = arith.constant 0 : index
    %285 = vector.load %arg4[%c1_175, %c1_176, %c64_177, %c0_178] : memref<8x2x224x224xf32, #tpu.memory_space<vmem>>, vector<1x1x16x224xf32>
    %286 = vector.shape_cast %285 : vector<1x1x16x224xf32> to vector<16x224xf32>
    %287 = vector.shape_cast %284 : vector<16x224xf32> to vector<1x1x16x224xf32>
    tpu.vector_store %arg4[%c1_175, %c1_176, %c64_177, %c0_178], %287 {strides = array<i32>} : memref<8x2x224x224xf32, #tpu.memory_space<vmem>>, vector<1x1x16x224xf32>,
    %288 = vector.extract_strided_slice %5 {offsets = [1, 4864], sizes = [1, 224], strides = [1, 1]} : vector<8x7168xf32> to vector<1x224xf32>
    %289 = vector.shape_cast %288 : vector<1x224xf32> to vector<1x224xf32>
    %290 = vector.broadcast %289 : vector<1x224xf32> to vector<16x224xf32>
    %c1_179 = arith.constant 1 : index
    %c1_180 = arith.constant 1 : index
    %c80_181 = arith.constant 80 : index
    %c0_182 = arith.constant 0 : index
    %291 = vector.load %arg4[%c1_179, %c1_180, %c80_181, %c0_182] : memref<8x2x224x224xf32, #tpu.memory_space<vmem>>, vector<1x1x16x224xf32>
    %292 = vector.shape_cast %291 : vector<1x1x16x224xf32> to vector<16x224xf32>
    %293 = vector.shape_cast %290 : vector<16x224xf32> to vector<1x1x16x224xf32>
    tpu.vector_store %arg4[%c1_179, %c1_180, %c80_181, %c0_182], %293 {strides = array<i32>} : memref<8x2x224x224xf32, #tpu.memory_space<vmem>>, vector<1x1x16x224xf32>,
    %294 = vector.extract_strided_slice %5 {offsets = [1, 5120], sizes = [1, 224], strides = [1, 1]} : vector<8x7168xf32> to vector<1x224xf32>
    %295 = vector.shape_cast %294 : vector<1x224xf32> to vector<1x224xf32>
    %296 = vector.broadcast %295 : vector<1x224xf32> to vector<16x224xf32>
    %c1_183 = arith.constant 1 : index
    %c1_184 = arith.constant 1 : index
    %c96_185 = arith.constant 96 : index
    %c0_186 = arith.constant 0 : index
    %297 = vector.load %arg4[%c1_183, %c1_184, %c96_185, %c0_186] : memref<8x2x224x224xf32, #tpu.memory_space<vmem>>, vector<1x1x16x224xf32>
    %298 = vector.shape_cast %297 : vector<1x1x16x224xf32> to vector<16x224xf32>
    %299 = vector.shape_cast %296 : vector<16x224xf32> to vector<1x1x16x224xf32>
    tpu.vector_store %arg4[%c1_183, %c1_184, %c96_185, %c0_186], %299 {strides = array<i32>} : memref<8x2x224x224xf32, #tpu.memory_space<vmem>>, vector<1x1x16x224xf32>,
    %300 = vector.extract_strided_slice %5 {offsets = [1, 5376], sizes = [1, 224], strides = [1, 1]} : vector<8x7168xf32> to vector<1x224xf32>
    %301 = vector.shape_cast %300 : vector<1x224xf32> to vector<1x224xf32>
    %302 = vector.broadcast %301 : vector<1x224xf32> to vector<16x224xf32>
    %c1_187 = arith.constant 1 : index
    %c1_188 = arith.constant 1 : index
    %c112_189 = arith.constant 112 : index
    %c0_190 = arith.constant 0 : index
    %303 = vector.load %arg4[%c1_187, %c1_188, %c112_189, %c0_190] : memref<8x2x224x224xf32, #tpu.memory_space<vmem>>, vector<1x1x16x224xf32>
    %304 = vector.shape_cast %303 : vector<1x1x16x224xf32> to vector<16x224xf32>
    %305 = vector.shape_cast %302 : vector<16x224xf32> to vector<1x1x16x224xf32>
    tpu.vector_store %arg4[%c1_187, %c1_188, %c112_189, %c0_190], %305 {strides = array<i32>} : memref<8x2x224x224xf32, #tpu.memory_space<vmem>>, vector<1x1x16x224xf32>,
    %306 = vector.extract_strided_slice %5 {offsets = [1, 5632], sizes = [1, 224], strides = [1, 1]} : vector<8x7168xf32> to vector<1x224xf32>
    %307 = vector.shape_cast %306 : vector<1x224xf32> to vector<1x224xf32>
    %308 = vector.broadcast %307 : vector<1x224xf32> to vector<16x224xf32>
    %c1_191 = arith.constant 1 : index
    %c1_192 = arith.constant 1 : index
    %c128_193 = arith.constant 128 : index
    %c0_194 = arith.constant 0 : index
    %309 = vector.load %arg4[%c1_191, %c1_192, %c128_193, %c0_194] : memref<8x2x224x224xf32, #tpu.memory_space<vmem>>, vector<1x1x16x224xf32>
    %310 = vector.shape_cast %309 : vector<1x1x16x224xf32> to vector<16x224xf32>
    %311 = vector.shape_cast %308 : vector<16x224xf32> to vector<1x1x16x224xf32>
    tpu.vector_store %arg4[%c1_191, %c1_192, %c128_193, %c0_194], %311 {strides = array<i32>} : memref<8x2x224x224xf32, #tpu.memory_space<vmem>>, vector<1x1x16x224xf32>,
    %312 = vector.extract_strided_slice %5 {offsets = [1, 5888], sizes = [1, 224], strides = [1, 1]} : vector<8x7168xf32> to vector<1x224xf32>
    %313 = vector.shape_cast %312 : vector<1x224xf32> to vector<1x224xf32>
    %314 = vector.broadcast %313 : vector<1x224xf32> to vector<16x224xf32>
    %c1_195 = arith.constant 1 : index
    %c1_196 = arith.constant 1 : index
    %c144_197 = arith.constant 144 : index
    %c0_198 = arith.constant 0 : index
    %315 = vector.load %arg4[%c1_195, %c1_196, %c144_197, %c0_198] : memref<8x2x224x224xf32, #tpu.memory_space<vmem>>, vector<1x1x16x224xf32>
    %316 = vector.shape_cast %315 : vector<1x1x16x224xf32> to vector<16x224xf32>
    %317 = vector.shape_cast %314 : vector<16x224xf32> to vector<1x1x16x224xf32>
    tpu.vector_store %arg4[%c1_195, %c1_196, %c144_197, %c0_198], %317 {strides = array<i32>} : memref<8x2x224x224xf32, #tpu.memory_space<vmem>>, vector<1x1x16x224xf32>,
    %318 = vector.extract_strided_slice %5 {offsets = [1, 6144], sizes = [1, 224], strides = [1, 1]} : vector<8x7168xf32> to vector<1x224xf32>
    %319 = vector.shape_cast %318 : vector<1x224xf32> to vector<1x224xf32>
    %320 = vector.broadcast %319 : vector<1x224xf32> to vector<16x224xf32>
    %c1_199 = arith.constant 1 : index
    %c1_200 = arith.constant 1 : index
    %c160_201 = arith.constant 160 : index
    %c0_202 = arith.constant 0 : index
    %321 = vector.load %arg4[%c1_199, %c1_200, %c160_201, %c0_202] : memref<8x2x224x224xf32, #tpu.memory_space<vmem>>, vector<1x1x16x224xf32>
    %322 = vector.shape_cast %321 : vector<1x1x16x224xf32> to vector<16x224xf32>
    %323 = vector.shape_cast %320 : vector<16x224xf32> to vector<1x1x16x224xf32>
    tpu.vector_store %arg4[%c1_199, %c1_200, %c160_201, %c0_202], %323 {strides = array<i32>} : memref<8x2x224x224xf32, #tpu.memory_space<vmem>>, vector<1x1x16x224xf32>,
    %324 = vector.extract_strided_slice %5 {offsets = [1, 6400], sizes = [1, 224], strides = [1, 1]} : vector<8x7168xf32> to vector<1x224xf32>
    %325 = vector.shape_cast %324 : vector<1x224xf32> to vector<1x224xf32>
    %326 = vector.broadcast %325 : vector<1x224xf32> to vector<16x224xf32>
    %c1_203 = arith.constant 1 : index
    %c1_204 = arith.constant 1 : index
    %c176_205 = arith.constant 176 : index
    %c0_206 = arith.constant 0 : index
    %327 = vector.load %arg4[%c1_203, %c1_204, %c176_205, %c0_206] : memref<8x2x224x224xf32, #tpu.memory_space<vmem>>, vector<1x1x16x224xf32>
    %328 = vector.shape_cast %327 : vector<1x1x16x224xf32> to vector<16x224xf32>
    %329 = vector.shape_cast %326 : vector<16x224xf32> to vector<1x1x16x224xf32>
    tpu.vector_store %arg4[%c1_203, %c1_204, %c176_205, %c0_206], %329 {strides = array<i32>} : memref<8x2x224x224xf32, #tpu.memory_space<vmem>>, vector<1x1x16x224xf32>,
    %330 = vector.extract_strided_slice %5 {offsets = [1, 6656], sizes = [1, 224], strides = [1, 1]} : vector<8x7168xf32> to vector<1x224xf32>
    %331 = vector.shape_cast %330 : vector<1x224xf32> to vector<1x224xf32>
    %332 = vector.broadcast %331 : vector<1x224xf32> to vector<16x224xf32>
    %c1_207 = arith.constant 1 : index
    %c1_208 = arith.constant 1 : index
    %c192_209 = arith.constant 192 : index
    %c0_210 = arith.constant 0 : index
    %333 = vector.load %arg4[%c1_207, %c1_208, %c192_209, %c0_210] : memref<8x2x224x224xf32, #tpu.memory_space<vmem>>, vector<1x1x16x224xf32>
    %334 = vector.shape_cast %333 : vector<1x1x16x224xf32> to vector<16x224xf32>
    %335 = vector.shape_cast %332 : vector<16x224xf32> to vector<1x1x16x224xf32>
    tpu.vector_store %arg4[%c1_207, %c1_208, %c192_209, %c0_210], %335 {strides = array<i32>} : memref<8x2x224x224xf32, #tpu.memory_space<vmem>>, vector<1x1x16x224xf32>,
    %336 = vector.extract_strided_slice %5 {offsets = [1, 6912], sizes = [1, 224], strides = [1, 1]} : vector<8x7168xf32> to vector<1x224xf32>
    %337 = vector.shape_cast %336 : vector<1x224xf32> to vector<1x224xf32>
    %338 = vector.broadcast %337 : vector<1x224xf32> to vector<16x224xf32>
    %c1_211 = arith.constant 1 : index
    %c1_212 = arith.constant 1 : index
    %c208_213 = arith.constant 208 : index
    %c0_214 = arith.constant 0 : index
    %339 = vector.load %arg4[%c1_211, %c1_212, %c208_213, %c0_214] : memref<8x2x224x224xf32, #tpu.memory_space<vmem>>, vector<1x1x16x224xf32>
    %340 = vector.shape_cast %339 : vector<1x1x16x224xf32> to vector<16x224xf32>
    %341 = vector.shape_cast %338 : vector<16x224xf32> to vector<1x1x16x224xf32>
    tpu.vector_store %arg4[%c1_211, %c1_212, %c208_213, %c0_214], %341 {strides = array<i32>} : memref<8x2x224x224xf32, #tpu.memory_space<vmem>>, vector<1x1x16x224xf32>,
    %342 = vector.extract_strided_slice %5 {offsets = [2, 0], sizes = [1, 224], strides = [1, 1]} : vector<8x7168xf32> to vector<1x224xf32>
    %343 = vector.shape_cast %342 : vector<1x224xf32> to vector<1x224xf32>
    %344 = vector.broadcast %343 : vector<1x224xf32> to vector<16x224xf32>
    %c2 = arith.constant 2 : index
    %c0_215 = arith.constant 0 : index
    %c0_216 = arith.constant 0 : index
    %c0_217 = arith.constant 0 : index
    %345 = vector.load %arg4[%c2, %c0_215, %c0_216, %c0_217] : memref<8x2x224x224xf32, #tpu.memory_space<vmem>>, vector<1x1x16x224xf32>
    %346 = vector.shape_cast %345 : vector<1x1x16x224xf32> to vector<16x224xf32>
    %347 = vector.shape_cast %344 : vector<16x224xf32> to vector<1x1x16x224xf32>
    tpu.vector_store %arg4[%c2, %c0_215, %c0_216, %c0_217], %347 {strides = array<i32>} : memref<8x2x224x224xf32, #tpu.memory_space<vmem>>, vector<1x1x16x224xf32>,
    %348 = vector.extract_strided_slice %5 {offsets = [2, 256], sizes = [1, 224], strides = [1, 1]} : vector<8x7168xf32> to vector<1x224xf32>
    %349 = vector.shape_cast %348 : vector<1x224xf32> to vector<1x224xf32>
    %350 = vector.broadcast %349 : vector<1x224xf32> to vector<16x224xf32>
    %c2_218 = arith.constant 2 : index
    %c0_219 = arith.constant 0 : index
    %c16_220 = arith.constant 16 : index
    %c0_221 = arith.constant 0 : index
    %351 = vector.load %arg4[%c2_218, %c0_219, %c16_220, %c0_221] : memref<8x2x224x224xf32, #tpu.memory_space<vmem>>, vector<1x1x16x224xf32>
    %352 = vector.shape_cast %351 : vector<1x1x16x224xf32> to vector<16x224xf32>
    %353 = vector.shape_cast %350 : vector<16x224xf32> to vector<1x1x16x224xf32>
    tpu.vector_store %arg4[%c2_218, %c0_219, %c16_220, %c0_221], %353 {strides = array<i32>} : memref<8x2x224x224xf32, #tpu.memory_space<vmem>>, vector<1x1x16x224xf32>,
    %354 = vector.extract_strided_slice %5 {offsets = [2, 512], sizes = [1, 224], strides = [1, 1]} : vector<8x7168xf32> to vector<1x224xf32>
    %355 = vector.shape_cast %354 : vector<1x224xf32> to vector<1x224xf32>
    %356 = vector.broadcast %355 : vector<1x224xf32> to vector<16x224xf32>
    %c2_222 = arith.constant 2 : index
    %c0_223 = arith.constant 0 : index
    %c32_224 = arith.constant 32 : index
    %c0_225 = arith.constant 0 : index
    %357 = vector.load %arg4[%c2_222, %c0_223, %c32_224, %c0_225] : memref<8x2x224x224xf32, #tpu.memory_space<vmem>>, vector<1x1x16x224xf32>
    %358 = vector.shape_cast %357 : vector<1x1x16x224xf32> to vector<16x224xf32>
    %359 = vector.shape_cast %356 : vector<16x224xf32> to vector<1x1x16x224xf32>
    tpu.vector_store %arg4[%c2_222, %c0_223, %c32_224, %c0_225], %359 {strides = array<i32>} : memref<8x2x224x224xf32, #tpu.memory_space<vmem>>, vector<1x1x16x224xf32>,
    %360 = vector.extract_strided_slice %5 {offsets = [2, 768], sizes = [1, 224], strides = [1, 1]} : vector<8x7168xf32> to vector<1x224xf32>
    %361 = vector.shape_cast %360 : vector<1x224xf32> to vector<1x224xf32>
    %362 = vector.broadcast %361 : vector<1x224xf32> to vector<16x224xf32>
    %c2_226 = arith.constant 2 : index
    %c0_227 = arith.constant 0 : index
    %c48_228 = arith.constant 48 : index
    %c0_229 = arith.constant 0 : index
    %363 = vector.load %arg4[%c2_226, %c0_227, %c48_228, %c0_229] : memref<8x2x224x224xf32, #tpu.memory_space<vmem>>, vector<1x1x16x224xf32>
    %364 = vector.shape_cast %363 : vector<1x1x16x224xf32> to vector<16x224xf32>
    %365 = vector.shape_cast %362 : vector<16x224xf32> to vector<1x1x16x224xf32>
    tpu.vector_store %arg4[%c2_226, %c0_227, %c48_228, %c0_229], %365 {strides = array<i32>} : memref<8x2x224x224xf32, #tpu.memory_space<vmem>>, vector<1x1x16x224xf32>,
    %366 = vector.extract_strided_slice %5 {offsets = [2, 1024], sizes = [1, 224], strides = [1, 1]} : vector<8x7168xf32> to vector<1x224xf32>
    %367 = vector.shape_cast %366 : vector<1x224xf32> to vector<1x224xf32>
    %368 = vector.broadcast %367 : vector<1x224xf32> to vector<16x224xf32>
    %c2_230 = arith.constant 2 : index
    %c0_231 = arith.constant 0 : index
    %c64_232 = arith.constant 64 : index
    %c0_233 = arith.constant 0 : index
    %369 = vector.load %arg4[%c2_230, %c0_231, %c64_232, %c0_233] : memref<8x2x224x224xf32, #tpu.memory_space<vmem>>, vector<1x1x16x224xf32>
    %370 = vector.shape_cast %369 : vector<1x1x16x224xf32> to vector<16x224xf32>
    %371 = vector.shape_cast %368 : vector<16x224xf32> to vector<1x1x16x224xf32>
    tpu.vector_store %arg4[%c2_230, %c0_231, %c64_232, %c0_233], %371 {strides = array<i32>} : memref<8x2x224x224xf32, #tpu.memory_space<vmem>>, vector<1x1x16x224xf32>,
    %372 = vector.extract_strided_slice %5 {offsets = [2, 1280], sizes = [1, 224], strides = [1, 1]} : vector<8x7168xf32> to vector<1x224xf32>
    %373 = vector.shape_cast %372 : vector<1x224xf32> to vector<1x224xf32>
    %374 = vector.broadcast %373 : vector<1x224xf32> to vector<16x224xf32>
    %c2_234 = arith.constant 2 : index
    %c0_235 = arith.constant 0 : index
    %c80_236 = arith.constant 80 : index
    %c0_237 = arith.constant 0 : index
    %375 = vector.load %arg4[%c2_234, %c0_235, %c80_236, %c0_237] : memref<8x2x224x224xf32, #tpu.memory_space<vmem>>, vector<1x1x16x224xf32>
    %376 = vector.shape_cast %375 : vector<1x1x16x224xf32> to vector<16x224xf32>
    %377 = vector.shape_cast %374 : vector<16x224xf32> to vector<1x1x16x224xf32>
    tpu.vector_store %arg4[%c2_234, %c0_235, %c80_236, %c0_237], %377 {strides = array<i32>} : memref<8x2x224x224xf32, #tpu.memory_space<vmem>>, vector<1x1x16x224xf32>,
    %378 = vector.extract_strided_slice %5 {offsets = [2, 1536], sizes = [1, 224], strides = [1, 1]} : vector<8x7168xf32> to vector<1x224xf32>
    %379 = vector.shape_cast %378 : vector<1x224xf32> to vector<1x224xf32>
    %380 = vector.broadcast %379 : vector<1x224xf32> to vector<16x224xf32>
    %c2_238 = arith.constant 2 : index
    %c0_239 = arith.constant 0 : index
    %c96_240 = arith.constant 96 : index
    %c0_241 = arith.constant 0 : index
    %381 = vector.load %arg4[%c2_238, %c0_239, %c96_240, %c0_241] : memref<8x2x224x224xf32, #tpu.memory_space<vmem>>, vector<1x1x16x224xf32>
    %382 = vector.shape_cast %381 : vector<1x1x16x224xf32> to vector<16x224xf32>
    %383 = vector.shape_cast %380 : vector<16x224xf32> to vector<1x1x16x224xf32>
    tpu.vector_store %arg4[%c2_238, %c0_239, %c96_240, %c0_241], %383 {strides = array<i32>} : memref<8x2x224x224xf32, #tpu.memory_space<vmem>>, vector<1x1x16x224xf32>,
    %384 = vector.extract_strided_slice %5 {offsets = [2, 1792], sizes = [1, 224], strides = [1, 1]} : vector<8x7168xf32> to vector<1x224xf32>
    %385 = vector.shape_cast %384 : vector<1x224xf32> to vector<1x224xf32>
    %386 = vector.broadcast %385 : vector<1x224xf32> to vector<16x224xf32>
    %c2_242 = arith.constant 2 : index
    %c0_243 = arith.constant 0 : index
    %c112_244 = arith.constant 112 : index
    %c0_245 = arith.constant 0 : index
    %387 = vector.load %arg4[%c2_242, %c0_243, %c112_244, %c0_245] : memref<8x2x224x224xf32, #tpu.memory_space<vmem>>, vector<1x1x16x224xf32>
    %388 = vector.shape_cast %387 : vector<1x1x16x224xf32> to vector<16x224xf32>
    %389 = vector.shape_cast %386 : vector<16x224xf32> to vector<1x1x16x224xf32>
    tpu.vector_store %arg4[%c2_242, %c0_243, %c112_244, %c0_245], %389 {strides = array<i32>} : memref<8x2x224x224xf32, #tpu.memory_space<vmem>>, vector<1x1x16x224xf32>,
    %390 = vector.extract_strided_slice %5 {offsets = [2, 2048], sizes = [1, 224], strides = [1, 1]} : vector<8x7168xf32> to vector<1x224xf32>
    %391 = vector.shape_cast %390 : vector<1x224xf32> to vector<1x224xf32>
    %392 = vector.broadcast %391 : vector<1x224xf32> to vector<16x224xf32>
    %c2_246 = arith.constant 2 : index
    %c0_247 = arith.constant 0 : index
    %c128_248 = arith.constant 128 : index
    %c0_249 = arith.constant 0 : index
    %393 = vector.load %arg4[%c2_246, %c0_247, %c128_248, %c0_249] : memref<8x2x224x224xf32, #tpu.memory_space<vmem>>, vector<1x1x16x224xf32>
    %394 = vector.shape_cast %393 : vector<1x1x16x224xf32> to vector<16x224xf32>
    %395 = vector.shape_cast %392 : vector<16x224xf32> to vector<1x1x16x224xf32>
    tpu.vector_store %arg4[%c2_246, %c0_247, %c128_248, %c0_249], %395 {strides = array<i32>} : memref<8x2x224x224xf32, #tpu.memory_space<vmem>>, vector<1x1x16x224xf32>,
    %396 = vector.extract_strided_slice %5 {offsets = [2, 2304], sizes = [1, 224], strides = [1, 1]} : vector<8x7168xf32> to vector<1x224xf32>
    %397 = vector.shape_cast %396 : vector<1x224xf32> to vector<1x224xf32>
    %398 = vector.broadcast %397 : vector<1x224xf32> to vector<16x224xf32>
    %c2_250 = arith.constant 2 : index
    %c0_251 = arith.constant 0 : index
    %c144_252 = arith.constant 144 : index
    %c0_253 = arith.constant 0 : index
    %399 = vector.load %arg4[%c2_250, %c0_251, %c144_252, %c0_253] : memref<8x2x224x224xf32, #tpu.memory_space<vmem>>, vector<1x1x16x224xf32>
    %400 = vector.shape_cast %399 : vector<1x1x16x224xf32> to vector<16x224xf32>
    %401 = vector.shape_cast %398 : vector<16x224xf32> to vector<1x1x16x224xf32>
    tpu.vector_store %arg4[%c2_250, %c0_251, %c144_252, %c0_253], %401 {strides = array<i32>} : memref<8x2x224x224xf32, #tpu.memory_space<vmem>>, vector<1x1x16x224xf32>,
    %402 = vector.extract_strided_slice %5 {offsets = [2, 2560], sizes = [1, 224], strides = [1, 1]} : vector<8x7168xf32> to vector<1x224xf32>
    %403 = vector.shape_cast %402 : vector<1x224xf32> to vector<1x224xf32>
    %404 = vector.broadcast %403 : vector<1x224xf32> to vector<16x224xf32>
    %c2_254 = arith.constant 2 : index
    %c0_255 = arith.constant 0 : index
    %c160_256 = arith.constant 160 : index
    %c0_257 = arith.constant 0 : index
    %405 = vector.load %arg4[%c2_254, %c0_255, %c160_256, %c0_257] : memref<8x2x224x224xf32, #tpu.memory_space<vmem>>, vector<1x1x16x224xf32>
    %406 = vector.shape_cast %405 : vector<1x1x16x224xf32> to vector<16x224xf32>
    %407 = vector.shape_cast %404 : vector<16x224xf32> to vector<1x1x16x224xf32>
    tpu.vector_store %arg4[%c2_254, %c0_255, %c160_256, %c0_257], %407 {strides = array<i32>} : memref<8x2x224x224xf32, #tpu.memory_space<vmem>>, vector<1x1x16x224xf32>,
    %408 = vector.extract_strided_slice %5 {offsets = [2, 2816], sizes = [1, 224], strides = [1, 1]} : vector<8x7168xf32> to vector<1x224xf32>
    %409 = vector.shape_cast %408 : vector<1x224xf32> to vector<1x224xf32>
    %410 = vector.broadcast %409 : vector<1x224xf32> to vector<16x224xf32>
    %c2_258 = arith.constant 2 : index
    %c0_259 = arith.constant 0 : index
    %c176_260 = arith.constant 176 : index
    %c0_261 = arith.constant 0 : index
    %411 = vector.load %arg4[%c2_258, %c0_259, %c176_260, %c0_261] : memref<8x2x224x224xf32, #tpu.memory_space<vmem>>, vector<1x1x16x224xf32>
    %412 = vector.shape_cast %411 : vector<1x1x16x224xf32> to vector<16x224xf32>
    %413 = vector.shape_cast %410 : vector<16x224xf32> to vector<1x1x16x224xf32>
    tpu.vector_store %arg4[%c2_258, %c0_259, %c176_260, %c0_261], %413 {strides = array<i32>} : memref<8x2x224x224xf32, #tpu.memory_space<vmem>>, vector<1x1x16x224xf32>,
    %414 = vector.extract_strided_slice %5 {offsets = [2, 3072], sizes = [1, 224], strides = [1, 1]} : vector<8x7168xf32> to vector<1x224xf32>
    %415 = vector.shape_cast %414 : vector<1x224xf32> to vector<1x224xf32>
    %416 = vector.broadcast %415 : vector<1x224xf32> to vector<16x224xf32>
    %c2_262 = arith.constant 2 : index
    %c0_263 = arith.constant 0 : index
    %c192_264 = arith.constant 192 : index
    %c0_265 = arith.constant 0 : index
    %417 = vector.load %arg4[%c2_262, %c0_263, %c192_264, %c0_265] : memref<8x2x224x224xf32, #tpu.memory_space<vmem>>, vector<1x1x16x224xf32>
    %418 = vector.shape_cast %417 : vector<1x1x16x224xf32> to vector<16x224xf32>
    %419 = vector.shape_cast %416 : vector<16x224xf32> to vector<1x1x16x224xf32>
    tpu.vector_store %arg4[%c2_262, %c0_263, %c192_264, %c0_265], %419 {strides = array<i32>} : memref<8x2x224x224xf32, #tpu.memory_space<vmem>>, vector<1x1x16x224xf32>,
    %420 = vector.extract_strided_slice %5 {offsets = [2, 3328], sizes = [1, 224], strides = [1, 1]} : vector<8x7168xf32> to vector<1x224xf32>
    %421 = vector.shape_cast %420 : vector<1x224xf32> to vector<1x224xf32>
    %422 = vector.broadcast %421 : vector<1x224xf32> to vector<16x224xf32>
    %c2_266 = arith.constant 2 : index
    %c0_267 = arith.constant 0 : index
    %c208_268 = arith.constant 208 : index
    %c0_269 = arith.constant 0 : index
    %423 = vector.load %arg4[%c2_266, %c0_267, %c208_268, %c0_269] : memref<8x2x224x224xf32, #tpu.memory_space<vmem>>, vector<1x1x16x224xf32>
    %424 = vector.shape_cast %423 : vector<1x1x16x224xf32> to vector<16x224xf32>
    %425 = vector.shape_cast %422 : vector<16x224xf32> to vector<1x1x16x224xf32>
    tpu.vector_store %arg4[%c2_266, %c0_267, %c208_268, %c0_269], %425 {strides = array<i32>} : memref<8x2x224x224xf32, #tpu.memory_space<vmem>>, vector<1x1x16x224xf32>,
    %426 = vector.extract_strided_slice %5 {offsets = [2, 3584], sizes = [1, 224], strides = [1, 1]} : vector<8x7168xf32> to vector<1x224xf32>
    %427 = vector.shape_cast %426 : vector<1x224xf32> to vector<1x224xf32>
    %428 = vector.broadcast %427 : vector<1x224xf32> to vector<16x224xf32>
    %c2_270 = arith.constant 2 : index
    %c1_271 = arith.constant 1 : index
    %c0_272 = arith.constant 0 : index
    %c0_273 = arith.constant 0 : index
    %429 = vector.load %arg4[%c2_270, %c1_271, %c0_272, %c0_273] : memref<8x2x224x224xf32, #tpu.memory_space<vmem>>, vector<1x1x16x224xf32>
    %430 = vector.shape_cast %429 : vector<1x1x16x224xf32> to vector<16x224xf32>
    %431 = vector.shape_cast %428 : vector<16x224xf32> to vector<1x1x16x224xf32>
    tpu.vector_store %arg4[%c2_270, %c1_271, %c0_272, %c0_273], %431 {strides = array<i32>} : memref<8x2x224x224xf32, #tpu.memory_space<vmem>>, vector<1x1x16x224xf32>,
    %432 = vector.extract_strided_slice %5 {offsets = [2, 3840], sizes = [1, 224], strides = [1, 1]} : vector<8x7168xf32> to vector<1x224xf32>
    %433 = vector.shape_cast %432 : vector<1x224xf32> to vector<1x224xf32>
    %434 = vector.broadcast %433 : vector<1x224xf32> to vector<16x224xf32>
    %c2_274 = arith.constant 2 : index
    %c1_275 = arith.constant 1 : index
    %c16_276 = arith.constant 16 : index
    %c0_277 = arith.constant 0 : index
    %435 = vector.load %arg4[%c2_274, %c1_275, %c16_276, %c0_277] : memref<8x2x224x224xf32, #tpu.memory_space<vmem>>, vector<1x1x16x224xf32>
    %436 = vector.shape_cast %435 : vector<1x1x16x224xf32> to vector<16x224xf32>
    %437 = vector.shape_cast %434 : vector<16x224xf32> to vector<1x1x16x224xf32>
    tpu.vector_store %arg4[%c2_274, %c1_275, %c16_276, %c0_277], %437 {strides = array<i32>} : memref<8x2x224x224xf32, #tpu.memory_space<vmem>>, vector<1x1x16x224xf32>,
    %438 = vector.extract_strided_slice %5 {offsets = [2, 4096], sizes = [1, 224], strides = [1, 1]} : vector<8x7168xf32> to vector<1x224xf32>
    %439 = vector.shape_cast %438 : vector<1x224xf32> to vector<1x224xf32>
    %440 = vector.broadcast %439 : vector<1x224xf32> to vector<16x224xf32>
    %c2_278 = arith.constant 2 : index
    %c1_279 = arith.constant 1 : index
    %c32_280 = arith.constant 32 : index
    %c0_281 = arith.constant 0 : index
    %441 = vector.load %arg4[%c2_278, %c1_279, %c32_280, %c0_281] : memref<8x2x224x224xf32, #tpu.memory_space<vmem>>, vector<1x1x16x224xf32>
    %442 = vector.shape_cast %441 : vector<1x1x16x224xf32> to vector<16x224xf32>
    %443 = vector.shape_cast %440 : vector<16x224xf32> to vector<1x1x16x224xf32>
    tpu.vector_store %arg4[%c2_278, %c1_279, %c32_280, %c0_281], %443 {strides = array<i32>} : memref<8x2x224x224xf32, #tpu.memory_space<vmem>>, vector<1x1x16x224xf32>,
    %444 = vector.extract_strided_slice %5 {offsets = [2, 4352], sizes = [1, 224], strides = [1, 1]} : vector<8x7168xf32> to vector<1x224xf32>
    %445 = vector.shape_cast %444 : vector<1x224xf32> to vector<1x224xf32>
    %446 = vector.broadcast %445 : vector<1x224xf32> to vector<16x224xf32>
    %c2_282 = arith.constant 2 : index
    %c1_283 = arith.constant 1 : index
    %c48_284 = arith.constant 48 : index
    %c0_285 = arith.constant 0 : index
    %447 = vector.load %arg4[%c2_282, %c1_283, %c48_284, %c0_285] : memref<8x2x224x224xf32, #tpu.memory_space<vmem>>, vector<1x1x16x224xf32>
    %448 = vector.shape_cast %447 : vector<1x1x16x224xf32> to vector<16x224xf32>
    %449 = vector.shape_cast %446 : vector<16x224xf32> to vector<1x1x16x224xf32>
    tpu.vector_store %arg4[%c2_282, %c1_283, %c48_284, %c0_285], %449 {strides = array<i32>} : memref<8x2x224x224xf32, #tpu.memory_space<vmem>>, vector<1x1x16x224xf32>,
    %450 = vector.extract_strided_slice %5 {offsets = [2, 4608], sizes = [1, 224], strides = [1, 1]} : vector<8x7168xf32> to vector<1x224xf32>
    %451 = vector.shape_cast %450 : vector<1x224xf32> to vector<1x224xf32>
    %452 = vector.broadcast %451 : vector<1x224xf32> to vector<16x224xf32>
    %c2_286 = arith.constant 2 : index
    %c1_287 = arith.constant 1 : index
    %c64_288 = arith.constant 64 : index
    %c0_289 = arith.constant 0 : index
    %453 = vector.load %arg4[%c2_286, %c1_287, %c64_288, %c0_289] : memref<8x2x224x224xf32, #tpu.memory_space<vmem>>, vector<1x1x16x224xf32>
    %454 = vector.shape_cast %453 : vector<1x1x16x224xf32> to vector<16x224xf32>
    %455 = vector.shape_cast %452 : vector<16x224xf32> to vector<1x1x16x224xf32>
    tpu.vector_store %arg4[%c2_286, %c1_287, %c64_288, %c0_289], %455 {strides = array<i32>} : memref<8x2x224x224xf32, #tpu.memory_space<vmem>>, vector<1x1x16x224xf32>,
    %456 = vector.extract_strided_slice %5 {offsets = [2, 4864], sizes = [1, 224], strides = [1, 1]} : vector<8x7168xf32> to vector<1x224xf32>
    %457 = vector.shape_cast %456 : vector<1x224xf32> to vector<1x224xf32>
    %458 = vector.broadcast %457 : vector<1x224xf32> to vector<16x224xf32>
    %c2_290 = arith.constant 2 : index
    %c1_291 = arith.constant 1 : index
    %c80_292 = arith.constant 80 : index
    %c0_293 = arith.constant 0 : index
    %459 = vector.load %arg4[%c2_290, %c1_291, %c80_292, %c0_293] : memref<8x2x224x224xf32, #tpu.memory_space<vmem>>, vector<1x1x16x224xf32>
    %460 = vector.shape_cast %459 : vector<1x1x16x224xf32> to vector<16x224xf32>
    %461 = vector.shape_cast %458 : vector<16x224xf32> to vector<1x1x16x224xf32>
    tpu.vector_store %arg4[%c2_290, %c1_291, %c80_292, %c0_293], %461 {strides = array<i32>} : memref<8x2x224x224xf32, #tpu.memory_space<vmem>>, vector<1x1x16x224xf32>,
    %462 = vector.extract_strided_slice %5 {offsets = [2, 5120], sizes = [1, 224], strides = [1, 1]} : vector<8x7168xf32> to vector<1x224xf32>
    %463 = vector.shape_cast %462 : vector<1x224xf32> to vector<1x224xf32>
    %464 = vector.broadcast %463 : vector<1x224xf32> to vector<16x224xf32>
    %c2_294 = arith.constant 2 : index
    %c1_295 = arith.constant 1 : index
    %c96_296 = arith.constant 96 : index
    %c0_297 = arith.constant 0 : index
    %465 = vector.load %arg4[%c2_294, %c1_295, %c96_296, %c0_297] : memref<8x2x224x224xf32, #tpu.memory_space<vmem>>, vector<1x1x16x224xf32>
    %466 = vector.shape_cast %465 : vector<1x1x16x224xf32> to vector<16x224xf32>
    %467 = vector.shape_cast %464 : vector<16x224xf32> to vector<1x1x16x224xf32>
    tpu.vector_store %arg4[%c2_294, %c1_295, %c96_296, %c0_297], %467 {strides = array<i32>} : memref<8x2x224x224xf32, #tpu.memory_space<vmem>>, vector<1x1x16x224xf32>,
    %468 = vector.extract_strided_slice %5 {offsets = [2, 5376], sizes = [1, 224], strides = [1, 1]} : vector<8x7168xf32> to vector<1x224xf32>
    %469 = vector.shape_cast %468 : vector<1x224xf32> to vector<1x224xf32>
    %470 = vector.broadcast %469 : vector<1x224xf32> to vector<16x224xf32>
    %c2_298 = arith.constant 2 : index
    %c1_299 = arith.constant 1 : index
    %c112_300 = arith.constant 112 : index
    %c0_301 = arith.constant 0 : index
    %471 = vector.load %arg4[%c2_298, %c1_299, %c112_300, %c0_301] : memref<8x2x224x224xf32, #tpu.memory_space<vmem>>, vector<1x1x16x224xf32>
    %472 = vector.shape_cast %471 : vector<1x1x16x224xf32> to vector<16x224xf32>
    %473 = vector.shape_cast %470 : vector<16x224xf32> to vector<1x1x16x224xf32>
    tpu.vector_store %arg4[%c2_298, %c1_299, %c112_300, %c0_301], %473 {strides = array<i32>} : memref<8x2x224x224xf32, #tpu.memory_space<vmem>>, vector<1x1x16x224xf32>,
    %474 = vector.extract_strided_slice %5 {offsets = [2, 5632], sizes = [1, 224], strides = [1, 1]} : vector<8x7168xf32> to vector<1x224xf32>
    %475 = vector.shape_cast %474 : vector<1x224xf32> to vector<1x224xf32>
    %476 = vector.broadcast %475 : vector<1x224xf32> to vector<16x224xf32>
    %c2_302 = arith.constant 2 : index
    %c1_303 = arith.constant 1 : index
    %c128_304 = arith.constant 128 : index
    %c0_305 = arith.constant 0 : index
    %477 = vector.load %arg4[%c2_302, %c1_303, %c128_304, %c0_305] : memref<8x2x224x224xf32, #tpu.memory_space<vmem>>, vector<1x1x16x224xf32>
    %478 = vector.shape_cast %477 : vector<1x1x16x224xf32> to vector<16x224xf32>
    %479 = vector.shape_cast %476 : vector<16x224xf32> to vector<1x1x16x224xf32>
    tpu.vector_store %arg4[%c2_302, %c1_303, %c128_304, %c0_305], %479 {strides = array<i32>} : memref<8x2x224x224xf32, #tpu.memory_space<vmem>>, vector<1x1x16x224xf32>,
    %480 = vector.extract_strided_slice %5 {offsets = [2, 5888], sizes = [1, 224], strides = [1, 1]} : vector<8x7168xf32> to vector<1x224xf32>
    %481 = vector.shape_cast %480 : vector<1x224xf32> to vector<1x224xf32>
    %482 = vector.broadcast %481 : vector<1x224xf32> to vector<16x224xf32>
    %c2_306 = arith.constant 2 : index
    %c1_307 = arith.constant 1 : index
    %c144_308 = arith.constant 144 : index
    %c0_309 = arith.constant 0 : index
    %483 = vector.load %arg4[%c2_306, %c1_307, %c144_308, %c0_309] : memref<8x2x224x224xf32, #tpu.memory_space<vmem>>, vector<1x1x16x224xf32>
    %484 = vector.shape_cast %483 : vector<1x1x16x224xf32> to vector<16x224xf32>
    %485 = vector.shape_cast %482 : vector<16x224xf32> to vector<1x1x16x224xf32>
    tpu.vector_store %arg4[%c2_306, %c1_307, %c144_308, %c0_309], %485 {strides = array<i32>} : memref<8x2x224x224xf32, #tpu.memory_space<vmem>>, vector<1x1x16x224xf32>,
    %486 = vector.extract_strided_slice %5 {offsets = [2, 6144], sizes = [1, 224], strides = [1, 1]} : vector<8x7168xf32> to vector<1x224xf32>
    %487 = vector.shape_cast %486 : vector<1x224xf32> to vector<1x224xf32>
    %488 = vector.broadcast %487 : vector<1x224xf32> to vector<16x224xf32>
    %c2_310 = arith.constant 2 : index
    %c1_311 = arith.constant 1 : index
    %c160_312 = arith.constant 160 : index
    %c0_313 = arith.constant 0 : index
    %489 = vector.load %arg4[%c2_310, %c1_311, %c160_312, %c0_313] : memref<8x2x224x224xf32, #tpu.memory_space<vmem>>, vector<1x1x16x224xf32>
    %490 = vector.shape_cast %489 : vector<1x1x16x224xf32> to vector<16x224xf32>
    %491 = vector.shape_cast %488 : vector<16x224xf32> to vector<1x1x16x224xf32>
    tpu.vector_store %arg4[%c2_310, %c1_311, %c160_312, %c0_313], %491 {strides = array<i32>} : memref<8x2x224x224xf32, #tpu.memory_space<vmem>>, vector<1x1x16x224xf32>,
    %492 = vector.extract_strided_slice %5 {offsets = [2, 6400], sizes = [1, 224], strides = [1, 1]} : vector<8x7168xf32> to vector<1x224xf32>
    %493 = vector.shape_cast %492 : vector<1x224xf32> to vector<1x224xf32>
    %494 = vector.broadcast %493 : vector<1x224xf32> to vector<16x224xf32>
    %c2_314 = arith.constant 2 : index
    %c1_315 = arith.constant 1 : index
    %c176_316 = arith.constant 176 : index
    %c0_317 = arith.constant 0 : index
    %495 = vector.load %arg4[%c2_314, %c1_315, %c176_316, %c0_317] : memref<8x2x224x224xf32, #tpu.memory_space<vmem>>, vector<1x1x16x224xf32>
    %496 = vector.shape_cast %495 : vector<1x1x16x224xf32> to vector<16x224xf32>
    %497 = vector.shape_cast %494 : vector<16x224xf32> to vector<1x1x16x224xf32>
    tpu.vector_store %arg4[%c2_314, %c1_315, %c176_316, %c0_317], %497 {strides = array<i32>} : memref<8x2x224x224xf32, #tpu.memory_space<vmem>>, vector<1x1x16x224xf32>,
    %498 = vector.extract_strided_slice %5 {offsets = [2, 6656], sizes = [1, 224], strides = [1, 1]} : vector<8x7168xf32> to vector<1x224xf32>
    %499 = vector.shape_cast %498 : vector<1x224xf32> to vector<1x224xf32>
    %500 = vector.broadcast %499 : vector<1x224xf32> to vector<16x224xf32>
    %c2_318 = arith.constant 2 : index
    %c1_319 = arith.constant 1 : index
    %c192_320 = arith.constant 192 : index
    %c0_321 = arith.constant 0 : index
    %501 = vector.load %arg4[%c2_318, %c1_319, %c192_320, %c0_321] : memref<8x2x224x224xf32, #tpu.memory_space<vmem>>, vector<1x1x16x224xf32>
    %502 = vector.shape_cast %501 : vector<1x1x16x224xf32> to vector<16x224xf32>
    %503 = vector.shape_cast %500 : vector<16x224xf32> to vector<1x1x16x224xf32>
    tpu.vector_store %arg4[%c2_318, %c1_319, %c192_320, %c0_321], %503 {strides = array<i32>} : memref<8x2x224x224xf32, #tpu.memory_space<vmem>>, vector<1x1x16x224xf32>,
    %504 = vector.extract_strided_slice %5 {offsets = [2, 6912], sizes = [1, 224], strides = [1, 1]} : vector<8x7168xf32> to vector<1x224xf32>
    %505 = vector.shape_cast %504 : vector<1x224xf32> to vector<1x224xf32>
    %506 = vector.broadcast %505 : vector<1x224xf32> to vector<16x224xf32>
    %c2_322 = arith.constant 2 : index
    %c1_323 = arith.constant 1 : index
    %c208_324 = arith.constant 208 : index
    %c0_325 = arith.constant 0 : index
    %507 = vector.load %arg4[%c2_322, %c1_323, %c208_324, %c0_325] : memref<8x2x224x224xf32, #tpu.memory_space<vmem>>, vector<1x1x16x224xf32>
    %508 = vector.shape_cast %507 : vector<1x1x16x224xf32> to vector<16x224xf32>
    %509 = vector.shape_cast %506 : vector<16x224xf32> to vector<1x1x16x224xf32>
    tpu.vector_store %arg4[%c2_322, %c1_323, %c208_324, %c0_325], %509 {strides = array<i32>} : memref<8x2x224x224xf32, #tpu.memory_space<vmem>>, vector<1x1x16x224xf32>,
    %510 = vector.extract_strided_slice %5 {offsets = [3, 0], sizes = [1, 224], strides = [1, 1]} : vector<8x7168xf32> to vector<1x224xf32>
    %511 = vector.shape_cast %510 : vector<1x224xf32> to vector<1x224xf32>
    %512 = vector.broadcast %511 : vector<1x224xf32> to vector<16x224xf32>
    %c3 = arith.constant 3 : index
    %c0_326 = arith.constant 0 : index
    %c0_327 = arith.constant 0 : index
    %c0_328 = arith.constant 0 : index
    %513 = vector.load %arg4[%c3, %c0_326, %c0_327, %c0_328] : memref<8x2x224x224xf32, #tpu.memory_space<vmem>>, vector<1x1x16x224xf32>
    %514 = vector.shape_cast %513 : vector<1x1x16x224xf32> to vector<16x224xf32>
    %515 = vector.shape_cast %512 : vector<16x224xf32> to vector<1x1x16x224xf32>
    tpu.vector_store %arg4[%c3, %c0_326, %c0_327, %c0_328], %515 {strides = array<i32>} : memref<8x2x224x224xf32, #tpu.memory_space<vmem>>, vector<1x1x16x224xf32>,
    %516 = vector.extract_strided_slice %5 {offsets = [3, 256], sizes = [1, 224], strides = [1, 1]} : vector<8x7168xf32> to vector<1x224xf32>
    %517 = vector.shape_cast %516 : vector<1x224xf32> to vector<1x224xf32>
    %518 = vector.broadcast %517 : vector<1x224xf32> to vector<16x224xf32>
    %c3_329 = arith.constant 3 : index
    %c0_330 = arith.constant 0 : index
    %c16_331 = arith.constant 16 : index
    %c0_332 = arith.constant 0 : index
    %519 = vector.load %arg4[%c3_329, %c0_330, %c16_331, %c0_332] : memref<8x2x224x224xf32, #tpu.memory_space<vmem>>, vector<1x1x16x224xf32>
    %520 = vector.shape_cast %519 : vector<1x1x16x224xf32> to vector<16x224xf32>
    %521 = vector.shape_cast %518 : vector<16x224xf32> to vector<1x1x16x224xf32>
    tpu.vector_store %arg4[%c3_329, %c0_330, %c16_331, %c0_332], %521 {strides = array<i32>} : memref<8x2x224x224xf32, #tpu.memory_space<vmem>>, vector<1x1x16x224xf32>,
    %522 = vector.extract_strided_slice %5 {offsets = [3, 512], sizes = [1, 224], strides = [1, 1]} : vector<8x7168xf32> to vector<1x224xf32>
    %523 = vector.shape_cast %522 : vector<1x224xf32> to vector<1x224xf32>
    %524 = vector.broadcast %523 : vector<1x224xf32> to vector<16x224xf32>
    %c3_333 = arith.constant 3 : index
    %c0_334 = arith.constant 0 : index
    %c32_335 = arith.constant 32 : index
    %c0_336 = arith.constant 0 : index
    %525 = vector.load %arg4[%c3_333, %c0_334, %c32_335, %c0_336] : memref<8x2x224x224xf32, #tpu.memory_space<vmem>>, vector<1x1x16x224xf32>
    %526 = vector.shape_cast %525 : vector<1x1x16x224xf32> to vector<16x224xf32>
    %527 = vector.shape_cast %524 : vector<16x224xf32> to vector<1x1x16x224xf32>
    tpu.vector_store %arg4[%c3_333, %c0_334, %c32_335, %c0_336], %527 {strides = array<i32>} : memref<8x2x224x224xf32, #tpu.memory_space<vmem>>, vector<1x1x16x224xf32>,
    %528 = vector.extract_strided_slice %5 {offsets = [3, 768], sizes = [1, 224], strides = [1, 1]} : vector<8x7168xf32> to vector<1x224xf32>
    %529 = vector.shape_cast %528 : vector<1x224xf32> to vector<1x224xf32>
    %530 = vector.broadcast %529 : vector<1x224xf32> to vector<16x224xf32>
    %c3_337 = arith.constant 3 : index
    %c0_338 = arith.constant 0 : index
    %c48_339 = arith.constant 48 : index
    %c0_340 = arith.constant 0 : index
    %531 = vector.load %arg4[%c3_337, %c0_338, %c48_339, %c0_340] : memref<8x2x224x224xf32, #tpu.memory_space<vmem>>, vector<1x1x16x224xf32>
    %532 = vector.shape_cast %531 : vector<1x1x16x224xf32> to vector<16x224xf32>
    %533 = vector.shape_cast %530 : vector<16x224xf32> to vector<1x1x16x224xf32>
    tpu.vector_store %arg4[%c3_337, %c0_338, %c48_339, %c0_340], %533 {strides = array<i32>} : memref<8x2x224x224xf32, #tpu.memory_space<vmem>>, vector<1x1x16x224xf32>,
    %534 = vector.extract_strided_slice %5 {offsets = [3, 1024], sizes = [1, 224], strides = [1, 1]} : vector<8x7168xf32> to vector<1x224xf32>
    %535 = vector.shape_cast %534 : vector<1x224xf32> to vector<1x224xf32>
    %536 = vector.broadcast %535 : vector<1x224xf32> to vector<16x224xf32>
    %c3_341 = arith.constant 3 : index
    %c0_342 = arith.constant 0 : index
    %c64_343 = arith.constant 64 : index
    %c0_344 = arith.constant 0 : index
    %537 = vector.load %arg4[%c3_341, %c0_342, %c64_343, %c0_344] : memref<8x2x224x224xf32, #tpu.memory_space<vmem>>, vector<1x1x16x224xf32>
    %538 = vector.shape_cast %537 : vector<1x1x16x224xf32> to vector<16x224xf32>
    %539 = vector.shape_cast %536 : vector<16x224xf32> to vector<1x1x16x224xf32>
    tpu.vector_store %arg4[%c3_341, %c0_342, %c64_343, %c0_344], %539 {strides = array<i32>} : memref<8x2x224x224xf32, #tpu.memory_space<vmem>>, vector<1x1x16x224xf32>,
    %540 = vector.extract_strided_slice %5 {offsets = [3, 1280], sizes = [1, 224], strides = [1, 1]} : vector<8x7168xf32> to vector<1x224xf32>
    %541 = vector.shape_cast %540 : vector<1x224xf32> to vector<1x224xf32>
    %542 = vector.broadcast %541 : vector<1x224xf32> to vector<16x224xf32>
    %c3_345 = arith.constant 3 : index
    %c0_346 = arith.constant 0 : index
    %c80_347 = arith.constant 80 : index
    %c0_348 = arith.constant 0 : index
    %543 = vector.load %arg4[%c3_345, %c0_346, %c80_347, %c0_348] : memref<8x2x224x224xf32, #tpu.memory_space<vmem>>, vector<1x1x16x224xf32>
    %544 = vector.shape_cast %543 : vector<1x1x16x224xf32> to vector<16x224xf32>
    %545 = vector.shape_cast %542 : vector<16x224xf32> to vector<1x1x16x224xf32>
    tpu.vector_store %arg4[%c3_345, %c0_346, %c80_347, %c0_348], %545 {strides = array<i32>} : memref<8x2x224x224xf32, #tpu.memory_space<vmem>>, vector<1x1x16x224xf32>,
    %546 = vector.extract_strided_slice %5 {offsets = [3, 1536], sizes = [1, 224], strides = [1, 1]} : vector<8x7168xf32> to vector<1x224xf32>
    %547 = vector.shape_cast %546 : vector<1x224xf32> to vector<1x224xf32>
    %548 = vector.broadcast %547 : vector<1x224xf32> to vector<16x224xf32>
    %c3_349 = arith.constant 3 : index
    %c0_350 = arith.constant 0 : index
    %c96_351 = arith.constant 96 : index
    %c0_352 = arith.constant 0 : index
    %549 = vector.load %arg4[%c3_349, %c0_350, %c96_351, %c0_352] : memref<8x2x224x224xf32, #tpu.memory_space<vmem>>, vector<1x1x16x224xf32>
    %550 = vector.shape_cast %549 : vector<1x1x16x224xf32> to vector<16x224xf32>
    %551 = vector.shape_cast %548 : vector<16x224xf32> to vector<1x1x16x224xf32>
    tpu.vector_store %arg4[%c3_349, %c0_350, %c96_351, %c0_352], %551 {strides = array<i32>} : memref<8x2x224x224xf32, #tpu.memory_space<vmem>>, vector<1x1x16x224xf32>,
    %552 = vector.extract_strided_slice %5 {offsets = [3, 1792], sizes = [1, 224], strides = [1, 1]} : vector<8x7168xf32> to vector<1x224xf32>
    %553 = vector.shape_cast %552 : vector<1x224xf32> to vector<1x224xf32>
    %554 = vector.broadcast %553 : vector<1x224xf32> to vector<16x224xf32>
    %c3_353 = arith.constant 3 : index
    %c0_354 = arith.constant 0 : index
    %c112_355 = arith.constant 112 : index
    %c0_356 = arith.constant 0 : index
    %555 = vector.load %arg4[%c3_353, %c0_354, %c112_355, %c0_356] : memref<8x2x224x224xf32, #tpu.memory_space<vmem>>, vector<1x1x16x224xf32>
    %556 = vector.shape_cast %555 : vector<1x1x16x224xf32> to vector<16x224xf32>
    %557 = vector.shape_cast %554 : vector<16x224xf32> to vector<1x1x16x224xf32>
    tpu.vector_store %arg4[%c3_353, %c0_354, %c112_355, %c0_356], %557 {strides = array<i32>} : memref<8x2x224x224xf32, #tpu.memory_space<vmem>>, vector<1x1x16x224xf32>,
    %558 = vector.extract_strided_slice %5 {offsets = [3, 2048], sizes = [1, 224], strides = [1, 1]} : vector<8x7168xf32> to vector<1x224xf32>
    %559 = vector.shape_cast %558 : vector<1x224xf32> to vector<1x224xf32>
    %560 = vector.broadcast %559 : vector<1x224xf32> to vector<16x224xf32>
    %c3_357 = arith.constant 3 : index
    %c0_358 = arith.constant 0 : index
    %c128_359 = arith.constant 128 : index
    %c0_360 = arith.constant 0 : index
    %561 = vector.load %arg4[%c3_357, %c0_358, %c128_359, %c0_360] : memref<8x2x224x224xf32, #tpu.memory_space<vmem>>, vector<1x1x16x224xf32>
    %562 = vector.shape_cast %561 : vector<1x1x16x224xf32> to vector<16x224xf32>
    %563 = vector.shape_cast %560 : vector<16x224xf32> to vector<1x1x16x224xf32>
    tpu.vector_store %arg4[%c3_357, %c0_358, %c128_359, %c0_360], %563 {strides = array<i32>} : memref<8x2x224x224xf32, #tpu.memory_space<vmem>>, vector<1x1x16x224xf32>,
    %564 = vector.extract_strided_slice %5 {offsets = [3, 2304], sizes = [1, 224], strides = [1, 1]} : vector<8x7168xf32> to vector<1x224xf32>
    %565 = vector.shape_cast %564 : vector<1x224xf32> to vector<1x224xf32>
    %566 = vector.broadcast %565 : vector<1x224xf32> to vector<16x224xf32>
    %c3_361 = arith.constant 3 : index
    %c0_362 = arith.constant 0 : index
    %c144_363 = arith.constant 144 : index
    %c0_364 = arith.constant 0 : index
    %567 = vector.load %arg4[%c3_361, %c0_362, %c144_363, %c0_364] : memref<8x2x224x224xf32, #tpu.memory_space<vmem>>, vector<1x1x16x224xf32>
    %568 = vector.shape_cast %567 : vector<1x1x16x224xf32> to vector<16x224xf32>
    %569 = vector.shape_cast %566 : vector<16x224xf32> to vector<1x1x16x224xf32>
    tpu.vector_store %arg4[%c3_361, %c0_362, %c144_363, %c0_364], %569 {strides = array<i32>} : memref<8x2x224x224xf32, #tpu.memory_space<vmem>>, vector<1x1x16x224xf32>,
    %570 = vector.extract_strided_slice %5 {offsets = [3, 2560], sizes = [1, 224], strides = [1, 1]} : vector<8x7168xf32> to vector<1x224xf32>
    %571 = vector.shape_cast %570 : vector<1x224xf32> to vector<1x224xf32>
    %572 = vector.broadcast %571 : vector<1x224xf32> to vector<16x224xf32>
    %c3_365 = arith.constant 3 : index
    %c0_366 = arith.constant 0 : index
    %c160_367 = arith.constant 160 : index
    %c0_368 = arith.constant 0 : index
    %573 = vector.load %arg4[%c3_365, %c0_366, %c160_367, %c0_368] : memref<8x2x224x224xf32, #tpu.memory_space<vmem>>, vector<1x1x16x224xf32>
    %574 = vector.shape_cast %573 : vector<1x1x16x224xf32> to vector<16x224xf32>
    %575 = vector.shape_cast %572 : vector<16x224xf32> to vector<1x1x16x224xf32>
    tpu.vector_store %arg4[%c3_365, %c0_366, %c160_367, %c0_368], %575 {strides = array<i32>} : memref<8x2x224x224xf32, #tpu.memory_space<vmem>>, vector<1x1x16x224xf32>,
    %576 = vector.extract_strided_slice %5 {offsets = [3, 2816], sizes = [1, 224], strides = [1, 1]} : vector<8x7168xf32> to vector<1x224xf32>
    %577 = vector.shape_cast %576 : vector<1x224xf32> to vector<1x224xf32>
    %578 = vector.broadcast %577 : vector<1x224xf32> to vector<16x224xf32>
    %c3_369 = arith.constant 3 : index
    %c0_370 = arith.constant 0 : index
    %c176_371 = arith.constant 176 : index
    %c0_372 = arith.constant 0 : index
    %579 = vector.load %arg4[%c3_369, %c0_370, %c176_371, %c0_372] : memref<8x2x224x224xf32, #tpu.memory_space<vmem>>, vector<1x1x16x224xf32>
    %580 = vector.shape_cast %579 : vector<1x1x16x224xf32> to vector<16x224xf32>
    %581 = vector.shape_cast %578 : vector<16x224xf32> to vector<1x1x16x224xf32>
    tpu.vector_store %arg4[%c3_369, %c0_370, %c176_371, %c0_372], %581 {strides = array<i32>} : memref<8x2x224x224xf32, #tpu.memory_space<vmem>>, vector<1x1x16x224xf32>,
    %582 = vector.extract_strided_slice %5 {offsets = [3, 3072], sizes = [1, 224], strides = [1, 1]} : vector<8x7168xf32> to vector<1x224xf32>
    %583 = vector.shape_cast %582 : vector<1x224xf32> to vector<1x224xf32>
    %584 = vector.broadcast %583 : vector<1x224xf32> to vector<16x224xf32>
    %c3_373 = arith.constant 3 : index
    %c0_374 = arith.constant 0 : index
    %c192_375 = arith.constant 192 : index
    %c0_376 = arith.constant 0 : index
    %585 = vector.load %arg4[%c3_373, %c0_374, %c192_375, %c0_376] : memref<8x2x224x224xf32, #tpu.memory_space<vmem>>, vector<1x1x16x224xf32>
    %586 = vector.shape_cast %585 : vector<1x1x16x224xf32> to vector<16x224xf32>
    %587 = vector.shape_cast %584 : vector<16x224xf32> to vector<1x1x16x224xf32>
    tpu.vector_store %arg4[%c3_373, %c0_374, %c192_375, %c0_376], %587 {strides = array<i32>} : memref<8x2x224x224xf32, #tpu.memory_space<vmem>>, vector<1x1x16x224xf32>,
    %588 = vector.extract_strided_slice %5 {offsets = [3, 3328], sizes = [1, 224], strides = [1, 1]} : vector<8x7168xf32> to vector<1x224xf32>
    %589 = vector.shape_cast %588 : vector<1x224xf32> to vector<1x224xf32>
    %590 = vector.broadcast %589 : vector<1x224xf32> to vector<16x224xf32>
    %c3_377 = arith.constant 3 : index
    %c0_378 = arith.constant 0 : index
    %c208_379 = arith.constant 208 : index
    %c0_380 = arith.constant 0 : index
    %591 = vector.load %arg4[%c3_377, %c0_378, %c208_379, %c0_380] : memref<8x2x224x224xf32, #tpu.memory_space<vmem>>, vector<1x1x16x224xf32>
    %592 = vector.shape_cast %591 : vector<1x1x16x224xf32> to vector<16x224xf32>
    %593 = vector.shape_cast %590 : vector<16x224xf32> to vector<1x1x16x224xf32>
    tpu.vector_store %arg4[%c3_377, %c0_378, %c208_379, %c0_380], %593 {strides = array<i32>} : memref<8x2x224x224xf32, #tpu.memory_space<vmem>>, vector<1x1x16x224xf32>,
    %594 = vector.extract_strided_slice %5 {offsets = [3, 3584], sizes = [1, 224], strides = [1, 1]} : vector<8x7168xf32> to vector<1x224xf32>
    %595 = vector.shape_cast %594 : vector<1x224xf32> to vector<1x224xf32>
    %596 = vector.broadcast %595 : vector<1x224xf32> to vector<16x224xf32>
    %c3_381 = arith.constant 3 : index
    %c1_382 = arith.constant 1 : index
    %c0_383 = arith.constant 0 : index
    %c0_384 = arith.constant 0 : index
    %597 = vector.load %arg4[%c3_381, %c1_382, %c0_383, %c0_384] : memref<8x2x224x224xf32, #tpu.memory_space<vmem>>, vector<1x1x16x224xf32>
    %598 = vector.shape_cast %597 : vector<1x1x16x224xf32> to vector<16x224xf32>
    %599 = vector.shape_cast %596 : vector<16x224xf32> to vector<1x1x16x224xf32>
    tpu.vector_store %arg4[%c3_381, %c1_382, %c0_383, %c0_384], %599 {strides = array<i32>} : memref<8x2x224x224xf32, #tpu.memory_space<vmem>>, vector<1x1x16x224xf32>,
    %600 = vector.extract_strided_slice %5 {offsets = [3, 3840], sizes = [1, 224], strides = [1, 1]} : vector<8x7168xf32> to vector<1x224xf32>
    %601 = vector.shape_cast %600 : vector<1x224xf32> to vector<1x224xf32>
    %602 = vector.broadcast %601 : vector<1x224xf32> to vector<16x224xf32>
    %c3_385 = arith.constant 3 : index
    %c1_386 = arith.constant 1 : index
    %c16_387 = arith.constant 16 : index
    %c0_388 = arith.constant 0 : index
    %603 = vector.load %arg4[%c3_385, %c1_386, %c16_387, %c0_388] : memref<8x2x224x224xf32, #tpu.memory_space<vmem>>, vector<1x1x16x224xf32>
    %604 = vector.shape_cast %603 : vector<1x1x16x224xf32> to vector<16x224xf32>
    %605 = vector.shape_cast %602 : vector<16x224xf32> to vector<1x1x16x224xf32>
    tpu.vector_store %arg4[%c3_385, %c1_386, %c16_387, %c0_388], %605 {strides = array<i32>} : memref<8x2x224x224xf32, #tpu.memory_space<vmem>>, vector<1x1x16x224xf32>,
    %606 = vector.extract_strided_slice %5 {offsets = [3, 4096], sizes = [1, 224], strides = [1, 1]} : vector<8x7168xf32> to vector<1x224xf32>
    %607 = vector.shape_cast %606 : vector<1x224xf32> to vector<1x224xf32>
    %608 = vector.broadcast %607 : vector<1x224xf32> to vector<16x224xf32>
    %c3_389 = arith.constant 3 : index
    %c1_390 = arith.constant 1 : index
    %c32_391 = arith.constant 32 : index
    %c0_392 = arith.constant 0 : index
    %609 = vector.load %arg4[%c3_389, %c1_390, %c32_391, %c0_392] : memref<8x2x224x224xf32, #tpu.memory_space<vmem>>, vector<1x1x16x224xf32>
    %610 = vector.shape_cast %609 : vector<1x1x16x224xf32> to vector<16x224xf32>
    %611 = vector.shape_cast %608 : vector<16x224xf32> to vector<1x1x16x224xf32>
    tpu.vector_store %arg4[%c3_389, %c1_390, %c32_391, %c0_392], %611 {strides = array<i32>} : memref<8x2x224x224xf32, #tpu.memory_space<vmem>>, vector<1x1x16x224xf32>,
    %612 = vector.extract_strided_slice %5 {offsets = [3, 4352], sizes = [1, 224], strides = [1, 1]} : vector<8x7168xf32> to vector<1x224xf32>
    %613 = vector.shape_cast %612 : vector<1x224xf32> to vector<1x224xf32>
    %614 = vector.broadcast %613 : vector<1x224xf32> to vector<16x224xf32>
    %c3_393 = arith.constant 3 : index
    %c1_394 = arith.constant 1 : index
    %c48_395 = arith.constant 48 : index
    %c0_396 = arith.constant 0 : index
    %615 = vector.load %arg4[%c3_393, %c1_394, %c48_395, %c0_396] : memref<8x2x224x224xf32, #tpu.memory_space<vmem>>, vector<1x1x16x224xf32>
    %616 = vector.shape_cast %615 : vector<1x1x16x224xf32> to vector<16x224xf32>
    %617 = vector.shape_cast %614 : vector<16x224xf32> to vector<1x1x16x224xf32>
    tpu.vector_store %arg4[%c3_393, %c1_394, %c48_395, %c0_396], %617 {strides = array<i32>} : memref<8x2x224x224xf32, #tpu.memory_space<vmem>>, vector<1x1x16x224xf32>,
    %618 = vector.extract_strided_slice %5 {offsets = [3, 4608], sizes = [1, 224], strides = [1, 1]} : vector<8x7168xf32> to vector<1x224xf32>
    %619 = vector.shape_cast %618 : vector<1x224xf32> to vector<1x224xf32>
    %620 = vector.broadcast %619 : vector<1x224xf32> to vector<16x224xf32>
    %c3_397 = arith.constant 3 : index
    %c1_398 = arith.constant 1 : index
    %c64_399 = arith.constant 64 : index
    %c0_400 = arith.constant 0 : index
    %621 = vector.load %arg4[%c3_397, %c1_398, %c64_399, %c0_400] : memref<8x2x224x224xf32, #tpu.memory_space<vmem>>, vector<1x1x16x224xf32>
    %622 = vector.shape_cast %621 : vector<1x1x16x224xf32> to vector<16x224xf32>
    %623 = vector.shape_cast %620 : vector<16x224xf32> to vector<1x1x16x224xf32>
    tpu.vector_store %arg4[%c3_397, %c1_398, %c64_399, %c0_400], %623 {strides = array<i32>} : memref<8x2x224x224xf32, #tpu.memory_space<vmem>>, vector<1x1x16x224xf32>,
    %624 = vector.extract_strided_slice %5 {offsets = [3, 4864], sizes = [1, 224], strides = [1, 1]} : vector<8x7168xf32> to vector<1x224xf32>
    %625 = vector.shape_cast %624 : vector<1x224xf32> to vector<1x224xf32>
    %626 = vector.broadcast %625 : vector<1x224xf32> to vector<16x224xf32>
    %c3_401 = arith.constant 3 : index
    %c1_402 = arith.constant 1 : index
    %c80_403 = arith.constant 80 : index
    %c0_404 = arith.constant 0 : index
    %627 = vector.load %arg4[%c3_401, %c1_402, %c80_403, %c0_404] : memref<8x2x224x224xf32, #tpu.memory_space<vmem>>, vector<1x1x16x224xf32>
    %628 = vector.shape_cast %627 : vector<1x1x16x224xf32> to vector<16x224xf32>
    %629 = vector.shape_cast %626 : vector<16x224xf32> to vector<1x1x16x224xf32>
    tpu.vector_store %arg4[%c3_401, %c1_402, %c80_403, %c0_404], %629 {strides = array<i32>} : memref<8x2x224x224xf32, #tpu.memory_space<vmem>>, vector<1x1x16x224xf32>,
    %630 = vector.extract_strided_slice %5 {offsets = [3, 5120], sizes = [1, 224], strides = [1, 1]} : vector<8x7168xf32> to vector<1x224xf32>
    %631 = vector.shape_cast %630 : vector<1x224xf32> to vector<1x224xf32>
    %632 = vector.broadcast %631 : vector<1x224xf32> to vector<16x224xf32>
    %c3_405 = arith.constant 3 : index
    %c1_406 = arith.constant 1 : index
    %c96_407 = arith.constant 96 : index
    %c0_408 = arith.constant 0 : index
    %633 = vector.load %arg4[%c3_405, %c1_406, %c96_407, %c0_408] : memref<8x2x224x224xf32, #tpu.memory_space<vmem>>, vector<1x1x16x224xf32>
    %634 = vector.shape_cast %633 : vector<1x1x16x224xf32> to vector<16x224xf32>
    %635 = vector.shape_cast %632 : vector<16x224xf32> to vector<1x1x16x224xf32>
    tpu.vector_store %arg4[%c3_405, %c1_406, %c96_407, %c0_408], %635 {strides = array<i32>} : memref<8x2x224x224xf32, #tpu.memory_space<vmem>>, vector<1x1x16x224xf32>,
    %636 = vector.extract_strided_slice %5 {offsets = [3, 5376], sizes = [1, 224], strides = [1, 1]} : vector<8x7168xf32> to vector<1x224xf32>
    %637 = vector.shape_cast %636 : vector<1x224xf32> to vector<1x224xf32>
    %638 = vector.broadcast %637 : vector<1x224xf32> to vector<16x224xf32>
    %c3_409 = arith.constant 3 : index
    %c1_410 = arith.constant 1 : index
    %c112_411 = arith.constant 112 : index
    %c0_412 = arith.constant 0 : index
    %639 = vector.load %arg4[%c3_409, %c1_410, %c112_411, %c0_412] : memref<8x2x224x224xf32, #tpu.memory_space<vmem>>, vector<1x1x16x224xf32>
    %640 = vector.shape_cast %639 : vector<1x1x16x224xf32> to vector<16x224xf32>
    %641 = vector.shape_cast %638 : vector<16x224xf32> to vector<1x1x16x224xf32>
    tpu.vector_store %arg4[%c3_409, %c1_410, %c112_411, %c0_412], %641 {strides = array<i32>} : memref<8x2x224x224xf32, #tpu.memory_space<vmem>>, vector<1x1x16x224xf32>,
    %642 = vector.extract_strided_slice %5 {offsets = [3, 5632], sizes = [1, 224], strides = [1, 1]} : vector<8x7168xf32> to vector<1x224xf32>
    %643 = vector.shape_cast %642 : vector<1x224xf32> to vector<1x224xf32>
    %644 = vector.broadcast %643 : vector<1x224xf32> to vector<16x224xf32>
    %c3_413 = arith.constant 3 : index
    %c1_414 = arith.constant 1 : index
    %c128_415 = arith.constant 128 : index
    %c0_416 = arith.constant 0 : index
    %645 = vector.load %arg4[%c3_413, %c1_414, %c128_415, %c0_416] : memref<8x2x224x224xf32, #tpu.memory_space<vmem>>, vector<1x1x16x224xf32>
    %646 = vector.shape_cast %645 : vector<1x1x16x224xf32> to vector<16x224xf32>
    %647 = vector.shape_cast %644 : vector<16x224xf32> to vector<1x1x16x224xf32>
    tpu.vector_store %arg4[%c3_413, %c1_414, %c128_415, %c0_416], %647 {strides = array<i32>} : memref<8x2x224x224xf32, #tpu.memory_space<vmem>>, vector<1x1x16x224xf32>,
    %648 = vector.extract_strided_slice %5 {offsets = [3, 5888], sizes = [1, 224], strides = [1, 1]} : vector<8x7168xf32> to vector<1x224xf32>
    %649 = vector.shape_cast %648 : vector<1x224xf32> to vector<1x224xf32>
    %650 = vector.broadcast %649 : vector<1x224xf32> to vector<16x224xf32>
    %c3_417 = arith.constant 3 : index
    %c1_418 = arith.constant 1 : index
    %c144_419 = arith.constant 144 : index
    %c0_420 = arith.constant 0 : index
    %651 = vector.load %arg4[%c3_417, %c1_418, %c144_419, %c0_420] : memref<8x2x224x224xf32, #tpu.memory_space<vmem>>, vector<1x1x16x224xf32>
    %652 = vector.shape_cast %651 : vector<1x1x16x224xf32> to vector<16x224xf32>
    %653 = vector.shape_cast %650 : vector<16x224xf32> to vector<1x1x16x224xf32>
    tpu.vector_store %arg4[%c3_417, %c1_418, %c144_419, %c0_420], %653 {strides = array<i32>} : memref<8x2x224x224xf32, #tpu.memory_space<vmem>>, vector<1x1x16x224xf32>,
    %654 = vector.extract_strided_slice %5 {offsets = [3, 6144], sizes = [1, 224], strides = [1, 1]} : vector<8x7168xf32> to vector<1x224xf32>
    %655 = vector.shape_cast %654 : vector<1x224xf32> to vector<1x224xf32>
    %656 = vector.broadcast %655 : vector<1x224xf32> to vector<16x224xf32>
    %c3_421 = arith.constant 3 : index
    %c1_422 = arith.constant 1 : index
    %c160_423 = arith.constant 160 : index
    %c0_424 = arith.constant 0 : index
    %657 = vector.load %arg4[%c3_421, %c1_422, %c160_423, %c0_424] : memref<8x2x224x224xf32, #tpu.memory_space<vmem>>, vector<1x1x16x224xf32>
    %658 = vector.shape_cast %657 : vector<1x1x16x224xf32> to vector<16x224xf32>
    %659 = vector.shape_cast %656 : vector<16x224xf32> to vector<1x1x16x224xf32>
    tpu.vector_store %arg4[%c3_421, %c1_422, %c160_423, %c0_424], %659 {strides = array<i32>} : memref<8x2x224x224xf32, #tpu.memory_space<vmem>>, vector<1x1x16x224xf32>,
    %660 = vector.extract_strided_slice %5 {offsets = [3, 6400], sizes = [1, 224], strides = [1, 1]} : vector<8x7168xf32> to vector<1x224xf32>
    %661 = vector.shape_cast %660 : vector<1x224xf32> to vector<1x224xf32>
    %662 = vector.broadcast %661 : vector<1x224xf32> to vector<16x224xf32>
    %c3_425 = arith.constant 3 : index
    %c1_426 = arith.constant 1 : index
    %c176_427 = arith.constant 176 : index
    %c0_428 = arith.constant 0 : index
    %663 = vector.load %arg4[%c3_425, %c1_426, %c176_427, %c0_428] : memref<8x2x224x224xf32, #tpu.memory_space<vmem>>, vector<1x1x16x224xf32>
    %664 = vector.shape_cast %663 : vector<1x1x16x224xf32> to vector<16x224xf32>
    %665 = vector.shape_cast %662 : vector<16x224xf32> to vector<1x1x16x224xf32>
    tpu.vector_store %arg4[%c3_425, %c1_426, %c176_427, %c0_428], %665 {strides = array<i32>} : memref<8x2x224x224xf32, #tpu.memory_space<vmem>>, vector<1x1x16x224xf32>,
    %666 = vector.extract_strided_slice %5 {offsets = [3, 6656], sizes = [1, 224], strides = [1, 1]} : vector<8x7168xf32> to vector<1x224xf32>
    %667 = vector.shape_cast %666 : vector<1x224xf32> to vector<1x224xf32>
    %668 = vector.broadcast %667 : vector<1x224xf32> to vector<16x224xf32>
    %c3_429 = arith.constant 3 : index
    %c1_430 = arith.constant 1 : index
    %c192_431 = arith.constant 192 : index
    %c0_432 = arith.constant 0 : index
    %669 = vector.load %arg4[%c3_429, %c1_430, %c192_431, %c0_432] : memref<8x2x224x224xf32, #tpu.memory_space<vmem>>, vector<1x1x16x224xf32>
    %670 = vector.shape_cast %669 : vector<1x1x16x224xf32> to vector<16x224xf32>
    %671 = vector.shape_cast %668 : vector<16x224xf32> to vector<1x1x16x224xf32>
    tpu.vector_store %arg4[%c3_429, %c1_430, %c192_431, %c0_432], %671 {strides = array<i32>} : memref<8x2x224x224xf32, #tpu.memory_space<vmem>>, vector<1x1x16x224xf32>,
    %672 = vector.extract_strided_slice %5 {offsets = [3, 6912], sizes = [1, 224], strides = [1, 1]} : vector<8x7168xf32> to vector<1x224xf32>
    %673 = vector.shape_cast %672 : vector<1x224xf32> to vector<1x224xf32>
    %674 = vector.broadcast %673 : vector<1x224xf32> to vector<16x224xf32>
    %c3_433 = arith.constant 3 : index
    %c1_434 = arith.constant 1 : index
    %c208_435 = arith.constant 208 : index
    %c0_436 = arith.constant 0 : index
    %675 = vector.load %arg4[%c3_433, %c1_434, %c208_435, %c0_436] : memref<8x2x224x224xf32, #tpu.memory_space<vmem>>, vector<1x1x16x224xf32>
    %676 = vector.shape_cast %675 : vector<1x1x16x224xf32> to vector<16x224xf32>
    %677 = vector.shape_cast %674 : vector<16x224xf32> to vector<1x1x16x224xf32>
    tpu.vector_store %arg4[%c3_433, %c1_434, %c208_435, %c0_436], %677 {strides = array<i32>} : memref<8x2x224x224xf32, #tpu.memory_space<vmem>>, vector<1x1x16x224xf32>,
    %678 = vector.extract_strided_slice %5 {offsets = [4, 0], sizes = [1, 224], strides = [1, 1]} : vector<8x7168xf32> to vector<1x224xf32>
    %679 = vector.shape_cast %678 : vector<1x224xf32> to vector<1x224xf32>
    %680 = vector.broadcast %679 : vector<1x224xf32> to vector<16x224xf32>
    %c4 = arith.constant 4 : index
    %c0_437 = arith.constant 0 : index
    %c0_438 = arith.constant 0 : index
    %c0_439 = arith.constant 0 : index
    %681 = vector.load %arg4[%c4, %c0_437, %c0_438, %c0_439] : memref<8x2x224x224xf32, #tpu.memory_space<vmem>>, vector<1x1x16x224xf32>
    %682 = vector.shape_cast %681 : vector<1x1x16x224xf32> to vector<16x224xf32>
    %683 = vector.shape_cast %680 : vector<16x224xf32> to vector<1x1x16x224xf32>
    tpu.vector_store %arg4[%c4, %c0_437, %c0_438, %c0_439], %683 {strides = array<i32>} : memref<8x2x224x224xf32, #tpu.memory_space<vmem>>, vector<1x1x16x224xf32>,
    %684 = vector.extract_strided_slice %5 {offsets = [4, 256], sizes = [1, 224], strides = [1, 1]} : vector<8x7168xf32> to vector<1x224xf32>
    %685 = vector.shape_cast %684 : vector<1x224xf32> to vector<1x224xf32>
    %686 = vector.broadcast %685 : vector<1x224xf32> to vector<16x224xf32>
    %c4_440 = arith.constant 4 : index
    %c0_441 = arith.constant 0 : index
    %c16_442 = arith.constant 16 : index
    %c0_443 = arith.constant 0 : index
    %687 = vector.load %arg4[%c4_440, %c0_441, %c16_442, %c0_443] : memref<8x2x224x224xf32, #tpu.memory_space<vmem>>, vector<1x1x16x224xf32>
    %688 = vector.shape_cast %687 : vector<1x1x16x224xf32> to vector<16x224xf32>
    %689 = vector.shape_cast %686 : vector<16x224xf32> to vector<1x1x16x224xf32>
    tpu.vector_store %arg4[%c4_440, %c0_441, %c16_442, %c0_443], %689 {strides = array<i32>} : memref<8x2x224x224xf32, #tpu.memory_space<vmem>>, vector<1x1x16x224xf32>,
    %690 = vector.extract_strided_slice %5 {offsets = [4, 512], sizes = [1, 224], strides = [1, 1]} : vector<8x7168xf32> to vector<1x224xf32>
    %691 = vector.shape_cast %690 : vector<1x224xf32> to vector<1x224xf32>
    %692 = vector.broadcast %691 : vector<1x224xf32> to vector<16x224xf32>
    %c4_444 = arith.constant 4 : index
    %c0_445 = arith.constant 0 : index
    %c32_446 = arith.constant 32 : index
    %c0_447 = arith.constant 0 : index
    %693 = vector.load %arg4[%c4_444, %c0_445, %c32_446, %c0_447] : memref<8x2x224x224xf32, #tpu.memory_space<vmem>>, vector<1x1x16x224xf32>
    %694 = vector.shape_cast %693 : vector<1x1x16x224xf32> to vector<16x224xf32>
    %695 = vector.shape_cast %692 : vector<16x224xf32> to vector<1x1x16x224xf32>
    tpu.vector_store %arg4[%c4_444, %c0_445, %c32_446, %c0_447], %695 {strides = array<i32>} : memref<8x2x224x224xf32, #tpu.memory_space<vmem>>, vector<1x1x16x224xf32>,
    %696 = vector.extract_strided_slice %5 {offsets = [4, 768], sizes = [1, 224], strides = [1, 1]} : vector<8x7168xf32> to vector<1x224xf32>
    %697 = vector.shape_cast %696 : vector<1x224xf32> to vector<1x224xf32>
    %698 = vector.broadcast %697 : vector<1x224xf32> to vector<16x224xf32>
    %c4_448 = arith.constant 4 : index
    %c0_449 = arith.constant 0 : index
    %c48_450 = arith.constant 48 : index
    %c0_451 = arith.constant 0 : index
    %699 = vector.load %arg4[%c4_448, %c0_449, %c48_450, %c0_451] : memref<8x2x224x224xf32, #tpu.memory_space<vmem>>, vector<1x1x16x224xf32>
    %700 = vector.shape_cast %699 : vector<1x1x16x224xf32> to vector<16x224xf32>
    %701 = vector.shape_cast %698 : vector<16x224xf32> to vector<1x1x16x224xf32>
    tpu.vector_store %arg4[%c4_448, %c0_449, %c48_450, %c0_451], %701 {strides = array<i32>} : memref<8x2x224x224xf32, #tpu.memory_space<vmem>>, vector<1x1x16x224xf32>,
    %702 = vector.extract_strided_slice %5 {offsets = [4, 1024], sizes = [1, 224], strides = [1, 1]} : vector<8x7168xf32> to vector<1x224xf32>
    %703 = vector.shape_cast %702 : vector<1x224xf32> to vector<1x224xf32>
    %704 = vector.broadcast %703 : vector<1x224xf32> to vector<16x224xf32>
    %c4_452 = arith.constant 4 : index
    %c0_453 = arith.constant 0 : index
    %c64_454 = arith.constant 64 : index
    %c0_455 = arith.constant 0 : index
    %705 = vector.load %arg4[%c4_452, %c0_453, %c64_454, %c0_455] : memref<8x2x224x224xf32, #tpu.memory_space<vmem>>, vector<1x1x16x224xf32>
    %706 = vector.shape_cast %705 : vector<1x1x16x224xf32> to vector<16x224xf32>
    %707 = vector.shape_cast %704 : vector<16x224xf32> to vector<1x1x16x224xf32>
    tpu.vector_store %arg4[%c4_452, %c0_453, %c64_454, %c0_455], %707 {strides = array<i32>} : memref<8x2x224x224xf32, #tpu.memory_space<vmem>>, vector<1x1x16x224xf32>,
    %708 = vector.extract_strided_slice %5 {offsets = [4, 1280], sizes = [1, 224], strides = [1, 1]} : vector<8x7168xf32> to vector<1x224xf32>
    %709 = vector.shape_cast %708 : vector<1x224xf32> to vector<1x224xf32>
    %710 = vector.broadcast %709 : vector<1x224xf32> to vector<16x224xf32>
    %c4_456 = arith.constant 4 : index
    %c0_457 = arith.constant 0 : index
    %c80_458 = arith.constant 80 : index
    %c0_459 = arith.constant 0 : index
    %711 = vector.load %arg4[%c4_456, %c0_457, %c80_458, %c0_459] : memref<8x2x224x224xf32, #tpu.memory_space<vmem>>, vector<1x1x16x224xf32>
    %712 = vector.shape_cast %711 : vector<1x1x16x224xf32> to vector<16x224xf32>
    %713 = vector.shape_cast %710 : vector<16x224xf32> to vector<1x1x16x224xf32>
    tpu.vector_store %arg4[%c4_456, %c0_457, %c80_458, %c0_459], %713 {strides = array<i32>} : memref<8x2x224x224xf32, #tpu.memory_space<vmem>>, vector<1x1x16x224xf32>,
    %714 = vector.extract_strided_slice %5 {offsets = [4, 1536], sizes = [1, 224], strides = [1, 1]} : vector<8x7168xf32> to vector<1x224xf32>
    %715 = vector.shape_cast %714 : vector<1x224xf32> to vector<1x224xf32>
    %716 = vector.broadcast %715 : vector<1x224xf32> to vector<16x224xf32>
    %c4_460 = arith.constant 4 : index
    %c0_461 = arith.constant 0 : index
    %c96_462 = arith.constant 96 : index
    %c0_463 = arith.constant 0 : index
    %717 = vector.load %arg4[%c4_460, %c0_461, %c96_462, %c0_463] : memref<8x2x224x224xf32, #tpu.memory_space<vmem>>, vector<1x1x16x224xf32>
    %718 = vector.shape_cast %717 : vector<1x1x16x224xf32> to vector<16x224xf32>
    %719 = vector.shape_cast %716 : vector<16x224xf32> to vector<1x1x16x224xf32>
    tpu.vector_store %arg4[%c4_460, %c0_461, %c96_462, %c0_463], %719 {strides = array<i32>} : memref<8x2x224x224xf32, #tpu.memory_space<vmem>>, vector<1x1x16x224xf32>,
    %720 = vector.extract_strided_slice %5 {offsets = [4, 1792], sizes = [1, 224], strides = [1, 1]} : vector<8x7168xf32> to vector<1x224xf32>
    %721 = vector.shape_cast %720 : vector<1x224xf32> to vector<1x224xf32>
    %722 = vector.broadcast %721 : vector<1x224xf32> to vector<16x224xf32>
    %c4_464 = arith.constant 4 : index
    %c0_465 = arith.constant 0 : index
    %c112_466 = arith.constant 112 : index
    %c0_467 = arith.constant 0 : index
    %723 = vector.load %arg4[%c4_464, %c0_465, %c112_466, %c0_467] : memref<8x2x224x224xf32, #tpu.memory_space<vmem>>, vector<1x1x16x224xf32>
    %724 = vector.shape_cast %723 : vector<1x1x16x224xf32> to vector<16x224xf32>
    %725 = vector.shape_cast %722 : vector<16x224xf32> to vector<1x1x16x224xf32>
    tpu.vector_store %arg4[%c4_464, %c0_465, %c112_466, %c0_467], %725 {strides = array<i32>} : memref<8x2x224x224xf32, #tpu.memory_space<vmem>>, vector<1x1x16x224xf32>,
    %726 = vector.extract_strided_slice %5 {offsets = [4, 2048], sizes = [1, 224], strides = [1, 1]} : vector<8x7168xf32> to vector<1x224xf32>
    %727 = vector.shape_cast %726 : vector<1x224xf32> to vector<1x224xf32>
    %728 = vector.broadcast %727 : vector<1x224xf32> to vector<16x224xf32>
    %c4_468 = arith.constant 4 : index
    %c0_469 = arith.constant 0 : index
    %c128_470 = arith.constant 128 : index
    %c0_471 = arith.constant 0 : index
    %729 = vector.load %arg4[%c4_468, %c0_469, %c128_470, %c0_471] : memref<8x2x224x224xf32, #tpu.memory_space<vmem>>, vector<1x1x16x224xf32>
    %730 = vector.shape_cast %729 : vector<1x1x16x224xf32> to vector<16x224xf32>
    %731 = vector.shape_cast %728 : vector<16x224xf32> to vector<1x1x16x224xf32>
    tpu.vector_store %arg4[%c4_468, %c0_469, %c128_470, %c0_471], %731 {strides = array<i32>} : memref<8x2x224x224xf32, #tpu.memory_space<vmem>>, vector<1x1x16x224xf32>,
    %732 = vector.extract_strided_slice %5 {offsets = [4, 2304], sizes = [1, 224], strides = [1, 1]} : vector<8x7168xf32> to vector<1x224xf32>
    %733 = vector.shape_cast %732 : vector<1x224xf32> to vector<1x224xf32>
    %734 = vector.broadcast %733 : vector<1x224xf32> to vector<16x224xf32>
    %c4_472 = arith.constant 4 : index
    %c0_473 = arith.constant 0 : index
    %c144_474 = arith.constant 144 : index
    %c0_475 = arith.constant 0 : index
    %735 = vector.load %arg4[%c4_472, %c0_473, %c144_474, %c0_475] : memref<8x2x224x224xf32, #tpu.memory_space<vmem>>, vector<1x1x16x224xf32>
    %736 = vector.shape_cast %735 : vector<1x1x16x224xf32> to vector<16x224xf32>
    %737 = vector.shape_cast %734 : vector<16x224xf32> to vector<1x1x16x224xf32>
    tpu.vector_store %arg4[%c4_472, %c0_473, %c144_474, %c0_475], %737 {strides = array<i32>} : memref<8x2x224x224xf32, #tpu.memory_space<vmem>>, vector<1x1x16x224xf32>,
    %738 = vector.extract_strided_slice %5 {offsets = [4, 2560], sizes = [1, 224], strides = [1, 1]} : vector<8x7168xf32> to vector<1x224xf32>
    %739 = vector.shape_cast %738 : vector<1x224xf32> to vector<1x224xf32>
    %740 = vector.broadcast %739 : vector<1x224xf32> to vector<16x224xf32>
    %c4_476 = arith.constant 4 : index
    %c0_477 = arith.constant 0 : index
    %c160_478 = arith.constant 160 : index
    %c0_479 = arith.constant 0 : index
    %741 = vector.load %arg4[%c4_476, %c0_477, %c160_478, %c0_479] : memref<8x2x224x224xf32, #tpu.memory_space<vmem>>, vector<1x1x16x224xf32>
    %742 = vector.shape_cast %741 : vector<1x1x16x224xf32> to vector<16x224xf32>
    %743 = vector.shape_cast %740 : vector<16x224xf32> to vector<1x1x16x224xf32>
    tpu.vector_store %arg4[%c4_476, %c0_477, %c160_478, %c0_479], %743 {strides = array<i32>} : memref<8x2x224x224xf32, #tpu.memory_space<vmem>>, vector<1x1x16x224xf32>,
    %744 = vector.extract_strided_slice %5 {offsets = [4, 2816], sizes = [1, 224], strides = [1, 1]} : vector<8x7168xf32> to vector<1x224xf32>
    %745 = vector.shape_cast %744 : vector<1x224xf32> to vector<1x224xf32>
    %746 = vector.broadcast %745 : vector<1x224xf32> to vector<16x224xf32>
    %c4_480 = arith.constant 4 : index
    %c0_481 = arith.constant 0 : index
    %c176_482 = arith.constant 176 : index
    %c0_483 = arith.constant 0 : index
    %747 = vector.load %arg4[%c4_480, %c0_481, %c176_482, %c0_483] : memref<8x2x224x224xf32, #tpu.memory_space<vmem>>, vector<1x1x16x224xf32>
    %748 = vector.shape_cast %747 : vector<1x1x16x224xf32> to vector<16x224xf32>
    %749 = vector.shape_cast %746 : vector<16x224xf32> to vector<1x1x16x224xf32>
    tpu.vector_store %arg4[%c4_480, %c0_481, %c176_482, %c0_483], %749 {strides = array<i32>} : memref<8x2x224x224xf32, #tpu.memory_space<vmem>>, vector<1x1x16x224xf32>,
    %750 = vector.extract_strided_slice %5 {offsets = [4, 3072], sizes = [1, 224], strides = [1, 1]} : vector<8x7168xf32> to vector<1x224xf32>
    %751 = vector.shape_cast %750 : vector<1x224xf32> to vector<1x224xf32>
    %752 = vector.broadcast %751 : vector<1x224xf32> to vector<16x224xf32>
    %c4_484 = arith.constant 4 : index
    %c0_485 = arith.constant 0 : index
    %c192_486 = arith.constant 192 : index
    %c0_487 = arith.constant 0 : index
    %753 = vector.load %arg4[%c4_484, %c0_485, %c192_486, %c0_487] : memref<8x2x224x224xf32, #tpu.memory_space<vmem>>, vector<1x1x16x224xf32>
    %754 = vector.shape_cast %753 : vector<1x1x16x224xf32> to vector<16x224xf32>
    %755 = vector.shape_cast %752 : vector<16x224xf32> to vector<1x1x16x224xf32>
    tpu.vector_store %arg4[%c4_484, %c0_485, %c192_486, %c0_487], %755 {strides = array<i32>} : memref<8x2x224x224xf32, #tpu.memory_space<vmem>>, vector<1x1x16x224xf32>,
    %756 = vector.extract_strided_slice %5 {offsets = [4, 3328], sizes = [1, 224], strides = [1, 1]} : vector<8x7168xf32> to vector<1x224xf32>
    %757 = vector.shape_cast %756 : vector<1x224xf32> to vector<1x224xf32>
    %758 = vector.broadcast %757 : vector<1x224xf32> to vector<16x224xf32>
    %c4_488 = arith.constant 4 : index
    %c0_489 = arith.constant 0 : index
    %c208_490 = arith.constant 208 : index
    %c0_491 = arith.constant 0 : index
    %759 = vector.load %arg4[%c4_488, %c0_489, %c208_490, %c0_491] : memref<8x2x224x224xf32, #tpu.memory_space<vmem>>, vector<1x1x16x224xf32>
    %760 = vector.shape_cast %759 : vector<1x1x16x224xf32> to vector<16x224xf32>
    %761 = vector.shape_cast %758 : vector<16x224xf32> to vector<1x1x16x224xf32>
    tpu.vector_store %arg4[%c4_488, %c0_489, %c208_490, %c0_491], %761 {strides = array<i32>} : memref<8x2x224x224xf32, #tpu.memory_space<vmem>>, vector<1x1x16x224xf32>,
    %762 = vector.extract_strided_slice %5 {offsets = [4, 3584], sizes = [1, 224], strides = [1, 1]} : vector<8x7168xf32> to vector<1x224xf32>
    %763 = vector.shape_cast %762 : vector<1x224xf32> to vector<1x224xf32>
    %764 = vector.broadcast %763 : vector<1x224xf32> to vector<16x224xf32>
    %c4_492 = arith.constant 4 : index
    %c1_493 = arith.constant 1 : index
    %c0_494 = arith.constant 0 : index
    %c0_495 = arith.constant 0 : index
    %765 = vector.load %arg4[%c4_492, %c1_493, %c0_494, %c0_495] : memref<8x2x224x224xf32, #tpu.memory_space<vmem>>, vector<1x1x16x224xf32>
    %766 = vector.shape_cast %765 : vector<1x1x16x224xf32> to vector<16x224xf32>
    %767 = vector.shape_cast %764 : vector<16x224xf32> to vector<1x1x16x224xf32>
    tpu.vector_store %arg4[%c4_492, %c1_493, %c0_494, %c0_495], %767 {strides = array<i32>} : memref<8x2x224x224xf32, #tpu.memory_space<vmem>>, vector<1x1x16x224xf32>,
    %768 = vector.extract_strided_slice %5 {offsets = [4, 3840], sizes = [1, 224], strides = [1, 1]} : vector<8x7168xf32> to vector<1x224xf32>
    %769 = vector.shape_cast %768 : vector<1x224xf32> to vector<1x224xf32>
    %770 = vector.broadcast %769 : vector<1x224xf32> to vector<16x224xf32>
    %c4_496 = arith.constant 4 : index
    %c1_497 = arith.constant 1 : index
    %c16_498 = arith.constant 16 : index
    %c0_499 = arith.constant 0 : index
    %771 = vector.load %arg4[%c4_496, %c1_497, %c16_498, %c0_499] : memref<8x2x224x224xf32, #tpu.memory_space<vmem>>, vector<1x1x16x224xf32>
    %772 = vector.shape_cast %771 : vector<1x1x16x224xf32> to vector<16x224xf32>
    %773 = vector.shape_cast %770 : vector<16x224xf32> to vector<1x1x16x224xf32>
    tpu.vector_store %arg4[%c4_496, %c1_497, %c16_498, %c0_499], %773 {strides = array<i32>} : memref<8x2x224x224xf32, #tpu.memory_space<vmem>>, vector<1x1x16x224xf32>,
    %774 = vector.extract_strided_slice %5 {offsets = [4, 4096], sizes = [1, 224], strides = [1, 1]} : vector<8x7168xf32> to vector<1x224xf32>
    %775 = vector.shape_cast %774 : vector<1x224xf32> to vector<1x224xf32>
    %776 = vector.broadcast %775 : vector<1x224xf32> to vector<16x224xf32>
    %c4_500 = arith.constant 4 : index
    %c1_501 = arith.constant 1 : index
    %c32_502 = arith.constant 32 : index
    %c0_503 = arith.constant 0 : index
    %777 = vector.load %arg4[%c4_500, %c1_501, %c32_502, %c0_503] : memref<8x2x224x224xf32, #tpu.memory_space<vmem>>, vector<1x1x16x224xf32>
    %778 = vector.shape_cast %777 : vector<1x1x16x224xf32> to vector<16x224xf32>
    %779 = vector.shape_cast %776 : vector<16x224xf32> to vector<1x1x16x224xf32>
    tpu.vector_store %arg4[%c4_500, %c1_501, %c32_502, %c0_503], %779 {strides = array<i32>} : memref<8x2x224x224xf32, #tpu.memory_space<vmem>>, vector<1x1x16x224xf32>,
    %780 = vector.extract_strided_slice %5 {offsets = [4, 4352], sizes = [1, 224], strides = [1, 1]} : vector<8x7168xf32> to vector<1x224xf32>
    %781 = vector.shape_cast %780 : vector<1x224xf32> to vector<1x224xf32>
    %782 = vector.broadcast %781 : vector<1x224xf32> to vector<16x224xf32>
    %c4_504 = arith.constant 4 : index
    %c1_505 = arith.constant 1 : index
    %c48_506 = arith.constant 48 : index
    %c0_507 = arith.constant 0 : index
    %783 = vector.load %arg4[%c4_504, %c1_505, %c48_506, %c0_507] : memref<8x2x224x224xf32, #tpu.memory_space<vmem>>, vector<1x1x16x224xf32>
    %784 = vector.shape_cast %783 : vector<1x1x16x224xf32> to vector<16x224xf32>
    %785 = vector.shape_cast %782 : vector<16x224xf32> to vector<1x1x16x224xf32>
    tpu.vector_store %arg4[%c4_504, %c1_505, %c48_506, %c0_507], %785 {strides = array<i32>} : memref<8x2x224x224xf32, #tpu.memory_space<vmem>>, vector<1x1x16x224xf32>,
    %786 = vector.extract_strided_slice %5 {offsets = [4, 4608], sizes = [1, 224], strides = [1, 1]} : vector<8x7168xf32> to vector<1x224xf32>
    %787 = vector.shape_cast %786 : vector<1x224xf32> to vector<1x224xf32>
    %788 = vector.broadcast %787 : vector<1x224xf32> to vector<16x224xf32>
    %c4_508 = arith.constant 4 : index
    %c1_509 = arith.constant 1 : index
    %c64_510 = arith.constant 64 : index
    %c0_511 = arith.constant 0 : index
    %789 = vector.load %arg4[%c4_508, %c1_509, %c64_510, %c0_511] : memref<8x2x224x224xf32, #tpu.memory_space<vmem>>, vector<1x1x16x224xf32>
    %790 = vector.shape_cast %789 : vector<1x1x16x224xf32> to vector<16x224xf32>
    %791 = vector.shape_cast %788 : vector<16x224xf32> to vector<1x1x16x224xf32>
    tpu.vector_store %arg4[%c4_508, %c1_509, %c64_510, %c0_511], %791 {strides = array<i32>} : memref<8x2x224x224xf32, #tpu.memory_space<vmem>>, vector<1x1x16x224xf32>,
    %792 = vector.extract_strided_slice %5 {offsets = [4, 4864], sizes = [1, 224], strides = [1, 1]} : vector<8x7168xf32> to vector<1x224xf32>
    %793 = vector.shape_cast %792 : vector<1x224xf32> to vector<1x224xf32>
    %794 = vector.broadcast %793 : vector<1x224xf32> to vector<16x224xf32>
    %c4_512 = arith.constant 4 : index
    %c1_513 = arith.constant 1 : index
    %c80_514 = arith.constant 80 : index
    %c0_515 = arith.constant 0 : index
    %795 = vector.load %arg4[%c4_512, %c1_513, %c80_514, %c0_515] : memref<8x2x224x224xf32, #tpu.memory_space<vmem>>, vector<1x1x16x224xf32>
    %796 = vector.shape_cast %795 : vector<1x1x16x224xf32> to vector<16x224xf32>
    %797 = vector.shape_cast %794 : vector<16x224xf32> to vector<1x1x16x224xf32>
    tpu.vector_store %arg4[%c4_512, %c1_513, %c80_514, %c0_515], %797 {strides = array<i32>} : memref<8x2x224x224xf32, #tpu.memory_space<vmem>>, vector<1x1x16x224xf32>,
    %798 = vector.extract_strided_slice %5 {offsets = [4, 5120], sizes = [1, 224], strides = [1, 1]} : vector<8x7168xf32> to vector<1x224xf32>
    %799 = vector.shape_cast %798 : vector<1x224xf32> to vector<1x224xf32>
    %800 = vector.broadcast %799 : vector<1x224xf32> to vector<16x224xf32>
    %c4_516 = arith.constant 4 : index
    %c1_517 = arith.constant 1 : index
    %c96_518 = arith.constant 96 : index
    %c0_519 = arith.constant 0 : index
    %801 = vector.load %arg4[%c4_516, %c1_517, %c96_518, %c0_519] : memref<8x2x224x224xf32, #tpu.memory_space<vmem>>, vector<1x1x16x224xf32>
    %802 = vector.shape_cast %801 : vector<1x1x16x224xf32> to vector<16x224xf32>
    %803 = vector.shape_cast %800 : vector<16x224xf32> to vector<1x1x16x224xf32>
    tpu.vector_store %arg4[%c4_516, %c1_517, %c96_518, %c0_519], %803 {strides = array<i32>} : memref<8x2x224x224xf32, #tpu.memory_space<vmem>>, vector<1x1x16x224xf32>,
    %804 = vector.extract_strided_slice %5 {offsets = [4, 5376], sizes = [1, 224], strides = [1, 1]} : vector<8x7168xf32> to vector<1x224xf32>
    %805 = vector.shape_cast %804 : vector<1x224xf32> to vector<1x224xf32>
    %806 = vector.broadcast %805 : vector<1x224xf32> to vector<16x224xf32>
    %c4_520 = arith.constant 4 : index
    %c1_521 = arith.constant 1 : index
    %c112_522 = arith.constant 112 : index
    %c0_523 = arith.constant 0 : index
    %807 = vector.load %arg4[%c4_520, %c1_521, %c112_522, %c0_523] : memref<8x2x224x224xf32, #tpu.memory_space<vmem>>, vector<1x1x16x224xf32>
    %808 = vector.shape_cast %807 : vector<1x1x16x224xf32> to vector<16x224xf32>
    %809 = vector.shape_cast %806 : vector<16x224xf32> to vector<1x1x16x224xf32>
    tpu.vector_store %arg4[%c4_520, %c1_521, %c112_522, %c0_523], %809 {strides = array<i32>} : memref<8x2x224x224xf32, #tpu.memory_space<vmem>>, vector<1x1x16x224xf32>,
    %810 = vector.extract_strided_slice %5 {offsets = [4, 5632], sizes = [1, 224], strides = [1, 1]} : vector<8x7168xf32> to vector<1x224xf32>
    %811 = vector.shape_cast %810 : vector<1x224xf32> to vector<1x224xf32>
    %812 = vector.broadcast %811 : vector<1x224xf32> to vector<16x224xf32>
    %c4_524 = arith.constant 4 : index
    %c1_525 = arith.constant 1 : index
    %c128_526 = arith.constant 128 : index
    %c0_527 = arith.constant 0 : index
    %813 = vector.load %arg4[%c4_524, %c1_525, %c128_526, %c0_527] : memref<8x2x224x224xf32, #tpu.memory_space<vmem>>, vector<1x1x16x224xf32>
    %814 = vector.shape_cast %813 : vector<1x1x16x224xf32> to vector<16x224xf32>
    %815 = vector.shape_cast %812 : vector<16x224xf32> to vector<1x1x16x224xf32>
    tpu.vector_store %arg4[%c4_524, %c1_525, %c128_526, %c0_527], %815 {strides = array<i32>} : memref<8x2x224x224xf32, #tpu.memory_space<vmem>>, vector<1x1x16x224xf32>,
    %816 = vector.extract_strided_slice %5 {offsets = [4, 5888], sizes = [1, 224], strides = [1, 1]} : vector<8x7168xf32> to vector<1x224xf32>
    %817 = vector.shape_cast %816 : vector<1x224xf32> to vector<1x224xf32>
    %818 = vector.broadcast %817 : vector<1x224xf32> to vector<16x224xf32>
    %c4_528 = arith.constant 4 : index
    %c1_529 = arith.constant 1 : index
    %c144_530 = arith.constant 144 : index
    %c0_531 = arith.constant 0 : index
    %819 = vector.load %arg4[%c4_528, %c1_529, %c144_530, %c0_531] : memref<8x2x224x224xf32, #tpu.memory_space<vmem>>, vector<1x1x16x224xf32>
    %820 = vector.shape_cast %819 : vector<1x1x16x224xf32> to vector<16x224xf32>
    %821 = vector.shape_cast %818 : vector<16x224xf32> to vector<1x1x16x224xf32>
    tpu.vector_store %arg4[%c4_528, %c1_529, %c144_530, %c0_531], %821 {strides = array<i32>} : memref<8x2x224x224xf32, #tpu.memory_space<vmem>>, vector<1x1x16x224xf32>,
    %822 = vector.extract_strided_slice %5 {offsets = [4, 6144], sizes = [1, 224], strides = [1, 1]} : vector<8x7168xf32> to vector<1x224xf32>
    %823 = vector.shape_cast %822 : vector<1x224xf32> to vector<1x224xf32>
    %824 = vector.broadcast %823 : vector<1x224xf32> to vector<16x224xf32>
    %c4_532 = arith.constant 4 : index
    %c1_533 = arith.constant 1 : index
    %c160_534 = arith.constant 160 : index
    %c0_535 = arith.constant 0 : index
    %825 = vector.load %arg4[%c4_532, %c1_533, %c160_534, %c0_535] : memref<8x2x224x224xf32, #tpu.memory_space<vmem>>, vector<1x1x16x224xf32>
    %826 = vector.shape_cast %825 : vector<1x1x16x224xf32> to vector<16x224xf32>
    %827 = vector.shape_cast %824 : vector<16x224xf32> to vector<1x1x16x224xf32>
    tpu.vector_store %arg4[%c4_532, %c1_533, %c160_534, %c0_535], %827 {strides = array<i32>} : memref<8x2x224x224xf32, #tpu.memory_space<vmem>>, vector<1x1x16x224xf32>,
    %828 = vector.extract_strided_slice %5 {offsets = [4, 6400], sizes = [1, 224], strides = [1, 1]} : vector<8x7168xf32> to vector<1x224xf32>
    %829 = vector.shape_cast %828 : vector<1x224xf32> to vector<1x224xf32>
    %830 = vector.broadcast %829 : vector<1x224xf32> to vector<16x224xf32>
    %c4_536 = arith.constant 4 : index
    %c1_537 = arith.constant 1 : index
    %c176_538 = arith.constant 176 : index
    %c0_539 = arith.constant 0 : index
    %831 = vector.load %arg4[%c4_536, %c1_537, %c176_538, %c0_539] : memref<8x2x224x224xf32, #tpu.memory_space<vmem>>, vector<1x1x16x224xf32>
    %832 = vector.shape_cast %831 : vector<1x1x16x224xf32> to vector<16x224xf32>
    %833 = vector.shape_cast %830 : vector<16x224xf32> to vector<1x1x16x224xf32>
    tpu.vector_store %arg4[%c4_536, %c1_537, %c176_538, %c0_539], %833 {strides = array<i32>} : memref<8x2x224x224xf32, #tpu.memory_space<vmem>>, vector<1x1x16x224xf32>,
    %834 = vector.extract_strided_slice %5 {offsets = [4, 6656], sizes = [1, 224], strides = [1, 1]} : vector<8x7168xf32> to vector<1x224xf32>
    %835 = vector.shape_cast %834 : vector<1x224xf32> to vector<1x224xf32>
    %836 = vector.broadcast %835 : vector<1x224xf32> to vector<16x224xf32>
    %c4_540 = arith.constant 4 : index
    %c1_541 = arith.constant 1 : index
    %c192_542 = arith.constant 192 : index
    %c0_543 = arith.constant 0 : index
    %837 = vector.load %arg4[%c4_540, %c1_541, %c192_542, %c0_543] : memref<8x2x224x224xf32, #tpu.memory_space<vmem>>, vector<1x1x16x224xf32>
    %838 = vector.shape_cast %837 : vector<1x1x16x224xf32> to vector<16x224xf32>
    %839 = vector.shape_cast %836 : vector<16x224xf32> to vector<1x1x16x224xf32>
    tpu.vector_store %arg4[%c4_540, %c1_541, %c192_542, %c0_543], %839 {strides = array<i32>} : memref<8x2x224x224xf32, #tpu.memory_space<vmem>>, vector<1x1x16x224xf32>,
    %840 = vector.extract_strided_slice %5 {offsets = [4, 6912], sizes = [1, 224], strides = [1, 1]} : vector<8x7168xf32> to vector<1x224xf32>
    %841 = vector.shape_cast %840 : vector<1x224xf32> to vector<1x224xf32>
    %842 = vector.broadcast %841 : vector<1x224xf32> to vector<16x224xf32>
    %c4_544 = arith.constant 4 : index
    %c1_545 = arith.constant 1 : index
    %c208_546 = arith.constant 208 : index
    %c0_547 = arith.constant 0 : index
    %843 = vector.load %arg4[%c4_544, %c1_545, %c208_546, %c0_547] : memref<8x2x224x224xf32, #tpu.memory_space<vmem>>, vector<1x1x16x224xf32>
    %844 = vector.shape_cast %843 : vector<1x1x16x224xf32> to vector<16x224xf32>
    %845 = vector.shape_cast %842 : vector<16x224xf32> to vector<1x1x16x224xf32>
    tpu.vector_store %arg4[%c4_544, %c1_545, %c208_546, %c0_547], %845 {strides = array<i32>} : memref<8x2x224x224xf32, #tpu.memory_space<vmem>>, vector<1x1x16x224xf32>,
    %846 = vector.extract_strided_slice %5 {offsets = [5, 0], sizes = [1, 224], strides = [1, 1]} : vector<8x7168xf32> to vector<1x224xf32>
    %847 = vector.shape_cast %846 : vector<1x224xf32> to vector<1x224xf32>
    %848 = vector.broadcast %847 : vector<1x224xf32> to vector<16x224xf32>
    %c5 = arith.constant 5 : index
    %c0_548 = arith.constant 0 : index
    %c0_549 = arith.constant 0 : index
    %c0_550 = arith.constant 0 : index
    %849 = vector.load %arg4[%c5, %c0_548, %c0_549, %c0_550] : memref<8x2x224x224xf32, #tpu.memory_space<vmem>>, vector<1x1x16x224xf32>
    %850 = vector.shape_cast %849 : vector<1x1x16x224xf32> to vector<16x224xf32>
    %851 = vector.shape_cast %848 : vector<16x224xf32> to vector<1x1x16x224xf32>
    tpu.vector_store %arg4[%c5, %c0_548, %c0_549, %c0_550], %851 {strides = array<i32>} : memref<8x2x224x224xf32, #tpu.memory_space<vmem>>, vector<1x1x16x224xf32>,
    %852 = vector.extract_strided_slice %5 {offsets = [5, 256], sizes = [1, 224], strides = [1, 1]} : vector<8x7168xf32> to vector<1x224xf32>
    %853 = vector.shape_cast %852 : vector<1x224xf32> to vector<1x224xf32>
    %854 = vector.broadcast %853 : vector<1x224xf32> to vector<16x224xf32>
    %c5_551 = arith.constant 5 : index
    %c0_552 = arith.constant 0 : index
    %c16_553 = arith.constant 16 : index
    %c0_554 = arith.constant 0 : index
    %855 = vector.load %arg4[%c5_551, %c0_552, %c16_553, %c0_554] : memref<8x2x224x224xf32, #tpu.memory_space<vmem>>, vector<1x1x16x224xf32>
    %856 = vector.shape_cast %855 : vector<1x1x16x224xf32> to vector<16x224xf32>
    %857 = vector.shape_cast %854 : vector<16x224xf32> to vector<1x1x16x224xf32>
    tpu.vector_store %arg4[%c5_551, %c0_552, %c16_553, %c0_554], %857 {strides = array<i32>} : memref<8x2x224x224xf32, #tpu.memory_space<vmem>>, vector<1x1x16x224xf32>,
    %858 = vector.extract_strided_slice %5 {offsets = [5, 512], sizes = [1, 224], strides = [1, 1]} : vector<8x7168xf32> to vector<1x224xf32>
    %859 = vector.shape_cast %858 : vector<1x224xf32> to vector<1x224xf32>
    %860 = vector.broadcast %859 : vector<1x224xf32> to vector<16x224xf32>
    %c5_555 = arith.constant 5 : index
    %c0_556 = arith.constant 0 : index
    %c32_557 = arith.constant 32 : index
    %c0_558 = arith.constant 0 : index
    %861 = vector.load %arg4[%c5_555, %c0_556, %c32_557, %c0_558] : memref<8x2x224x224xf32, #tpu.memory_space<vmem>>, vector<1x1x16x224xf32>
    %862 = vector.shape_cast %861 : vector<1x1x16x224xf32> to vector<16x224xf32>
    %863 = vector.shape_cast %860 : vector<16x224xf32> to vector<1x1x16x224xf32>
    tpu.vector_store %arg4[%c5_555, %c0_556, %c32_557, %c0_558], %863 {strides = array<i32>} : memref<8x2x224x224xf32, #tpu.memory_space<vmem>>, vector<1x1x16x224xf32>,
    %864 = vector.extract_strided_slice %5 {offsets = [5, 768], sizes = [1, 224], strides = [1, 1]} : vector<8x7168xf32> to vector<1x224xf32>
    %865 = vector.shape_cast %864 : vector<1x224xf32> to vector<1x224xf32>
    %866 = vector.broadcast %865 : vector<1x224xf32> to vector<16x224xf32>
    %c5_559 = arith.constant 5 : index
    %c0_560 = arith.constant 0 : index
    %c48_561 = arith.constant 48 : index
    %c0_562 = arith.constant 0 : index
    %867 = vector.load %arg4[%c5_559, %c0_560, %c48_561, %c0_562] : memref<8x2x224x224xf32, #tpu.memory_space<vmem>>, vector<1x1x16x224xf32>
    %868 = vector.shape_cast %867 : vector<1x1x16x224xf32> to vector<16x224xf32>
    %869 = vector.shape_cast %866 : vector<16x224xf32> to vector<1x1x16x224xf32>
    tpu.vector_store %arg4[%c5_559, %c0_560, %c48_561, %c0_562], %869 {strides = array<i32>} : memref<8x2x224x224xf32, #tpu.memory_space<vmem>>, vector<1x1x16x224xf32>,
    %870 = vector.extract_strided_slice %5 {offsets = [5, 1024], sizes = [1, 224], strides = [1, 1]} : vector<8x7168xf32> to vector<1x224xf32>
    %871 = vector.shape_cast %870 : vector<1x224xf32> to vector<1x224xf32>
    %872 = vector.broadcast %871 : vector<1x224xf32> to vector<16x224xf32>
    %c5_563 = arith.constant 5 : index
    %c0_564 = arith.constant 0 : index
    %c64_565 = arith.constant 64 : index
    %c0_566 = arith.constant 0 : index
    %873 = vector.load %arg4[%c5_563, %c0_564, %c64_565, %c0_566] : memref<8x2x224x224xf32, #tpu.memory_space<vmem>>, vector<1x1x16x224xf32>
    %874 = vector.shape_cast %873 : vector<1x1x16x224xf32> to vector<16x224xf32>
    %875 = vector.shape_cast %872 : vector<16x224xf32> to vector<1x1x16x224xf32>
    tpu.vector_store %arg4[%c5_563, %c0_564, %c64_565, %c0_566], %875 {strides = array<i32>} : memref<8x2x224x224xf32, #tpu.memory_space<vmem>>, vector<1x1x16x224xf32>,
    %876 = vector.extract_strided_slice %5 {offsets = [5, 1280], sizes = [1, 224], strides = [1, 1]} : vector<8x7168xf32> to vector<1x224xf32>
    %877 = vector.shape_cast %876 : vector<1x224xf32> to vector<1x224xf32>
    %878 = vector.broadcast %877 : vector<1x224xf32> to vector<16x224xf32>
    %c5_567 = arith.constant 5 : index
    %c0_568 = arith.constant 0 : index
    %c80_569 = arith.constant 80 : index
    %c0_570 = arith.constant 0 : index
    %879 = vector.load %arg4[%c5_567, %c0_568, %c80_569, %c0_570] : memref<8x2x224x224xf32, #tpu.memory_space<vmem>>, vector<1x1x16x224xf32>
    %880 = vector.shape_cast %879 : vector<1x1x16x224xf32> to vector<16x224xf32>
    %881 = vector.shape_cast %878 : vector<16x224xf32> to vector<1x1x16x224xf32>
    tpu.vector_store %arg4[%c5_567, %c0_568, %c80_569, %c0_570], %881 {strides = array<i32>} : memref<8x2x224x224xf32, #tpu.memory_space<vmem>>, vector<1x1x16x224xf32>,
    %882 = vector.extract_strided_slice %5 {offsets = [5, 1536], sizes = [1, 224], strides = [1, 1]} : vector<8x7168xf32> to vector<1x224xf32>
    %883 = vector.shape_cast %882 : vector<1x224xf32> to vector<1x224xf32>
    %884 = vector.broadcast %883 : vector<1x224xf32> to vector<16x224xf32>
    %c5_571 = arith.constant 5 : index
    %c0_572 = arith.constant 0 : index
    %c96_573 = arith.constant 96 : index
    %c0_574 = arith.constant 0 : index
    %885 = vector.load %arg4[%c5_571, %c0_572, %c96_573, %c0_574] : memref<8x2x224x224xf32, #tpu.memory_space<vmem>>, vector<1x1x16x224xf32>
    %886 = vector.shape_cast %885 : vector<1x1x16x224xf32> to vector<16x224xf32>
    %887 = vector.shape_cast %884 : vector<16x224xf32> to vector<1x1x16x224xf32>
    tpu.vector_store %arg4[%c5_571, %c0_572, %c96_573, %c0_574], %887 {strides = array<i32>} : memref<8x2x224x224xf32, #tpu.memory_space<vmem>>, vector<1x1x16x224xf32>,
    %888 = vector.extract_strided_slice %5 {offsets = [5, 1792], sizes = [1, 224], strides = [1, 1]} : vector<8x7168xf32> to vector<1x224xf32>
    %889 = vector.shape_cast %888 : vector<1x224xf32> to vector<1x224xf32>
    %890 = vector.broadcast %889 : vector<1x224xf32> to vector<16x224xf32>
    %c5_575 = arith.constant 5 : index
    %c0_576 = arith.constant 0 : index
    %c112_577 = arith.constant 112 : index
    %c0_578 = arith.constant 0 : index
    %891 = vector.load %arg4[%c5_575, %c0_576, %c112_577, %c0_578] : memref<8x2x224x224xf32, #tpu.memory_space<vmem>>, vector<1x1x16x224xf32>
    %892 = vector.shape_cast %891 : vector<1x1x16x224xf32> to vector<16x224xf32>
    %893 = vector.shape_cast %890 : vector<16x224xf32> to vector<1x1x16x224xf32>
    tpu.vector_store %arg4[%c5_575, %c0_576, %c112_577, %c0_578], %893 {strides = array<i32>} : memref<8x2x224x224xf32, #tpu.memory_space<vmem>>, vector<1x1x16x224xf32>,
    %894 = vector.extract_strided_slice %5 {offsets = [5, 2048], sizes = [1, 224], strides = [1, 1]} : vector<8x7168xf32> to vector<1x224xf32>
    %895 = vector.shape_cast %894 : vector<1x224xf32> to vector<1x224xf32>
    %896 = vector.broadcast %895 : vector<1x224xf32> to vector<16x224xf32>
    %c5_579 = arith.constant 5 : index
    %c0_580 = arith.constant 0 : index
    %c128_581 = arith.constant 128 : index
    %c0_582 = arith.constant 0 : index
    %897 = vector.load %arg4[%c5_579, %c0_580, %c128_581, %c0_582] : memref<8x2x224x224xf32, #tpu.memory_space<vmem>>, vector<1x1x16x224xf32>
    %898 = vector.shape_cast %897 : vector<1x1x16x224xf32> to vector<16x224xf32>
    %899 = vector.shape_cast %896 : vector<16x224xf32> to vector<1x1x16x224xf32>
    tpu.vector_store %arg4[%c5_579, %c0_580, %c128_581, %c0_582], %899 {strides = array<i32>} : memref<8x2x224x224xf32, #tpu.memory_space<vmem>>, vector<1x1x16x224xf32>,
    %900 = vector.extract_strided_slice %5 {offsets = [5, 2304], sizes = [1, 224], strides = [1, 1]} : vector<8x7168xf32> to vector<1x224xf32>
    %901 = vector.shape_cast %900 : vector<1x224xf32> to vector<1x224xf32>
    %902 = vector.broadcast %901 : vector<1x224xf32> to vector<16x224xf32>
    %c5_583 = arith.constant 5 : index
    %c0_584 = arith.constant 0 : index
    %c144_585 = arith.constant 144 : index
    %c0_586 = arith.constant 0 : index
    %903 = vector.load %arg4[%c5_583, %c0_584, %c144_585, %c0_586] : memref<8x2x224x224xf32, #tpu.memory_space<vmem>>, vector<1x1x16x224xf32>
    %904 = vector.shape_cast %903 : vector<1x1x16x224xf32> to vector<16x224xf32>
    %905 = vector.shape_cast %902 : vector<16x224xf32> to vector<1x1x16x224xf32>
    tpu.vector_store %arg4[%c5_583, %c0_584, %c144_585, %c0_586], %905 {strides = array<i32>} : memref<8x2x224x224xf32, #tpu.memory_space<vmem>>, vector<1x1x16x224xf32>,
    %906 = vector.extract_strided_slice %5 {offsets = [5, 2560], sizes = [1, 224], strides = [1, 1]} : vector<8x7168xf32> to vector<1x224xf32>
    %907 = vector.shape_cast %906 : vector<1x224xf32> to vector<1x224xf32>
    %908 = vector.broadcast %907 : vector<1x224xf32> to vector<16x224xf32>
    %c5_587 = arith.constant 5 : index
    %c0_588 = arith.constant 0 : index
    %c160_589 = arith.constant 160 : index
    %c0_590 = arith.constant 0 : index
    %909 = vector.load %arg4[%c5_587, %c0_588, %c160_589, %c0_590] : memref<8x2x224x224xf32, #tpu.memory_space<vmem>>, vector<1x1x16x224xf32>
    %910 = vector.shape_cast %909 : vector<1x1x16x224xf32> to vector<16x224xf32>
    %911 = vector.shape_cast %908 : vector<16x224xf32> to vector<1x1x16x224xf32>
    tpu.vector_store %arg4[%c5_587, %c0_588, %c160_589, %c0_590], %911 {strides = array<i32>} : memref<8x2x224x224xf32, #tpu.memory_space<vmem>>, vector<1x1x16x224xf32>,
    %912 = vector.extract_strided_slice %5 {offsets = [5, 2816], sizes = [1, 224], strides = [1, 1]} : vector<8x7168xf32> to vector<1x224xf32>
    %913 = vector.shape_cast %912 : vector<1x224xf32> to vector<1x224xf32>
    %914 = vector.broadcast %913 : vector<1x224xf32> to vector<16x224xf32>
    %c5_591 = arith.constant 5 : index
    %c0_592 = arith.constant 0 : index
    %c176_593 = arith.constant 176 : index
    %c0_594 = arith.constant 0 : index
    %915 = vector.load %arg4[%c5_591, %c0_592, %c176_593, %c0_594] : memref<8x2x224x224xf32, #tpu.memory_space<vmem>>, vector<1x1x16x224xf32>
    %916 = vector.shape_cast %915 : vector<1x1x16x224xf32> to vector<16x224xf32>
    %917 = vector.shape_cast %914 : vector<16x224xf32> to vector<1x1x16x224xf32>
    tpu.vector_store %arg4[%c5_591, %c0_592, %c176_593, %c0_594], %917 {strides = array<i32>} : memref<8x2x224x224xf32, #tpu.memory_space<vmem>>, vector<1x1x16x224xf32>,
    %918 = vector.extract_strided_slice %5 {offsets = [5, 3072], sizes = [1, 224], strides = [1, 1]} : vector<8x7168xf32> to vector<1x224xf32>
    %919 = vector.shape_cast %918 : vector<1x224xf32> to vector<1x224xf32>
    %920 = vector.broadcast %919 : vector<1x224xf32> to vector<16x224xf32>
    %c5_595 = arith.constant 5 : index
    %c0_596 = arith.constant 0 : index
    %c192_597 = arith.constant 192 : index
    %c0_598 = arith.constant 0 : index
    %921 = vector.load %arg4[%c5_595, %c0_596, %c192_597, %c0_598] : memref<8x2x224x224xf32, #tpu.memory_space<vmem>>, vector<1x1x16x224xf32>
    %922 = vector.shape_cast %921 : vector<1x1x16x224xf32> to vector<16x224xf32>
    %923 = vector.shape_cast %920 : vector<16x224xf32> to vector<1x1x16x224xf32>
    tpu.vector_store %arg4[%c5_595, %c0_596, %c192_597, %c0_598], %923 {strides = array<i32>} : memref<8x2x224x224xf32, #tpu.memory_space<vmem>>, vector<1x1x16x224xf32>,
    %924 = vector.extract_strided_slice %5 {offsets = [5, 3328], sizes = [1, 224], strides = [1, 1]} : vector<8x7168xf32> to vector<1x224xf32>
    %925 = vector.shape_cast %924 : vector<1x224xf32> to vector<1x224xf32>
    %926 = vector.broadcast %925 : vector<1x224xf32> to vector<16x224xf32>
    %c5_599 = arith.constant 5 : index
    %c0_600 = arith.constant 0 : index
    %c208_601 = arith.constant 208 : index
    %c0_602 = arith.constant 0 : index
    %927 = vector.load %arg4[%c5_599, %c0_600, %c208_601, %c0_602] : memref<8x2x224x224xf32, #tpu.memory_space<vmem>>, vector<1x1x16x224xf32>
    %928 = vector.shape_cast %927 : vector<1x1x16x224xf32> to vector<16x224xf32>
    %929 = vector.shape_cast %926 : vector<16x224xf32> to vector<1x1x16x224xf32>
    tpu.vector_store %arg4[%c5_599, %c0_600, %c208_601, %c0_602], %929 {strides = array<i32>} : memref<8x2x224x224xf32, #tpu.memory_space<vmem>>, vector<1x1x16x224xf32>,
    %930 = vector.extract_strided_slice %5 {offsets = [5, 3584], sizes = [1, 224], strides = [1, 1]} : vector<8x7168xf32> to vector<1x224xf32>
    %931 = vector.shape_cast %930 : vector<1x224xf32> to vector<1x224xf32>
    %932 = vector.broadcast %931 : vector<1x224xf32> to vector<16x224xf32>
    %c5_603 = arith.constant 5 : index
    %c1_604 = arith.constant 1 : index
    %c0_605 = arith.constant 0 : index
    %c0_606 = arith.constant 0 : index
    %933 = vector.load %arg4[%c5_603, %c1_604, %c0_605, %c0_606] : memref<8x2x224x224xf32, #tpu.memory_space<vmem>>, vector<1x1x16x224xf32>
    %934 = vector.shape_cast %933 : vector<1x1x16x224xf32> to vector<16x224xf32>
    %935 = vector.shape_cast %932 : vector<16x224xf32> to vector<1x1x16x224xf32>
    tpu.vector_store %arg4[%c5_603, %c1_604, %c0_605, %c0_606], %935 {strides = array<i32>} : memref<8x2x224x224xf32, #tpu.memory_space<vmem>>, vector<1x1x16x224xf32>,
    %936 = vector.extract_strided_slice %5 {offsets = [5, 3840], sizes = [1, 224], strides = [1, 1]} : vector<8x7168xf32> to vector<1x224xf32>
    %937 = vector.shape_cast %936 : vector<1x224xf32> to vector<1x224xf32>
    %938 = vector.broadcast %937 : vector<1x224xf32> to vector<16x224xf32>
    %c5_607 = arith.constant 5 : index
    %c1_608 = arith.constant 1 : index
    %c16_609 = arith.constant 16 : index
    %c0_610 = arith.constant 0 : index
    %939 = vector.load %arg4[%c5_607, %c1_608, %c16_609, %c0_610] : memref<8x2x224x224xf32, #tpu.memory_space<vmem>>, vector<1x1x16x224xf32>
    %940 = vector.shape_cast %939 : vector<1x1x16x224xf32> to vector<16x224xf32>
    %941 = vector.shape_cast %938 : vector<16x224xf32> to vector<1x1x16x224xf32>
    tpu.vector_store %arg4[%c5_607, %c1_608, %c16_609, %c0_610], %941 {strides = array<i32>} : memref<8x2x224x224xf32, #tpu.memory_space<vmem>>, vector<1x1x16x224xf32>,
    %942 = vector.extract_strided_slice %5 {offsets = [5, 4096], sizes = [1, 224], strides = [1, 1]} : vector<8x7168xf32> to vector<1x224xf32>
    %943 = vector.shape_cast %942 : vector<1x224xf32> to vector<1x224xf32>
    %944 = vector.broadcast %943 : vector<1x224xf32> to vector<16x224xf32>
    %c5_611 = arith.constant 5 : index
    %c1_612 = arith.constant 1 : index
    %c32_613 = arith.constant 32 : index
    %c0_614 = arith.constant 0 : index
    %945 = vector.load %arg4[%c5_611, %c1_612, %c32_613, %c0_614] : memref<8x2x224x224xf32, #tpu.memory_space<vmem>>, vector<1x1x16x224xf32>
    %946 = vector.shape_cast %945 : vector<1x1x16x224xf32> to vector<16x224xf32>
    %947 = vector.shape_cast %944 : vector<16x224xf32> to vector<1x1x16x224xf32>
    tpu.vector_store %arg4[%c5_611, %c1_612, %c32_613, %c0_614], %947 {strides = array<i32>} : memref<8x2x224x224xf32, #tpu.memory_space<vmem>>, vector<1x1x16x224xf32>,
    %948 = vector.extract_strided_slice %5 {offsets = [5, 4352], sizes = [1, 224], strides = [1, 1]} : vector<8x7168xf32> to vector<1x224xf32>
    %949 = vector.shape_cast %948 : vector<1x224xf32> to vector<1x224xf32>
    %950 = vector.broadcast %949 : vector<1x224xf32> to vector<16x224xf32>
    %c5_615 = arith.constant 5 : index
    %c1_616 = arith.constant 1 : index
    %c48_617 = arith.constant 48 : index
    %c0_618 = arith.constant 0 : index
    %951 = vector.load %arg4[%c5_615, %c1_616, %c48_617, %c0_618] : memref<8x2x224x224xf32, #tpu.memory_space<vmem>>, vector<1x1x16x224xf32>
    %952 = vector.shape_cast %951 : vector<1x1x16x224xf32> to vector<16x224xf32>
    %953 = vector.shape_cast %950 : vector<16x224xf32> to vector<1x1x16x224xf32>
    tpu.vector_store %arg4[%c5_615, %c1_616, %c48_617, %c0_618], %953 {strides = array<i32>} : memref<8x2x224x224xf32, #tpu.memory_space<vmem>>, vector<1x1x16x224xf32>,
    %954 = vector.extract_strided_slice %5 {offsets = [5, 4608], sizes = [1, 224], strides = [1, 1]} : vector<8x7168xf32> to vector<1x224xf32>
    %955 = vector.shape_cast %954 : vector<1x224xf32> to vector<1x224xf32>
    %956 = vector.broadcast %955 : vector<1x224xf32> to vector<16x224xf32>
    %c5_619 = arith.constant 5 : index
    %c1_620 = arith.constant 1 : index
    %c64_621 = arith.constant 64 : index
    %c0_622 = arith.constant 0 : index
    %957 = vector.load %arg4[%c5_619, %c1_620, %c64_621, %c0_622] : memref<8x2x224x224xf32, #tpu.memory_space<vmem>>, vector<1x1x16x224xf32>
    %958 = vector.shape_cast %957 : vector<1x1x16x224xf32> to vector<16x224xf32>
    %959 = vector.shape_cast %956 : vector<16x224xf32> to vector<1x1x16x224xf32>
    tpu.vector_store %arg4[%c5_619, %c1_620, %c64_621, %c0_622], %959 {strides = array<i32>} : memref<8x2x224x224xf32, #tpu.memory_space<vmem>>, vector<1x1x16x224xf32>,
    %960 = vector.extract_strided_slice %5 {offsets = [5, 4864], sizes = [1, 224], strides = [1, 1]} : vector<8x7168xf32> to vector<1x224xf32>
    %961 = vector.shape_cast %960 : vector<1x224xf32> to vector<1x224xf32>
    %962 = vector.broadcast %961 : vector<1x224xf32> to vector<16x224xf32>
    %c5_623 = arith.constant 5 : index
    %c1_624 = arith.constant 1 : index
    %c80_625 = arith.constant 80 : index
    %c0_626 = arith.constant 0 : index
    %963 = vector.load %arg4[%c5_623, %c1_624, %c80_625, %c0_626] : memref<8x2x224x224xf32, #tpu.memory_space<vmem>>, vector<1x1x16x224xf32>
    %964 = vector.shape_cast %963 : vector<1x1x16x224xf32> to vector<16x224xf32>
    %965 = vector.shape_cast %962 : vector<16x224xf32> to vector<1x1x16x224xf32>
    tpu.vector_store %arg4[%c5_623, %c1_624, %c80_625, %c0_626], %965 {strides = array<i32>} : memref<8x2x224x224xf32, #tpu.memory_space<vmem>>, vector<1x1x16x224xf32>,
    %966 = vector.extract_strided_slice %5 {offsets = [5, 5120], sizes = [1, 224], strides = [1, 1]} : vector<8x7168xf32> to vector<1x224xf32>
    %967 = vector.shape_cast %966 : vector<1x224xf32> to vector<1x224xf32>
    %968 = vector.broadcast %967 : vector<1x224xf32> to vector<16x224xf32>
    %c5_627 = arith.constant 5 : index
    %c1_628 = arith.constant 1 : index
    %c96_629 = arith.constant 96 : index
    %c0_630 = arith.constant 0 : index
    %969 = vector.load %arg4[%c5_627, %c1_628, %c96_629, %c0_630] : memref<8x2x224x224xf32, #tpu.memory_space<vmem>>, vector<1x1x16x224xf32>
    %970 = vector.shape_cast %969 : vector<1x1x16x224xf32> to vector<16x224xf32>
    %971 = vector.shape_cast %968 : vector<16x224xf32> to vector<1x1x16x224xf32>
    tpu.vector_store %arg4[%c5_627, %c1_628, %c96_629, %c0_630], %971 {strides = array<i32>} : memref<8x2x224x224xf32, #tpu.memory_space<vmem>>, vector<1x1x16x224xf32>,
    %972 = vector.extract_strided_slice %5 {offsets = [5, 5376], sizes = [1, 224], strides = [1, 1]} : vector<8x7168xf32> to vector<1x224xf32>
    %973 = vector.shape_cast %972 : vector<1x224xf32> to vector<1x224xf32>
    %974 = vector.broadcast %973 : vector<1x224xf32> to vector<16x224xf32>
    %c5_631 = arith.constant 5 : index
    %c1_632 = arith.constant 1 : index
    %c112_633 = arith.constant 112 : index
    %c0_634 = arith.constant 0 : index
    %975 = vector.load %arg4[%c5_631, %c1_632, %c112_633, %c0_634] : memref<8x2x224x224xf32, #tpu.memory_space<vmem>>, vector<1x1x16x224xf32>
    %976 = vector.shape_cast %975 : vector<1x1x16x224xf32> to vector<16x224xf32>
    %977 = vector.shape_cast %974 : vector<16x224xf32> to vector<1x1x16x224xf32>
    tpu.vector_store %arg4[%c5_631, %c1_632, %c112_633, %c0_634], %977 {strides = array<i32>} : memref<8x2x224x224xf32, #tpu.memory_space<vmem>>, vector<1x1x16x224xf32>,
    %978 = vector.extract_strided_slice %5 {offsets = [5, 5632], sizes = [1, 224], strides = [1, 1]} : vector<8x7168xf32> to vector<1x224xf32>
    %979 = vector.shape_cast %978 : vector<1x224xf32> to vector<1x224xf32>
    %980 = vector.broadcast %979 : vector<1x224xf32> to vector<16x224xf32>
    %c5_635 = arith.constant 5 : index
    %c1_636 = arith.constant 1 : index
    %c128_637 = arith.constant 128 : index
    %c0_638 = arith.constant 0 : index
    %981 = vector.load %arg4[%c5_635, %c1_636, %c128_637, %c0_638] : memref<8x2x224x224xf32, #tpu.memory_space<vmem>>, vector<1x1x16x224xf32>
    %982 = vector.shape_cast %981 : vector<1x1x16x224xf32> to vector<16x224xf32>
    %983 = vector.shape_cast %980 : vector<16x224xf32> to vector<1x1x16x224xf32>
    tpu.vector_store %arg4[%c5_635, %c1_636, %c128_637, %c0_638], %983 {strides = array<i32>} : memref<8x2x224x224xf32, #tpu.memory_space<vmem>>, vector<1x1x16x224xf32>,
    %984 = vector.extract_strided_slice %5 {offsets = [5, 5888], sizes = [1, 224], strides = [1, 1]} : vector<8x7168xf32> to vector<1x224xf32>
    %985 = vector.shape_cast %984 : vector<1x224xf32> to vector<1x224xf32>
    %986 = vector.broadcast %985 : vector<1x224xf32> to vector<16x224xf32>
    %c5_639 = arith.constant 5 : index
    %c1_640 = arith.constant 1 : index
    %c144_641 = arith.constant 144 : index
    %c0_642 = arith.constant 0 : index
    %987 = vector.load %arg4[%c5_639, %c1_640, %c144_641, %c0_642] : memref<8x2x224x224xf32, #tpu.memory_space<vmem>>, vector<1x1x16x224xf32>
    %988 = vector.shape_cast %987 : vector<1x1x16x224xf32> to vector<16x224xf32>
    %989 = vector.shape_cast %986 : vector<16x224xf32> to vector<1x1x16x224xf32>
    tpu.vector_store %arg4[%c5_639, %c1_640, %c144_641, %c0_642], %989 {strides = array<i32>} : memref<8x2x224x224xf32, #tpu.memory_space<vmem>>, vector<1x1x16x224xf32>,
    %990 = vector.extract_strided_slice %5 {offsets = [5, 6144], sizes = [1, 224], strides = [1, 1]} : vector<8x7168xf32> to vector<1x224xf32>
    %991 = vector.shape_cast %990 : vector<1x224xf32> to vector<1x224xf32>
    %992 = vector.broadcast %991 : vector<1x224xf32> to vector<16x224xf32>
    %c5_643 = arith.constant 5 : index
    %c1_644 = arith.constant 1 : index
    %c160_645 = arith.constant 160 : index
    %c0_646 = arith.constant 0 : index
    %993 = vector.load %arg4[%c5_643, %c1_644, %c160_645, %c0_646] : memref<8x2x224x224xf32, #tpu.memory_space<vmem>>, vector<1x1x16x224xf32>
    %994 = vector.shape_cast %993 : vector<1x1x16x224xf32> to vector<16x224xf32>
    %995 = vector.shape_cast %992 : vector<16x224xf32> to vector<1x1x16x224xf32>
    tpu.vector_store %arg4[%c5_643, %c1_644, %c160_645, %c0_646], %995 {strides = array<i32>} : memref<8x2x224x224xf32, #tpu.memory_space<vmem>>, vector<1x1x16x224xf32>,
    %996 = vector.extract_strided_slice %5 {offsets = [5, 6400], sizes = [1, 224], strides = [1, 1]} : vector<8x7168xf32> to vector<1x224xf32>
    %997 = vector.shape_cast %996 : vector<1x224xf32> to vector<1x224xf32>
    %998 = vector.broadcast %997 : vector<1x224xf32> to vector<16x224xf32>
    %c5_647 = arith.constant 5 : index
    %c1_648 = arith.constant 1 : index
    %c176_649 = arith.constant 176 : index
    %c0_650 = arith.constant 0 : index
    %999 = vector.load %arg4[%c5_647, %c1_648, %c176_649, %c0_650] : memref<8x2x224x224xf32, #tpu.memory_space<vmem>>, vector<1x1x16x224xf32>
    %1000 = vector.shape_cast %999 : vector<1x1x16x224xf32> to vector<16x224xf32>
    %1001 = vector.shape_cast %998 : vector<16x224xf32> to vector<1x1x16x224xf32>
    tpu.vector_store %arg4[%c5_647, %c1_648, %c176_649, %c0_650], %1001 {strides = array<i32>} : memref<8x2x224x224xf32, #tpu.memory_space<vmem>>, vector<1x1x16x224xf32>,
    %1002 = vector.extract_strided_slice %5 {offsets = [5, 6656], sizes = [1, 224], strides = [1, 1]} : vector<8x7168xf32> to vector<1x224xf32>
    %1003 = vector.shape_cast %1002 : vector<1x224xf32> to vector<1x224xf32>
    %1004 = vector.broadcast %1003 : vector<1x224xf32> to vector<16x224xf32>
    %c5_651 = arith.constant 5 : index
    %c1_652 = arith.constant 1 : index
    %c192_653 = arith.constant 192 : index
    %c0_654 = arith.constant 0 : index
    %1005 = vector.load %arg4[%c5_651, %c1_652, %c192_653, %c0_654] : memref<8x2x224x224xf32, #tpu.memory_space<vmem>>, vector<1x1x16x224xf32>
    %1006 = vector.shape_cast %1005 : vector<1x1x16x224xf32> to vector<16x224xf32>
    %1007 = vector.shape_cast %1004 : vector<16x224xf32> to vector<1x1x16x224xf32>
    tpu.vector_store %arg4[%c5_651, %c1_652, %c192_653, %c0_654], %1007 {strides = array<i32>} : memref<8x2x224x224xf32, #tpu.memory_space<vmem>>, vector<1x1x16x224xf32>,
    %1008 = vector.extract_strided_slice %5 {offsets = [5, 6912], sizes = [1, 224], strides = [1, 1]} : vector<8x7168xf32> to vector<1x224xf32>
    %1009 = vector.shape_cast %1008 : vector<1x224xf32> to vector<1x224xf32>
    %1010 = vector.broadcast %1009 : vector<1x224xf32> to vector<16x224xf32>
    %c5_655 = arith.constant 5 : index
    %c1_656 = arith.constant 1 : index
    %c208_657 = arith.constant 208 : index
    %c0_658 = arith.constant 0 : index
    %1011 = vector.load %arg4[%c5_655, %c1_656, %c208_657, %c0_658] : memref<8x2x224x224xf32, #tpu.memory_space<vmem>>, vector<1x1x16x224xf32>
    %1012 = vector.shape_cast %1011 : vector<1x1x16x224xf32> to vector<16x224xf32>
    %1013 = vector.shape_cast %1010 : vector<16x224xf32> to vector<1x1x16x224xf32>
    tpu.vector_store %arg4[%c5_655, %c1_656, %c208_657, %c0_658], %1013 {strides = array<i32>} : memref<8x2x224x224xf32, #tpu.memory_space<vmem>>, vector<1x1x16x224xf32>,
    %1014 = vector.extract_strided_slice %5 {offsets = [6, 0], sizes = [1, 224], strides = [1, 1]} : vector<8x7168xf32> to vector<1x224xf32>
    %1015 = vector.shape_cast %1014 : vector<1x224xf32> to vector<1x224xf32>
    %1016 = vector.broadcast %1015 : vector<1x224xf32> to vector<16x224xf32>
    %c6 = arith.constant 6 : index
    %c0_659 = arith.constant 0 : index
    %c0_660 = arith.constant 0 : index
    %c0_661 = arith.constant 0 : index
    %1017 = vector.load %arg4[%c6, %c0_659, %c0_660, %c0_661] : memref<8x2x224x224xf32, #tpu.memory_space<vmem>>, vector<1x1x16x224xf32>
    %1018 = vector.shape_cast %1017 : vector<1x1x16x224xf32> to vector<16x224xf32>
    %1019 = vector.shape_cast %1016 : vector<16x224xf32> to vector<1x1x16x224xf32>
    tpu.vector_store %arg4[%c6, %c0_659, %c0_660, %c0_661], %1019 {strides = array<i32>} : memref<8x2x224x224xf32, #tpu.memory_space<vmem>>, vector<1x1x16x224xf32>,
    %1020 = vector.extract_strided_slice %5 {offsets = [6, 256], sizes = [1, 224], strides = [1, 1]} : vector<8x7168xf32> to vector<1x224xf32>
    %1021 = vector.shape_cast %1020 : vector<1x224xf32> to vector<1x224xf32>
    %1022 = vector.broadcast %1021 : vector<1x224xf32> to vector<16x224xf32>
    %c6_662 = arith.constant 6 : index
    %c0_663 = arith.constant 0 : index
    %c16_664 = arith.constant 16 : index
    %c0_665 = arith.constant 0 : index
    %1023 = vector.load %arg4[%c6_662, %c0_663, %c16_664, %c0_665] : memref<8x2x224x224xf32, #tpu.memory_space<vmem>>, vector<1x1x16x224xf32>
    %1024 = vector.shape_cast %1023 : vector<1x1x16x224xf32> to vector<16x224xf32>
    %1025 = vector.shape_cast %1022 : vector<16x224xf32> to vector<1x1x16x224xf32>
    tpu.vector_store %arg4[%c6_662, %c0_663, %c16_664, %c0_665], %1025 {strides = array<i32>} : memref<8x2x224x224xf32, #tpu.memory_space<vmem>>, vector<1x1x16x224xf32>,
    %1026 = vector.extract_strided_slice %5 {offsets = [6, 512], sizes = [1, 224], strides = [1, 1]} : vector<8x7168xf32> to vector<1x224xf32>
    %1027 = vector.shape_cast %1026 : vector<1x224xf32> to vector<1x224xf32>
    %1028 = vector.broadcast %1027 : vector<1x224xf32> to vector<16x224xf32>
    %c6_666 = arith.constant 6 : index
    %c0_667 = arith.constant 0 : index
    %c32_668 = arith.constant 32 : index
    %c0_669 = arith.constant 0 : index
    %1029 = vector.load %arg4[%c6_666, %c0_667, %c32_668, %c0_669] : memref<8x2x224x224xf32, #tpu.memory_space<vmem>>, vector<1x1x16x224xf32>
    %1030 = vector.shape_cast %1029 : vector<1x1x16x224xf32> to vector<16x224xf32>
    %1031 = vector.shape_cast %1028 : vector<16x224xf32> to vector<1x1x16x224xf32>
    tpu.vector_store %arg4[%c6_666, %c0_667, %c32_668, %c0_669], %1031 {strides = array<i32>} : memref<8x2x224x224xf32, #tpu.memory_space<vmem>>, vector<1x1x16x224xf32>,
    %1032 = vector.extract_strided_slice %5 {offsets = [6, 768], sizes = [1, 224], strides = [1, 1]} : vector<8x7168xf32> to vector<1x224xf32>
    %1033 = vector.shape_cast %1032 : vector<1x224xf32> to vector<1x224xf32>
    %1034 = vector.broadcast %1033 : vector<1x224xf32> to vector<16x224xf32>
    %c6_670 = arith.constant 6 : index
    %c0_671 = arith.constant 0 : index
    %c48_672 = arith.constant 48 : index
    %c0_673 = arith.constant 0 : index
    %1035 = vector.load %arg4[%c6_670, %c0_671, %c48_672, %c0_673] : memref<8x2x224x224xf32, #tpu.memory_space<vmem>>, vector<1x1x16x224xf32>
    %1036 = vector.shape_cast %1035 : vector<1x1x16x224xf32> to vector<16x224xf32>
    %1037 = vector.shape_cast %1034 : vector<16x224xf32> to vector<1x1x16x224xf32>
    tpu.vector_store %arg4[%c6_670, %c0_671, %c48_672, %c0_673], %1037 {strides = array<i32>} : memref<8x2x224x224xf32, #tpu.memory_space<vmem>>, vector<1x1x16x224xf32>,
    %1038 = vector.extract_strided_slice %5 {offsets = [6, 1024], sizes = [1, 224], strides = [1, 1]} : vector<8x7168xf32> to vector<1x224xf32>
    %1039 = vector.shape_cast %1038 : vector<1x224xf32> to vector<1x224xf32>
    %1040 = vector.broadcast %1039 : vector<1x224xf32> to vector<16x224xf32>
    %c6_674 = arith.constant 6 : index
    %c0_675 = arith.constant 0 : index
    %c64_676 = arith.constant 64 : index
    %c0_677 = arith.constant 0 : index
    %1041 = vector.load %arg4[%c6_674, %c0_675, %c64_676, %c0_677] : memref<8x2x224x224xf32, #tpu.memory_space<vmem>>, vector<1x1x16x224xf32>
    %1042 = vector.shape_cast %1041 : vector<1x1x16x224xf32> to vector<16x224xf32>
    %1043 = vector.shape_cast %1040 : vector<16x224xf32> to vector<1x1x16x224xf32>
    tpu.vector_store %arg4[%c6_674, %c0_675, %c64_676, %c0_677], %1043 {strides = array<i32>} : memref<8x2x224x224xf32, #tpu.memory_space<vmem>>, vector<1x1x16x224xf32>,
    %1044 = vector.extract_strided_slice %5 {offsets = [6, 1280], sizes = [1, 224], strides = [1, 1]} : vector<8x7168xf32> to vector<1x224xf32>
    %1045 = vector.shape_cast %1044 : vector<1x224xf32> to vector<1x224xf32>
    %1046 = vector.broadcast %1045 : vector<1x224xf32> to vector<16x224xf32>
    %c6_678 = arith.constant 6 : index
    %c0_679 = arith.constant 0 : index
    %c80_680 = arith.constant 80 : index
    %c0_681 = arith.constant 0 : index
    %1047 = vector.load %arg4[%c6_678, %c0_679, %c80_680, %c0_681] : memref<8x2x224x224xf32, #tpu.memory_space<vmem>>, vector<1x1x16x224xf32>
    %1048 = vector.shape_cast %1047 : vector<1x1x16x224xf32> to vector<16x224xf32>
    %1049 = vector.shape_cast %1046 : vector<16x224xf32> to vector<1x1x16x224xf32>
    tpu.vector_store %arg4[%c6_678, %c0_679, %c80_680, %c0_681], %1049 {strides = array<i32>} : memref<8x2x224x224xf32, #tpu.memory_space<vmem>>, vector<1x1x16x224xf32>,
    %1050 = vector.extract_strided_slice %5 {offsets = [6, 1536], sizes = [1, 224], strides = [1, 1]} : vector<8x7168xf32> to vector<1x224xf32>
    %1051 = vector.shape_cast %1050 : vector<1x224xf32> to vector<1x224xf32>
    %1052 = vector.broadcast %1051 : vector<1x224xf32> to vector<16x224xf32>
    %c6_682 = arith.constant 6 : index
    %c0_683 = arith.constant 0 : index
    %c96_684 = arith.constant 96 : index
    %c0_685 = arith.constant 0 : index
    %1053 = vector.load %arg4[%c6_682, %c0_683, %c96_684, %c0_685] : memref<8x2x224x224xf32, #tpu.memory_space<vmem>>, vector<1x1x16x224xf32>
    %1054 = vector.shape_cast %1053 : vector<1x1x16x224xf32> to vector<16x224xf32>
    %1055 = vector.shape_cast %1052 : vector<16x224xf32> to vector<1x1x16x224xf32>
    tpu.vector_store %arg4[%c6_682, %c0_683, %c96_684, %c0_685], %1055 {strides = array<i32>} : memref<8x2x224x224xf32, #tpu.memory_space<vmem>>, vector<1x1x16x224xf32>,
    %1056 = vector.extract_strided_slice %5 {offsets = [6, 1792], sizes = [1, 224], strides = [1, 1]} : vector<8x7168xf32> to vector<1x224xf32>
    %1057 = vector.shape_cast %1056 : vector<1x224xf32> to vector<1x224xf32>
    %1058 = vector.broadcast %1057 : vector<1x224xf32> to vector<16x224xf32>
    %c6_686 = arith.constant 6 : index
    %c0_687 = arith.constant 0 : index
    %c112_688 = arith.constant 112 : index
    %c0_689 = arith.constant 0 : index
    %1059 = vector.load %arg4[%c6_686, %c0_687, %c112_688, %c0_689] : memref<8x2x224x224xf32, #tpu.memory_space<vmem>>, vector<1x1x16x224xf32>
    %1060 = vector.shape_cast %1059 : vector<1x1x16x224xf32> to vector<16x224xf32>
    %1061 = vector.shape_cast %1058 : vector<16x224xf32> to vector<1x1x16x224xf32>
    tpu.vector_store %arg4[%c6_686, %c0_687, %c112_688, %c0_689], %1061 {strides = array<i32>} : memref<8x2x224x224xf32, #tpu.memory_space<vmem>>, vector<1x1x16x224xf32>,
    %1062 = vector.extract_strided_slice %5 {offsets = [6, 2048], sizes = [1, 224], strides = [1, 1]} : vector<8x7168xf32> to vector<1x224xf32>
    %1063 = vector.shape_cast %1062 : vector<1x224xf32> to vector<1x224xf32>
    %1064 = vector.broadcast %1063 : vector<1x224xf32> to vector<16x224xf32>
    %c6_690 = arith.constant 6 : index
    %c0_691 = arith.constant 0 : index
    %c128_692 = arith.constant 128 : index
    %c0_693 = arith.constant 0 : index
    %1065 = vector.load %arg4[%c6_690, %c0_691, %c128_692, %c0_693] : memref<8x2x224x224xf32, #tpu.memory_space<vmem>>, vector<1x1x16x224xf32>
    %1066 = vector.shape_cast %1065 : vector<1x1x16x224xf32> to vector<16x224xf32>
    %1067 = vector.shape_cast %1064 : vector<16x224xf32> to vector<1x1x16x224xf32>
    tpu.vector_store %arg4[%c6_690, %c0_691, %c128_692, %c0_693], %1067 {strides = array<i32>} : memref<8x2x224x224xf32, #tpu.memory_space<vmem>>, vector<1x1x16x224xf32>,
    %1068 = vector.extract_strided_slice %5 {offsets = [6, 2304], sizes = [1, 224], strides = [1, 1]} : vector<8x7168xf32> to vector<1x224xf32>
    %1069 = vector.shape_cast %1068 : vector<1x224xf32> to vector<1x224xf32>
    %1070 = vector.broadcast %1069 : vector<1x224xf32> to vector<16x224xf32>
    %c6_694 = arith.constant 6 : index
    %c0_695 = arith.constant 0 : index
    %c144_696 = arith.constant 144 : index
    %c0_697 = arith.constant 0 : index
    %1071 = vector.load %arg4[%c6_694, %c0_695, %c144_696, %c0_697] : memref<8x2x224x224xf32, #tpu.memory_space<vmem>>, vector<1x1x16x224xf32>
    %1072 = vector.shape_cast %1071 : vector<1x1x16x224xf32> to vector<16x224xf32>
    %1073 = vector.shape_cast %1070 : vector<16x224xf32> to vector<1x1x16x224xf32>
    tpu.vector_store %arg4[%c6_694, %c0_695, %c144_696, %c0_697], %1073 {strides = array<i32>} : memref<8x2x224x224xf32, #tpu.memory_space<vmem>>, vector<1x1x16x224xf32>,
    %1074 = vector.extract_strided_slice %5 {offsets = [6, 2560], sizes = [1, 224], strides = [1, 1]} : vector<8x7168xf32> to vector<1x224xf32>
    %1075 = vector.shape_cast %1074 : vector<1x224xf32> to vector<1x224xf32>
    %1076 = vector.broadcast %1075 : vector<1x224xf32> to vector<16x224xf32>
    %c6_698 = arith.constant 6 : index
    %c0_699 = arith.constant 0 : index
    %c160_700 = arith.constant 160 : index
    %c0_701 = arith.constant 0 : index
    %1077 = vector.load %arg4[%c6_698, %c0_699, %c160_700, %c0_701] : memref<8x2x224x224xf32, #tpu.memory_space<vmem>>, vector<1x1x16x224xf32>
    %1078 = vector.shape_cast %1077 : vector<1x1x16x224xf32> to vector<16x224xf32>
    %1079 = vector.shape_cast %1076 : vector<16x224xf32> to vector<1x1x16x224xf32>
    tpu.vector_store %arg4[%c6_698, %c0_699, %c160_700, %c0_701], %1079 {strides = array<i32>} : memref<8x2x224x224xf32, #tpu.memory_space<vmem>>, vector<1x1x16x224xf32>,
    %1080 = vector.extract_strided_slice %5 {offsets = [6, 2816], sizes = [1, 224], strides = [1, 1]} : vector<8x7168xf32> to vector<1x224xf32>
    %1081 = vector.shape_cast %1080 : vector<1x224xf32> to vector<1x224xf32>
    %1082 = vector.broadcast %1081 : vector<1x224xf32> to vector<16x224xf32>
    %c6_702 = arith.constant 6 : index
    %c0_703 = arith.constant 0 : index
    %c176_704 = arith.constant 176 : index
    %c0_705 = arith.constant 0 : index
    %1083 = vector.load %arg4[%c6_702, %c0_703, %c176_704, %c0_705] : memref<8x2x224x224xf32, #tpu.memory_space<vmem>>, vector<1x1x16x224xf32>
    %1084 = vector.shape_cast %1083 : vector<1x1x16x224xf32> to vector<16x224xf32>
    %1085 = vector.shape_cast %1082 : vector<16x224xf32> to vector<1x1x16x224xf32>
    tpu.vector_store %arg4[%c6_702, %c0_703, %c176_704, %c0_705], %1085 {strides = array<i32>} : memref<8x2x224x224xf32, #tpu.memory_space<vmem>>, vector<1x1x16x224xf32>,
    %1086 = vector.extract_strided_slice %5 {offsets = [6, 3072], sizes = [1, 224], strides = [1, 1]} : vector<8x7168xf32> to vector<1x224xf32>
    %1087 = vector.shape_cast %1086 : vector<1x224xf32> to vector<1x224xf32>
    %1088 = vector.broadcast %1087 : vector<1x224xf32> to vector<16x224xf32>
    %c6_706 = arith.constant 6 : index
    %c0_707 = arith.constant 0 : index
    %c192_708 = arith.constant 192 : index
    %c0_709 = arith.constant 0 : index
    %1089 = vector.load %arg4[%c6_706, %c0_707, %c192_708, %c0_709] : memref<8x2x224x224xf32, #tpu.memory_space<vmem>>, vector<1x1x16x224xf32>
    %1090 = vector.shape_cast %1089 : vector<1x1x16x224xf32> to vector<16x224xf32>
    %1091 = vector.shape_cast %1088 : vector<16x224xf32> to vector<1x1x16x224xf32>
    tpu.vector_store %arg4[%c6_706, %c0_707, %c192_708, %c0_709], %1091 {strides = array<i32>} : memref<8x2x224x224xf32, #tpu.memory_space<vmem>>, vector<1x1x16x224xf32>,
    %1092 = vector.extract_strided_slice %5 {offsets = [6, 3328], sizes = [1, 224], strides = [1, 1]} : vector<8x7168xf32> to vector<1x224xf32>
    %1093 = vector.shape_cast %1092 : vector<1x224xf32> to vector<1x224xf32>
    %1094 = vector.broadcast %1093 : vector<1x224xf32> to vector<16x224xf32>
    %c6_710 = arith.constant 6 : index
    %c0_711 = arith.constant 0 : index
    %c208_712 = arith.constant 208 : index
    %c0_713 = arith.constant 0 : index
    %1095 = vector.load %arg4[%c6_710, %c0_711, %c208_712, %c0_713] : memref<8x2x224x224xf32, #tpu.memory_space<vmem>>, vector<1x1x16x224xf32>
    %1096 = vector.shape_cast %1095 : vector<1x1x16x224xf32> to vector<16x224xf32>
    %1097 = vector.shape_cast %1094 : vector<16x224xf32> to vector<1x1x16x224xf32>
    tpu.vector_store %arg4[%c6_710, %c0_711, %c208_712, %c0_713], %1097 {strides = array<i32>} : memref<8x2x224x224xf32, #tpu.memory_space<vmem>>, vector<1x1x16x224xf32>,
    %1098 = vector.extract_strided_slice %5 {offsets = [6, 3584], sizes = [1, 224], strides = [1, 1]} : vector<8x7168xf32> to vector<1x224xf32>
    %1099 = vector.shape_cast %1098 : vector<1x224xf32> to vector<1x224xf32>
    %1100 = vector.broadcast %1099 : vector<1x224xf32> to vector<16x224xf32>
    %c6_714 = arith.constant 6 : index
    %c1_715 = arith.constant 1 : index
    %c0_716 = arith.constant 0 : index
    %c0_717 = arith.constant 0 : index
    %1101 = vector.load %arg4[%c6_714, %c1_715, %c0_716, %c0_717] : memref<8x2x224x224xf32, #tpu.memory_space<vmem>>, vector<1x1x16x224xf32>
    %1102 = vector.shape_cast %1101 : vector<1x1x16x224xf32> to vector<16x224xf32>
    %1103 = vector.shape_cast %1100 : vector<16x224xf32> to vector<1x1x16x224xf32>
    tpu.vector_store %arg4[%c6_714, %c1_715, %c0_716, %c0_717], %1103 {strides = array<i32>} : memref<8x2x224x224xf32, #tpu.memory_space<vmem>>, vector<1x1x16x224xf32>,
    %1104 = vector.extract_strided_slice %5 {offsets = [6, 3840], sizes = [1, 224], strides = [1, 1]} : vector<8x7168xf32> to vector<1x224xf32>
    %1105 = vector.shape_cast %1104 : vector<1x224xf32> to vector<1x224xf32>
    %1106 = vector.broadcast %1105 : vector<1x224xf32> to vector<16x224xf32>
    %c6_718 = arith.constant 6 : index
    %c1_719 = arith.constant 1 : index
    %c16_720 = arith.constant 16 : index
    %c0_721 = arith.constant 0 : index
    %1107 = vector.load %arg4[%c6_718, %c1_719, %c16_720, %c0_721] : memref<8x2x224x224xf32, #tpu.memory_space<vmem>>, vector<1x1x16x224xf32>
    %1108 = vector.shape_cast %1107 : vector<1x1x16x224xf32> to vector<16x224xf32>
    %1109 = vector.shape_cast %1106 : vector<16x224xf32> to vector<1x1x16x224xf32>
    tpu.vector_store %arg4[%c6_718, %c1_719, %c16_720, %c0_721], %1109 {strides = array<i32>} : memref<8x2x224x224xf32, #tpu.memory_space<vmem>>, vector<1x1x16x224xf32>,
    %1110 = vector.extract_strided_slice %5 {offsets = [6, 4096], sizes = [1, 224], strides = [1, 1]} : vector<8x7168xf32> to vector<1x224xf32>
    %1111 = vector.shape_cast %1110 : vector<1x224xf32> to vector<1x224xf32>
    %1112 = vector.broadcast %1111 : vector<1x224xf32> to vector<16x224xf32>
    %c6_722 = arith.constant 6 : index
    %c1_723 = arith.constant 1 : index
    %c32_724 = arith.constant 32 : index
    %c0_725 = arith.constant 0 : index
    %1113 = vector.load %arg4[%c6_722, %c1_723, %c32_724, %c0_725] : memref<8x2x224x224xf32, #tpu.memory_space<vmem>>, vector<1x1x16x224xf32>
    %1114 = vector.shape_cast %1113 : vector<1x1x16x224xf32> to vector<16x224xf32>
    %1115 = vector.shape_cast %1112 : vector<16x224xf32> to vector<1x1x16x224xf32>
    tpu.vector_store %arg4[%c6_722, %c1_723, %c32_724, %c0_725], %1115 {strides = array<i32>} : memref<8x2x224x224xf32, #tpu.memory_space<vmem>>, vector<1x1x16x224xf32>,
    %1116 = vector.extract_strided_slice %5 {offsets = [6, 4352], sizes = [1, 224], strides = [1, 1]} : vector<8x7168xf32> to vector<1x224xf32>
    %1117 = vector.shape_cast %1116 : vector<1x224xf32> to vector<1x224xf32>
    %1118 = vector.broadcast %1117 : vector<1x224xf32> to vector<16x224xf32>
    %c6_726 = arith.constant 6 : index
    %c1_727 = arith.constant 1 : index
    %c48_728 = arith.constant 48 : index
    %c0_729 = arith.constant 0 : index
    %1119 = vector.load %arg4[%c6_726, %c1_727, %c48_728, %c0_729] : memref<8x2x224x224xf32, #tpu.memory_space<vmem>>, vector<1x1x16x224xf32>
    %1120 = vector.shape_cast %1119 : vector<1x1x16x224xf32> to vector<16x224xf32>
    %1121 = vector.shape_cast %1118 : vector<16x224xf32> to vector<1x1x16x224xf32>
    tpu.vector_store %arg4[%c6_726, %c1_727, %c48_728, %c0_729], %1121 {strides = array<i32>} : memref<8x2x224x224xf32, #tpu.memory_space<vmem>>, vector<1x1x16x224xf32>,
    %1122 = vector.extract_strided_slice %5 {offsets = [6, 4608], sizes = [1, 224], strides = [1, 1]} : vector<8x7168xf32> to vector<1x224xf32>
    %1123 = vector.shape_cast %1122 : vector<1x224xf32> to vector<1x224xf32>
    %1124 = vector.broadcast %1123 : vector<1x224xf32> to vector<16x224xf32>
    %c6_730 = arith.constant 6 : index
    %c1_731 = arith.constant 1 : index
    %c64_732 = arith.constant 64 : index
    %c0_733 = arith.constant 0 : index
    %1125 = vector.load %arg4[%c6_730, %c1_731, %c64_732, %c0_733] : memref<8x2x224x224xf32, #tpu.memory_space<vmem>>, vector<1x1x16x224xf32>
    %1126 = vector.shape_cast %1125 : vector<1x1x16x224xf32> to vector<16x224xf32>
    %1127 = vector.shape_cast %1124 : vector<16x224xf32> to vector<1x1x16x224xf32>
    tpu.vector_store %arg4[%c6_730, %c1_731, %c64_732, %c0_733], %1127 {strides = array<i32>} : memref<8x2x224x224xf32, #tpu.memory_space<vmem>>, vector<1x1x16x224xf32>,
    %1128 = vector.extract_strided_slice %5 {offsets = [6, 4864], sizes = [1, 224], strides = [1, 1]} : vector<8x7168xf32> to vector<1x224xf32>
    %1129 = vector.shape_cast %1128 : vector<1x224xf32> to vector<1x224xf32>
    %1130 = vector.broadcast %1129 : vector<1x224xf32> to vector<16x224xf32>
    %c6_734 = arith.constant 6 : index
    %c1_735 = arith.constant 1 : index
    %c80_736 = arith.constant 80 : index
    %c0_737 = arith.constant 0 : index
    %1131 = vector.load %arg4[%c6_734, %c1_735, %c80_736, %c0_737] : memref<8x2x224x224xf32, #tpu.memory_space<vmem>>, vector<1x1x16x224xf32>
    %1132 = vector.shape_cast %1131 : vector<1x1x16x224xf32> to vector<16x224xf32>
    %1133 = vector.shape_cast %1130 : vector<16x224xf32> to vector<1x1x16x224xf32>
    tpu.vector_store %arg4[%c6_734, %c1_735, %c80_736, %c0_737], %1133 {strides = array<i32>} : memref<8x2x224x224xf32, #tpu.memory_space<vmem>>, vector<1x1x16x224xf32>,
    %1134 = vector.extract_strided_slice %5 {offsets = [6, 5120], sizes = [1, 224], strides = [1, 1]} : vector<8x7168xf32> to vector<1x224xf32>
    %1135 = vector.shape_cast %1134 : vector<1x224xf32> to vector<1x224xf32>
    %1136 = vector.broadcast %1135 : vector<1x224xf32> to vector<16x224xf32>
    %c6_738 = arith.constant 6 : index
    %c1_739 = arith.constant 1 : index
    %c96_740 = arith.constant 96 : index
    %c0_741 = arith.constant 0 : index
    %1137 = vector.load %arg4[%c6_738, %c1_739, %c96_740, %c0_741] : memref<8x2x224x224xf32, #tpu.memory_space<vmem>>, vector<1x1x16x224xf32>
    %1138 = vector.shape_cast %1137 : vector<1x1x16x224xf32> to vector<16x224xf32>
    %1139 = vector.shape_cast %1136 : vector<16x224xf32> to vector<1x1x16x224xf32>
    tpu.vector_store %arg4[%c6_738, %c1_739, %c96_740, %c0_741], %1139 {strides = array<i32>} : memref<8x2x224x224xf32, #tpu.memory_space<vmem>>, vector<1x1x16x224xf32>,
    %1140 = vector.extract_strided_slice %5 {offsets = [6, 5376], sizes = [1, 224], strides = [1, 1]} : vector<8x7168xf32> to vector<1x224xf32>
    %1141 = vector.shape_cast %1140 : vector<1x224xf32> to vector<1x224xf32>
    %1142 = vector.broadcast %1141 : vector<1x224xf32> to vector<16x224xf32>
    %c6_742 = arith.constant 6 : index
    %c1_743 = arith.constant 1 : index
    %c112_744 = arith.constant 112 : index
    %c0_745 = arith.constant 0 : index
    %1143 = vector.load %arg4[%c6_742, %c1_743, %c112_744, %c0_745] : memref<8x2x224x224xf32, #tpu.memory_space<vmem>>, vector<1x1x16x224xf32>
    %1144 = vector.shape_cast %1143 : vector<1x1x16x224xf32> to vector<16x224xf32>
    %1145 = vector.shape_cast %1142 : vector<16x224xf32> to vector<1x1x16x224xf32>
    tpu.vector_store %arg4[%c6_742, %c1_743, %c112_744, %c0_745], %1145 {strides = array<i32>} : memref<8x2x224x224xf32, #tpu.memory_space<vmem>>, vector<1x1x16x224xf32>,
    %1146 = vector.extract_strided_slice %5 {offsets = [6, 5632], sizes = [1, 224], strides = [1, 1]} : vector<8x7168xf32> to vector<1x224xf32>
    %1147 = vector.shape_cast %1146 : vector<1x224xf32> to vector<1x224xf32>
    %1148 = vector.broadcast %1147 : vector<1x224xf32> to vector<16x224xf32>
    %c6_746 = arith.constant 6 : index
    %c1_747 = arith.constant 1 : index
    %c128_748 = arith.constant 128 : index
    %c0_749 = arith.constant 0 : index
    %1149 = vector.load %arg4[%c6_746, %c1_747, %c128_748, %c0_749] : memref<8x2x224x224xf32, #tpu.memory_space<vmem>>, vector<1x1x16x224xf32>
    %1150 = vector.shape_cast %1149 : vector<1x1x16x224xf32> to vector<16x224xf32>
    %1151 = vector.shape_cast %1148 : vector<16x224xf32> to vector<1x1x16x224xf32>
    tpu.vector_store %arg4[%c6_746, %c1_747, %c128_748, %c0_749], %1151 {strides = array<i32>} : memref<8x2x224x224xf32, #tpu.memory_space<vmem>>, vector<1x1x16x224xf32>,
    %1152 = vector.extract_strided_slice %5 {offsets = [6, 5888], sizes = [1, 224], strides = [1, 1]} : vector<8x7168xf32> to vector<1x224xf32>
    %1153 = vector.shape_cast %1152 : vector<1x224xf32> to vector<1x224xf32>
    %1154 = vector.broadcast %1153 : vector<1x224xf32> to vector<16x224xf32>
    %c6_750 = arith.constant 6 : index
    %c1_751 = arith.constant 1 : index
    %c144_752 = arith.constant 144 : index
    %c0_753 = arith.constant 0 : index
    %1155 = vector.load %arg4[%c6_750, %c1_751, %c144_752, %c0_753] : memref<8x2x224x224xf32, #tpu.memory_space<vmem>>, vector<1x1x16x224xf32>
    %1156 = vector.shape_cast %1155 : vector<1x1x16x224xf32> to vector<16x224xf32>
    %1157 = vector.shape_cast %1154 : vector<16x224xf32> to vector<1x1x16x224xf32>
    tpu.vector_store %arg4[%c6_750, %c1_751, %c144_752, %c0_753], %1157 {strides = array<i32>} : memref<8x2x224x224xf32, #tpu.memory_space<vmem>>, vector<1x1x16x224xf32>,
    %1158 = vector.extract_strided_slice %5 {offsets = [6, 6144], sizes = [1, 224], strides = [1, 1]} : vector<8x7168xf32> to vector<1x224xf32>
    %1159 = vector.shape_cast %1158 : vector<1x224xf32> to vector<1x224xf32>
    %1160 = vector.broadcast %1159 : vector<1x224xf32> to vector<16x224xf32>
    %c6_754 = arith.constant 6 : index
    %c1_755 = arith.constant 1 : index
    %c160_756 = arith.constant 160 : index
    %c0_757 = arith.constant 0 : index
    %1161 = vector.load %arg4[%c6_754, %c1_755, %c160_756, %c0_757] : memref<8x2x224x224xf32, #tpu.memory_space<vmem>>, vector<1x1x16x224xf32>
    %1162 = vector.shape_cast %1161 : vector<1x1x16x224xf32> to vector<16x224xf32>
    %1163 = vector.shape_cast %1160 : vector<16x224xf32> to vector<1x1x16x224xf32>
    tpu.vector_store %arg4[%c6_754, %c1_755, %c160_756, %c0_757], %1163 {strides = array<i32>} : memref<8x2x224x224xf32, #tpu.memory_space<vmem>>, vector<1x1x16x224xf32>,
    %1164 = vector.extract_strided_slice %5 {offsets = [6, 6400], sizes = [1, 224], strides = [1, 1]} : vector<8x7168xf32> to vector<1x224xf32>
    %1165 = vector.shape_cast %1164 : vector<1x224xf32> to vector<1x224xf32>
    %1166 = vector.broadcast %1165 : vector<1x224xf32> to vector<16x224xf32>
    %c6_758 = arith.constant 6 : index
    %c1_759 = arith.constant 1 : index
    %c176_760 = arith.constant 176 : index
    %c0_761 = arith.constant 0 : index
    %1167 = vector.load %arg4[%c6_758, %c1_759, %c176_760, %c0_761] : memref<8x2x224x224xf32, #tpu.memory_space<vmem>>, vector<1x1x16x224xf32>
    %1168 = vector.shape_cast %1167 : vector<1x1x16x224xf32> to vector<16x224xf32>
    %1169 = vector.shape_cast %1166 : vector<16x224xf32> to vector<1x1x16x224xf32>
    tpu.vector_store %arg4[%c6_758, %c1_759, %c176_760, %c0_761], %1169 {strides = array<i32>} : memref<8x2x224x224xf32, #tpu.memory_space<vmem>>, vector<1x1x16x224xf32>,
    %1170 = vector.extract_strided_slice %5 {offsets = [6, 6656], sizes = [1, 224], strides = [1, 1]} : vector<8x7168xf32> to vector<1x224xf32>
    %1171 = vector.shape_cast %1170 : vector<1x224xf32> to vector<1x224xf32>
    %1172 = vector.broadcast %1171 : vector<1x224xf32> to vector<16x224xf32>
    %c6_762 = arith.constant 6 : index
    %c1_763 = arith.constant 1 : index
    %c192_764 = arith.constant 192 : index
    %c0_765 = arith.constant 0 : index
    %1173 = vector.load %arg4[%c6_762, %c1_763, %c192_764, %c0_765] : memref<8x2x224x224xf32, #tpu.memory_space<vmem>>, vector<1x1x16x224xf32>
    %1174 = vector.shape_cast %1173 : vector<1x1x16x224xf32> to vector<16x224xf32>
    %1175 = vector.shape_cast %1172 : vector<16x224xf32> to vector<1x1x16x224xf32>
    tpu.vector_store %arg4[%c6_762, %c1_763, %c192_764, %c0_765], %1175 {strides = array<i32>} : memref<8x2x224x224xf32, #tpu.memory_space<vmem>>, vector<1x1x16x224xf32>,
    %1176 = vector.extract_strided_slice %5 {offsets = [6, 6912], sizes = [1, 224], strides = [1, 1]} : vector<8x7168xf32> to vector<1x224xf32>
    %1177 = vector.shape_cast %1176 : vector<1x224xf32> to vector<1x224xf32>
    %1178 = vector.broadcast %1177 : vector<1x224xf32> to vector<16x224xf32>
    %c6_766 = arith.constant 6 : index
    %c1_767 = arith.constant 1 : index
    %c208_768 = arith.constant 208 : index
    %c0_769 = arith.constant 0 : index
    %1179 = vector.load %arg4[%c6_766, %c1_767, %c208_768, %c0_769] : memref<8x2x224x224xf32, #tpu.memory_space<vmem>>, vector<1x1x16x224xf32>
    %1180 = vector.shape_cast %1179 : vector<1x1x16x224xf32> to vector<16x224xf32>
    %1181 = vector.shape_cast %1178 : vector<16x224xf32> to vector<1x1x16x224xf32>
    tpu.vector_store %arg4[%c6_766, %c1_767, %c208_768, %c0_769], %1181 {strides = array<i32>} : memref<8x2x224x224xf32, #tpu.memory_space<vmem>>, vector<1x1x16x224xf32>,
    %1182 = vector.extract_strided_slice %5 {offsets = [7, 0], sizes = [1, 224], strides = [1, 1]} : vector<8x7168xf32> to vector<1x224xf32>
    %1183 = vector.shape_cast %1182 : vector<1x224xf32> to vector<1x224xf32>
    %1184 = vector.broadcast %1183 : vector<1x224xf32> to vector<16x224xf32>
    %c7 = arith.constant 7 : index
    %c0_770 = arith.constant 0 : index
    %c0_771 = arith.constant 0 : index
    %c0_772 = arith.constant 0 : index
    %1185 = vector.load %arg4[%c7, %c0_770, %c0_771, %c0_772] : memref<8x2x224x224xf32, #tpu.memory_space<vmem>>, vector<1x1x16x224xf32>
    %1186 = vector.shape_cast %1185 : vector<1x1x16x224xf32> to vector<16x224xf32>
    %1187 = vector.shape_cast %1184 : vector<16x224xf32> to vector<1x1x16x224xf32>
    tpu.vector_store %arg4[%c7, %c0_770, %c0_771, %c0_772], %1187 {strides = array<i32>} : memref<8x2x224x224xf32, #tpu.memory_space<vmem>>, vector<1x1x16x224xf32>,
    %1188 = vector.extract_strided_slice %5 {offsets = [7, 256], sizes = [1, 224], strides = [1, 1]} : vector<8x7168xf32> to vector<1x224xf32>
    %1189 = vector.shape_cast %1188 : vector<1x224xf32> to vector<1x224xf32>
    %1190 = vector.broadcast %1189 : vector<1x224xf32> to vector<16x224xf32>
    %c7_773 = arith.constant 7 : index
    %c0_774 = arith.constant 0 : index
    %c16_775 = arith.constant 16 : index
    %c0_776 = arith.constant 0 : index
    %1191 = vector.load %arg4[%c7_773, %c0_774, %c16_775, %c0_776] : memref<8x2x224x224xf32, #tpu.memory_space<vmem>>, vector<1x1x16x224xf32>
    %1192 = vector.shape_cast %1191 : vector<1x1x16x224xf32> to vector<16x224xf32>
    %1193 = vector.shape_cast %1190 : vector<16x224xf32> to vector<1x1x16x224xf32>
    tpu.vector_store %arg4[%c7_773, %c0_774, %c16_775, %c0_776], %1193 {strides = array<i32>} : memref<8x2x224x224xf32, #tpu.memory_space<vmem>>, vector<1x1x16x224xf32>,
    %1194 = vector.extract_strided_slice %5 {offsets = [7, 512], sizes = [1, 224], strides = [1, 1]} : vector<8x7168xf32> to vector<1x224xf32>
    %1195 = vector.shape_cast %1194 : vector<1x224xf32> to vector<1x224xf32>
    %1196 = vector.broadcast %1195 : vector<1x224xf32> to vector<16x224xf32>
    %c7_777 = arith.constant 7 : index
    %c0_778 = arith.constant 0 : index
    %c32_779 = arith.constant 32 : index
    %c0_780 = arith.constant 0 : index
    %1197 = vector.load %arg4[%c7_777, %c0_778, %c32_779, %c0_780] : memref<8x2x224x224xf32, #tpu.memory_space<vmem>>, vector<1x1x16x224xf32>
    %1198 = vector.shape_cast %1197 : vector<1x1x16x224xf32> to vector<16x224xf32>
    %1199 = vector.shape_cast %1196 : vector<16x224xf32> to vector<1x1x16x224xf32>
    tpu.vector_store %arg4[%c7_777, %c0_778, %c32_779, %c0_780], %1199 {strides = array<i32>} : memref<8x2x224x224xf32, #tpu.memory_space<vmem>>, vector<1x1x16x224xf32>,
    %1200 = vector.extract_strided_slice %5 {offsets = [7, 768], sizes = [1, 224], strides = [1, 1]} : vector<8x7168xf32> to vector<1x224xf32>
    %1201 = vector.shape_cast %1200 : vector<1x224xf32> to vector<1x224xf32>
    %1202 = vector.broadcast %1201 : vector<1x224xf32> to vector<16x224xf32>
    %c7_781 = arith.constant 7 : index
    %c0_782 = arith.constant 0 : index
    %c48_783 = arith.constant 48 : index
    %c0_784 = arith.constant 0 : index
    %1203 = vector.load %arg4[%c7_781, %c0_782, %c48_783, %c0_784] : memref<8x2x224x224xf32, #tpu.memory_space<vmem>>, vector<1x1x16x224xf32>
    %1204 = vector.shape_cast %1203 : vector<1x1x16x224xf32> to vector<16x224xf32>
    %1205 = vector.shape_cast %1202 : vector<16x224xf32> to vector<1x1x16x224xf32>
    tpu.vector_store %arg4[%c7_781, %c0_782, %c48_783, %c0_784], %1205 {strides = array<i32>} : memref<8x2x224x224xf32, #tpu.memory_space<vmem>>, vector<1x1x16x224xf32>,
    %1206 = vector.extract_strided_slice %5 {offsets = [7, 1024], sizes = [1, 224], strides = [1, 1]} : vector<8x7168xf32> to vector<1x224xf32>
    %1207 = vector.shape_cast %1206 : vector<1x224xf32> to vector<1x224xf32>
    %1208 = vector.broadcast %1207 : vector<1x224xf32> to vector<16x224xf32>
    %c7_785 = arith.constant 7 : index
    %c0_786 = arith.constant 0 : index
    %c64_787 = arith.constant 64 : index
    %c0_788 = arith.constant 0 : index
    %1209 = vector.load %arg4[%c7_785, %c0_786, %c64_787, %c0_788] : memref<8x2x224x224xf32, #tpu.memory_space<vmem>>, vector<1x1x16x224xf32>
    %1210 = vector.shape_cast %1209 : vector<1x1x16x224xf32> to vector<16x224xf32>
    %1211 = vector.shape_cast %1208 : vector<16x224xf32> to vector<1x1x16x224xf32>
    tpu.vector_store %arg4[%c7_785, %c0_786, %c64_787, %c0_788], %1211 {strides = array<i32>} : memref<8x2x224x224xf32, #tpu.memory_space<vmem>>, vector<1x1x16x224xf32>,
    %1212 = vector.extract_strided_slice %5 {offsets = [7, 1280], sizes = [1, 224], strides = [1, 1]} : vector<8x7168xf32> to vector<1x224xf32>
    %1213 = vector.shape_cast %1212 : vector<1x224xf32> to vector<1x224xf32>
    %1214 = vector.broadcast %1213 : vector<1x224xf32> to vector<16x224xf32>
    %c7_789 = arith.constant 7 : index
    %c0_790 = arith.constant 0 : index
    %c80_791 = arith.constant 80 : index
    %c0_792 = arith.constant 0 : index
    %1215 = vector.load %arg4[%c7_789, %c0_790, %c80_791, %c0_792] : memref<8x2x224x224xf32, #tpu.memory_space<vmem>>, vector<1x1x16x224xf32>
    %1216 = vector.shape_cast %1215 : vector<1x1x16x224xf32> to vector<16x224xf32>
    %1217 = vector.shape_cast %1214 : vector<16x224xf32> to vector<1x1x16x224xf32>
    tpu.vector_store %arg4[%c7_789, %c0_790, %c80_791, %c0_792], %1217 {strides = array<i32>} : memref<8x2x224x224xf32, #tpu.memory_space<vmem>>, vector<1x1x16x224xf32>,
    %1218 = vector.extract_strided_slice %5 {offsets = [7, 1536], sizes = [1, 224], strides = [1, 1]} : vector<8x7168xf32> to vector<1x224xf32>
    %1219 = vector.shape_cast %1218 : vector<1x224xf32> to vector<1x224xf32>
    %1220 = vector.broadcast %1219 : vector<1x224xf32> to vector<16x224xf32>
    %c7_793 = arith.constant 7 : index
    %c0_794 = arith.constant 0 : index
    %c96_795 = arith.constant 96 : index
    %c0_796 = arith.constant 0 : index
    %1221 = vector.load %arg4[%c7_793, %c0_794, %c96_795, %c0_796] : memref<8x2x224x224xf32, #tpu.memory_space<vmem>>, vector<1x1x16x224xf32>
    %1222 = vector.shape_cast %1221 : vector<1x1x16x224xf32> to vector<16x224xf32>
    %1223 = vector.shape_cast %1220 : vector<16x224xf32> to vector<1x1x16x224xf32>
    tpu.vector_store %arg4[%c7_793, %c0_794, %c96_795, %c0_796], %1223 {strides = array<i32>} : memref<8x2x224x224xf32, #tpu.memory_space<vmem>>, vector<1x1x16x224xf32>,
    %1224 = vector.extract_strided_slice %5 {offsets = [7, 1792], sizes = [1, 224], strides = [1, 1]} : vector<8x7168xf32> to vector<1x224xf32>
    %1225 = vector.shape_cast %1224 : vector<1x224xf32> to vector<1x224xf32>
    %1226 = vector.broadcast %1225 : vector<1x224xf32> to vector<16x224xf32>
    %c7_797 = arith.constant 7 : index
    %c0_798 = arith.constant 0 : index
    %c112_799 = arith.constant 112 : index
    %c0_800 = arith.constant 0 : index
    %1227 = vector.load %arg4[%c7_797, %c0_798, %c112_799, %c0_800] : memref<8x2x224x224xf32, #tpu.memory_space<vmem>>, vector<1x1x16x224xf32>
    %1228 = vector.shape_cast %1227 : vector<1x1x16x224xf32> to vector<16x224xf32>
    %1229 = vector.shape_cast %1226 : vector<16x224xf32> to vector<1x1x16x224xf32>
    tpu.vector_store %arg4[%c7_797, %c0_798, %c112_799, %c0_800], %1229 {strides = array<i32>} : memref<8x2x224x224xf32, #tpu.memory_space<vmem>>, vector<1x1x16x224xf32>,
    %1230 = vector.extract_strided_slice %5 {offsets = [7, 2048], sizes = [1, 224], strides = [1, 1]} : vector<8x7168xf32> to vector<1x224xf32>
    %1231 = vector.shape_cast %1230 : vector<1x224xf32> to vector<1x224xf32>
    %1232 = vector.broadcast %1231 : vector<1x224xf32> to vector<16x224xf32>
    %c7_801 = arith.constant 7 : index
    %c0_802 = arith.constant 0 : index
    %c128_803 = arith.constant 128 : index
    %c0_804 = arith.constant 0 : index
    %1233 = vector.load %arg4[%c7_801, %c0_802, %c128_803, %c0_804] : memref<8x2x224x224xf32, #tpu.memory_space<vmem>>, vector<1x1x16x224xf32>
    %1234 = vector.shape_cast %1233 : vector<1x1x16x224xf32> to vector<16x224xf32>
    %1235 = vector.shape_cast %1232 : vector<16x224xf32> to vector<1x1x16x224xf32>
    tpu.vector_store %arg4[%c7_801, %c0_802, %c128_803, %c0_804], %1235 {strides = array<i32>} : memref<8x2x224x224xf32, #tpu.memory_space<vmem>>, vector<1x1x16x224xf32>,
    %1236 = vector.extract_strided_slice %5 {offsets = [7, 2304], sizes = [1, 224], strides = [1, 1]} : vector<8x7168xf32> to vector<1x224xf32>
    %1237 = vector.shape_cast %1236 : vector<1x224xf32> to vector<1x224xf32>
    %1238 = vector.broadcast %1237 : vector<1x224xf32> to vector<16x224xf32>
    %c7_805 = arith.constant 7 : index
    %c0_806 = arith.constant 0 : index
    %c144_807 = arith.constant 144 : index
    %c0_808 = arith.constant 0 : index
    %1239 = vector.load %arg4[%c7_805, %c0_806, %c144_807, %c0_808] : memref<8x2x224x224xf32, #tpu.memory_space<vmem>>, vector<1x1x16x224xf32>
    %1240 = vector.shape_cast %1239 : vector<1x1x16x224xf32> to vector<16x224xf32>
    %1241 = vector.shape_cast %1238 : vector<16x224xf32> to vector<1x1x16x224xf32>
    tpu.vector_store %arg4[%c7_805, %c0_806, %c144_807, %c0_808], %1241 {strides = array<i32>} : memref<8x2x224x224xf32, #tpu.memory_space<vmem>>, vector<1x1x16x224xf32>,
    %1242 = vector.extract_strided_slice %5 {offsets = [7, 2560], sizes = [1, 224], strides = [1, 1]} : vector<8x7168xf32> to vector<1x224xf32>
    %1243 = vector.shape_cast %1242 : vector<1x224xf32> to vector<1x224xf32>
    %1244 = vector.broadcast %1243 : vector<1x224xf32> to vector<16x224xf32>
    %c7_809 = arith.constant 7 : index
    %c0_810 = arith.constant 0 : index
    %c160_811 = arith.constant 160 : index
    %c0_812 = arith.constant 0 : index
    %1245 = vector.load %arg4[%c7_809, %c0_810, %c160_811, %c0_812] : memref<8x2x224x224xf32, #tpu.memory_space<vmem>>, vector<1x1x16x224xf32>
    %1246 = vector.shape_cast %1245 : vector<1x1x16x224xf32> to vector<16x224xf32>
    %1247 = vector.shape_cast %1244 : vector<16x224xf32> to vector<1x1x16x224xf32>
    tpu.vector_store %arg4[%c7_809, %c0_810, %c160_811, %c0_812], %1247 {strides = array<i32>} : memref<8x2x224x224xf32, #tpu.memory_space<vmem>>, vector<1x1x16x224xf32>,
    %1248 = vector.extract_strided_slice %5 {offsets = [7, 2816], sizes = [1, 224], strides = [1, 1]} : vector<8x7168xf32> to vector<1x224xf32>
    %1249 = vector.shape_cast %1248 : vector<1x224xf32> to vector<1x224xf32>
    %1250 = vector.broadcast %1249 : vector<1x224xf32> to vector<16x224xf32>
    %c7_813 = arith.constant 7 : index
    %c0_814 = arith.constant 0 : index
    %c176_815 = arith.constant 176 : index
    %c0_816 = arith.constant 0 : index
    %1251 = vector.load %arg4[%c7_813, %c0_814, %c176_815, %c0_816] : memref<8x2x224x224xf32, #tpu.memory_space<vmem>>, vector<1x1x16x224xf32>
    %1252 = vector.shape_cast %1251 : vector<1x1x16x224xf32> to vector<16x224xf32>
    %1253 = vector.shape_cast %1250 : vector<16x224xf32> to vector<1x1x16x224xf32>
    tpu.vector_store %arg4[%c7_813, %c0_814, %c176_815, %c0_816], %1253 {strides = array<i32>} : memref<8x2x224x224xf32, #tpu.memory_space<vmem>>, vector<1x1x16x224xf32>,
    %1254 = vector.extract_strided_slice %5 {offsets = [7, 3072], sizes = [1, 224], strides = [1, 1]} : vector<8x7168xf32> to vector<1x224xf32>
    %1255 = vector.shape_cast %1254 : vector<1x224xf32> to vector<1x224xf32>
    %1256 = vector.broadcast %1255 : vector<1x224xf32> to vector<16x224xf32>
    %c7_817 = arith.constant 7 : index
    %c0_818 = arith.constant 0 : index
    %c192_819 = arith.constant 192 : index
    %c0_820 = arith.constant 0 : index
    %1257 = vector.load %arg4[%c7_817, %c0_818, %c192_819, %c0_820] : memref<8x2x224x224xf32, #tpu.memory_space<vmem>>, vector<1x1x16x224xf32>
    %1258 = vector.shape_cast %1257 : vector<1x1x16x224xf32> to vector<16x224xf32>
    %1259 = vector.shape_cast %1256 : vector<16x224xf32> to vector<1x1x16x224xf32>
    tpu.vector_store %arg4[%c7_817, %c0_818, %c192_819, %c0_820], %1259 {strides = array<i32>} : memref<8x2x224x224xf32, #tpu.memory_space<vmem>>, vector<1x1x16x224xf32>,
    %1260 = vector.extract_strided_slice %5 {offsets = [7, 3328], sizes = [1, 224], strides = [1, 1]} : vector<8x7168xf32> to vector<1x224xf32>
    %1261 = vector.shape_cast %1260 : vector<1x224xf32> to vector<1x224xf32>
    %1262 = vector.broadcast %1261 : vector<1x224xf32> to vector<16x224xf32>
    %c7_821 = arith.constant 7 : index
    %c0_822 = arith.constant 0 : index
    %c208_823 = arith.constant 208 : index
    %c0_824 = arith.constant 0 : index
    %1263 = vector.load %arg4[%c7_821, %c0_822, %c208_823, %c0_824] : memref<8x2x224x224xf32, #tpu.memory_space<vmem>>, vector<1x1x16x224xf32>
    %1264 = vector.shape_cast %1263 : vector<1x1x16x224xf32> to vector<16x224xf32>
    %1265 = vector.shape_cast %1262 : vector<16x224xf32> to vector<1x1x16x224xf32>
    tpu.vector_store %arg4[%c7_821, %c0_822, %c208_823, %c0_824], %1265 {strides = array<i32>} : memref<8x2x224x224xf32, #tpu.memory_space<vmem>>, vector<1x1x16x224xf32>,
    %1266 = vector.extract_strided_slice %5 {offsets = [7, 3584], sizes = [1, 224], strides = [1, 1]} : vector<8x7168xf32> to vector<1x224xf32>
    %1267 = vector.shape_cast %1266 : vector<1x224xf32> to vector<1x224xf32>
    %1268 = vector.broadcast %1267 : vector<1x224xf32> to vector<16x224xf32>
    %c7_825 = arith.constant 7 : index
    %c1_826 = arith.constant 1 : index
    %c0_827 = arith.constant 0 : index
    %c0_828 = arith.constant 0 : index
    %1269 = vector.load %arg4[%c7_825, %c1_826, %c0_827, %c0_828] : memref<8x2x224x224xf32, #tpu.memory_space<vmem>>, vector<1x1x16x224xf32>
    %1270 = vector.shape_cast %1269 : vector<1x1x16x224xf32> to vector<16x224xf32>
    %1271 = vector.shape_cast %1268 : vector<16x224xf32> to vector<1x1x16x224xf32>
    tpu.vector_store %arg4[%c7_825, %c1_826, %c0_827, %c0_828], %1271 {strides = array<i32>} : memref<8x2x224x224xf32, #tpu.memory_space<vmem>>, vector<1x1x16x224xf32>,
    %1272 = vector.extract_strided_slice %5 {offsets = [7, 3840], sizes = [1, 224], strides = [1, 1]} : vector<8x7168xf32> to vector<1x224xf32>
    %1273 = vector.shape_cast %1272 : vector<1x224xf32> to vector<1x224xf32>
    %1274 = vector.broadcast %1273 : vector<1x224xf32> to vector<16x224xf32>
    %c7_829 = arith.constant 7 : index
    %c1_830 = arith.constant 1 : index
    %c16_831 = arith.constant 16 : index
    %c0_832 = arith.constant 0 : index
    %1275 = vector.load %arg4[%c7_829, %c1_830, %c16_831, %c0_832] : memref<8x2x224x224xf32, #tpu.memory_space<vmem>>, vector<1x1x16x224xf32>
    %1276 = vector.shape_cast %1275 : vector<1x1x16x224xf32> to vector<16x224xf32>
    %1277 = vector.shape_cast %1274 : vector<16x224xf32> to vector<1x1x16x224xf32>
    tpu.vector_store %arg4[%c7_829, %c1_830, %c16_831, %c0_832], %1277 {strides = array<i32>} : memref<8x2x224x224xf32, #tpu.memory_space<vmem>>, vector<1x1x16x224xf32>,
    %1278 = vector.extract_strided_slice %5 {offsets = [7, 4096], sizes = [1, 224], strides = [1, 1]} : vector<8x7168xf32> to vector<1x224xf32>
    %1279 = vector.shape_cast %1278 : vector<1x224xf32> to vector<1x224xf32>
    %1280 = vector.broadcast %1279 : vector<1x224xf32> to vector<16x224xf32>
    %c7_833 = arith.constant 7 : index
    %c1_834 = arith.constant 1 : index
    %c32_835 = arith.constant 32 : index
    %c0_836 = arith.constant 0 : index
    %1281 = vector.load %arg4[%c7_833, %c1_834, %c32_835, %c0_836] : memref<8x2x224x224xf32, #tpu.memory_space<vmem>>, vector<1x1x16x224xf32>
    %1282 = vector.shape_cast %1281 : vector<1x1x16x224xf32> to vector<16x224xf32>
    %1283 = vector.shape_cast %1280 : vector<16x224xf32> to vector<1x1x16x224xf32>
    tpu.vector_store %arg4[%c7_833, %c1_834, %c32_835, %c0_836], %1283 {strides = array<i32>} : memref<8x2x224x224xf32, #tpu.memory_space<vmem>>, vector<1x1x16x224xf32>,
    %1284 = vector.extract_strided_slice %5 {offsets = [7, 4352], sizes = [1, 224], strides = [1, 1]} : vector<8x7168xf32> to vector<1x224xf32>
    %1285 = vector.shape_cast %1284 : vector<1x224xf32> to vector<1x224xf32>
    %1286 = vector.broadcast %1285 : vector<1x224xf32> to vector<16x224xf32>
    %c7_837 = arith.constant 7 : index
    %c1_838 = arith.constant 1 : index
    %c48_839 = arith.constant 48 : index
    %c0_840 = arith.constant 0 : index
    %1287 = vector.load %arg4[%c7_837, %c1_838, %c48_839, %c0_840] : memref<8x2x224x224xf32, #tpu.memory_space<vmem>>, vector<1x1x16x224xf32>
    %1288 = vector.shape_cast %1287 : vector<1x1x16x224xf32> to vector<16x224xf32>
    %1289 = vector.shape_cast %1286 : vector<16x224xf32> to vector<1x1x16x224xf32>
    tpu.vector_store %arg4[%c7_837, %c1_838, %c48_839, %c0_840], %1289 {strides = array<i32>} : memref<8x2x224x224xf32, #tpu.memory_space<vmem>>, vector<1x1x16x224xf32>,
    %1290 = vector.extract_strided_slice %5 {offsets = [7, 4608], sizes = [1, 224], strides = [1, 1]} : vector<8x7168xf32> to vector<1x224xf32>
    %1291 = vector.shape_cast %1290 : vector<1x224xf32> to vector<1x224xf32>
    %1292 = vector.broadcast %1291 : vector<1x224xf32> to vector<16x224xf32>
    %c7_841 = arith.constant 7 : index
    %c1_842 = arith.constant 1 : index
    %c64_843 = arith.constant 64 : index
    %c0_844 = arith.constant 0 : index
    %1293 = vector.load %arg4[%c7_841, %c1_842, %c64_843, %c0_844] : memref<8x2x224x224xf32, #tpu.memory_space<vmem>>, vector<1x1x16x224xf32>
    %1294 = vector.shape_cast %1293 : vector<1x1x16x224xf32> to vector<16x224xf32>
    %1295 = vector.shape_cast %1292 : vector<16x224xf32> to vector<1x1x16x224xf32>
    tpu.vector_store %arg4[%c7_841, %c1_842, %c64_843, %c0_844], %1295 {strides = array<i32>} : memref<8x2x224x224xf32, #tpu.memory_space<vmem>>, vector<1x1x16x224xf32>,
    %1296 = vector.extract_strided_slice %5 {offsets = [7, 4864], sizes = [1, 224], strides = [1, 1]} : vector<8x7168xf32> to vector<1x224xf32>
    %1297 = vector.shape_cast %1296 : vector<1x224xf32> to vector<1x224xf32>
    %1298 = vector.broadcast %1297 : vector<1x224xf32> to vector<16x224xf32>
    %c7_845 = arith.constant 7 : index
    %c1_846 = arith.constant 1 : index
    %c80_847 = arith.constant 80 : index
    %c0_848 = arith.constant 0 : index
    %1299 = vector.load %arg4[%c7_845, %c1_846, %c80_847, %c0_848] : memref<8x2x224x224xf32, #tpu.memory_space<vmem>>, vector<1x1x16x224xf32>
    %1300 = vector.shape_cast %1299 : vector<1x1x16x224xf32> to vector<16x224xf32>
    %1301 = vector.shape_cast %1298 : vector<16x224xf32> to vector<1x1x16x224xf32>
    tpu.vector_store %arg4[%c7_845, %c1_846, %c80_847, %c0_848], %1301 {strides = array<i32>} : memref<8x2x224x224xf32, #tpu.memory_space<vmem>>, vector<1x1x16x224xf32>,
    %1302 = vector.extract_strided_slice %5 {offsets = [7, 5120], sizes = [1, 224], strides = [1, 1]} : vector<8x7168xf32> to vector<1x224xf32>
    %1303 = vector.shape_cast %1302 : vector<1x224xf32> to vector<1x224xf32>
    %1304 = vector.broadcast %1303 : vector<1x224xf32> to vector<16x224xf32>
    %c7_849 = arith.constant 7 : index
    %c1_850 = arith.constant 1 : index
    %c96_851 = arith.constant 96 : index
    %c0_852 = arith.constant 0 : index
    %1305 = vector.load %arg4[%c7_849, %c1_850, %c96_851, %c0_852] : memref<8x2x224x224xf32, #tpu.memory_space<vmem>>, vector<1x1x16x224xf32>
    %1306 = vector.shape_cast %1305 : vector<1x1x16x224xf32> to vector<16x224xf32>
    %1307 = vector.shape_cast %1304 : vector<16x224xf32> to vector<1x1x16x224xf32>
    tpu.vector_store %arg4[%c7_849, %c1_850, %c96_851, %c0_852], %1307 {strides = array<i32>} : memref<8x2x224x224xf32, #tpu.memory_space<vmem>>, vector<1x1x16x224xf32>,
    %1308 = vector.extract_strided_slice %5 {offsets = [7, 5376], sizes = [1, 224], strides = [1, 1]} : vector<8x7168xf32> to vector<1x224xf32>
    %1309 = vector.shape_cast %1308 : vector<1x224xf32> to vector<1x224xf32>
    %1310 = vector.broadcast %1309 : vector<1x224xf32> to vector<16x224xf32>
    %c7_853 = arith.constant 7 : index
    %c1_854 = arith.constant 1 : index
    %c112_855 = arith.constant 112 : index
    %c0_856 = arith.constant 0 : index
    %1311 = vector.load %arg4[%c7_853, %c1_854, %c112_855, %c0_856] : memref<8x2x224x224xf32, #tpu.memory_space<vmem>>, vector<1x1x16x224xf32>
    %1312 = vector.shape_cast %1311 : vector<1x1x16x224xf32> to vector<16x224xf32>
    %1313 = vector.shape_cast %1310 : vector<16x224xf32> to vector<1x1x16x224xf32>
    tpu.vector_store %arg4[%c7_853, %c1_854, %c112_855, %c0_856], %1313 {strides = array<i32>} : memref<8x2x224x224xf32, #tpu.memory_space<vmem>>, vector<1x1x16x224xf32>,
    %1314 = vector.extract_strided_slice %5 {offsets = [7, 5632], sizes = [1, 224], strides = [1, 1]} : vector<8x7168xf32> to vector<1x224xf32>
    %1315 = vector.shape_cast %1314 : vector<1x224xf32> to vector<1x224xf32>
    %1316 = vector.broadcast %1315 : vector<1x224xf32> to vector<16x224xf32>
    %c7_857 = arith.constant 7 : index
    %c1_858 = arith.constant 1 : index
    %c128_859 = arith.constant 128 : index
    %c0_860 = arith.constant 0 : index
    %1317 = vector.load %arg4[%c7_857, %c1_858, %c128_859, %c0_860] : memref<8x2x224x224xf32, #tpu.memory_space<vmem>>, vector<1x1x16x224xf32>
    %1318 = vector.shape_cast %1317 : vector<1x1x16x224xf32> to vector<16x224xf32>
    %1319 = vector.shape_cast %1316 : vector<16x224xf32> to vector<1x1x16x224xf32>
    tpu.vector_store %arg4[%c7_857, %c1_858, %c128_859, %c0_860], %1319 {strides = array<i32>} : memref<8x2x224x224xf32, #tpu.memory_space<vmem>>, vector<1x1x16x224xf32>,
    %1320 = vector.extract_strided_slice %5 {offsets = [7, 5888], sizes = [1, 224], strides = [1, 1]} : vector<8x7168xf32> to vector<1x224xf32>
    %1321 = vector.shape_cast %1320 : vector<1x224xf32> to vector<1x224xf32>
    %1322 = vector.broadcast %1321 : vector<1x224xf32> to vector<16x224xf32>
    %c7_861 = arith.constant 7 : index
    %c1_862 = arith.constant 1 : index
    %c144_863 = arith.constant 144 : index
    %c0_864 = arith.constant 0 : index
    %1323 = vector.load %arg4[%c7_861, %c1_862, %c144_863, %c0_864] : memref<8x2x224x224xf32, #tpu.memory_space<vmem>>, vector<1x1x16x224xf32>
    %1324 = vector.shape_cast %1323 : vector<1x1x16x224xf32> to vector<16x224xf32>
    %1325 = vector.shape_cast %1322 : vector<16x224xf32> to vector<1x1x16x224xf32>
    tpu.vector_store %arg4[%c7_861, %c1_862, %c144_863, %c0_864], %1325 {strides = array<i32>} : memref<8x2x224x224xf32, #tpu.memory_space<vmem>>, vector<1x1x16x224xf32>,
    %1326 = vector.extract_strided_slice %5 {offsets = [7, 6144], sizes = [1, 224], strides = [1, 1]} : vector<8x7168xf32> to vector<1x224xf32>
    %1327 = vector.shape_cast %1326 : vector<1x224xf32> to vector<1x224xf32>
    %1328 = vector.broadcast %1327 : vector<1x224xf32> to vector<16x224xf32>
    %c7_865 = arith.constant 7 : index
    %c1_866 = arith.constant 1 : index
    %c160_867 = arith.constant 160 : index
    %c0_868 = arith.constant 0 : index
    %1329 = vector.load %arg4[%c7_865, %c1_866, %c160_867, %c0_868] : memref<8x2x224x224xf32, #tpu.memory_space<vmem>>, vector<1x1x16x224xf32>
    %1330 = vector.shape_cast %1329 : vector<1x1x16x224xf32> to vector<16x224xf32>
    %1331 = vector.shape_cast %1328 : vector<16x224xf32> to vector<1x1x16x224xf32>
    tpu.vector_store %arg4[%c7_865, %c1_866, %c160_867, %c0_868], %1331 {strides = array<i32>} : memref<8x2x224x224xf32, #tpu.memory_space<vmem>>, vector<1x1x16x224xf32>,
    %1332 = vector.extract_strided_slice %5 {offsets = [7, 6400], sizes = [1, 224], strides = [1, 1]} : vector<8x7168xf32> to vector<1x224xf32>
    %1333 = vector.shape_cast %1332 : vector<1x224xf32> to vector<1x224xf32>
    %1334 = vector.broadcast %1333 : vector<1x224xf32> to vector<16x224xf32>
    %c7_869 = arith.constant 7 : index
    %c1_870 = arith.constant 1 : index
    %c176_871 = arith.constant 176 : index
    %c0_872 = arith.constant 0 : index
    %1335 = vector.load %arg4[%c7_869, %c1_870, %c176_871, %c0_872] : memref<8x2x224x224xf32, #tpu.memory_space<vmem>>, vector<1x1x16x224xf32>
    %1336 = vector.shape_cast %1335 : vector<1x1x16x224xf32> to vector<16x224xf32>
    %1337 = vector.shape_cast %1334 : vector<16x224xf32> to vector<1x1x16x224xf32>
    tpu.vector_store %arg4[%c7_869, %c1_870, %c176_871, %c0_872], %1337 {strides = array<i32>} : memref<8x2x224x224xf32, #tpu.memory_space<vmem>>, vector<1x1x16x224xf32>,
    %1338 = vector.extract_strided_slice %5 {offsets = [7, 6656], sizes = [1, 224], strides = [1, 1]} : vector<8x7168xf32> to vector<1x224xf32>
    %1339 = vector.shape_cast %1338 : vector<1x224xf32> to vector<1x224xf32>
    %1340 = vector.broadcast %1339 : vector<1x224xf32> to vector<16x224xf32>
    %c7_873 = arith.constant 7 : index
    %c1_874 = arith.constant 1 : index
    %c192_875 = arith.constant 192 : index
    %c0_876 = arith.constant 0 : index
    %1341 = vector.load %arg4[%c7_873, %c1_874, %c192_875, %c0_876] : memref<8x2x224x224xf32, #tpu.memory_space<vmem>>, vector<1x1x16x224xf32>
    %1342 = vector.shape_cast %1341 : vector<1x1x16x224xf32> to vector<16x224xf32>
    %1343 = vector.shape_cast %1340 : vector<16x224xf32> to vector<1x1x16x224xf32>
    tpu.vector_store %arg4[%c7_873, %c1_874, %c192_875, %c0_876], %1343 {strides = array<i32>} : memref<8x2x224x224xf32, #tpu.memory_space<vmem>>, vector<1x1x16x224xf32>,
    %1344 = vector.extract_strided_slice %5 {offsets = [7, 6912], sizes = [1, 224], strides = [1, 1]} : vector<8x7168xf32> to vector<1x224xf32>
    %1345 = vector.shape_cast %1344 : vector<1x224xf32> to vector<1x224xf32>
    %1346 = vector.broadcast %1345 : vector<1x224xf32> to vector<16x224xf32>
    %c7_877 = arith.constant 7 : index
    %c1_878 = arith.constant 1 : index
    %c208_879 = arith.constant 208 : index
    %c0_880 = arith.constant 0 : index
    %1347 = vector.load %arg4[%c7_877, %c1_878, %c208_879, %c0_880] : memref<8x2x224x224xf32, #tpu.memory_space<vmem>>, vector<1x1x16x224xf32>
    %1348 = vector.shape_cast %1347 : vector<1x1x16x224xf32> to vector<16x224xf32>
    %1349 = vector.shape_cast %1346 : vector<16x224xf32> to vector<1x1x16x224xf32>
    tpu.vector_store %arg4[%c7_877, %c1_878, %c208_879, %c0_880], %1349 {strides = array<i32>} : memref<8x2x224x224xf32, #tpu.memory_space<vmem>>, vector<1x1x16x224xf32>,
    return
  }
  func.func @transform_0(%arg0: i32) -> (i32, i32) {
    %c0_i32 = arith.constant 0 : i32
    %c0_i32_0 = arith.constant 0 : i32
    return %arg0, %c0_i32 : i32, i32
  }
  func.func @transform_1(%arg0: i32) -> (i32, i32) {
    %c0_i32 = arith.constant 0 : i32
    %c0_i32_0 = arith.constant 0 : i32
    %c0_i32_1 = arith.constant 0 : i32
    return %c0_i32, %c0_i32_0 : i32, i32
  }
  func.func @transform_2(%arg0: i32) -> (i32, i32) {
    %c0_i32 = arith.constant 0 : i32
    %c0_i32_0 = arith.constant 0 : i32
    %c0_i32_1 = arith.constant 0 : i32
    return %c0_i32, %c0_i32_0 : i32, i32
  }
  func.func @transform_3(%arg0: i32) -> (i32, i32, i32, i32) {
    %c0_i32 = arith.constant 0 : i32
    %c0_i32_0 = arith.constant 0 : i32
    %c0_i32_1 = arith.constant 0 : i32
    %c0_i32_2 = arith.constant 0 : i32
    return %arg0, %c0_i32, %c0_i32_0, %c0_i32_1 : i32, i32, i32, i32
  }
}

</mosaic_0001>

<bundles_post_ra>
// kernel: tpu_custom_call.1
= control target key start
LH: loop header
LB: loop body
LE: loop exit
PB: predicated region body
PF: predicated region fallthrough
CT: control target
= control target key end

     0   :  { %8 = vsyncpa [#allocation3], 0  ;;  %s6014_s0 = inlined_call_operand.hbm [shape: f32[16,32], index: 0, kind: input, shape index: {}]   ;;  %s6015_s1 = inlined_call_operand.hbm [shape: f32[32,7168], index: 1, kind: input, shape index: {}]   ;;  %s6016_s2 = inlined_call_operand.hbm [shape: f32[1,7168], index: 2, kind: input, shape index: {}]   ;;  %s6017_s3 = inlined_call_operand.hbm [shape: f32[16,2,224,224], index: 3, kind: output, shape index: {}]  }
   0x1   :  { %10 = vsyncpa [#allocation3 + $0x1], 0 }
   0x2   :  { %11 = vsyncpa [#allocation6], 0 }
   0x3   :  { %12 = vsyncpa [#allocation4], 0 }
   0x4   :  { %14 = vsyncpa [#allocation4 + $0x1], 0  ;;  %s4337_s12 = smov 0   ;;  %s4339_s13 = smov 0  }
   0x5   :  { %s4341_s14 = smov 0   ;;  %s4343_s15 = smov 0  }
   0x6 LB: > { %s130_s18 = sshll.u32 %s6015_s1, 4  ;;  %s4361_s19 = sadd.s32 4294967295, %s4309_s15   ;;  %s4309_s15 = sphi %s4343_s15, %s6028_s15   ;;  %s4305_s14 = sphi %s4341_s14, %s6027_s14   ;;  %s4301_s13 = sphi %s4339_s13, %s6026_s13   ;;  %s4297_s12 = sphi %s4337_s12, %s6025_s12   ;;  %s131_s18 = int_to_ptr.hbm [resolvable:$true] %s130_s18 }
   0x7   : > { %p3165_p0 = scmp.ge.s32.totalorder %s4309_s15, 1  ;;  %p41_p1 = scmp.eq.s32.totalorder %s4361_s19, 0 }
   0x8   : > { %p119_p2 = scmp.lt.s32.totalorder %s4309_s15, 3  ;;  %s4311_s21 = smov [#allocation5]  }
   0x9   : > { %s132_s22 = sshll.u32 %s4311_s21, 4  ;;  %s145_s25 = sshll.u32 %s6016_s2, 4  ;;  %s133_s22 = int_to_ptr.vmem [resolvable:$true] %s132_s22  ;;  %s146_s25 = int_to_ptr.hbm [resolvable:$true] %s145_s25 }
   0xa   : > { %p4366_p3 = pnand %p3165_p0, %p119_p2  ;;  %s4312_s26 = smov [#allocation7]  }
   0xb   : > { %s147_s27 = sshll.u32 %s4312_s26, 4  ;;  %s4313_s28 = smov 7168   ;;  %s148_s27 = int_to_ptr.vmem [resolvable:$true] %s147_s27 }
   0xc   : > { %p4090_p4 = pneg %p4366_p3  ;;  %s4314_s29 = smov 448  }
   0xd   : > { %s3164_s30 = sadd.s32 4294967294, %s4309_s15   ;;  %s4380_s4 = sadd.s32 1, %s4309_s15  }
   0xe   : > { %p4091_p6 = pnand %p4090_p4, %p41_p1  ;;  %s24_s5 = ssub.s32 %s4309_s15, %s4380_s4 }
   0xf   : > { %s27_s6 = sadd.s32 1, %s4305_s14  ;;  %p25_p7 = scmp.eq.s32.totalorder %s24_s5, 0 }
  0x10   : > { %4093 = dma.hbm_to_vmem [thread:$0]  (!%p4091_p6), %s131_s18, 28672, %s133_s22, [#allocation6], %s4313_s28, %s4313_s28, %s4314_s29  }
  0x11   : > { %4096 = dma.hbm_to_vmem [thread:$0]  (!%p4091_p6), %s146_s25, 896, %s148_s27, [#allocation6]  }
  0x12   : > { %p34_p8 = scmp.ne.s32.totalorder %s4305_s14, %s4301_s13  ;;  %p35_p9 = scmp.eq.s32.totalorder %s4309_s15, 0 }
  0x13   : > { %p40_p10 = scmp.ne.s32.totalorder %s4301_s13, %s4297_s12  ;;  %p106_p13 = scmp.eq.s32.totalorder %s4361_s19, 1 }
  0x14   : > { %s4391_s7 = scalar_select %p25_p7, %s4305_s14, %s27_s6  }
  0x15   : > { %p4393_p11 = por %p35_p9, %p34_p8  ;;  %p4399_p12 = por %p41_p1, %p40_p10 }
  0x16   : > { %p112_p0 = scmp.eq.s32.totalorder %s3164_s30, 1  ;;  %p4107_p2 = scmp.lt.s32.totalorder %s4309_s15, 2 }
  0x17   : > { %s158_s10 = sand.u32 1, %s4305_s14   ;;  %p4406_p4 = por %p106_p13, %p34_p8 }
  0x18   : > { %p4410_p6 = por %p112_p0, %p40_p10  ;;  %s3169_s17 = sshll.u32 %s158_s10, 3 }
  0x19   : > { %s3170_s18 = sshll.u32 %s4309_s15, 3  ;;  %s162_s24 = scalar_lea.vmem [#allocation2], %s3169_s17 }
  0x1a   : > { %s166_s23 = scalar_lea.hbm %s6014_s0, %s3170_s18  ;;  %s170_s25 = sshll.u32 %s162_s24, 4  ;;  %s171_s25 = int_to_ptr.vmem [resolvable:$true] %s170_s25 }
  0x1b   : > { %s168_s26 = sshll.u32 %s166_s23, 4  ;;  %p4420_p7 = pnand %p4107_p2, %p4393_p11  ;;  %s169_s26 = int_to_ptr.hbm [resolvable:$true] %s168_s26 }
  0x1c   : > { %s159_s28 = scalar_lea.sflag [#allocation3], %s158_s10  ;;  %s4209_s29 = sshra.s32 %s169_s26, 4  ;;  %s4210_s29 = int_to_ptr.hbm [resolvable:$true] %s4209_s29 }
  0x1d   : > { %s4211_s30 = scalar_lea.hbm %s4210_s29, 8  ;;  %p4213_p9 = pneg %p4420_p7 }
  0x1e   : > { %p4212_p8 = scmp.ne.s32.totalorder %s4210_s29, %s4211_s30  ;;  %s4216_s17 = scalar_lea.hbm %s6014_s0, 16 }
  0x1f   : > { %p4217_p11 = scmp.lt.s32.totalorder %s4210_s29, %s6014_s0  ;;  %p4218_p0 = scmp.lt.s32.totalorder %s4216_s17, %s4211_s30 }
  0x20   : > { %p4214_p10 = pnand %p4213_p9, %p4212_p8 }
  0x21   : > { %p4219_p2 = por %p4218_p0, %p4217_p11 }
  0x22   : > { %p4215_p13 = pneg %p4214_p10 }
  0x24   : > { %p4220_p5 = pnand %p4219_p2, %p4215_p13 }
  0x26   : > { %4223 = shalt.err (!%p4220_p5)
}
  0x27   : > { %4100 = dma.hbm_to_vmem [thread:$0]  (!%p4420_p7), %s169_s26, 128, %s171_s25, %s159_s28  }
  0x28   : > { %179 = sbr.rel (%p4366_p3) target bundleno = 1089 (0x441), region = 32  ;;  %s4437_s10 = sand.u32 (!%p4366_p3), 1, %s4301_s13  }
  0x29   : > { %s3172_s21 = sshll.u32 (!%p4366_p3), %s4437_s10, 3  ;;  %s182_s22 = scalar_lea.sflag (!%p4366_p3), [#allocation3], %s4437_s10 }
  0x2a   : > { %s185_s23 = scalar_lea.vmem (!%p4366_p3), [#allocation2], %s3172_s21 }
  0x2d   : > { %4284 = dma.done.wait (%p4399_p12), %s182_s22, 128  }
  0x2e   : > { %4286 = vsyncadd (%p4399_p12), %s182_s22, 4294967168 }
  0x2f   : > { %4288 = dma.done.wait (%p41_p1), [#allocation6], 29568  }
  0x30   : > { %4290 = vsyncadd (%p41_p1), [#allocation6], 4294937728  ;;  %v391_v0 = vld [vmem:[#allocation5 + $0x550] sm:$0xff]  ;;  %v392_v1 = vld [vmem:[#allocation5 + $0x558] sm:$0xff]  ;;  %vm571_vm0 = vcmask 261120   ;;  %s4076_s20 = smul.u32 7168, %s4437_s10 }
  0x31   : > { %v335_v2 = vld [vmem:[#allocation5 + $0x390] sm:$0xff]  ;;  %627 = vmatpush.msra.mxu2 %v391_v0  ;;  %647 = vmatpush.msra.mxu3 %v392_v1  ;;  %v336_v3 = vld [vmem:[#allocation5 + $0x398] sm:$0xff]  ;;  %v389_v6 = vld [vmem:[#allocation5 + $0x540] sm:$0xff]  ;;  %vm1698_vm1 = vcmask 785408   ;;  %s4077_s24 = smul.u32 7168, %s4361_s19  ;;  %s3056_s29 = scalar_lea.sflag [#allocation4], %s4437_s10 }
  0x32   : > { %v279_v4 = vld [vmem:[#allocation5 + $0x1d0] sm:$0xff]  ;;  %v280_v5 = vld [vmem:[#allocation5 + $0x1d8] sm:$0xff]  ;;  %v390_v7 = vld [vmem:[#allocation5 + $0x548] sm:$0xff]  ;;  %587 = vmatpush.msra.mxu0 %v389_v6  ;;  %s4567_s9 = scalar_lea.vmem [#allocation8], %s4076_s20  ;;  %s4259_s18 = scalar_lea.hbm %s6017_s3, 14336 }
  0x33   : > { %628 = vmatpush.msra.mxu2 %v335_v2  ;;  %648 = vmatpush.msra.mxu3 %v336_v3  ;;  %v223_v8 = vld [vmem:[#allocation5 + $0x10] sm:$0xff]  ;;  %v224_v9 = vld [vmem:[#allocation5 + $0x18] sm:$0xff]  ;;  %v333_v10 = vld [vmem:[#allocation5 + $0x380] sm:$0xff]  ;;  %s3068_s27 = scalar_lea.hbm %s6017_s3, %s4077_s24  ;;  %s3069_s19 = sshll.u32 %s4567_s9, 4  ;;  %s3070_s19 = int_to_ptr.vmem [resolvable:$true] %s3069_s19 }
  0x34   : > { %607 = vmatpush.msra.mxu1 %v390_v7  ;;  %v334_v11 = vld [vmem:[#allocation5 + $0x388] sm:$0xff]  ;;  %v4449_v12 = vld [vmem:[%s185_s23] sm:$0xff]  ;;  %588 = vmatpush.msra.mxu0 %v333_v10  ;;  %v277_v15 = vld [vmem:[#allocation5 + $0x1c0] sm:$0xff]  ;;  %s3071_s28 = sshll.u32 %s3068_s27, 4  ;;  %s3072_s28 = int_to_ptr.hbm [resolvable:$true] %s3071_s28 }
  0x35   : > { %629 = vmatpush.msra.mxu2 %v279_v4  ;;  %649 = vmatpush.msra.mxu3 %v280_v5  ;;  %v395_v13 = vld [vmem:[#allocation5 + $0x570] sm:$0xff]  ;;  %v396_v14 = vld [vmem:[#allocation5 + $0x578] sm:$0xff]  ;;  %v278_v16 = vld [vmem:[#allocation5 + $0x1c8] sm:$0xff]  ;;  %s4253_s30 = sshra.s32 %s3072_s28, 4  ;;  %s4254_s30 = int_to_ptr.hbm [resolvable:$true] %s4253_s30 }
  0x36   : > { %608 = vmatpush.msra.mxu1 %v334_v11  ;;  %v339_v17 = vld [vmem:[#allocation5 + $0x3b0] sm:$0xff]  ;;  %v340_v18 = vld [vmem:[#allocation5 + $0x3b8] sm:$0xff]  ;;  %v221_v19 = vld [vmem:[#allocation5] sm:$0xff]  ;;  %589 = vmatpush.msra.mxu0 %v277_v15  ;;  %s4255_s5 = scalar_lea.hbm %s4254_s30, 7168  ;;  %p4260_p12 = scmp.lt.s32.totalorder %s4254_s30, %s6017_s3 }
  0x37   : > { %630 = vmatpush.msra.mxu2 %v223_v8  ;;  %650 = vmatpush.msra.mxu3 %v224_v9  ;;  %v222_v20 = vld [vmem:[#allocation5 + $0x8] sm:$0xff]  ;;  %v283_v21 = vld [vmem:[#allocation5 + $0x1f0] sm:$0xff]  ;;  %v284_v22 = vld [vmem:[#allocation5 + $0x1f8] sm:$0xff]  ;;  %p4256_p1 = scmp.ne.s32.totalorder %s4254_s30, %s4255_s5  ;;  %p4261_p7 = scmp.lt.s32.totalorder %s4259_s18, %s4255_s5 }
  0x38   : > { %3177 = vmatmul.msk.f32.vlgmr.msra.gmra.mxu2 %vm571_vm0, %v4449_v12  ;;  %3178 = vmatmul.msk.f32.vlgmr.msra.gmra.mxu3 %vm571_vm0, %v4449_v12  ;;  %v393_v23 = vld [vmem:[#allocation5 + $0x560] sm:$0xff]  ;;  %v394_v24 = vld [vmem:[#allocation5 + $0x568] sm:$0xff]  ;;  %v227_v25 = vld [vmem:[#allocation5 + $0x30] sm:$0xff] }
  0x39   : > { %707 = vmatpush.msrb.mxu2 %v395_v13  ;;  %727 = vmatpush.msrb.mxu3 %v396_v14  ;;  %v228_v26 = vld [vmem:[#allocation5 + $0x38] sm:$0xff]  ;;  %v337_v27 = vld [vmem:[#allocation5 + $0x3a0] sm:$0xff]  ;;  %v338_v28 = vld [vmem:[#allocation5 + $0x3a8] sm:$0xff]  ;;  %p4257_p3 = pnand %p4256_p1, %p4406_p4  ;;  %p4262_p8 = por %p4261_p7, %p4260_p12 }
  0x3a   : > { %609 = vmatpush.msra.mxu1 %v278_v16  ;;  %590 = vmatpush.msra.mxu0 %v221_v19  ;;  %v399_v29 = vld [vmem:[#allocation5 + $0x590] sm:$0xff]  ;;  %v400_v30 = vld [vmem:[#allocation5 + $0x598] sm:$0xff]  ;;  %v281_v31 = vld [vmem:[#allocation5 + $0x1e0] sm:$0xff] }
  0x3b   : > { %708 = vmatpush.msrb.mxu2 %v339_v17  ;;  %728 = vmatpush.msrb.mxu3 %v340_v18  ;;  %v282_v32 = vld [vmem:[#allocation5 + $0x1e8] sm:$0xff]  ;;  %v343_v33 = vld [vmem:[#allocation5 + $0x3d0] sm:$0xff]  ;;  %v344_v34 = vld [vmem:[#allocation5 + $0x3d8] sm:$0xff]  ;;  %p4258_p5 = pneg %p4257_p3 }
  0x3c   : > { %610 = vmatpush.msra.mxu1 %v222_v20  ;;  %3175 = vmatmul.msk.f32.vlgmr.msra.gmra.mxu0 %vm571_vm0, %v4449_v12  ;;  %v225_v35 = vld [vmem:[#allocation5 + $0x20] sm:$0xff]  ;;  %v226_v36 = vld [vmem:[#allocation5 + $0x28] sm:$0xff]  ;;  %v287_v37 = vld [vmem:[#allocation5 + $0x210] sm:$0xff] }
  0x3d   : > { %709 = vmatpush.msrb.mxu2 %v283_v21  ;;  %729 = vmatpush.msrb.mxu3 %v284_v22  ;;  %v288_v38 = vld [vmem:[#allocation5 + $0x218] sm:$0xff]  ;;  %v397_v39 = vld [vmem:[#allocation5 + $0x580] sm:$0xff]  ;;  %v398_v40 = vld [vmem:[#allocation5 + $0x588] sm:$0xff]  ;;  %p4263_p9 = pnand %p4262_p8, %p4258_p5 }
  0x3e   : > { %3176 = vmatmul.msk.f32.vlgmr.msra.gmra.mxu1 %vm571_vm0, %v4449_v12  ;;  %667 = vmatpush.msrb.mxu0 %v393_v23  ;;  %v231_v41 = vld [vmem:[#allocation5 + $0x50] sm:$0xff]  ;;  %v232_v42 = vld [vmem:[#allocation5 + $0x58] sm:$0xff]  ;;  %v341_v43 = vld [vmem:[#allocation5 + $0x3c0] sm:$0xff] }
  0x3f   : > { %687 = vmatpush.msrb.mxu1 %v394_v24  ;;  %710 = vmatpush.msrb.mxu2 %v227_v25  ;;  %v342_v44 = vld [vmem:[#allocation5 + $0x3c8] sm:$0xff]  ;;  %v403_v45 = vld [vmem:[#allocation5 + $0x5b0] sm:$0xff]  ;;  %v404_v46 = vld [vmem:[#allocation5 + $0x5b8] sm:$0xff] }
  0x40   : > { %730 = vmatpush.msrb.mxu3 %v228_v26  ;;  %668 = vmatpush.msrb.mxu0 %v337_v27  ;;  %v285_v47 = vld [vmem:[#allocation5 + $0x200] sm:$0xff]  ;;  %v286_v48 = vld [vmem:[#allocation5 + $0x208] sm:$0xff]  ;;  %v347_v49 = vld [vmem:[#allocation5 + $0x3f0] sm:$0xff] }
  0x41   : > { %688 = vmatpush.msrb.mxu1 %v338_v28  ;;  %3181 = vmatmul.msk.f32.vlgmr.msrb.gmra.mxu2 %vm571_vm0, %v4449_v12  ;;  %v348_v50 = vld [vmem:[#allocation5 + $0x3f8] sm:$0xff]  ;;  %v229_v51 = vld [vmem:[#allocation5 + $0x40] sm:$0xff]  ;;  %v230_v52 = vld [vmem:[#allocation5 + $0x48] sm:$0xff] }
  0x42   : > { %3182 = vmatmul.msk.f32.vlgmr.msrb.gmra.mxu3 %vm571_vm0, %v4449_v12  ;;  %787 = vmatpush.msra.mxu2 %v399_v29  ;;  %v291_v53 = vld [vmem:[#allocation5 + $0x230] sm:$0xff]  ;;  %v292_v54 = vld [vmem:[#allocation5 + $0x238] sm:$0xff]  ;;  %v401_v55 = vld [vmem:[#allocation5 + $0x5a0] sm:$0xff] }
  0x43   : > { %807 = vmatpush.msra.mxu3 %v400_v30  ;;  %669 = vmatpush.msrb.mxu0 %v281_v31  ;;  %v402_v56 = vld [vmem:[#allocation5 + $0x5a8] sm:$0xff]  ;;  %v235_v57 = vld [vmem:[#allocation5 + $0x70] sm:$0xff]  ;;  %v236_v58 = vld [vmem:[#allocation5 + $0x78] sm:$0xff] }
  0x44   : > { %689 = vmatpush.msrb.mxu1 %v282_v32  ;;  %788 = vmatpush.msra.mxu2 %v343_v33  ;;  %v345_v59 = vld [vmem:[#allocation5 + $0x3e0] sm:$0xff]  ;;  %v346_v60 = vld [vmem:[#allocation5 + $0x3e8] sm:$0xff]  ;;  %v407_v61 = vld [vmem:[#allocation5 + $0x5d0] sm:$0xff] }
  0x45   : > { %808 = vmatpush.msra.mxu3 %v344_v34  ;;  %670 = vmatpush.msrb.mxu0 %v225_v35  ;;  %v408_v62 = vld [vmem:[#allocation5 + $0x5d8] sm:$0xff]  ;;  %v289_v63 = vld [vmem:[#allocation5 + $0x220] sm:$0xff]  ;;  %v290_v0 = vld [vmem:[#allocation5 + $0x228] sm:$0xff] }
  0x46   : > { %690 = vmatpush.msrb.mxu1 %v226_v36  ;;  %789 = vmatpush.msra.mxu2 %v287_v37  ;;  %v351_v1 = vld [vmem:[#allocation5 + $0x410] sm:$0xff]  ;;  %v352_v2 = vld [vmem:[#allocation5 + $0x418] sm:$0xff]  ;;  %v233_v3 = vld [vmem:[#allocation5 + $0x60] sm:$0xff] }
  0x47   : > { %809 = vmatpush.msra.mxu3 %v288_v38  ;;  %3179 = vmatmul.msk.f32.vlgmr.msrb.gmra.mxu0 %vm571_vm0, %v4449_v12  ;;  %v234_v4 = vld [vmem:[#allocation5 + $0x68] sm:$0xff]  ;;  %v295_v5 = vld [vmem:[#allocation5 + $0x250] sm:$0xff]  ;;  %v296_v6 = vld [vmem:[#allocation5 + $0x258] sm:$0xff] }
  0x48   : > { %3180 = vmatmul.msk.f32.vlgmr.msrb.gmra.mxu1 %vm571_vm0, %v4449_v12  ;;  %747 = vmatpush.msra.mxu0 %v397_v39  ;;  %v405_v7 = vld [vmem:[#allocation5 + $0x5c0] sm:$0xff]  ;;  %v406_v8 = vld [vmem:[#allocation5 + $0x5c8] sm:$0xff]  ;;  %v239_v9 = vld [vmem:[#allocation5 + $0x90] sm:$0xff] }
  0x49   : > { %767 = vmatpush.msra.mxu1 %v398_v40  ;;  %790 = vmatpush.msra.mxu2 %v231_v41  ;;  %v240_v10 = vld [vmem:[#allocation5 + $0x98] sm:$0xff]  ;;  %v349_v11 = vld [vmem:[#allocation5 + $0x400] sm:$0xff]  ;;  %v350_v13 = vld [vmem:[#allocation5 + $0x408] sm:$0xff] }
  0x4a   : > { %810 = vmatpush.msra.mxu3 %v232_v42  ;;  %748 = vmatpush.msra.mxu0 %v341_v43  ;;  %v411_v14 = vld [vmem:[#allocation5 + $0x5f0] sm:$0xff]  ;;  %v412_v15 = vld [vmem:[#allocation5 + $0x5f8] sm:$0xff]  ;;  %v293_v16 = vld [vmem:[#allocation5 + $0x240] sm:$0xff] }
  0x4b   : > { %768 = vmatpush.msra.mxu1 %v342_v44  ;;  %3185 = vmatmul.msk.f32.vlgmr.msra.gmra.mxu2 %vm571_vm0, %v4449_v12  ;;  %v294_v17 = vld [vmem:[#allocation5 + $0x248] sm:$0xff]  ;;  %v355_v18 = vld [vmem:[#allocation5 + $0x430] sm:$0xff]  ;;  %v356_v19 = vld [vmem:[#allocation5 + $0x438] sm:$0xff] }
  0x4c   : > { %3186 = vmatmul.msk.f32.vlgmr.msra.gmra.mxu3 %vm571_vm0, %v4449_v12  ;;  %867 = vmatpush.msrb.mxu2 %v403_v45  ;;  %v237_v20 = vld [vmem:[#allocation5 + $0x80] sm:$0xff]  ;;  %v238_v21 = vld [vmem:[#allocation5 + $0x88] sm:$0xff]  ;;  %v299_v22 = vld [vmem:[#allocation5 + $0x270] sm:$0xff] }
  0x4d   : > { %887 = vmatpush.msrb.mxu3 %v404_v46  ;;  %749 = vmatpush.msra.mxu0 %v285_v47  ;;  %v300_v23 = vld [vmem:[#allocation5 + $0x278] sm:$0xff]  ;;  %v409_v24 = vld [vmem:[#allocation5 + $0x5e0] sm:$0xff]  ;;  %v410_v25 = vld [vmem:[#allocation5 + $0x5e8] sm:$0xff] }
  0x4e   : > { %769 = vmatpush.msra.mxu1 %v286_v48  ;;  %868 = vmatpush.msrb.mxu2 %v347_v49  ;;  %v243_v26 = vld [vmem:[#allocation5 + $0xb0] sm:$0xff]  ;;  %v244_v27 = vld [vmem:[#allocation5 + $0xb8] sm:$0xff]  ;;  %v353_v28 = vld [vmem:[#allocation5 + $0x420] sm:$0xff] }
  0x4f   : > { %888 = vmatpush.msrb.mxu3 %v348_v50  ;;  %750 = vmatpush.msra.mxu0 %v229_v51  ;;  %v354_v29 = vld [vmem:[#allocation5 + $0x428] sm:$0xff]  ;;  %v415_v30 = vld [vmem:[#allocation5 + $0x610] sm:$0xff]  ;;  %v416_v31 = vld [vmem:[#allocation5 + $0x618] sm:$0xff] }
  0x50   : > { %770 = vmatpush.msra.mxu1 %v230_v52  ;;  %869 = vmatpush.msrb.mxu2 %v291_v53  ;;  %v297_v32 = vld [vmem:[#allocation5 + $0x260] sm:$0xff]  ;;  %v298_v33 = vld [vmem:[#allocation5 + $0x268] sm:$0xff]  ;;  %v359_v34 = vld [vmem:[#allocation5 + $0x450] sm:$0xff] }
  0x51   : > { %889 = vmatpush.msrb.mxu3 %v292_v54  ;;  %3183 = vmatmul.msk.f32.vlgmr.msra.gmra.mxu0 %vm571_vm0, %v4449_v12  ;;  %v360_v35 = vld [vmem:[#allocation5 + $0x458] sm:$0xff]  ;;  %v241_v36 = vld [vmem:[#allocation5 + $0xa0] sm:$0xff]  ;;  %v242_v37 = vld [vmem:[#allocation5 + $0xa8] sm:$0xff] }
  0x52   : > { %3184 = vmatmul.msk.f32.vlgmr.msra.gmra.mxu1 %vm571_vm0, %v4449_v12  ;;  %827 = vmatpush.msrb.mxu0 %v401_v55  ;;  %v303_v38 = vld [vmem:[#allocation5 + $0x290] sm:$0xff]  ;;  %v304_v39 = vld [vmem:[#allocation5 + $0x298] sm:$0xff]  ;;  %v413_v40 = vld [vmem:[#allocation5 + $0x600] sm:$0xff] }
  0x53   : > { %847 = vmatpush.msrb.mxu1 %v402_v56  ;;  %870 = vmatpush.msrb.mxu2 %v235_v57  ;;  %v414_v41 = vld [vmem:[#allocation5 + $0x608] sm:$0xff]  ;;  %v247_v42 = vld [vmem:[#allocation5 + $0xd0] sm:$0xff]  ;;  %v248_v43 = vld [vmem:[#allocation5 + $0xd8] sm:$0xff] }
  0x54   : > { %890 = vmatpush.msrb.mxu3 %v236_v58  ;;  %828 = vmatpush.msrb.mxu0 %v345_v59  ;;  %v357_v44 = vld [vmem:[#allocation5 + $0x440] sm:$0xff]  ;;  %v358_v45 = vld [vmem:[#allocation5 + $0x448] sm:$0xff]  ;;  %v419_v46 = vld [vmem:[#allocation5 + $0x630] sm:$0xff] }
  0x55   : > { %848 = vmatpush.msrb.mxu1 %v346_v60  ;;  %3189 = vmatmul.msk.f32.vlgmr.msrb.gmra.mxu2 %vm571_vm0, %v4449_v12  ;;  %v420_v47 = vld [vmem:[#allocation5 + $0x638] sm:$0xff]  ;;  %v301_v48 = vld [vmem:[#allocation5 + $0x280] sm:$0xff]  ;;  %v302_v49 = vld [vmem:[#allocation5 + $0x288] sm:$0xff] }
  0x56   : > { %3190 = vmatmul.msk.f32.vlgmr.msrb.gmra.mxu3 %vm571_vm0, %v4449_v12  ;;  %947 = vmatpush.msra.mxu2 %v407_v61  ;;  %v363_v50 = vld [vmem:[#allocation5 + $0x470] sm:$0xff]  ;;  %v364_v51 = vld [vmem:[#allocation5 + $0x478] sm:$0xff]  ;;  %v245_v52 = vld [vmem:[#allocation5 + $0xc0] sm:$0xff] }
  0x57   : > { %967 = vmatpush.msra.mxu3 %v408_v62  ;;  %829 = vmatpush.msrb.mxu0 %v289_v63  ;;  %v246_v53 = vld [vmem:[#allocation5 + $0xc8] sm:$0xff]  ;;  %v307_v54 = vld [vmem:[#allocation5 + $0x2b0] sm:$0xff]  ;;  %v308_v55 = vld [vmem:[#allocation5 + $0x2b8] sm:$0xff] }
  0x58   : > { %849 = vmatpush.msrb.mxu1 %v290_v0  ;;  %948 = vmatpush.msra.mxu2 %v351_v1  ;;  %v417_v56 = vld [vmem:[#allocation5 + $0x620] sm:$0xff]  ;;  %v418_v57 = vld [vmem:[#allocation5 + $0x628] sm:$0xff]  ;;  %v251_v58 = vld [vmem:[#allocation5 + $0xf0] sm:$0xff] }
  0x59   : > { %968 = vmatpush.msra.mxu3 %v352_v2  ;;  %830 = vmatpush.msrb.mxu0 %v233_v3  ;;  %v252_v59 = vld [vmem:[#allocation5 + $0xf8] sm:$0xff]  ;;  %v361_v60 = vld [vmem:[#allocation5 + $0x460] sm:$0xff]  ;;  %v362_v61 = vld [vmem:[#allocation5 + $0x468] sm:$0xff] }
  0x5a   : > { %850 = vmatpush.msrb.mxu1 %v234_v4  ;;  %949 = vmatpush.msra.mxu2 %v295_v5  ;;  %v423_v62 = vld [vmem:[#allocation5 + $0x650] sm:$0xff]  ;;  %v424_v63 = vld [vmem:[#allocation5 + $0x658] sm:$0xff]  ;;  %v305_v0 = vld [vmem:[#allocation5 + $0x2a0] sm:$0xff] }
  0x5b   : > { %969 = vmatpush.msra.mxu3 %v296_v6  ;;  %3187 = vmatmul.msk.f32.vlgmr.msrb.gmra.mxu0 %vm571_vm0, %v4449_v12  ;;  %v306_v1 = vld [vmem:[#allocation5 + $0x2a8] sm:$0xff]  ;;  %v367_v2 = vld [vmem:[#allocation5 + $0x490] sm:$0xff]  ;;  %v368_v3 = vld [vmem:[#allocation5 + $0x498] sm:$0xff] }
  0x5c   : > { %3188 = vmatmul.msk.f32.vlgmr.msrb.gmra.mxu1 %vm571_vm0, %v4449_v12  ;;  %907 = vmatpush.msra.mxu0 %v405_v7  ;;  %v249_v4 = vld [vmem:[#allocation5 + $0xe0] sm:$0xff]  ;;  %v250_v5 = vld [vmem:[#allocation5 + $0xe8] sm:$0xff]  ;;  %v311_v6 = vld [vmem:[#allocation5 + $0x2d0] sm:$0xff] }
  0x5d   : > { %927 = vmatpush.msra.mxu1 %v406_v8  ;;  %950 = vmatpush.msra.mxu2 %v239_v9  ;;  %v312_v7 = vld [vmem:[#allocation5 + $0x2d8] sm:$0xff]  ;;  %v421_v8 = vld [vmem:[#allocation5 + $0x640] sm:$0xff]  ;;  %v422_v9 = vld [vmem:[#allocation5 + $0x648] sm:$0xff] }
  0x5e   : > { %970 = vmatpush.msra.mxu3 %v240_v10  ;;  %908 = vmatpush.msra.mxu0 %v349_v11  ;;  %v255_v10 = vld [vmem:[#allocation5 + $0x110] sm:$0xff]  ;;  %v256_v11 = vld [vmem:[#allocation5 + $0x118] sm:$0xff] }
  0x5f   : > { %928 = vmatpush.msra.mxu1 %v350_v13  ;;  %3193 = vmatmul.msk.f32.vlgmr.msra.gmra.mxu2 %vm571_vm0, %v4449_v12  ;;  %v365_v13 = vld [vmem:[#allocation5 + $0x480] sm:$0xff] }
  0x60   : > { %3194 = vmatmul.msk.f32.vlgmr.msra.gmra.mxu3 %vm571_vm0, %v4449_v12  ;;  %1027 = vmatpush.msrb.mxu2 %v411_v14  ;;  %v366_v14 = vld [vmem:[#allocation5 + $0x488] sm:$0xff] }
  0x61   : > { %1047 = vmatpush.msrb.mxu3 %v412_v15  ;;  %909 = vmatpush.msra.mxu0 %v293_v16  ;;  %v427_v15 = vld [vmem:[#allocation5 + $0x670] sm:$0xff]  ;;  %v428_v16 = vld [vmem:[#allocation5 + $0x678] sm:$0xff] }
  0x62   : > { %929 = vmatpush.msra.mxu1 %v294_v17  ;;  %1028 = vmatpush.msrb.mxu2 %v355_v18  ;;  %v309_v17 = vld [vmem:[#allocation5 + $0x2c0] sm:$0xff]  ;;  %v310_v18 = vld [vmem:[#allocation5 + $0x2c8] sm:$0xff] }
  0x63   : > { %1048 = vmatpush.msrb.mxu3 %v356_v19  ;;  %910 = vmatpush.msra.mxu0 %v237_v20  ;;  %v371_v19 = vld [vmem:[#allocation5 + $0x4b0] sm:$0xff]  ;;  %v372_v20 = vld [vmem:[#allocation5 + $0x4b8] sm:$0xff] }
  0x64   : > { %930 = vmatpush.msra.mxu1 %v238_v21  ;;  %1029 = vmatpush.msrb.mxu2 %v299_v22  ;;  %v253_v21 = vld [vmem:[#allocation5 + $0x100] sm:$0xff]  ;;  %v254_v22 = vld [vmem:[#allocation5 + $0x108] sm:$0xff] }
  0x65   : > { %1049 = vmatpush.msrb.mxu3 %v300_v23  ;;  %3191 = vmatmul.msk.f32.vlgmr.msra.gmra.mxu0 %vm571_vm0, %v4449_v12  ;;  %v315_v23 = vld [vmem:[#allocation5 + $0x2f0] sm:$0xff] }
  0x66   : > { %3192 = vmatmul.msk.f32.vlgmr.msra.gmra.mxu1 %vm571_vm0, %v4449_v12  ;;  %987 = vmatpush.msrb.mxu0 %v409_v24  ;;  %v316_v24 = vld [vmem:[#allocation5 + $0x2f8] sm:$0xff] }
  0x67   : > { %1007 = vmatpush.msrb.mxu1 %v410_v25  ;;  %1030 = vmatpush.msrb.mxu2 %v243_v26  ;;  %v425_v25 = vld [vmem:[#allocation5 + $0x660] sm:$0xff]  ;;  %v426_v26 = vld [vmem:[#allocation5 + $0x668] sm:$0xff] }
  0x68   : > { %1050 = vmatpush.msrb.mxu3 %v244_v27  ;;  %988 = vmatpush.msrb.mxu0 %v353_v28  ;;  %v259_v27 = vld [vmem:[#allocation5 + $0x130] sm:$0xff]  ;;  %v260_v28 = vld [vmem:[#allocation5 + $0x138] sm:$0xff] }
  0x69   : > { %1008 = vmatpush.msrb.mxu1 %v354_v29  ;;  %3197 = vmatmul.msk.f32.vlgmr.msrb.gmra.mxu2 %vm571_vm0, %v4449_v12  ;;  %v369_v29 = vld [vmem:[#allocation5 + $0x4a0] sm:$0xff] }
  0x6a   : > { %3198 = vmatmul.msk.f32.vlgmr.msrb.gmra.mxu3 %vm571_vm0, %v4449_v12  ;;  %1107 = vmatpush.msra.mxu2 %v415_v30  ;;  %v370_v30 = vld [vmem:[#allocation5 + $0x4a8] sm:$0xff] }
  0x6b   : > { %1127 = vmatpush.msra.mxu3 %v416_v31  ;;  %989 = vmatpush.msrb.mxu0 %v297_v32  ;;  %v431_v31 = vld [vmem:[#allocation5 + $0x690] sm:$0xff]  ;;  %v432_v32 = vld [vmem:[#allocation5 + $0x698] sm:$0xff] }
  0x6c   : > { %1009 = vmatpush.msrb.mxu1 %v298_v33  ;;  %1108 = vmatpush.msra.mxu2 %v359_v34  ;;  %v313_v33 = vld [vmem:[#allocation5 + $0x2e0] sm:$0xff]  ;;  %v314_v34 = vld [vmem:[#allocation5 + $0x2e8] sm:$0xff] }
  0x6d   : > { %1128 = vmatpush.msra.mxu3 %v360_v35  ;;  %990 = vmatpush.msrb.mxu0 %v241_v36  ;;  %v375_v35 = vld [vmem:[#allocation5 + $0x4d0] sm:$0xff]  ;;  %v376_v36 = vld [vmem:[#allocation5 + $0x4d8] sm:$0xff] }
  0x6e   : > { %1010 = vmatpush.msrb.mxu1 %v242_v37  ;;  %1109 = vmatpush.msra.mxu2 %v303_v38  ;;  %v257_v37 = vld [vmem:[#allocation5 + $0x120] sm:$0xff]  ;;  %v258_v38 = vld [vmem:[#allocation5 + $0x128] sm:$0xff] }
  0x6f   : > { %1129 = vmatpush.msra.mxu3 %v304_v39  ;;  %3195 = vmatmul.msk.f32.vlgmr.msrb.gmra.mxu0 %vm571_vm0, %v4449_v12  ;;  %v319_v39 = vld [vmem:[#allocation5 + $0x310] sm:$0xff] }
  0x70   : > { %3196 = vmatmul.msk.f32.vlgmr.msrb.gmra.mxu1 %vm571_vm0, %v4449_v12  ;;  %1067 = vmatpush.msra.mxu0 %v413_v40  ;;  %v320_v40 = vld [vmem:[#allocation5 + $0x318] sm:$0xff] }
  0x71   : > { %1087 = vmatpush.msra.mxu1 %v414_v41  ;;  %1110 = vmatpush.msra.mxu2 %v247_v42  ;;  %v429_v41 = vld [vmem:[#allocation5 + $0x680] sm:$0xff]  ;;  %v430_v42 = vld [vmem:[#allocation5 + $0x688] sm:$0xff] }
  0x72   : > { %1130 = vmatpush.msra.mxu3 %v248_v43  ;;  %1068 = vmatpush.msra.mxu0 %v357_v44  ;;  %v263_v43 = vld [vmem:[#allocation5 + $0x150] sm:$0xff]  ;;  %v264_v44 = vld [vmem:[#allocation5 + $0x158] sm:$0xff] }
  0x73   : > { %1088 = vmatpush.msra.mxu1 %v358_v45  ;;  %3201 = vmatmul.msk.f32.vlgmr.msra.gmra.mxu2 %vm571_vm0, %v4449_v12  ;;  %v373_v45 = vld [vmem:[#allocation5 + $0x4c0] sm:$0xff] }
  0x74   : > { %3202 = vmatmul.msk.f32.vlgmr.msra.gmra.mxu3 %vm571_vm0, %v4449_v12  ;;  %1187 = vmatpush.msrb.mxu2 %v419_v46  ;;  %v374_v46 = vld [vmem:[#allocation5 + $0x4c8] sm:$0xff] }
  0x75   : > { %1207 = vmatpush.msrb.mxu3 %v420_v47  ;;  %1069 = vmatpush.msra.mxu0 %v301_v48  ;;  %v435_v47 = vld [vmem:[#allocation5 + $0x6b0] sm:$0xff]  ;;  %v436_v48 = vld [vmem:[#allocation5 + $0x6b8] sm:$0xff] }
  0x76   : > { %1089 = vmatpush.msra.mxu1 %v302_v49  ;;  %1188 = vmatpush.msrb.mxu2 %v363_v50  ;;  %v317_v49 = vld [vmem:[#allocation5 + $0x300] sm:$0xff]  ;;  %v318_v50 = vld [vmem:[#allocation5 + $0x308] sm:$0xff] }
  0x77   : > { %1208 = vmatpush.msrb.mxu3 %v364_v51  ;;  %1070 = vmatpush.msra.mxu0 %v245_v52  ;;  %v379_v51 = vld [vmem:[#allocation5 + $0x4f0] sm:$0xff]  ;;  %v380_v52 = vld [vmem:[#allocation5 + $0x4f8] sm:$0xff] }
  0x78   : > { %1090 = vmatpush.msra.mxu1 %v246_v53  ;;  %1189 = vmatpush.msrb.mxu2 %v307_v54  ;;  %v261_v53 = vld [vmem:[#allocation5 + $0x140] sm:$0xff]  ;;  %v262_v54 = vld [vmem:[#allocation5 + $0x148] sm:$0xff] }
  0x79   : > { %1209 = vmatpush.msrb.mxu3 %v308_v55  ;;  %3199 = vmatmul.msk.f32.vlgmr.msra.gmra.mxu0 %vm571_vm0, %v4449_v12  ;;  %v323_v55 = vld [vmem:[#allocation5 + $0x330] sm:$0xff] }
  0x7a   : > { %3200 = vmatmul.msk.f32.vlgmr.msra.gmra.mxu1 %vm571_vm0, %v4449_v12  ;;  %1147 = vmatpush.msrb.mxu0 %v417_v56  ;;  %v324_v56 = vld [vmem:[#allocation5 + $0x338] sm:$0xff] }
  0x7b   : > { %1167 = vmatpush.msrb.mxu1 %v418_v57  ;;  %1190 = vmatpush.msrb.mxu2 %v251_v58  ;;  %v433_v57 = vld [vmem:[#allocation5 + $0x6a0] sm:$0xff]  ;;  %v434_v58 = vld [vmem:[#allocation5 + $0x6a8] sm:$0xff] }
  0x7c   : > { %1210 = vmatpush.msrb.mxu3 %v252_v59  ;;  %1148 = vmatpush.msrb.mxu0 %v361_v60  ;;  %v267_v59 = vld [vmem:[#allocation5 + $0x170] sm:$0xff]  ;;  %v268_v60 = vld [vmem:[#allocation5 + $0x178] sm:$0xff] }
  0x7d   : > { %1168 = vmatpush.msrb.mxu1 %v362_v61  ;;  %3205 = vmatmul.msk.f32.vlgmr.msrb.gmra.mxu2 %vm571_vm0, %v4449_v12  ;;  %v377_v61 = vld [vmem:[#allocation5 + $0x4e0] sm:$0xff] }
  0x7e   : > { %3206 = vmatmul.msk.f32.vlgmr.msrb.gmra.mxu3 %vm571_vm0, %v4449_v12  ;;  %1267 = vmatpush.msra.mxu2 %v423_v62  ;;  %v378_v62 = vld [vmem:[#allocation5 + $0x4e8] sm:$0xff] }
  0x7f   : > { %1287 = vmatpush.msra.mxu3 %v424_v63  ;;  %1149 = vmatpush.msrb.mxu0 %v305_v0  ;;  %v439_v63 = vld [vmem:[#allocation5 + $0x6d0] sm:$0xff]  ;;  %v440_v0 = vld [vmem:[#allocation5 + $0x6d8] sm:$0xff] }
  0x80   : > { %1169 = vmatpush.msrb.mxu1 %v306_v1  ;;  %1268 = vmatpush.msra.mxu2 %v367_v2  ;;  %v321_v1 = vld [vmem:[#allocation5 + $0x320] sm:$0xff]  ;;  %v322_v2 = vld [vmem:[#allocation5 + $0x328] sm:$0xff] }
  0x81   : > { %1288 = vmatpush.msra.mxu3 %v368_v3  ;;  %1150 = vmatpush.msrb.mxu0 %v249_v4  ;;  %v383_v3 = vld [vmem:[#allocation5 + $0x510] sm:$0xff]  ;;  %v384_v4 = vld [vmem:[#allocation5 + $0x518] sm:$0xff] }
  0x82   : > { %1170 = vmatpush.msrb.mxu1 %v250_v5  ;;  %1269 = vmatpush.msra.mxu2 %v311_v6  ;;  %v265_v5 = vld [vmem:[#allocation5 + $0x160] sm:$0xff]  ;;  %v266_v6 = vld [vmem:[#allocation5 + $0x168] sm:$0xff] }
  0x83   : > { %1289 = vmatpush.msra.mxu3 %v312_v7  ;;  %3203 = vmatmul.msk.f32.vlgmr.msrb.gmra.mxu0 %vm571_vm0, %v4449_v12  ;;  %v327_v7 = vld [vmem:[#allocation5 + $0x350] sm:$0xff] }
  0x84   : > { %3204 = vmatmul.msk.f32.vlgmr.msrb.gmra.mxu1 %vm571_vm0, %v4449_v12  ;;  %1227 = vmatpush.msra.mxu0 %v421_v8  ;;  %v328_v8 = vld [vmem:[#allocation5 + $0x358] sm:$0xff] }
  0x85   : > { %1247 = vmatpush.msra.mxu1 %v422_v9  ;;  %1270 = vmatpush.msra.mxu2 %v255_v10  ;;  %v437_v9 = vld [vmem:[#allocation5 + $0x6c0] sm:$0xff]  ;;  %v438_v10 = vld [vmem:[#allocation5 + $0x6c8] sm:$0xff] }
  0x86   : > { %1290 = vmatpush.msra.mxu3 %v256_v11  ;;  %1228 = vmatpush.msra.mxu0 %v365_v13  ;;  %v271_v11 = vld [vmem:[#allocation5 + $0x190] sm:$0xff]  ;;  %v272_v13 = vld [vmem:[#allocation5 + $0x198] sm:$0xff] }
  0x87   : > { %1248 = vmatpush.msra.mxu1 %v366_v14  ;;  %3209 = vmatmul.msk.f32.vlgmr.msra.gmra.mxu2 %vm571_vm0, %v4449_v12  ;;  %v381_v14 = vld [vmem:[#allocation5 + $0x500] sm:$0xff] }
  0x88   : > { %3210 = vmatmul.msk.f32.vlgmr.msra.gmra.mxu3 %vm571_vm0, %v4449_v12  ;;  %1347 = vmatpush.msrb.mxu2 %v427_v15  ;;  %v382_v15 = vld [vmem:[#allocation5 + $0x508] sm:$0xff] }
  0x89   : > { %1367 = vmatpush.msrb.mxu3 %v428_v16  ;;  %1229 = vmatpush.msra.mxu0 %v309_v17  ;;  %v443_v16 = vld [vmem:[#allocation5 + $0x6f0] sm:$0xff]  ;;  %v444_v17 = vld [vmem:[#allocation5 + $0x6f8] sm:$0xff] }
  0x8a   : > { %1249 = vmatpush.msra.mxu1 %v310_v18  ;;  %1348 = vmatpush.msrb.mxu2 %v371_v19  ;;  %v325_v18 = vld [vmem:[#allocation5 + $0x340] sm:$0xff]  ;;  %v326_v19 = vld [vmem:[#allocation5 + $0x348] sm:$0xff] }
  0x8b   : > { %1368 = vmatpush.msrb.mxu3 %v372_v20  ;;  %1230 = vmatpush.msra.mxu0 %v253_v21  ;;  %v387_v20 = vld [vmem:[#allocation5 + $0x530] sm:$0xff]  ;;  %v388_v21 = vld [vmem:[#allocation5 + $0x538] sm:$0xff] }
  0x8c   : > { %1250 = vmatpush.msra.mxu1 %v254_v22  ;;  %1349 = vmatpush.msrb.mxu2 %v315_v23  ;;  %v269_v22 = vld [vmem:[#allocation5 + $0x180] sm:$0xff]  ;;  %v270_v23 = vld [vmem:[#allocation5 + $0x188] sm:$0xff] }
  0x8d   : > { %1369 = vmatpush.msrb.mxu3 %v316_v24  ;;  %3207 = vmatmul.msk.f32.vlgmr.msra.gmra.mxu0 %vm571_vm0, %v4449_v12  ;;  %v331_v24 = vld [vmem:[#allocation5 + $0x370] sm:$0xff] }
  0x8e   : > { %3208 = vmatmul.msk.f32.vlgmr.msra.gmra.mxu1 %vm571_vm0, %v4449_v12  ;;  %1307 = vmatpush.msrb.mxu0 %v425_v25  ;;  %v332_v25 = vld [vmem:[#allocation5 + $0x378] sm:$0xff] }
  0x8f   : > { %1327 = vmatpush.msrb.mxu1 %v426_v26  ;;  %1350 = vmatpush.msrb.mxu2 %v259_v27  ;;  %v441_v26 = vld [vmem:[#allocation5 + $0x6e0] sm:$0xff]  ;;  %v442_v27 = vld [vmem:[#allocation5 + $0x6e8] sm:$0xff] }
  0x90   : > { %1370 = vmatpush.msrb.mxu3 %v260_v28  ;;  %1308 = vmatpush.msrb.mxu0 %v369_v29  ;;  %v275_v28 = vld [vmem:[#allocation5 + $0x1b0] sm:$0xff]  ;;  %v276_v29 = vld [vmem:[#allocation5 + $0x1b8] sm:$0xff] }
  0x91   : > { %1328 = vmatpush.msrb.mxu1 %v370_v30  ;;  %3213 = vmatmul.msk.f32.vlgmr.msrb.gmra.mxu2 %vm571_vm0, %v4449_v12  ;;  %v4551_v30 = vld [vmem:[#allocation7] sm:$0xff] }
  0x92   : > { %3214 = vmatmul.msk.f32.vlgmr.msrb.gmra.mxu3 %vm571_vm0, %v4449_v12  ;;  %1427 = vmatpush.msra.mxu2 %v431_v31  ;;  %v385_v31 = vld [vmem:[#allocation5 + $0x520] sm:$0xff] }
  0x93   : > { %1447 = vmatpush.msra.mxu3 %v432_v32  ;;  %1309 = vmatpush.msrb.mxu0 %v313_v33  ;;  %v386_v32 = vld [vmem:[#allocation5 + $0x528] sm:$0xff]  ;;  %v329_v33 = vld [vmem:[#allocation5 + $0x360] sm:$0xff] }
  0x94   : > { %1329 = vmatpush.msrb.mxu1 %v314_v34  ;;  %1428 = vmatpush.msra.mxu2 %v375_v35  ;;  %v330_v34 = vld [vmem:[#allocation5 + $0x368] sm:$0xff]  ;;  %v459_v35 = vperm.slane %v4551_v30, 0 }
  0x95   : > { %1448 = vmatpush.msra.mxu3 %v376_v36  ;;  %1310 = vmatpush.msrb.mxu0 %v257_v37  ;;  %v273_v36 = vld [vmem:[#allocation5 + $0x1a0] sm:$0xff]  ;;  %v274_v37 = vld [vmem:[#allocation5 + $0x1a8] sm:$0xff] }
  0x96   : > { %1330 = vmatpush.msrb.mxu1 %v258_v38  ;;  %1429 = vmatpush.msra.mxu2 %v319_v39 }
  0x97   : > { %1449 = vmatpush.msra.mxu3 %v320_v40  ;;  %3211 = vmatmul.msk.f32.vlgmr.msrb.gmra.mxu0 %vm571_vm0, %v4449_v12 }
  0x98   : > { %3212 = vmatmul.msk.f32.vlgmr.msrb.gmra.mxu1 %vm571_vm0, %v4449_v12  ;;  %1387 = vmatpush.msra.mxu0 %v429_v41 }
  0x99   : > { %1407 = vmatpush.msra.mxu1 %v430_v42  ;;  %1430 = vmatpush.msra.mxu2 %v263_v43 }
  0x9a   : > { %1450 = vmatpush.msra.mxu3 %v264_v44  ;;  %1388 = vmatpush.msra.mxu0 %v373_v45  ;;  %v460_v44 = vperm.slane %v4551_v30, 1 }
  0x9b   : > { %1408 = vmatpush.msra.mxu1 %v374_v46  ;;  %3217 = vmatmul.msk.f32.vlgmr.msra.gmra.mxu2 %vm571_vm0, %v4449_v12 }
  0x9c   : > { %3218 = vmatmul.msk.f32.vlgmr.msra.gmra.mxu3 %vm571_vm0, %v4449_v12  ;;  %1507 = vmatpush.msrb.mxu2 %v435_v47 }
  0x9d   : > { %1527 = vmatpush.msrb.mxu3 %v436_v48  ;;  %1389 = vmatpush.msra.mxu0 %v317_v49 }
  0x9e   : > { %1409 = vmatpush.msra.mxu1 %v318_v50  ;;  %1508 = vmatpush.msrb.mxu2 %v379_v51 }
  0x9f   : > { %1528 = vmatpush.msrb.mxu3 %v380_v52  ;;  %1390 = vmatpush.msra.mxu0 %v261_v53 }
  0xa0   : > { %1410 = vmatpush.msra.mxu1 %v262_v54  ;;  %1509 = vmatpush.msrb.mxu2 %v323_v55  ;;  %v461_v55 = vperm.slane %v4551_v30, 2 }
  0xa1   : > { %1529 = vmatpush.msrb.mxu3 %v324_v56  ;;  %3215 = vmatmul.msk.f32.vlgmr.msra.gmra.mxu0 %vm571_vm0, %v4449_v12 }
  0xa2   : > { %3216 = vmatmul.msk.f32.vlgmr.msra.gmra.mxu1 %vm571_vm0, %v4449_v12  ;;  %1467 = vmatpush.msrb.mxu0 %v433_v57 }
  0xa3   : > { %1487 = vmatpush.msrb.mxu1 %v434_v58  ;;  %1510 = vmatpush.msrb.mxu2 %v267_v59 }
  0xa4   : > { %1530 = vmatpush.msrb.mxu3 %v268_v60  ;;  %1468 = vmatpush.msrb.mxu0 %v377_v61 }
  0xa5   : > { %1488 = vmatpush.msrb.mxu1 %v378_v62  ;;  %3221 = vmatmul.msk.f32.vlgmr.msrb.gmra.mxu2 %vm571_vm0, %v4449_v12 }
  0xa6   : > { %3222 = vmatmul.msk.f32.vlgmr.msrb.gmra.mxu3 %vm571_vm0, %v4449_v12  ;;  %1587 = vmatpush.msra.mxu2 %v439_v63 }
  0xa7   : > { %1607 = vmatpush.msra.mxu3 %v440_v0  ;;  %1469 = vmatpush.msrb.mxu0 %v321_v1 }
  0xa8   : > { %1489 = vmatpush.msrb.mxu1 %v322_v2  ;;  %1588 = vmatpush.msra.mxu2 %v383_v3  ;;  %v462_v2 = vperm.slane %v4551_v30, 3 }
  0xa9   : > { %1608 = vmatpush.msra.mxu3 %v384_v4  ;;  %1470 = vmatpush.msrb.mxu0 %v265_v5 }
  0xaa   : > { %1490 = vmatpush.msrb.mxu1 %v266_v6  ;;  %1589 = vmatpush.msra.mxu2 %v327_v7 }
  0xab   : > { %1609 = vmatpush.msra.mxu3 %v328_v8  ;;  %3219 = vmatmul.msk.f32.vlgmr.msrb.gmra.mxu0 %vm571_vm0, %v4449_v12 }
  0xac   : > { %3220 = vmatmul.msk.f32.vlgmr.msrb.gmra.mxu1 %vm571_vm0, %v4449_v12  ;;  %1547 = vmatpush.msra.mxu0 %v437_v9 }
  0xad   : > { %1567 = vmatpush.msra.mxu1 %v438_v10  ;;  %1590 = vmatpush.msra.mxu2 %v271_v11 }
  0xae   : > { %1610 = vmatpush.msra.mxu3 %v272_v13  ;;  %1548 = vmatpush.msra.mxu0 %v381_v14  ;;  %v463_v14 = vperm.slane %v4551_v30, 4 }
  0xaf   : > { %1568 = vmatpush.msra.mxu1 %v382_v15  ;;  %3225 = vmatmul.msk.f32.vlgmr.msra.gmra.mxu2 %vm571_vm0, %v4449_v12 }
  0xb0   : > { %3226 = vmatmul.msk.f32.vlgmr.msra.gmra.mxu3 %vm571_vm0, %v4449_v12  ;;  %1667 = vmatpush.msrb.mxu2 %v443_v16 }
  0xb1   : > { %1687 = vmatpush.msrb.mxu3 %v444_v17  ;;  %1549 = vmatpush.msra.mxu0 %v325_v18 }
  0xb2   : > { %1569 = vmatpush.msra.mxu1 %v326_v19  ;;  %1668 = vmatpush.msrb.mxu2 %v387_v20 }
  0xb3   : > { %1688 = vmatpush.msrb.mxu3 %v388_v21  ;;  %1550 = vmatpush.msra.mxu0 %v269_v22 }
  0xb4   : > { %1570 = vmatpush.msra.mxu1 %v270_v23  ;;  %1669 = vmatpush.msrb.mxu2 %v331_v24 }
  0xb5   : > { %1689 = vmatpush.msrb.mxu3 %v332_v25  ;;  %3223 = vmatmul.msk.f32.vlgmr.msra.gmra.mxu0 %vm571_vm0, %v4449_v12  ;;  %v464_v25 = vperm.slane %v4551_v30, 5 }
  0xb6   : > { %3224 = vmatmul.msk.f32.vlgmr.msra.gmra.mxu1 %vm571_vm0, %v4449_v12  ;;  %1627 = vmatpush.msrb.mxu0 %v441_v26 }
  0xb7   : > { %1647 = vmatpush.msrb.mxu1 %v442_v27  ;;  %1670 = vmatpush.msrb.mxu2 %v275_v28 }
  0xb8   : > { %1690 = vmatpush.msrb.mxu3 %v276_v29  ;;  %1628 = vmatpush.msrb.mxu0 %v385_v31 }
  0xb9   : > { %1648 = vmatpush.msrb.mxu1 %v386_v32  ;;  %3229 = vmatmul.msk.f32.vlgmr.msrb.gmra.mxu2 %vm571_vm0, %v4449_v12  ;;  %v592_v38 = vpop.f32.mrf.mxu0 }
  0xba   : > { %3230 = vmatmul.msk.f32.vlgmr.msrb.gmra.mxu3 %vm571_vm0, %v4449_v12  ;;  %1629 = vmatpush.msrb.mxu0 %v329_v33  ;;  %v593_v39 = vadd.f32 %v592_v38, %v459_v35 }
  0xbb   : > { %1649 = vmatpush.msrb.mxu1 %v330_v34  ;;  %v612_v45 = vpop.f32.mrf.mxu1  ;;  %v632_v56 = vpop.f32.mrf.mxu2 }
  0xbc   : > { %1630 = vmatpush.msrb.mxu0 %v273_v36  ;;  %v1695_v40 = vperm.slane %v593_v39, 0  ;;  %v1865_v41 = vperm.slane %v593_v39, 1  ;;  %v2035_v42 = vperm.slane %v593_v39, 2  ;;  %v2375_v43 = vperm.slane %v593_v39, 4  ;;  %v652_v3 = vpop.f32.mrf.mxu3 }
  0xbd   : > { %1650 = vmatpush.msrb.mxu1 %v274_v37  ;;  %3227 = vmatmul.msk.f32.vlgmr.msrb.gmra.mxu0 %vm571_vm0, %v4449_v12  ;;  %v2545_v46 = vperm.slane %v593_v39, 5  ;;  %v2715_v47 = vperm.slane %v593_v39, 6  ;;  %v613_v48 = vadd.f32 %v612_v45, %v460_v44  ;;  %v2885_v49 = vperm.slane %v593_v39, 7 }
  0xbe   : > { %3228 = vmatmul.msk.f32.vlgmr.msrb.gmra.mxu1 %vm571_vm0, %v4449_v12  ;;  %1697 = vst [vmem:[%s4567_s9] sm:$0xff] %v1695_v40  ;;  %v2205_v12 = vperm.slane %v593_v39, 3  ;;  %v633_v59 = vadd.f32 %v632_v56, %v461_v55  ;;  %v653_v6 = vadd.f32 %v652_v3, %v462_v2  ;;  %v465_v37 = vperm.slane %v4551_v30, 6  ;;  %v4740_v55 = vld [vmem:[#allocation7 + $0x8] sm:$0xff] }
  0xbf   : > { %1700 = vst [vmem:[%s4567_s9 + $0x10] sm:$0xff] %v1695_v40  ;;  %v1696_v50 = vperm.slane %v613_v48, 0  ;;  %v1866_v51 = vperm.slane %v613_v48, 1  ;;  %v2036_v52 = vperm.slane %v613_v48, 2  ;;  %v2206_v53 = vperm.slane %v613_v48, 3 }
  0xc0   : > { %3287 = vst [vmem:[%s4567_s9 + $0x380] sm:$0xff] %v1865_v41  ;;  %v2376_v54 = vperm.slane %v613_v48, 4  ;;  %v2546_v57 = vperm.slane %v613_v48, 5  ;;  %v2716_v58 = vperm.slane %v613_v48, 6  ;;  %v2886_v60 = vperm.slane %v613_v48, 7 }
  0xc1   : > { %3289 = vst [vmem:[%s4567_s9 + $0x390] sm:$0xff] %v1865_v41  ;;  %v1702_v61 = vperm.slane %v633_v59, 0  ;;  %v1872_v62 = vperm.slane %v633_v59, 1  ;;  %v2042_v63 = vperm.slane %v633_v59, 2  ;;  %v2212_v0 = vperm.slane %v633_v59, 3 }
  0xc2   : > { %3399 = vst [vmem:[%s4567_s9 + $0x700] sm:$0xff] %v2035_v42  ;;  %v2382_v1 = vperm.slane %v633_v59, 4  ;;  %v2552_v4 = vperm.slane %v633_v59, 5  ;;  %v2722_v5 = vperm.slane %v633_v59, 6  ;;  %v2892_v7 = vperm.slane %v633_v59, 7 }
  0xc3   : > { %3401 = vst [vmem:[%s4567_s9 + $0x710] sm:$0xff] %v2035_v42  ;;  %v1703_v8 = vperm.slane %v653_v6, 0  ;;  %v1873_v9 = vperm.slane %v653_v6, 1  ;;  %v2043_v10 = vperm.slane %v653_v6, 2  ;;  %v2213_v11 = vperm.slane %v653_v6, 3 }
  0xc4   : > { %3511 = vst [vmem:[%s4567_s9 + $0xa80] sm:$0xff] %v2205_v12  ;;  %v2383_v13 = vperm.slane %v653_v6, 4  ;;  %v672_v15 = vpop.f32.mrf.mxu0  ;;  %v2553_v16 = vperm.slane %v653_v6, 5  ;;  %v2723_v17 = vperm.slane %v653_v6, 6  ;;  %v2893_v19 = vperm.slane %v653_v6, 7  ;;  %v712_v38 = vpop.f32.mrf.mxu2 }
  0xc5   : > { %3513 = vst [vmem:[%s4567_s9 + $0xa90] sm:$0xff] %v2205_v12  ;;  %v673_v18 = vadd.f32 %v672_v15, %v463_v14  ;;  %v692_v26 = vpop.f32.mrf.mxu1  ;;  %v713_v41 = vadd.f32 %v712_v38, %v465_v37  ;;  %v732_v48 = vpop.f32.mrf.mxu3 }
  0xc6   : > { %3623 = vst [vmem:[%s4567_s9 + $0xe00] sm:$0xff] %v2375_v43  ;;  %v693_v29 = vadd.f32 %v692_v26, %v464_v25 }
  0xc7   : > { %3625 = vst [vmem:[%s4567_s9 + $0xe10] sm:$0xff] %v2375_v43  ;;  %v1708_v20 = vperm.slane %v673_v18, 0  ;;  %v1878_v21 = vperm.slane %v673_v18, 1  ;;  %v2048_v22 = vperm.slane %v673_v18, 2  ;;  %v2218_v23 = vperm.slane %v673_v18, 3 }
  0xc8   : > { %3735 = vst [vmem:[%s4567_s9 + $0x1180] sm:$0xff] %v2545_v46  ;;  %v2388_v24 = vperm.slane %v673_v18, 4  ;;  %v2558_v27 = vperm.slane %v673_v18, 5  ;;  %v2728_v28 = vperm.slane %v673_v18, 6  ;;  %v2898_v31 = vperm.slane %v673_v18, 7 }
  0xc9   : > { %3737 = vst [vmem:[%s4567_s9 + $0x1190] sm:$0xff] %v2545_v46  ;;  %v1709_v32 = vperm.slane %v693_v29, 0  ;;  %v1879_v33 = vperm.slane %v693_v29, 1  ;;  %v2049_v34 = vperm.slane %v693_v29, 2  ;;  %v2219_v35 = vperm.slane %v693_v29, 3 }
  0xca   : > { %3847 = vst [vmem:[%s4567_s9 + $0x1500] sm:$0xff] %v2715_v47  ;;  %v2389_v36 = vperm.slane %v693_v29, 4  ;;  %v2559_v39 = vperm.slane %v693_v29, 5  ;;  %v2729_v40 = vperm.slane %v693_v29, 6  ;;  %v2899_v42 = vperm.slane %v693_v29, 7 }
  0xcb   : > { %3849 = vst [vmem:[%s4567_s9 + $0x1510] sm:$0xff] %v2715_v47  ;;  %v1714_v12 = vperm.slane %v713_v41, 0  ;;  %v1884_v43 = vperm.slane %v713_v41, 1  ;;  %v2054_v44 = vperm.slane %v713_v41, 2  ;;  %v2224_v45 = vperm.slane %v713_v41, 3 }
  0xcc   : > { %3959 = vst [vmem:[%s4567_s9 + $0x1880] sm:$0xff] %v2885_v49  ;;  %v2394_v46 = vperm.slane %v713_v41, 4  ;;  %v466_v47 = vperm.slane %v4551_v30, 7 }
  0xcd   : > { %3961 = vst [vmem:[%s4567_s9 + $0x1890] sm:$0xff] %v2885_v49  ;;  %v2564_v49 = vperm.slane %v713_v41, 5 }
  0xce   : > { %1699 = vst.msk [vmem:[%s4567_s9 + $0x8] sm:$0xff] %vm1698_vm1, %v1696_v50  ;;  %v752_v59 = vpop.f32.mrf.mxu0  ;;  %v792_v18 = vpop.f32.mrf.mxu2 }
  0xcf   : > { %1701 = vst.msk [vmem:[%s4567_s9 + $0x18] sm:$0xff] %vm1698_vm1, %v1696_v50  ;;  %v2734_v50 = vperm.slane %v713_v41, 6  ;;  %v772_v6 = vpop.f32.mrf.mxu1  ;;  %v812_v29 = vpop.f32.mrf.mxu3 }
  0xd0   : > { %3288 = vst.msk [vmem:[%s4567_s9 + $0x388] sm:$0xff] %vm1698_vm1, %v1866_v51 }
  0xd1   : > { %3290 = vst.msk [vmem:[%s4567_s9 + $0x398] sm:$0xff] %vm1698_vm1, %v1866_v51  ;;  %v733_v51 = vadd.f32 %v732_v48, %v466_v47 }
  0xd2   : > { %3400 = vst.msk [vmem:[%s4567_s9 + $0x708] sm:$0xff] %vm1698_vm1, %v2036_v52 }
  0xd3   : > { %3402 = vst.msk [vmem:[%s4567_s9 + $0x718] sm:$0xff] %vm1698_vm1, %v2036_v52  ;;  %v2904_v52 = vperm.slane %v713_v41, 7  ;;  %v1715_v30 = vperm.slane %v733_v51, 0  ;;  %v2225_v56 = vperm.slane %v733_v51, 3 }
  0xd4   : > { %3512 = vst.msk [vmem:[%s4567_s9 + $0xa88] sm:$0xff] %vm1698_vm1, %v2206_v53 }
  0xd5   : > { %3514 = vst.msk [vmem:[%s4567_s9 + $0xa98] sm:$0xff] %vm1698_vm1, %v2206_v53  ;;  %v1885_v53 = vperm.slane %v733_v51, 1 }
  0xd6   : > { %3624 = vst.msk [vmem:[%s4567_s9 + $0xe08] sm:$0xff] %vm1698_vm1, %v2376_v54 }
  0xd7   : > { %3626 = vst.msk [vmem:[%s4567_s9 + $0xe18] sm:$0xff] %vm1698_vm1, %v2376_v54  ;;  %v2055_v54 = vperm.slane %v733_v51, 2 }
  0xd8   : > { %3736 = vst.msk [vmem:[%s4567_s9 + $0x1188] sm:$0xff] %vm1698_vm1, %v2546_v57  ;;  %v832_v41 = vpop.f32.mrf.mxu0 }
  0xd9   : > { %3738 = vst.msk [vmem:[%s4567_s9 + $0x1198] sm:$0xff] %vm1698_vm1, %v2546_v57  ;;  %v2395_v57 = vperm.slane %v733_v51, 4 }
  0xda   : > { %3848 = vst.msk [vmem:[%s4567_s9 + $0x1508] sm:$0xff] %vm1698_vm1, %v2716_v58 }
  0xdb   : > { %3850 = vst.msk [vmem:[%s4567_s9 + $0x1518] sm:$0xff] %vm1698_vm1, %v2716_v58  ;;  %v467_v58 = vperm.slane %v4740_v55, 0 }
  0xdc   : > { %3960 = vst.msk [vmem:[%s4567_s9 + $0x1888] sm:$0xff] %vm1698_vm1, %v2886_v60 }
  0xdd   : > { %3962 = vst.msk [vmem:[%s4567_s9 + $0x1898] sm:$0xff] %vm1698_vm1, %v2886_v60  ;;  %v2565_v60 = vperm.slane %v733_v51, 5 }
  0xde   : > { %1704 = vst [vmem:[%s4567_s9 + $0x20] sm:$0xff] %v1702_v61 }
  0xdf   : > { %1706 = vst [vmem:[%s4567_s9 + $0x30] sm:$0xff] %v1702_v61  ;;  %v2735_v61 = vperm.slane %v733_v51, 6 }
  0xe0   : > { %3291 = vst [vmem:[%s4567_s9 + $0x3a0] sm:$0xff] %v1872_v62 }
  0xe1   : > { %3293 = vst [vmem:[%s4567_s9 + $0x3b0] sm:$0xff] %v1872_v62  ;;  %v753_v62 = vadd.f32 %v752_v59, %v467_v58 }
  0xe2   : > { %3403 = vst [vmem:[%s4567_s9 + $0x720] sm:$0xff] %v2042_v63 }
  0xe3   : > { %3405 = vst [vmem:[%s4567_s9 + $0x730] sm:$0xff] %v2042_v63  ;;  %v2905_v63 = vperm.slane %v733_v51, 7  ;;  %v2060_v2 = vperm.slane %v753_v62, 2  ;;  %v2230_v3 = vperm.slane %v753_v62, 3  ;;  %v852_v51 = vpop.f32.mrf.mxu1 }
  0xe4   : > { %3515 = vst [vmem:[%s4567_s9 + $0xaa0] sm:$0xff] %v2212_v0 }
  0xe5   : > { %3517 = vst [vmem:[%s4567_s9 + $0xab0] sm:$0xff] %v2212_v0  ;;  %v1720_v0 = vperm.slane %v753_v62, 0 }
  0xe6   : > { %3627 = vst [vmem:[%s4567_s9 + $0xe20] sm:$0xff] %v2382_v1 }
  0xe7   : > { %3629 = vst [vmem:[%s4567_s9 + $0xe30] sm:$0xff] %v2382_v1  ;;  %v1890_v1 = vperm.slane %v753_v62, 1 }
  0xe8   : > { %3739 = vst [vmem:[%s4567_s9 + $0x11a0] sm:$0xff] %v2552_v4 }
  0xe9   : > { %3741 = vst [vmem:[%s4567_s9 + $0x11b0] sm:$0xff] %v2552_v4  ;;  %v2400_v4 = vperm.slane %v753_v62, 4 }
  0xea   : > { %3851 = vst [vmem:[%s4567_s9 + $0x1520] sm:$0xff] %v2722_v5 }
  0xeb   : > { %3853 = vst [vmem:[%s4567_s9 + $0x1530] sm:$0xff] %v2722_v5  ;;  %v468_v5 = vperm.slane %v4740_v55, 1 }
  0xec   : > { %3963 = vst [vmem:[%s4567_s9 + $0x18a0] sm:$0xff] %v2892_v7 }
  0xed   : > { %3965 = vst [vmem:[%s4567_s9 + $0x18b0] sm:$0xff] %v2892_v7  ;;  %v2570_v7 = vperm.slane %v753_v62, 5 }
  0xee   : > { %1705 = vst.msk [vmem:[%s4567_s9 + $0x28] sm:$0xff] %vm1698_vm1, %v1703_v8 }
  0xef   : > { %1707 = vst.msk [vmem:[%s4567_s9 + $0x38] sm:$0xff] %vm1698_vm1, %v1703_v8  ;;  %v2740_v8 = vperm.slane %v753_v62, 6 }
  0xf0   : > { %3292 = vst.msk [vmem:[%s4567_s9 + $0x3a8] sm:$0xff] %vm1698_vm1, %v1873_v9 }
  0xf1   : > { %3294 = vst.msk [vmem:[%s4567_s9 + $0x3b8] sm:$0xff] %vm1698_vm1, %v1873_v9  ;;  %v773_v9 = vadd.f32 %v772_v6, %v468_v5 }
  0xf2   : > { %3404 = vst.msk [vmem:[%s4567_s9 + $0x728] sm:$0xff] %vm1698_vm1, %v2043_v10 }
  0xf3   : > { %3406 = vst.msk [vmem:[%s4567_s9 + $0x738] sm:$0xff] %vm1698_vm1, %v2043_v10  ;;  %v2910_v10 = vperm.slane %v753_v62, 7  ;;  %v2061_v14 = vperm.slane %v773_v9, 2  ;;  %v2231_v15 = vperm.slane %v773_v9, 3  ;;  %v872_v62 = vpop.f32.mrf.mxu2 }
  0xf4   : > { %3516 = vst.msk [vmem:[%s4567_s9 + $0xaa8] sm:$0xff] %vm1698_vm1, %v2213_v11 }
  0xf5   : > { %3518 = vst.msk [vmem:[%s4567_s9 + $0xab8] sm:$0xff] %vm1698_vm1, %v2213_v11  ;;  %v1721_v11 = vperm.slane %v773_v9, 0 }
  0xf6   : > { %3628 = vst.msk [vmem:[%s4567_s9 + $0xe28] sm:$0xff] %vm1698_vm1, %v2383_v13 }
  0xf7   : > { %3630 = vst.msk [vmem:[%s4567_s9 + $0xe38] sm:$0xff] %vm1698_vm1, %v2383_v13  ;;  %v1891_v13 = vperm.slane %v773_v9, 1 }
  0xf8   : > { %3740 = vst.msk [vmem:[%s4567_s9 + $0x11a8] sm:$0xff] %vm1698_vm1, %v2553_v16 }
  0xf9   : > { %3742 = vst.msk [vmem:[%s4567_s9 + $0x11b8] sm:$0xff] %vm1698_vm1, %v2553_v16  ;;  %v2401_v16 = vperm.slane %v773_v9, 4 }
  0xfa   : > { %3852 = vst.msk [vmem:[%s4567_s9 + $0x1528] sm:$0xff] %vm1698_vm1, %v2723_v17 }
  0xfb   : > { %3854 = vst.msk [vmem:[%s4567_s9 + $0x1538] sm:$0xff] %vm1698_vm1, %v2723_v17  ;;  %v469_v17 = vperm.slane %v4740_v55, 2 }
  0xfc   : > { %3964 = vst.msk [vmem:[%s4567_s9 + $0x18a8] sm:$0xff] %vm1698_vm1, %v2893_v19 }
  0xfd   : > { %3966 = vst.msk [vmem:[%s4567_s9 + $0x18b8] sm:$0xff] %vm1698_vm1, %v2893_v19  ;;  %v2571_v19 = vperm.slane %v773_v9, 5 }
  0xfe   : > { %1710 = vst [vmem:[%s4567_s9 + $0x40] sm:$0xff] %v1708_v20 }
  0xff   : > { %1712 = vst [vmem:[%s4567_s9 + $0x50] sm:$0xff] %v1708_v20  ;;  %v2741_v20 = vperm.slane %v773_v9, 6 }
 0x100   : > { %3295 = vst [vmem:[%s4567_s9 + $0x3c0] sm:$0xff] %v1878_v21 }
 0x101   : > { %3297 = vst [vmem:[%s4567_s9 + $0x3d0] sm:$0xff] %v1878_v21  ;;  %v793_v21 = vadd.f32 %v792_v18, %v469_v17  ;;  %v4942_v17 = vld [vmem:[#allocation7 + $0x10] sm:$0xff] }
 0x102   : > { %3407 = vst [vmem:[%s4567_s9 + $0x740] sm:$0xff] %v2048_v22 }
 0x103   : > { %3409 = vst [vmem:[%s4567_s9 + $0x750] sm:$0xff] %v2048_v22  ;;  %v2911_v22 = vperm.slane %v773_v9, 7  ;;  %v2066_v25 = vperm.slane %v793_v21, 2  ;;  %v2236_v26 = vperm.slane %v793_v21, 3  ;;  %v892_v9 = vpop.f32.mrf.mxu3 }
 0x104   : > { %3519 = vst [vmem:[%s4567_s9 + $0xac0] sm:$0xff] %v2218_v23 }
 0x105   : > { %3521 = vst [vmem:[%s4567_s9 + $0xad0] sm:$0xff] %v2218_v23  ;;  %v1726_v23 = vperm.slane %v793_v21, 0 }
 0x106   : > { %3631 = vst [vmem:[%s4567_s9 + $0xe40] sm:$0xff] %v2388_v24 }
 0x107   : > { %3633 = vst [vmem:[%s4567_s9 + $0xe50] sm:$0xff] %v2388_v24  ;;  %v1896_v24 = vperm.slane %v793_v21, 1 }
 0x108   : > { %3743 = vst [vmem:[%s4567_s9 + $0x11c0] sm:$0xff] %v2558_v27 }
 0x109   : > { %3745 = vst [vmem:[%s4567_s9 + $0x11d0] sm:$0xff] %v2558_v27  ;;  %v2406_v27 = vperm.slane %v793_v21, 4 }
 0x10a   : > { %3855 = vst [vmem:[%s4567_s9 + $0x1540] sm:$0xff] %v2728_v28 }
 0x10b   : > { %3857 = vst [vmem:[%s4567_s9 + $0x1550] sm:$0xff] %v2728_v28  ;;  %v470_v28 = vperm.slane %v4740_v55, 3 }
 0x10c   : > { %3967 = vst [vmem:[%s4567_s9 + $0x18c0] sm:$0xff] %v2898_v31 }
 0x10d   : > { %3969 = vst [vmem:[%s4567_s9 + $0x18d0] sm:$0xff] %v2898_v31  ;;  %v2576_v31 = vperm.slane %v793_v21, 5 }
 0x10e   : > { %1711 = vst.msk [vmem:[%s4567_s9 + $0x48] sm:$0xff] %vm1698_vm1, %v1709_v32 }
 0x10f   : > { %1713 = vst.msk [vmem:[%s4567_s9 + $0x58] sm:$0xff] %vm1698_vm1, %v1709_v32  ;;  %v2746_v32 = vperm.slane %v793_v21, 6 }
 0x110   : > { %3296 = vst.msk [vmem:[%s4567_s9 + $0x3c8] sm:$0xff] %vm1698_vm1, %v1879_v33 }
 0x111   : > { %3298 = vst.msk [vmem:[%s4567_s9 + $0x3d8] sm:$0xff] %vm1698_vm1, %v1879_v33  ;;  %v813_v33 = vadd.f32 %v812_v29, %v470_v28 }
 0x112   : > { %3408 = vst.msk [vmem:[%s4567_s9 + $0x748] sm:$0xff] %vm1698_vm1, %v2049_v34 }
 0x113   : > { %3410 = vst.msk [vmem:[%s4567_s9 + $0x758] sm:$0xff] %vm1698_vm1, %v2049_v34  ;;  %v2916_v34 = vperm.slane %v793_v21, 7  ;;  %v2067_v37 = vperm.slane %v813_v33, 2  ;;  %v2237_v38 = vperm.slane %v813_v33, 3  ;;  %v912_v21 = vpop.f32.mrf.mxu0 }
 0x114   : > { %3520 = vst.msk [vmem:[%s4567_s9 + $0xac8] sm:$0xff] %vm1698_vm1, %v2219_v35 }
 0x115   : > { %3522 = vst.msk [vmem:[%s4567_s9 + $0xad8] sm:$0xff] %vm1698_vm1, %v2219_v35  ;;  %v1727_v35 = vperm.slane %v813_v33, 0 }
 0x116   : > { %3632 = vst.msk [vmem:[%s4567_s9 + $0xe48] sm:$0xff] %vm1698_vm1, %v2389_v36 }
 0x117   : > { %3634 = vst.msk [vmem:[%s4567_s9 + $0xe58] sm:$0xff] %vm1698_vm1, %v2389_v36  ;;  %v1897_v36 = vperm.slane %v813_v33, 1 }
 0x118   : > { %3744 = vst.msk [vmem:[%s4567_s9 + $0x11c8] sm:$0xff] %vm1698_vm1, %v2559_v39 }
 0x119   : > { %3746 = vst.msk [vmem:[%s4567_s9 + $0x11d8] sm:$0xff] %vm1698_vm1, %v2559_v39  ;;  %v2407_v39 = vperm.slane %v813_v33, 4 }
 0x11a   : > { %3856 = vst.msk [vmem:[%s4567_s9 + $0x1548] sm:$0xff] %vm1698_vm1, %v2729_v40 }
 0x11b   : > { %3858 = vst.msk [vmem:[%s4567_s9 + $0x1558] sm:$0xff] %vm1698_vm1, %v2729_v40  ;;  %v471_v40 = vperm.slane %v4740_v55, 4 }
 0x11c   : > { %3968 = vst.msk [vmem:[%s4567_s9 + $0x18c8] sm:$0xff] %vm1698_vm1, %v2899_v42 }
 0x11d   : > { %3970 = vst.msk [vmem:[%s4567_s9 + $0x18d8] sm:$0xff] %vm1698_vm1, %v2899_v42  ;;  %v2577_v42 = vperm.slane %v813_v33, 5 }
 0x11e   : > { %1716 = vst [vmem:[%s4567_s9 + $0x60] sm:$0xff] %v1714_v12 }
 0x11f   : > { %1718 = vst [vmem:[%s4567_s9 + $0x70] sm:$0xff] %v1714_v12  ;;  %v2747_v12 = vperm.slane %v813_v33, 6 }
 0x120   : > { %3299 = vst [vmem:[%s4567_s9 + $0x3e0] sm:$0xff] %v1884_v43 }
 0x121   : > { %3301 = vst [vmem:[%s4567_s9 + $0x3f0] sm:$0xff] %v1884_v43  ;;  %v833_v43 = vadd.f32 %v832_v41, %v471_v40 }
 0x122   : > { %3411 = vst [vmem:[%s4567_s9 + $0x760] sm:$0xff] %v2054_v44 }
 0x123   : > { %3413 = vst [vmem:[%s4567_s9 + $0x770] sm:$0xff] %v2054_v44  ;;  %v2917_v44 = vperm.slane %v813_v33, 7  ;;  %v2072_v47 = vperm.slane %v833_v43, 2  ;;  %v2242_v48 = vperm.slane %v833_v43, 3  ;;  %v932_v33 = vpop.f32.mrf.mxu1 }
 0x124   : > { %3523 = vst [vmem:[%s4567_s9 + $0xae0] sm:$0xff] %v2224_v45 }
 0x125   : > { %3525 = vst [vmem:[%s4567_s9 + $0xaf0] sm:$0xff] %v2224_v45  ;;  %v1732_v45 = vperm.slane %v833_v43, 0 }
 0x126   : > { %3635 = vst [vmem:[%s4567_s9 + $0xe60] sm:$0xff] %v2394_v46 }
 0x127   : > { %3637 = vst [vmem:[%s4567_s9 + $0xe70] sm:$0xff] %v2394_v46  ;;  %v1902_v46 = vperm.slane %v833_v43, 1 }
 0x128   : > { %3747 = vst [vmem:[%s4567_s9 + $0x11e0] sm:$0xff] %v2564_v49 }
 0x129   : > { %3749 = vst [vmem:[%s4567_s9 + $0x11f0] sm:$0xff] %v2564_v49  ;;  %v2412_v49 = vperm.slane %v833_v43, 4 }
 0x12a   : > { %3859 = vst [vmem:[%s4567_s9 + $0x1560] sm:$0xff] %v2734_v50 }
 0x12b   : > { %3861 = vst [vmem:[%s4567_s9 + $0x1570] sm:$0xff] %v2734_v50  ;;  %v472_v50 = vperm.slane %v4740_v55, 5 }
 0x12c   : > { %3971 = vst [vmem:[%s4567_s9 + $0x18e0] sm:$0xff] %v2904_v52 }
 0x12d   : > { %3973 = vst [vmem:[%s4567_s9 + $0x18f0] sm:$0xff] %v2904_v52  ;;  %v2582_v52 = vperm.slane %v833_v43, 5 }
 0x12e   : > { %1717 = vst.msk [vmem:[%s4567_s9 + $0x68] sm:$0xff] %vm1698_vm1, %v1715_v30 }
 0x12f   : > { %1719 = vst.msk [vmem:[%s4567_s9 + $0x78] sm:$0xff] %vm1698_vm1, %v1715_v30  ;;  %v2752_v30 = vperm.slane %v833_v43, 6 }
 0x130   : > { %3300 = vst.msk [vmem:[%s4567_s9 + $0x3e8] sm:$0xff] %vm1698_vm1, %v1885_v53 }
 0x131   : > { %3302 = vst.msk [vmem:[%s4567_s9 + $0x3f8] sm:$0xff] %vm1698_vm1, %v1885_v53  ;;  %v853_v53 = vadd.f32 %v852_v51, %v472_v50 }
 0x132   : > { %3412 = vst.msk [vmem:[%s4567_s9 + $0x768] sm:$0xff] %vm1698_vm1, %v2055_v54 }
 0x133   : > { %3414 = vst.msk [vmem:[%s4567_s9 + $0x778] sm:$0xff] %vm1698_vm1, %v2055_v54  ;;  %v2922_v54 = vperm.slane %v833_v43, 7  ;;  %v2073_v58 = vperm.slane %v853_v53, 2  ;;  %v2243_v59 = vperm.slane %v853_v53, 3  ;;  %v952_v43 = vpop.f32.mrf.mxu2 }
 0x134   : > { %3524 = vst.msk [vmem:[%s4567_s9 + $0xae8] sm:$0xff] %vm1698_vm1, %v2225_v56 }
 0x135   : > { %3526 = vst.msk [vmem:[%s4567_s9 + $0xaf8] sm:$0xff] %vm1698_vm1, %v2225_v56  ;;  %v1733_v56 = vperm.slane %v853_v53, 0 }
 0x136   : > { %3636 = vst.msk [vmem:[%s4567_s9 + $0xe68] sm:$0xff] %vm1698_vm1, %v2395_v57 }
 0x137   : > { %3638 = vst.msk [vmem:[%s4567_s9 + $0xe78] sm:$0xff] %vm1698_vm1, %v2395_v57  ;;  %v1903_v57 = vperm.slane %v853_v53, 1 }
 0x138   : > { %3748 = vst.msk [vmem:[%s4567_s9 + $0x11e8] sm:$0xff] %vm1698_vm1, %v2565_v60 }
 0x139   : > { %3750 = vst.msk [vmem:[%s4567_s9 + $0x11f8] sm:$0xff] %vm1698_vm1, %v2565_v60  ;;  %v2413_v60 = vperm.slane %v853_v53, 4 }
 0x13a   : > { %3860 = vst.msk [vmem:[%s4567_s9 + $0x1568] sm:$0xff] %vm1698_vm1, %v2735_v61 }
 0x13b   : > { %3862 = vst.msk [vmem:[%s4567_s9 + $0x1578] sm:$0xff] %vm1698_vm1, %v2735_v61  ;;  %v473_v61 = vperm.slane %v4740_v55, 6 }
 0x13c   : > { %3972 = vst.msk [vmem:[%s4567_s9 + $0x18e8] sm:$0xff] %vm1698_vm1, %v2905_v63 }
 0x13d   : > { %3974 = vst.msk [vmem:[%s4567_s9 + $0x18f8] sm:$0xff] %vm1698_vm1, %v2905_v63  ;;  %v2583_v63 = vperm.slane %v853_v53, 5 }
 0x13e   : > { %1722 = vst [vmem:[%s4567_s9 + $0x80] sm:$0xff] %v1720_v0 }
 0x13f   : > { %1724 = vst [vmem:[%s4567_s9 + $0x90] sm:$0xff] %v1720_v0  ;;  %v2753_v0 = vperm.slane %v853_v53, 6 }
 0x140   : > { %3303 = vst [vmem:[%s4567_s9 + $0x400] sm:$0xff] %v1890_v1 }
 0x141   : > { %3305 = vst [vmem:[%s4567_s9 + $0x410] sm:$0xff] %v1890_v1  ;;  %v873_v1 = vadd.f32 %v872_v62, %v473_v61 }
 0x142   : > { %3415 = vst [vmem:[%s4567_s9 + $0x780] sm:$0xff] %v2060_v2 }
 0x143   : > { %3417 = vst [vmem:[%s4567_s9 + $0x790] sm:$0xff] %v2060_v2  ;;  %v2923_v2 = vperm.slane %v853_v53, 7  ;;  %v2078_v5 = vperm.slane %v873_v1, 2  ;;  %v2248_v6 = vperm.slane %v873_v1, 3  ;;  %v972_v53 = vpop.f32.mrf.mxu3 }
 0x144   : > { %3527 = vst [vmem:[%s4567_s9 + $0xb00] sm:$0xff] %v2230_v3 }
 0x145   : > { %3529 = vst [vmem:[%s4567_s9 + $0xb10] sm:$0xff] %v2230_v3  ;;  %v1738_v3 = vperm.slane %v873_v1, 0 }
 0x146   : > { %3639 = vst [vmem:[%s4567_s9 + $0xe80] sm:$0xff] %v2400_v4 }
 0x147   : > { %3641 = vst [vmem:[%s4567_s9 + $0xe90] sm:$0xff] %v2400_v4  ;;  %v1908_v4 = vperm.slane %v873_v1, 1 }
 0x148   : > { %3751 = vst [vmem:[%s4567_s9 + $0x1200] sm:$0xff] %v2570_v7 }
 0x149   : > { %3753 = vst [vmem:[%s4567_s9 + $0x1210] sm:$0xff] %v2570_v7  ;;  %v2418_v7 = vperm.slane %v873_v1, 4 }
 0x14a   : > { %3863 = vst [vmem:[%s4567_s9 + $0x1580] sm:$0xff] %v2740_v8 }
 0x14b   : > { %3865 = vst [vmem:[%s4567_s9 + $0x1590] sm:$0xff] %v2740_v8  ;;  %v474_v8 = vperm.slane %v4740_v55, 7 }
 0x14c   : > { %3975 = vst [vmem:[%s4567_s9 + $0x1900] sm:$0xff] %v2910_v10 }
 0x14d   : > { %3977 = vst [vmem:[%s4567_s9 + $0x1910] sm:$0xff] %v2910_v10  ;;  %v2588_v10 = vperm.slane %v873_v1, 5 }
 0x14e   : > { %1723 = vst.msk [vmem:[%s4567_s9 + $0x88] sm:$0xff] %vm1698_vm1, %v1721_v11 }
 0x14f   : > { %1725 = vst.msk [vmem:[%s4567_s9 + $0x98] sm:$0xff] %vm1698_vm1, %v1721_v11  ;;  %v2758_v11 = vperm.slane %v873_v1, 6 }
 0x150   : > { %3304 = vst.msk [vmem:[%s4567_s9 + $0x408] sm:$0xff] %vm1698_vm1, %v1891_v13 }
 0x151   : > { %3306 = vst.msk [vmem:[%s4567_s9 + $0x418] sm:$0xff] %vm1698_vm1, %v1891_v13  ;;  %v893_v13 = vadd.f32 %v892_v9, %v474_v8 }
 0x152   : > { %3416 = vst.msk [vmem:[%s4567_s9 + $0x788] sm:$0xff] %vm1698_vm1, %v2061_v14 }
 0x153   : > { %3418 = vst.msk [vmem:[%s4567_s9 + $0x798] sm:$0xff] %vm1698_vm1, %v2061_v14  ;;  %v2928_v14 = vperm.slane %v873_v1, 7  ;;  %v1739_v55 = vperm.slane %v893_v13, 0  ;;  %v2249_v18 = vperm.slane %v893_v13, 3  ;;  %v992_v1 = vpop.f32.mrf.mxu0 }
 0x154   : > { %3528 = vst.msk [vmem:[%s4567_s9 + $0xb08] sm:$0xff] %vm1698_vm1, %v2231_v15 }
 0x155   : > { %3530 = vst.msk [vmem:[%s4567_s9 + $0xb18] sm:$0xff] %vm1698_vm1, %v2231_v15  ;;  %v1909_v15 = vperm.slane %v893_v13, 1 }
 0x156   : > { %3640 = vst.msk [vmem:[%s4567_s9 + $0xe88] sm:$0xff] %vm1698_vm1, %v2401_v16 }
 0x157   : > { %3642 = vst.msk [vmem:[%s4567_s9 + $0xe98] sm:$0xff] %vm1698_vm1, %v2401_v16  ;;  %v2079_v16 = vperm.slane %v893_v13, 2 }
 0x158   : > { %3752 = vst.msk [vmem:[%s4567_s9 + $0x1208] sm:$0xff] %vm1698_vm1, %v2571_v19 }
 0x159   : > { %3754 = vst.msk [vmem:[%s4567_s9 + $0x1218] sm:$0xff] %vm1698_vm1, %v2571_v19  ;;  %v2419_v19 = vperm.slane %v893_v13, 4 }
 0x15a   : > { %3864 = vst.msk [vmem:[%s4567_s9 + $0x1588] sm:$0xff] %vm1698_vm1, %v2741_v20 }
 0x15b   : > { %3866 = vst.msk [vmem:[%s4567_s9 + $0x1598] sm:$0xff] %vm1698_vm1, %v2741_v20  ;;  %v475_v20 = vperm.slane %v4942_v17, 0 }
 0x15c   : > { %3976 = vst.msk [vmem:[%s4567_s9 + $0x1908] sm:$0xff] %vm1698_vm1, %v2911_v22 }
 0x15d   : > { %3978 = vst.msk [vmem:[%s4567_s9 + $0x1918] sm:$0xff] %vm1698_vm1, %v2911_v22  ;;  %v2589_v22 = vperm.slane %v893_v13, 5 }
 0x15e   : > { %1728 = vst [vmem:[%s4567_s9 + $0xa0] sm:$0xff] %v1726_v23 }
 0x15f   : > { %1730 = vst [vmem:[%s4567_s9 + $0xb0] sm:$0xff] %v1726_v23  ;;  %v2759_v23 = vperm.slane %v893_v13, 6 }
 0x160   : > { %3307 = vst [vmem:[%s4567_s9 + $0x420] sm:$0xff] %v1896_v24 }
 0x161   : > { %3309 = vst [vmem:[%s4567_s9 + $0x430] sm:$0xff] %v1896_v24  ;;  %v913_v24 = vadd.f32 %v912_v21, %v475_v20 }
 0x162   : > { %3419 = vst [vmem:[%s4567_s9 + $0x7a0] sm:$0xff] %v2066_v25 }
 0x163   : > { %3421 = vst [vmem:[%s4567_s9 + $0x7b0] sm:$0xff] %v2066_v25  ;;  %v2929_v25 = vperm.slane %v893_v13, 7  ;;  %v2084_v28 = vperm.slane %v913_v24, 2  ;;  %v2254_v29 = vperm.slane %v913_v24, 3  ;;  %v1012_v13 = vpop.f32.mrf.mxu1 }
 0x164   : > { %3531 = vst [vmem:[%s4567_s9 + $0xb20] sm:$0xff] %v2236_v26 }
 0x165   : > { %3533 = vst [vmem:[%s4567_s9 + $0xb30] sm:$0xff] %v2236_v26  ;;  %v1744_v26 = vperm.slane %v913_v24, 0 }
 0x166   : > { %3643 = vst [vmem:[%s4567_s9 + $0xea0] sm:$0xff] %v2406_v27 }
 0x167   : > { %3645 = vst [vmem:[%s4567_s9 + $0xeb0] sm:$0xff] %v2406_v27  ;;  %v1914_v27 = vperm.slane %v913_v24, 1 }
 0x168   : > { %3755 = vst [vmem:[%s4567_s9 + $0x1220] sm:$0xff] %v2576_v31 }
 0x169   : > { %3757 = vst [vmem:[%s4567_s9 + $0x1230] sm:$0xff] %v2576_v31  ;;  %v2424_v31 = vperm.slane %v913_v24, 4 }
 0x16a   : > { %3867 = vst [vmem:[%s4567_s9 + $0x15a0] sm:$0xff] %v2746_v32 }
 0x16b   : > { %3869 = vst [vmem:[%s4567_s9 + $0x15b0] sm:$0xff] %v2746_v32  ;;  %v476_v32 = vperm.slane %v4942_v17, 1 }
 0x16c   : > { %3979 = vst [vmem:[%s4567_s9 + $0x1920] sm:$0xff] %v2916_v34 }
 0x16d   : > { %3981 = vst [vmem:[%s4567_s9 + $0x1930] sm:$0xff] %v2916_v34  ;;  %v2594_v34 = vperm.slane %v913_v24, 5 }
 0x16e   : > { %1729 = vst.msk [vmem:[%s4567_s9 + $0xa8] sm:$0xff] %vm1698_vm1, %v1727_v35 }
 0x16f   : > { %1731 = vst.msk [vmem:[%s4567_s9 + $0xb8] sm:$0xff] %vm1698_vm1, %v1727_v35  ;;  %v2764_v35 = vperm.slane %v913_v24, 6 }
 0x170   : > { %3308 = vst.msk [vmem:[%s4567_s9 + $0x428] sm:$0xff] %vm1698_vm1, %v1897_v36 }
 0x171   : > { %3310 = vst.msk [vmem:[%s4567_s9 + $0x438] sm:$0xff] %vm1698_vm1, %v1897_v36  ;;  %v933_v36 = vadd.f32 %v932_v33, %v476_v32 }
 0x172   : > { %3420 = vst.msk [vmem:[%s4567_s9 + $0x7a8] sm:$0xff] %vm1698_vm1, %v2067_v37 }
 0x173   : > { %3422 = vst.msk [vmem:[%s4567_s9 + $0x7b8] sm:$0xff] %vm1698_vm1, %v2067_v37  ;;  %v2934_v37 = vperm.slane %v913_v24, 7  ;;  %v2085_v40 = vperm.slane %v933_v36, 2  ;;  %v2255_v41 = vperm.slane %v933_v36, 3  ;;  %v1032_v24 = vpop.f32.mrf.mxu2 }
 0x174   : > { %3532 = vst.msk [vmem:[%s4567_s9 + $0xb28] sm:$0xff] %vm1698_vm1, %v2237_v38 }
 0x175   : > { %3534 = vst.msk [vmem:[%s4567_s9 + $0xb38] sm:$0xff] %vm1698_vm1, %v2237_v38  ;;  %v1745_v38 = vperm.slane %v933_v36, 0 }
 0x176   : > { %3644 = vst.msk [vmem:[%s4567_s9 + $0xea8] sm:$0xff] %vm1698_vm1, %v2407_v39 }
 0x177   : > { %3646 = vst.msk [vmem:[%s4567_s9 + $0xeb8] sm:$0xff] %vm1698_vm1, %v2407_v39  ;;  %v1915_v39 = vperm.slane %v933_v36, 1 }
 0x178   : > { %3756 = vst.msk [vmem:[%s4567_s9 + $0x1228] sm:$0xff] %vm1698_vm1, %v2577_v42 }
 0x179   : > { %3758 = vst.msk [vmem:[%s4567_s9 + $0x1238] sm:$0xff] %vm1698_vm1, %v2577_v42  ;;  %v2425_v42 = vperm.slane %v933_v36, 4 }
 0x17a   : > { %3868 = vst.msk [vmem:[%s4567_s9 + $0x15a8] sm:$0xff] %vm1698_vm1, %v2747_v12 }
 0x17b   : > { %3870 = vst.msk [vmem:[%s4567_s9 + $0x15b8] sm:$0xff] %vm1698_vm1, %v2747_v12  ;;  %v477_v12 = vperm.slane %v4942_v17, 2 }
 0x17c   : > { %3980 = vst.msk [vmem:[%s4567_s9 + $0x1928] sm:$0xff] %vm1698_vm1, %v2917_v44 }
 0x17d   : > { %3982 = vst.msk [vmem:[%s4567_s9 + $0x1938] sm:$0xff] %vm1698_vm1, %v2917_v44  ;;  %v2595_v44 = vperm.slane %v933_v36, 5 }
 0x17e   : > { %1734 = vst [vmem:[%s4567_s9 + $0xc0] sm:$0xff] %v1732_v45 }
 0x17f   : > { %1736 = vst [vmem:[%s4567_s9 + $0xd0] sm:$0xff] %v1732_v45  ;;  %v2765_v45 = vperm.slane %v933_v36, 6 }
 0x180   : > { %3311 = vst [vmem:[%s4567_s9 + $0x440] sm:$0xff] %v1902_v46 }
 0x181   : > { %3313 = vst [vmem:[%s4567_s9 + $0x450] sm:$0xff] %v1902_v46  ;;  %v953_v46 = vadd.f32 %v952_v43, %v477_v12  ;;  %v5144_v12 = vld [vmem:[#allocation7 + $0x18] sm:$0xff] }
 0x182   : > { %3423 = vst [vmem:[%s4567_s9 + $0x7c0] sm:$0xff] %v2072_v47 }
 0x183   : > { %3425 = vst [vmem:[%s4567_s9 + $0x7d0] sm:$0xff] %v2072_v47  ;;  %v2935_v47 = vperm.slane %v933_v36, 7  ;;  %v2090_v50 = vperm.slane %v953_v46, 2  ;;  %v2260_v51 = vperm.slane %v953_v46, 3  ;;  %v1052_v36 = vpop.f32.mrf.mxu3 }
 0x184   : > { %3535 = vst [vmem:[%s4567_s9 + $0xb40] sm:$0xff] %v2242_v48 }
 0x185   : > { %3537 = vst [vmem:[%s4567_s9 + $0xb50] sm:$0xff] %v2242_v48  ;;  %v1750_v48 = vperm.slane %v953_v46, 0 }
 0x186   : > { %3647 = vst [vmem:[%s4567_s9 + $0xec0] sm:$0xff] %v2412_v49 }
 0x187   : > { %3649 = vst [vmem:[%s4567_s9 + $0xed0] sm:$0xff] %v2412_v49  ;;  %v1920_v49 = vperm.slane %v953_v46, 1 }
 0x188   : > { %3759 = vst [vmem:[%s4567_s9 + $0x1240] sm:$0xff] %v2582_v52 }
 0x189   : > { %3761 = vst [vmem:[%s4567_s9 + $0x1250] sm:$0xff] %v2582_v52  ;;  %v2430_v52 = vperm.slane %v953_v46, 4 }
 0x18a   : > { %3871 = vst [vmem:[%s4567_s9 + $0x15c0] sm:$0xff] %v2752_v30 }
 0x18b   : > { %3873 = vst [vmem:[%s4567_s9 + $0x15d0] sm:$0xff] %v2752_v30  ;;  %v478_v30 = vperm.slane %v4942_v17, 3 }
 0x18c   : > { %3983 = vst [vmem:[%s4567_s9 + $0x1940] sm:$0xff] %v2922_v54 }
 0x18d   : > { %3985 = vst [vmem:[%s4567_s9 + $0x1950] sm:$0xff] %v2922_v54  ;;  %v2600_v54 = vperm.slane %v953_v46, 5 }
 0x18e   : > { %1735 = vst.msk [vmem:[%s4567_s9 + $0xc8] sm:$0xff] %vm1698_vm1, %v1733_v56 }
 0x18f   : > { %1737 = vst.msk [vmem:[%s4567_s9 + $0xd8] sm:$0xff] %vm1698_vm1, %v1733_v56  ;;  %v2770_v56 = vperm.slane %v953_v46, 6 }
 0x190   : > { %3312 = vst.msk [vmem:[%s4567_s9 + $0x448] sm:$0xff] %vm1698_vm1, %v1903_v57 }
 0x191   : > { %3314 = vst.msk [vmem:[%s4567_s9 + $0x458] sm:$0xff] %vm1698_vm1, %v1903_v57  ;;  %v973_v57 = vadd.f32 %v972_v53, %v478_v30 }
 0x192   : > { %3424 = vst.msk [vmem:[%s4567_s9 + $0x7c8] sm:$0xff] %vm1698_vm1, %v2073_v58 }
 0x193   : > { %3426 = vst.msk [vmem:[%s4567_s9 + $0x7d8] sm:$0xff] %vm1698_vm1, %v2073_v58  ;;  %v2940_v58 = vperm.slane %v953_v46, 7  ;;  %v2091_v61 = vperm.slane %v973_v57, 2  ;;  %v2261_v62 = vperm.slane %v973_v57, 3  ;;  %v1072_v46 = vpop.f32.mrf.mxu0 }
 0x194   : > { %3536 = vst.msk [vmem:[%s4567_s9 + $0xb48] sm:$0xff] %vm1698_vm1, %v2243_v59 }
 0x195   : > { %3538 = vst.msk [vmem:[%s4567_s9 + $0xb58] sm:$0xff] %vm1698_vm1, %v2243_v59  ;;  %v1751_v59 = vperm.slane %v973_v57, 0 }
 0x196   : > { %3648 = vst.msk [vmem:[%s4567_s9 + $0xec8] sm:$0xff] %vm1698_vm1, %v2413_v60 }
 0x197   : > { %3650 = vst.msk [vmem:[%s4567_s9 + $0xed8] sm:$0xff] %vm1698_vm1, %v2413_v60  ;;  %v1921_v60 = vperm.slane %v973_v57, 1 }
 0x198   : > { %3760 = vst.msk [vmem:[%s4567_s9 + $0x1248] sm:$0xff] %vm1698_vm1, %v2583_v63 }
 0x199   : > { %3762 = vst.msk [vmem:[%s4567_s9 + $0x1258] sm:$0xff] %vm1698_vm1, %v2583_v63  ;;  %v2431_v63 = vperm.slane %v973_v57, 4 }
 0x19a   : > { %3872 = vst.msk [vmem:[%s4567_s9 + $0x15c8] sm:$0xff] %vm1698_vm1, %v2753_v0 }
 0x19b   : > { %3874 = vst.msk [vmem:[%s4567_s9 + $0x15d8] sm:$0xff] %vm1698_vm1, %v2753_v0  ;;  %v479_v0 = vperm.slane %v4942_v17, 4 }
 0x19c   : > { %3984 = vst.msk [vmem:[%s4567_s9 + $0x1948] sm:$0xff] %vm1698_vm1, %v2923_v2 }
 0x19d   : > { %3986 = vst.msk [vmem:[%s4567_s9 + $0x1958] sm:$0xff] %vm1698_vm1, %v2923_v2  ;;  %v2601_v2 = vperm.slane %v973_v57, 5 }
 0x19e   : > { %1740 = vst [vmem:[%s4567_s9 + $0xe0] sm:$0xff] %v1738_v3 }
 0x19f   : > { %1742 = vst [vmem:[%s4567_s9 + $0xf0] sm:$0xff] %v1738_v3  ;;  %v2771_v3 = vperm.slane %v973_v57, 6 }
 0x1a0   : > { %3315 = vst [vmem:[%s4567_s9 + $0x460] sm:$0xff] %v1908_v4 }
 0x1a1   : > { %3317 = vst [vmem:[%s4567_s9 + $0x470] sm:$0xff] %v1908_v4  ;;  %v993_v4 = vadd.f32 %v992_v1, %v479_v0 }
 0x1a2   : > { %3427 = vst [vmem:[%s4567_s9 + $0x7e0] sm:$0xff] %v2078_v5 }
 0x1a3   : > { %3429 = vst [vmem:[%s4567_s9 + $0x7f0] sm:$0xff] %v2078_v5  ;;  %v2941_v5 = vperm.slane %v973_v57, 7  ;;  %v2096_v8 = vperm.slane %v993_v4, 2  ;;  %v2266_v9 = vperm.slane %v993_v4, 3  ;;  %v1092_v57 = vpop.f32.mrf.mxu1 }
 0x1a4   : > { %3539 = vst [vmem:[%s4567_s9 + $0xb60] sm:$0xff] %v2248_v6 }
 0x1a5   : > { %3541 = vst [vmem:[%s4567_s9 + $0xb70] sm:$0xff] %v2248_v6  ;;  %v1756_v6 = vperm.slane %v993_v4, 0 }
 0x1a6   : > { %3651 = vst [vmem:[%s4567_s9 + $0xee0] sm:$0xff] %v2418_v7 }
 0x1a7   : > { %3653 = vst [vmem:[%s4567_s9 + $0xef0] sm:$0xff] %v2418_v7  ;;  %v1926_v7 = vperm.slane %v993_v4, 1 }
 0x1a8   : > { %3763 = vst [vmem:[%s4567_s9 + $0x1260] sm:$0xff] %v2588_v10 }
 0x1a9   : > { %3765 = vst [vmem:[%s4567_s9 + $0x1270] sm:$0xff] %v2588_v10  ;;  %v2436_v10 = vperm.slane %v993_v4, 4 }
 0x1aa   : > { %3875 = vst [vmem:[%s4567_s9 + $0x15e0] sm:$0xff] %v2758_v11 }
 0x1ab   : > { %3877 = vst [vmem:[%s4567_s9 + $0x15f0] sm:$0xff] %v2758_v11  ;;  %v480_v11 = vperm.slane %v4942_v17, 5 }
 0x1ac   : > { %3987 = vst [vmem:[%s4567_s9 + $0x1960] sm:$0xff] %v2928_v14 }
 0x1ad   : > { %3989 = vst [vmem:[%s4567_s9 + $0x1970] sm:$0xff] %v2928_v14  ;;  %v2606_v14 = vperm.slane %v993_v4, 5 }
 0x1ae   : > { %1741 = vst.msk [vmem:[%s4567_s9 + $0xe8] sm:$0xff] %vm1698_vm1, %v1739_v55 }
 0x1af   : > { %1743 = vst.msk [vmem:[%s4567_s9 + $0xf8] sm:$0xff] %vm1698_vm1, %v1739_v55  ;;  %v2776_v55 = vperm.slane %v993_v4, 6 }
 0x1b0   : > { %3316 = vst.msk [vmem:[%s4567_s9 + $0x468] sm:$0xff] %vm1698_vm1, %v1909_v15 }
 0x1b1   : > { %3318 = vst.msk [vmem:[%s4567_s9 + $0x478] sm:$0xff] %vm1698_vm1, %v1909_v15  ;;  %v1013_v15 = vadd.f32 %v1012_v13, %v480_v11 }
 0x1b2   : > { %3428 = vst.msk [vmem:[%s4567_s9 + $0x7e8] sm:$0xff] %vm1698_vm1, %v2079_v16 }
 0x1b3   : > { %3430 = vst.msk [vmem:[%s4567_s9 + $0x7f8] sm:$0xff] %vm1698_vm1, %v2079_v16  ;;  %v2946_v16 = vperm.slane %v993_v4, 7  ;;  %v2097_v20 = vperm.slane %v1013_v15, 2  ;;  %v2267_v21 = vperm.slane %v1013_v15, 3  ;;  %v1112_v4 = vpop.f32.mrf.mxu2 }
 0x1b4   : > { %3540 = vst.msk [vmem:[%s4567_s9 + $0xb68] sm:$0xff] %vm1698_vm1, %v2249_v18 }
 0x1b5   : > { %3542 = vst.msk [vmem:[%s4567_s9 + $0xb78] sm:$0xff] %vm1698_vm1, %v2249_v18  ;;  %v1757_v18 = vperm.slane %v1013_v15, 0 }
 0x1b6   : > { %3652 = vst.msk [vmem:[%s4567_s9 + $0xee8] sm:$0xff] %vm1698_vm1, %v2419_v19 }
 0x1b7   : > { %3654 = vst.msk [vmem:[%s4567_s9 + $0xef8] sm:$0xff] %vm1698_vm1, %v2419_v19  ;;  %v1927_v19 = vperm.slane %v1013_v15, 1 }
 0x1b8   : > { %3764 = vst.msk [vmem:[%s4567_s9 + $0x1268] sm:$0xff] %vm1698_vm1, %v2589_v22 }
 0x1b9   : > { %3766 = vst.msk [vmem:[%s4567_s9 + $0x1278] sm:$0xff] %vm1698_vm1, %v2589_v22  ;;  %v2437_v22 = vperm.slane %v1013_v15, 4 }
 0x1ba   : > { %3876 = vst.msk [vmem:[%s4567_s9 + $0x15e8] sm:$0xff] %vm1698_vm1, %v2759_v23 }
 0x1bb   : > { %3878 = vst.msk [vmem:[%s4567_s9 + $0x15f8] sm:$0xff] %vm1698_vm1, %v2759_v23  ;;  %v481_v23 = vperm.slane %v4942_v17, 6 }
 0x1bc   : > { %3988 = vst.msk [vmem:[%s4567_s9 + $0x1968] sm:$0xff] %vm1698_vm1, %v2929_v25 }
 0x1bd   : > { %3990 = vst.msk [vmem:[%s4567_s9 + $0x1978] sm:$0xff] %vm1698_vm1, %v2929_v25  ;;  %v2607_v25 = vperm.slane %v1013_v15, 5 }
 0x1be   : > { %1746 = vst [vmem:[%s4567_s9 + $0x100] sm:$0xff] %v1744_v26 }
 0x1bf   : > { %1748 = vst [vmem:[%s4567_s9 + $0x110] sm:$0xff] %v1744_v26  ;;  %v2777_v26 = vperm.slane %v1013_v15, 6 }
 0x1c0   : > { %3319 = vst [vmem:[%s4567_s9 + $0x480] sm:$0xff] %v1914_v27 }
 0x1c1   : > { %3321 = vst [vmem:[%s4567_s9 + $0x490] sm:$0xff] %v1914_v27  ;;  %v1033_v27 = vadd.f32 %v1032_v24, %v481_v23 }
 0x1c2   : > { %3431 = vst [vmem:[%s4567_s9 + $0x800] sm:$0xff] %v2084_v28 }
 0x1c3   : > { %3433 = vst [vmem:[%s4567_s9 + $0x810] sm:$0xff] %v2084_v28  ;;  %v2947_v28 = vperm.slane %v1013_v15, 7  ;;  %v2102_v32 = vperm.slane %v1033_v27, 2  ;;  %v2272_v33 = vperm.slane %v1033_v27, 3  ;;  %v1132_v15 = vpop.f32.mrf.mxu3 }
 0x1c4   : > { %3543 = vst [vmem:[%s4567_s9 + $0xb80] sm:$0xff] %v2254_v29 }
 0x1c5   : > { %3545 = vst [vmem:[%s4567_s9 + $0xb90] sm:$0xff] %v2254_v29  ;;  %v1762_v29 = vperm.slane %v1033_v27, 0 }
 0x1c6   : > { %3655 = vst [vmem:[%s4567_s9 + $0xf00] sm:$0xff] %v2424_v31 }
 0x1c7   : > { %3657 = vst [vmem:[%s4567_s9 + $0xf10] sm:$0xff] %v2424_v31  ;;  %v1932_v31 = vperm.slane %v1033_v27, 1 }
 0x1c8   : > { %3767 = vst [vmem:[%s4567_s9 + $0x1280] sm:$0xff] %v2594_v34 }
 0x1c9   : > { %3769 = vst [vmem:[%s4567_s9 + $0x1290] sm:$0xff] %v2594_v34  ;;  %v2442_v34 = vperm.slane %v1033_v27, 4 }
 0x1ca   : > { %3879 = vst [vmem:[%s4567_s9 + $0x1600] sm:$0xff] %v2764_v35 }
 0x1cb   : > { %3881 = vst [vmem:[%s4567_s9 + $0x1610] sm:$0xff] %v2764_v35  ;;  %v482_v35 = vperm.slane %v4942_v17, 7 }
 0x1cc   : > { %3991 = vst [vmem:[%s4567_s9 + $0x1980] sm:$0xff] %v2934_v37 }
 0x1cd   : > { %3993 = vst [vmem:[%s4567_s9 + $0x1990] sm:$0xff] %v2934_v37  ;;  %v2612_v37 = vperm.slane %v1033_v27, 5 }
 0x1ce   : > { %1747 = vst.msk [vmem:[%s4567_s9 + $0x108] sm:$0xff] %vm1698_vm1, %v1745_v38 }
 0x1cf   : > { %1749 = vst.msk [vmem:[%s4567_s9 + $0x118] sm:$0xff] %vm1698_vm1, %v1745_v38  ;;  %v2782_v38 = vperm.slane %v1033_v27, 6 }
 0x1d0   : > { %3320 = vst.msk [vmem:[%s4567_s9 + $0x488] sm:$0xff] %vm1698_vm1, %v1915_v39 }
 0x1d1   : > { %3322 = vst.msk [vmem:[%s4567_s9 + $0x498] sm:$0xff] %vm1698_vm1, %v1915_v39  ;;  %v1053_v39 = vadd.f32 %v1052_v36, %v482_v35 }
 0x1d2   : > { %3432 = vst.msk [vmem:[%s4567_s9 + $0x808] sm:$0xff] %vm1698_vm1, %v2085_v40 }
 0x1d3   : > { %3434 = vst.msk [vmem:[%s4567_s9 + $0x818] sm:$0xff] %vm1698_vm1, %v2085_v40  ;;  %v2952_v40 = vperm.slane %v1033_v27, 7  ;;  %v1763_v17 = vperm.slane %v1053_v39, 0  ;;  %v2273_v43 = vperm.slane %v1053_v39, 3  ;;  %v1152_v27 = vpop.f32.mrf.mxu0 }
 0x1d4   : > { %3544 = vst.msk [vmem:[%s4567_s9 + $0xb88] sm:$0xff] %vm1698_vm1, %v2255_v41 }
 0x1d5   : > { %3546 = vst.msk [vmem:[%s4567_s9 + $0xb98] sm:$0xff] %vm1698_vm1, %v2255_v41  ;;  %v1933_v41 = vperm.slane %v1053_v39, 1 }
 0x1d6   : > { %3656 = vst.msk [vmem:[%s4567_s9 + $0xf08] sm:$0xff] %vm1698_vm1, %v2425_v42 }
 0x1d7   : > { %3658 = vst.msk [vmem:[%s4567_s9 + $0xf18] sm:$0xff] %vm1698_vm1, %v2425_v42  ;;  %v2103_v42 = vperm.slane %v1053_v39, 2 }
 0x1d8   : > { %3768 = vst.msk [vmem:[%s4567_s9 + $0x1288] sm:$0xff] %vm1698_vm1, %v2595_v44 }
 0x1d9   : > { %3770 = vst.msk [vmem:[%s4567_s9 + $0x1298] sm:$0xff] %vm1698_vm1, %v2595_v44  ;;  %v2443_v44 = vperm.slane %v1053_v39, 4 }
 0x1da   : > { %3880 = vst.msk [vmem:[%s4567_s9 + $0x1608] sm:$0xff] %vm1698_vm1, %v2765_v45 }
 0x1db   : > { %3882 = vst.msk [vmem:[%s4567_s9 + $0x1618] sm:$0xff] %vm1698_vm1, %v2765_v45  ;;  %v483_v45 = vperm.slane %v5144_v12, 0 }
 0x1dc   : > { %3992 = vst.msk [vmem:[%s4567_s9 + $0x1988] sm:$0xff] %vm1698_vm1, %v2935_v47 }
 0x1dd   : > { %3994 = vst.msk [vmem:[%s4567_s9 + $0x1998] sm:$0xff] %vm1698_vm1, %v2935_v47  ;;  %v2613_v47 = vperm.slane %v1053_v39, 5 }
 0x1de   : > { %1752 = vst [vmem:[%s4567_s9 + $0x120] sm:$0xff] %v1750_v48 }
 0x1df   : > { %1754 = vst [vmem:[%s4567_s9 + $0x130] sm:$0xff] %v1750_v48  ;;  %v2783_v48 = vperm.slane %v1053_v39, 6 }
 0x1e0   : > { %3323 = vst [vmem:[%s4567_s9 + $0x4a0] sm:$0xff] %v1920_v49 }
 0x1e1   : > { %3325 = vst [vmem:[%s4567_s9 + $0x4b0] sm:$0xff] %v1920_v49  ;;  %v1073_v49 = vadd.f32 %v1072_v46, %v483_v45 }
 0x1e2   : > { %3435 = vst [vmem:[%s4567_s9 + $0x820] sm:$0xff] %v2090_v50 }
 0x1e3   : > { %3437 = vst [vmem:[%s4567_s9 + $0x830] sm:$0xff] %v2090_v50  ;;  %v2953_v50 = vperm.slane %v1053_v39, 7  ;;  %v2108_v30 = vperm.slane %v1073_v49, 2  ;;  %v2278_v53 = vperm.slane %v1073_v49, 3  ;;  %v1172_v39 = vpop.f32.mrf.mxu1 }
 0x1e4   : > { %3547 = vst [vmem:[%s4567_s9 + $0xba0] sm:$0xff] %v2260_v51 }
 0x1e5   : > { %3549 = vst [vmem:[%s4567_s9 + $0xbb0] sm:$0xff] %v2260_v51  ;;  %v1768_v51 = vperm.slane %v1073_v49, 0 }
 0x1e6   : > { %3659 = vst [vmem:[%s4567_s9 + $0xf20] sm:$0xff] %v2430_v52 }
 0x1e7   : > { %3661 = vst [vmem:[%s4567_s9 + $0xf30] sm:$0xff] %v2430_v52  ;;  %v1938_v52 = vperm.slane %v1073_v49, 1 }
 0x1e8   : > { %3771 = vst [vmem:[%s4567_s9 + $0x12a0] sm:$0xff] %v2600_v54 }
 0x1e9   : > { %3773 = vst [vmem:[%s4567_s9 + $0x12b0] sm:$0xff] %v2600_v54  ;;  %v2448_v54 = vperm.slane %v1073_v49, 4 }
 0x1ea   : > { %3883 = vst [vmem:[%s4567_s9 + $0x1620] sm:$0xff] %v2770_v56 }
 0x1eb   : > { %3885 = vst [vmem:[%s4567_s9 + $0x1630] sm:$0xff] %v2770_v56  ;;  %v484_v56 = vperm.slane %v5144_v12, 1 }
 0x1ec   : > { %3995 = vst [vmem:[%s4567_s9 + $0x19a0] sm:$0xff] %v2940_v58 }
 0x1ed   : > { %3997 = vst [vmem:[%s4567_s9 + $0x19b0] sm:$0xff] %v2940_v58  ;;  %v2618_v58 = vperm.slane %v1073_v49, 5 }
 0x1ee   : > { %1753 = vst.msk [vmem:[%s4567_s9 + $0x128] sm:$0xff] %vm1698_vm1, %v1751_v59 }
 0x1ef   : > { %1755 = vst.msk [vmem:[%s4567_s9 + $0x138] sm:$0xff] %vm1698_vm1, %v1751_v59  ;;  %v2788_v59 = vperm.slane %v1073_v49, 6 }
 0x1f0   : > { %3324 = vst.msk [vmem:[%s4567_s9 + $0x4a8] sm:$0xff] %vm1698_vm1, %v1921_v60 }
 0x1f1   : > { %3326 = vst.msk [vmem:[%s4567_s9 + $0x4b8] sm:$0xff] %vm1698_vm1, %v1921_v60  ;;  %v1093_v60 = vadd.f32 %v1092_v57, %v484_v56 }
 0x1f2   : > { %3436 = vst.msk [vmem:[%s4567_s9 + $0x828] sm:$0xff] %vm1698_vm1, %v2091_v61 }
 0x1f3   : > { %3438 = vst.msk [vmem:[%s4567_s9 + $0x838] sm:$0xff] %vm1698_vm1, %v2091_v61  ;;  %v2958_v61 = vperm.slane %v1073_v49, 7  ;;  %v2109_v0 = vperm.slane %v1093_v60, 2  ;;  %v2279_v1 = vperm.slane %v1093_v60, 3  ;;  %v1192_v49 = vpop.f32.mrf.mxu2 }
 0x1f4   : > { %3548 = vst.msk [vmem:[%s4567_s9 + $0xba8] sm:$0xff] %vm1698_vm1, %v2261_v62 }
 0x1f5   : > { %3550 = vst.msk [vmem:[%s4567_s9 + $0xbb8] sm:$0xff] %vm1698_vm1, %v2261_v62  ;;  %v1769_v62 = vperm.slane %v1093_v60, 0 }
 0x1f6   : > { %3660 = vst.msk [vmem:[%s4567_s9 + $0xf28] sm:$0xff] %vm1698_vm1, %v2431_v63 }
 0x1f7   : > { %3662 = vst.msk [vmem:[%s4567_s9 + $0xf38] sm:$0xff] %vm1698_vm1, %v2431_v63  ;;  %v1939_v63 = vperm.slane %v1093_v60, 1 }
 0x1f8   : > { %3772 = vst.msk [vmem:[%s4567_s9 + $0x12a8] sm:$0xff] %vm1698_vm1, %v2601_v2 }
 0x1f9   : > { %3774 = vst.msk [vmem:[%s4567_s9 + $0x12b8] sm:$0xff] %vm1698_vm1, %v2601_v2  ;;  %v2449_v2 = vperm.slane %v1093_v60, 4 }
 0x1fa   : > { %3884 = vst.msk [vmem:[%s4567_s9 + $0x1628] sm:$0xff] %vm1698_vm1, %v2771_v3 }
 0x1fb   : > { %3886 = vst.msk [vmem:[%s4567_s9 + $0x1638] sm:$0xff] %vm1698_vm1, %v2771_v3  ;;  %v485_v3 = vperm.slane %v5144_v12, 2 }
 0x1fc   : > { %3996 = vst.msk [vmem:[%s4567_s9 + $0x19a8] sm:$0xff] %vm1698_vm1, %v2941_v5 }
 0x1fd   : > { %3998 = vst.msk [vmem:[%s4567_s9 + $0x19b8] sm:$0xff] %vm1698_vm1, %v2941_v5  ;;  %v2619_v5 = vperm.slane %v1093_v60, 5 }
 0x1fe   : > { %1758 = vst [vmem:[%s4567_s9 + $0x140] sm:$0xff] %v1756_v6 }
 0x1ff   : > { %1760 = vst [vmem:[%s4567_s9 + $0x150] sm:$0xff] %v1756_v6  ;;  %v2789_v6 = vperm.slane %v1093_v60, 6 }
 0x200   : > { %3327 = vst [vmem:[%s4567_s9 + $0x4c0] sm:$0xff] %v1926_v7 }
 0x201   : > { %3329 = vst [vmem:[%s4567_s9 + $0x4d0] sm:$0xff] %v1926_v7  ;;  %v1113_v7 = vadd.f32 %v1112_v4, %v485_v3  ;;  %v5346_v3 = vld [vmem:[#allocation7 + $0x20] sm:$0xff] }
 0x202   : > { %3439 = vst [vmem:[%s4567_s9 + $0x840] sm:$0xff] %v2096_v8 }
 0x203   : > { %3441 = vst [vmem:[%s4567_s9 + $0x850] sm:$0xff] %v2096_v8  ;;  %v2959_v8 = vperm.slane %v1093_v60, 7  ;;  %v2114_v11 = vperm.slane %v1113_v7, 2  ;;  %v2284_v13 = vperm.slane %v1113_v7, 3  ;;  %v1212_v60 = vpop.f32.mrf.mxu3 }
 0x204   : > { %3551 = vst [vmem:[%s4567_s9 + $0xbc0] sm:$0xff] %v2266_v9 }
 0x205   : > { %3553 = vst [vmem:[%s4567_s9 + $0xbd0] sm:$0xff] %v2266_v9  ;;  %v1774_v9 = vperm.slane %v1113_v7, 0 }
 0x206   : > { %3663 = vst [vmem:[%s4567_s9 + $0xf40] sm:$0xff] %v2436_v10 }
 0x207   : > { %3665 = vst [vmem:[%s4567_s9 + $0xf50] sm:$0xff] %v2436_v10  ;;  %v1944_v10 = vperm.slane %v1113_v7, 1 }
 0x208   : > { %3775 = vst [vmem:[%s4567_s9 + $0x12c0] sm:$0xff] %v2606_v14 }
 0x209   : > { %3777 = vst [vmem:[%s4567_s9 + $0x12d0] sm:$0xff] %v2606_v14  ;;  %v2454_v14 = vperm.slane %v1113_v7, 4 }
 0x20a   : > { %3887 = vst [vmem:[%s4567_s9 + $0x1640] sm:$0xff] %v2776_v55 }
 0x20b   : > { %3889 = vst [vmem:[%s4567_s9 + $0x1650] sm:$0xff] %v2776_v55  ;;  %v486_v55 = vperm.slane %v5144_v12, 3 }
 0x20c   : > { %3999 = vst [vmem:[%s4567_s9 + $0x19c0] sm:$0xff] %v2946_v16 }
 0x20d   : > { %4001 = vst [vmem:[%s4567_s9 + $0x19d0] sm:$0xff] %v2946_v16  ;;  %v2624_v16 = vperm.slane %v1113_v7, 5 }
 0x20e   : > { %1759 = vst.msk [vmem:[%s4567_s9 + $0x148] sm:$0xff] %vm1698_vm1, %v1757_v18 }
 0x20f   : > { %1761 = vst.msk [vmem:[%s4567_s9 + $0x158] sm:$0xff] %vm1698_vm1, %v1757_v18  ;;  %v2794_v18 = vperm.slane %v1113_v7, 6 }
 0x210   : > { %3328 = vst.msk [vmem:[%s4567_s9 + $0x4c8] sm:$0xff] %vm1698_vm1, %v1927_v19 }
 0x211   : > { %3330 = vst.msk [vmem:[%s4567_s9 + $0x4d8] sm:$0xff] %vm1698_vm1, %v1927_v19  ;;  %v1133_v19 = vadd.f32 %v1132_v15, %v486_v55 }
 0x212   : > { %3440 = vst.msk [vmem:[%s4567_s9 + $0x848] sm:$0xff] %vm1698_vm1, %v2097_v20 }
 0x213   : > { %3442 = vst.msk [vmem:[%s4567_s9 + $0x858] sm:$0xff] %vm1698_vm1, %v2097_v20  ;;  %v2964_v20 = vperm.slane %v1113_v7, 7  ;;  %v2115_v23 = vperm.slane %v1133_v19, 2  ;;  %v2285_v24 = vperm.slane %v1133_v19, 3  ;;  %v1232_v7 = vpop.f32.mrf.mxu0 }
 0x214   : > { %3552 = vst.msk [vmem:[%s4567_s9 + $0xbc8] sm:$0xff] %vm1698_vm1, %v2267_v21 }
 0x215   : > { %3554 = vst.msk [vmem:[%s4567_s9 + $0xbd8] sm:$0xff] %vm1698_vm1, %v2267_v21  ;;  %v1775_v21 = vperm.slane %v1133_v19, 0 }
 0x216   : > { %3664 = vst.msk [vmem:[%s4567_s9 + $0xf48] sm:$0xff] %vm1698_vm1, %v2437_v22 }
 0x217   : > { %3666 = vst.msk [vmem:[%s4567_s9 + $0xf58] sm:$0xff] %vm1698_vm1, %v2437_v22  ;;  %v1945_v22 = vperm.slane %v1133_v19, 1 }
 0x218   : > { %3776 = vst.msk [vmem:[%s4567_s9 + $0x12c8] sm:$0xff] %vm1698_vm1, %v2607_v25 }
 0x219   : > { %3778 = vst.msk [vmem:[%s4567_s9 + $0x12d8] sm:$0xff] %vm1698_vm1, %v2607_v25  ;;  %v2455_v25 = vperm.slane %v1133_v19, 4 }
 0x21a   : > { %3888 = vst.msk [vmem:[%s4567_s9 + $0x1648] sm:$0xff] %vm1698_vm1, %v2777_v26 }
 0x21b   : > { %3890 = vst.msk [vmem:[%s4567_s9 + $0x1658] sm:$0xff] %vm1698_vm1, %v2777_v26  ;;  %v487_v26 = vperm.slane %v5144_v12, 4 }
 0x21c   : > { %4000 = vst.msk [vmem:[%s4567_s9 + $0x19c8] sm:$0xff] %vm1698_vm1, %v2947_v28 }
 0x21d   : > { %4002 = vst.msk [vmem:[%s4567_s9 + $0x19d8] sm:$0xff] %vm1698_vm1, %v2947_v28  ;;  %v2625_v28 = vperm.slane %v1133_v19, 5 }
 0x21e   : > { %1764 = vst [vmem:[%s4567_s9 + $0x160] sm:$0xff] %v1762_v29 }
 0x21f   : > { %1766 = vst [vmem:[%s4567_s9 + $0x170] sm:$0xff] %v1762_v29  ;;  %v2795_v29 = vperm.slane %v1133_v19, 6 }
 0x220   : > { %3331 = vst [vmem:[%s4567_s9 + $0x4e0] sm:$0xff] %v1932_v31 }
 0x221   : > { %3333 = vst [vmem:[%s4567_s9 + $0x4f0] sm:$0xff] %v1932_v31  ;;  %v1153_v31 = vadd.f32 %v1152_v27, %v487_v26 }
 0x222   : > { %3443 = vst [vmem:[%s4567_s9 + $0x860] sm:$0xff] %v2102_v32 }
 0x223   : > { %3445 = vst [vmem:[%s4567_s9 + $0x870] sm:$0xff] %v2102_v32  ;;  %v2965_v32 = vperm.slane %v1133_v19, 7  ;;  %v2120_v35 = vperm.slane %v1153_v31, 2  ;;  %v2290_v36 = vperm.slane %v1153_v31, 3  ;;  %v1252_v19 = vpop.f32.mrf.mxu1 }
 0x224   : > { %3555 = vst [vmem:[%s4567_s9 + $0xbe0] sm:$0xff] %v2272_v33 }
 0x225   : > { %3557 = vst [vmem:[%s4567_s9 + $0xbf0] sm:$0xff] %v2272_v33  ;;  %v1780_v33 = vperm.slane %v1153_v31, 0 }
 0x226   : > { %3667 = vst [vmem:[%s4567_s9 + $0xf60] sm:$0xff] %v2442_v34 }
 0x227   : > { %3669 = vst [vmem:[%s4567_s9 + $0xf70] sm:$0xff] %v2442_v34  ;;  %v1950_v34 = vperm.slane %v1153_v31, 1 }
 0x228   : > { %3779 = vst [vmem:[%s4567_s9 + $0x12e0] sm:$0xff] %v2612_v37 }
 0x229   : > { %3781 = vst [vmem:[%s4567_s9 + $0x12f0] sm:$0xff] %v2612_v37  ;;  %v2460_v37 = vperm.slane %v1153_v31, 4 }
 0x22a   : > { %3891 = vst [vmem:[%s4567_s9 + $0x1660] sm:$0xff] %v2782_v38 }
 0x22b   : > { %3893 = vst [vmem:[%s4567_s9 + $0x1670] sm:$0xff] %v2782_v38  ;;  %v488_v38 = vperm.slane %v5144_v12, 5 }
 0x22c   : > { %4003 = vst [vmem:[%s4567_s9 + $0x19e0] sm:$0xff] %v2952_v40 }
 0x22d   : > { %4005 = vst [vmem:[%s4567_s9 + $0x19f0] sm:$0xff] %v2952_v40  ;;  %v2630_v40 = vperm.slane %v1153_v31, 5 }
 0x22e   : > { %1765 = vst.msk [vmem:[%s4567_s9 + $0x168] sm:$0xff] %vm1698_vm1, %v1763_v17 }
 0x22f   : > { %1767 = vst.msk [vmem:[%s4567_s9 + $0x178] sm:$0xff] %vm1698_vm1, %v1763_v17  ;;  %v2800_v17 = vperm.slane %v1153_v31, 6 }
 0x230   : > { %3332 = vst.msk [vmem:[%s4567_s9 + $0x4e8] sm:$0xff] %vm1698_vm1, %v1933_v41 }
 0x231   : > { %3334 = vst.msk [vmem:[%s4567_s9 + $0x4f8] sm:$0xff] %vm1698_vm1, %v1933_v41  ;;  %v1173_v41 = vadd.f32 %v1172_v39, %v488_v38 }
 0x232   : > { %3444 = vst.msk [vmem:[%s4567_s9 + $0x868] sm:$0xff] %vm1698_vm1, %v2103_v42 }
 0x233   : > { %3446 = vst.msk [vmem:[%s4567_s9 + $0x878] sm:$0xff] %vm1698_vm1, %v2103_v42  ;;  %v2970_v42 = vperm.slane %v1153_v31, 7  ;;  %v2121_v45 = vperm.slane %v1173_v41, 2  ;;  %v2291_v46 = vperm.slane %v1173_v41, 3  ;;  %v1272_v31 = vpop.f32.mrf.mxu2 }
 0x234   : > { %3556 = vst.msk [vmem:[%s4567_s9 + $0xbe8] sm:$0xff] %vm1698_vm1, %v2273_v43 }
 0x235   : > { %3558 = vst.msk [vmem:[%s4567_s9 + $0xbf8] sm:$0xff] %vm1698_vm1, %v2273_v43  ;;  %v1781_v43 = vperm.slane %v1173_v41, 0 }
 0x236   : > { %3668 = vst.msk [vmem:[%s4567_s9 + $0xf68] sm:$0xff] %vm1698_vm1, %v2443_v44 }
 0x237   : > { %3670 = vst.msk [vmem:[%s4567_s9 + $0xf78] sm:$0xff] %vm1698_vm1, %v2443_v44  ;;  %v1951_v44 = vperm.slane %v1173_v41, 1 }
 0x238   : > { %3780 = vst.msk [vmem:[%s4567_s9 + $0x12e8] sm:$0xff] %vm1698_vm1, %v2613_v47 }
 0x239   : > { %3782 = vst.msk [vmem:[%s4567_s9 + $0x12f8] sm:$0xff] %vm1698_vm1, %v2613_v47  ;;  %v2461_v47 = vperm.slane %v1173_v41, 4 }
 0x23a   : > { %3892 = vst.msk [vmem:[%s4567_s9 + $0x1668] sm:$0xff] %vm1698_vm1, %v2783_v48 }
 0x23b   : > { %3894 = vst.msk [vmem:[%s4567_s9 + $0x1678] sm:$0xff] %vm1698_vm1, %v2783_v48  ;;  %v489_v48 = vperm.slane %v5144_v12, 6 }
 0x23c   : > { %4004 = vst.msk [vmem:[%s4567_s9 + $0x19e8] sm:$0xff] %vm1698_vm1, %v2953_v50 }
 0x23d   : > { %4006 = vst.msk [vmem:[%s4567_s9 + $0x19f8] sm:$0xff] %vm1698_vm1, %v2953_v50  ;;  %v2631_v50 = vperm.slane %v1173_v41, 5 }
 0x23e   : > { %1770 = vst [vmem:[%s4567_s9 + $0x180] sm:$0xff] %v1768_v51 }
 0x23f   : > { %1772 = vst [vmem:[%s4567_s9 + $0x190] sm:$0xff] %v1768_v51  ;;  %v2801_v51 = vperm.slane %v1173_v41, 6 }
 0x240   : > { %3335 = vst [vmem:[%s4567_s9 + $0x500] sm:$0xff] %v1938_v52 }
 0x241   : > { %3337 = vst [vmem:[%s4567_s9 + $0x510] sm:$0xff] %v1938_v52  ;;  %v1193_v52 = vadd.f32 %v1192_v49, %v489_v48 }
 0x242   : > { %3447 = vst [vmem:[%s4567_s9 + $0x880] sm:$0xff] %v2108_v30 }
 0x243   : > { %3449 = vst [vmem:[%s4567_s9 + $0x890] sm:$0xff] %v2108_v30  ;;  %v2971_v30 = vperm.slane %v1173_v41, 7  ;;  %v2127_v56 = vperm.slane %v1193_v52, 2  ;;  %v2297_v57 = vperm.slane %v1193_v52, 3  ;;  %v1292_v41 = vpop.f32.mrf.mxu3 }
 0x244   : > { %3559 = vst [vmem:[%s4567_s9 + $0xc00] sm:$0xff] %v2278_v53 }
 0x245   : > { %3561 = vst [vmem:[%s4567_s9 + $0xc10] sm:$0xff] %v2278_v53  ;;  %v1787_v53 = vperm.slane %v1193_v52, 0 }
 0x246   : > { %3671 = vst [vmem:[%s4567_s9 + $0xf80] sm:$0xff] %v2448_v54 }
 0x247   : > { %3673 = vst [vmem:[%s4567_s9 + $0xf90] sm:$0xff] %v2448_v54  ;;  %v1957_v54 = vperm.slane %v1193_v52, 1 }
 0x248   : > { %3783 = vst [vmem:[%s4567_s9 + $0x1300] sm:$0xff] %v2618_v58 }
 0x249   : > { %3785 = vst [vmem:[%s4567_s9 + $0x1310] sm:$0xff] %v2618_v58  ;;  %v2467_v58 = vperm.slane %v1193_v52, 4 }
 0x24a   : > { %3895 = vst [vmem:[%s4567_s9 + $0x1680] sm:$0xff] %v2788_v59 }
 0x24b   : > { %3897 = vst [vmem:[%s4567_s9 + $0x1690] sm:$0xff] %v2788_v59  ;;  %v490_v59 = vperm.slane %v5144_v12, 7 }
 0x24c   : > { %4007 = vst [vmem:[%s4567_s9 + $0x1a00] sm:$0xff] %v2958_v61 }
 0x24d   : > { %4009 = vst [vmem:[%s4567_s9 + $0x1a10] sm:$0xff] %v2958_v61  ;;  %v2637_v61 = vperm.slane %v1193_v52, 5 }
 0x24e   : > { %1771 = vst.msk [vmem:[%s4567_s9 + $0x188] sm:$0xff] %vm1698_vm1, %v1769_v62 }
 0x24f   : > { %1773 = vst.msk [vmem:[%s4567_s9 + $0x198] sm:$0xff] %vm1698_vm1, %v1769_v62  ;;  %v2807_v62 = vperm.slane %v1193_v52, 6 }
 0x250   : > { %3336 = vst.msk [vmem:[%s4567_s9 + $0x508] sm:$0xff] %vm1698_vm1, %v1939_v63 }
 0x251   : > { %3338 = vst.msk [vmem:[%s4567_s9 + $0x518] sm:$0xff] %vm1698_vm1, %v1939_v63  ;;  %v1213_v63 = vadd.f32 %v1212_v60, %v490_v59 }
 0x252   : > { %3448 = vst.msk [vmem:[%s4567_s9 + $0x888] sm:$0xff] %vm1698_vm1, %v2109_v0 }
 0x253   : > { %3450 = vst.msk [vmem:[%s4567_s9 + $0x898] sm:$0xff] %vm1698_vm1, %v2109_v0  ;;  %v2977_v0 = vperm.slane %v1193_v52, 7  ;;  %v1788_v12 = vperm.slane %v1213_v63, 0  ;;  %v2298_v4 = vperm.slane %v1213_v63, 3  ;;  %v1312_v52 = vpop.f32.mrf.mxu0 }
 0x254   : > { %3560 = vst.msk [vmem:[%s4567_s9 + $0xc08] sm:$0xff] %vm1698_vm1, %v2279_v1 }
 0x255   : > { %3562 = vst.msk [vmem:[%s4567_s9 + $0xc18] sm:$0xff] %vm1698_vm1, %v2279_v1  ;;  %v1958_v1 = vperm.slane %v1213_v63, 1 }
 0x256   : > { %3672 = vst.msk [vmem:[%s4567_s9 + $0xf88] sm:$0xff] %vm1698_vm1, %v2449_v2 }
 0x257   : > { %3674 = vst.msk [vmem:[%s4567_s9 + $0xf98] sm:$0xff] %vm1698_vm1, %v2449_v2  ;;  %v2128_v2 = vperm.slane %v1213_v63, 2 }
 0x258   : > { %3784 = vst.msk [vmem:[%s4567_s9 + $0x1308] sm:$0xff] %vm1698_vm1, %v2619_v5 }
 0x259   : > { %3786 = vst.msk [vmem:[%s4567_s9 + $0x1318] sm:$0xff] %vm1698_vm1, %v2619_v5  ;;  %v2468_v5 = vperm.slane %v1213_v63, 4 }
 0x25a   : > { %3896 = vst.msk [vmem:[%s4567_s9 + $0x1688] sm:$0xff] %vm1698_vm1, %v2789_v6 }
 0x25b   : > { %3898 = vst.msk [vmem:[%s4567_s9 + $0x1698] sm:$0xff] %vm1698_vm1, %v2789_v6  ;;  %v491_v6 = vperm.slane %v5346_v3, 0 }
 0x25c   : > { %4008 = vst.msk [vmem:[%s4567_s9 + $0x1a08] sm:$0xff] %vm1698_vm1, %v2959_v8 }
 0x25d   : > { %4010 = vst.msk [vmem:[%s4567_s9 + $0x1a18] sm:$0xff] %vm1698_vm1, %v2959_v8  ;;  %v2638_v8 = vperm.slane %v1213_v63, 5 }
 0x25e   : > { %1776 = vst [vmem:[%s4567_s9 + $0x1a0] sm:$0xff] %v1774_v9 }
 0x25f   : > { %1778 = vst [vmem:[%s4567_s9 + $0x1b0] sm:$0xff] %v1774_v9  ;;  %v2808_v9 = vperm.slane %v1213_v63, 6 }
 0x260   : > { %3339 = vst [vmem:[%s4567_s9 + $0x520] sm:$0xff] %v1944_v10 }
 0x261   : > { %3341 = vst [vmem:[%s4567_s9 + $0x530] sm:$0xff] %v1944_v10  ;;  %v1233_v10 = vadd.f32 %v1232_v7, %v491_v6 }
 0x262   : > { %3451 = vst [vmem:[%s4567_s9 + $0x8a0] sm:$0xff] %v2114_v11 }
 0x263   : > { %3453 = vst [vmem:[%s4567_s9 + $0x8b0] sm:$0xff] %v2114_v11  ;;  %v2978_v11 = vperm.slane %v1213_v63, 7  ;;  %v2133_v55 = vperm.slane %v1233_v10, 2  ;;  %v2303_v15 = vperm.slane %v1233_v10, 3  ;;  %v1332_v63 = vpop.f32.mrf.mxu1 }
 0x264   : > { %3563 = vst [vmem:[%s4567_s9 + $0xc20] sm:$0xff] %v2284_v13 }
 0x265   : > { %3565 = vst [vmem:[%s4567_s9 + $0xc30] sm:$0xff] %v2284_v13  ;;  %v1793_v13 = vperm.slane %v1233_v10, 0 }
 0x266   : > { %3675 = vst [vmem:[%s4567_s9 + $0xfa0] sm:$0xff] %v2454_v14 }
 0x267   : > { %3677 = vst [vmem:[%s4567_s9 + $0xfb0] sm:$0xff] %v2454_v14  ;;  %v1963_v14 = vperm.slane %v1233_v10, 1 }
 0x268   : > { %3787 = vst [vmem:[%s4567_s9 + $0x1320] sm:$0xff] %v2624_v16 }
 0x269   : > { %3789 = vst [vmem:[%s4567_s9 + $0x1330] sm:$0xff] %v2624_v16  ;;  %v2473_v16 = vperm.slane %v1233_v10, 4 }
 0x26a   : > { %3899 = vst [vmem:[%s4567_s9 + $0x16a0] sm:$0xff] %v2794_v18 }
 0x26b   : > { %3901 = vst [vmem:[%s4567_s9 + $0x16b0] sm:$0xff] %v2794_v18  ;;  %v492_v18 = vperm.slane %v5346_v3, 1 }
 0x26c   : > { %4011 = vst [vmem:[%s4567_s9 + $0x1a20] sm:$0xff] %v2964_v20 }
 0x26d   : > { %4013 = vst [vmem:[%s4567_s9 + $0x1a30] sm:$0xff] %v2964_v20  ;;  %v2643_v20 = vperm.slane %v1233_v10, 5 }
 0x26e   : > { %1777 = vst.msk [vmem:[%s4567_s9 + $0x1a8] sm:$0xff] %vm1698_vm1, %v1775_v21 }
 0x26f   : > { %1779 = vst.msk [vmem:[%s4567_s9 + $0x1b8] sm:$0xff] %vm1698_vm1, %v1775_v21  ;;  %v2813_v21 = vperm.slane %v1233_v10, 6 }
 0x270   : > { %3340 = vst.msk [vmem:[%s4567_s9 + $0x528] sm:$0xff] %vm1698_vm1, %v1945_v22 }
 0x271   : > { %3342 = vst.msk [vmem:[%s4567_s9 + $0x538] sm:$0xff] %vm1698_vm1, %v1945_v22  ;;  %v1253_v22 = vadd.f32 %v1252_v19, %v492_v18 }
 0x272   : > { %3452 = vst.msk [vmem:[%s4567_s9 + $0x8a8] sm:$0xff] %vm1698_vm1, %v2115_v23 }
 0x273   : > { %3454 = vst.msk [vmem:[%s4567_s9 + $0x8b8] sm:$0xff] %vm1698_vm1, %v2115_v23  ;;  %v2983_v23 = vperm.slane %v1233_v10, 7  ;;  %v2134_v26 = vperm.slane %v1253_v22, 2  ;;  %v2304_v27 = vperm.slane %v1253_v22, 3  ;;  %v1352_v10 = vpop.f32.mrf.mxu2 }
 0x274   : > { %3564 = vst.msk [vmem:[%s4567_s9 + $0xc28] sm:$0xff] %vm1698_vm1, %v2285_v24 }
 0x275   : > { %3566 = vst.msk [vmem:[%s4567_s9 + $0xc38] sm:$0xff] %vm1698_vm1, %v2285_v24  ;;  %v1794_v24 = vperm.slane %v1253_v22, 0 }
 0x276   : > { %3676 = vst.msk [vmem:[%s4567_s9 + $0xfa8] sm:$0xff] %vm1698_vm1, %v2455_v25 }
 0x277   : > { %3678 = vst.msk [vmem:[%s4567_s9 + $0xfb8] sm:$0xff] %vm1698_vm1, %v2455_v25  ;;  %v1964_v25 = vperm.slane %v1253_v22, 1 }
 0x278   : > { %3788 = vst.msk [vmem:[%s4567_s9 + $0x1328] sm:$0xff] %vm1698_vm1, %v2625_v28 }
 0x279   : > { %3790 = vst.msk [vmem:[%s4567_s9 + $0x1338] sm:$0xff] %vm1698_vm1, %v2625_v28  ;;  %v2474_v28 = vperm.slane %v1253_v22, 4 }
 0x27a   : > { %3900 = vst.msk [vmem:[%s4567_s9 + $0x16a8] sm:$0xff] %vm1698_vm1, %v2795_v29 }
 0x27b   : > { %3902 = vst.msk [vmem:[%s4567_s9 + $0x16b8] sm:$0xff] %vm1698_vm1, %v2795_v29  ;;  %v493_v29 = vperm.slane %v5346_v3, 2 }
 0x27c   : > { %4012 = vst.msk [vmem:[%s4567_s9 + $0x1a28] sm:$0xff] %vm1698_vm1, %v2965_v32 }
 0x27d   : > { %4014 = vst.msk [vmem:[%s4567_s9 + $0x1a38] sm:$0xff] %vm1698_vm1, %v2965_v32  ;;  %v2644_v32 = vperm.slane %v1253_v22, 5 }
 0x27e   : > { %3231 = vst [vmem:[%s4567_s9 + $0x1c0] sm:$0xff] %v1780_v33 }
 0x27f   : > { %3233 = vst [vmem:[%s4567_s9 + $0x1d0] sm:$0xff] %v1780_v33  ;;  %v2814_v33 = vperm.slane %v1253_v22, 6 }
 0x280   : > { %3343 = vst [vmem:[%s4567_s9 + $0x540] sm:$0xff] %v1950_v34 }
 0x281   : > { %3345 = vst [vmem:[%s4567_s9 + $0x550] sm:$0xff] %v1950_v34  ;;  %v1273_v34 = vadd.f32 %v1272_v31, %v493_v29  ;;  %v5548_v29 = vld [vmem:[#allocation7 + $0x28] sm:$0xff] }
 0x282   : > { %3455 = vst [vmem:[%s4567_s9 + $0x8c0] sm:$0xff] %v2120_v35 }
 0x283   : > { %3457 = vst [vmem:[%s4567_s9 + $0x8d0] sm:$0xff] %v2120_v35  ;;  %v2984_v35 = vperm.slane %v1253_v22, 7  ;;  %v2139_v38 = vperm.slane %v1273_v34, 2  ;;  %v2309_v39 = vperm.slane %v1273_v34, 3  ;;  %v1372_v22 = vpop.f32.mrf.mxu3 }
 0x284   : > { %3567 = vst [vmem:[%s4567_s9 + $0xc40] sm:$0xff] %v2290_v36 }
 0x285   : > { %3569 = vst [vmem:[%s4567_s9 + $0xc50] sm:$0xff] %v2290_v36  ;;  %v1799_v36 = vperm.slane %v1273_v34, 0 }
 0x286   : > { %3679 = vst [vmem:[%s4567_s9 + $0xfc0] sm:$0xff] %v2460_v37 }
 0x287   : > { %3681 = vst [vmem:[%s4567_s9 + $0xfd0] sm:$0xff] %v2460_v37  ;;  %v1969_v37 = vperm.slane %v1273_v34, 1 }
 0x288   : > { %3791 = vst [vmem:[%s4567_s9 + $0x1340] sm:$0xff] %v2630_v40 }
 0x289   : > { %3793 = vst [vmem:[%s4567_s9 + $0x1350] sm:$0xff] %v2630_v40  ;;  %v2479_v40 = vperm.slane %v1273_v34, 4 }
 0x28a   : > { %3903 = vst [vmem:[%s4567_s9 + $0x16c0] sm:$0xff] %v2800_v17 }
 0x28b   : > { %3905 = vst [vmem:[%s4567_s9 + $0x16d0] sm:$0xff] %v2800_v17  ;;  %v494_v17 = vperm.slane %v5346_v3, 3 }
 0x28c   : > { %4015 = vst [vmem:[%s4567_s9 + $0x1a40] sm:$0xff] %v2970_v42 }
 0x28d   : > { %4017 = vst [vmem:[%s4567_s9 + $0x1a50] sm:$0xff] %v2970_v42  ;;  %v2649_v42 = vperm.slane %v1273_v34, 5 }
 0x28e   : > { %3232 = vst.msk [vmem:[%s4567_s9 + $0x1c8] sm:$0xff] %vm1698_vm1, %v1781_v43 }
 0x28f   : > { %3234 = vst.msk [vmem:[%s4567_s9 + $0x1d8] sm:$0xff] %vm1698_vm1, %v1781_v43  ;;  %v2819_v43 = vperm.slane %v1273_v34, 6 }
 0x290   : > { %3344 = vst.msk [vmem:[%s4567_s9 + $0x548] sm:$0xff] %vm1698_vm1, %v1951_v44 }
 0x291   : > { %3346 = vst.msk [vmem:[%s4567_s9 + $0x558] sm:$0xff] %vm1698_vm1, %v1951_v44  ;;  %v1293_v44 = vadd.f32 %v1292_v41, %v494_v17 }
 0x292   : > { %3456 = vst.msk [vmem:[%s4567_s9 + $0x8c8] sm:$0xff] %vm1698_vm1, %v2121_v45 }
 0x293   : > { %3458 = vst.msk [vmem:[%s4567_s9 + $0x8d8] sm:$0xff] %vm1698_vm1, %v2121_v45  ;;  %v2989_v45 = vperm.slane %v1273_v34, 7  ;;  %v2140_v48 = vperm.slane %v1293_v44, 2  ;;  %v2310_v49 = vperm.slane %v1293_v44, 3  ;;  %v1392_v34 = vpop.f32.mrf.mxu0 }
 0x294   : > { %3568 = vst.msk [vmem:[%s4567_s9 + $0xc48] sm:$0xff] %vm1698_vm1, %v2291_v46 }
 0x295   : > { %3570 = vst.msk [vmem:[%s4567_s9 + $0xc58] sm:$0xff] %vm1698_vm1, %v2291_v46  ;;  %v1800_v46 = vperm.slane %v1293_v44, 0 }
 0x296   : > { %3680 = vst.msk [vmem:[%s4567_s9 + $0xfc8] sm:$0xff] %vm1698_vm1, %v2461_v47 }
 0x297   : > { %3682 = vst.msk [vmem:[%s4567_s9 + $0xfd8] sm:$0xff] %vm1698_vm1, %v2461_v47  ;;  %v1970_v47 = vperm.slane %v1293_v44, 1 }
 0x298   : > { %3792 = vst.msk [vmem:[%s4567_s9 + $0x1348] sm:$0xff] %vm1698_vm1, %v2631_v50 }
 0x299   : > { %3794 = vst.msk [vmem:[%s4567_s9 + $0x1358] sm:$0xff] %vm1698_vm1, %v2631_v50  ;;  %v2480_v50 = vperm.slane %v1293_v44, 4 }
 0x29a   : > { %3904 = vst.msk [vmem:[%s4567_s9 + $0x16c8] sm:$0xff] %vm1698_vm1, %v2801_v51 }
 0x29b   : > { %3906 = vst.msk [vmem:[%s4567_s9 + $0x16d8] sm:$0xff] %vm1698_vm1, %v2801_v51  ;;  %v495_v51 = vperm.slane %v5346_v3, 4 }
 0x29c   : > { %4016 = vst.msk [vmem:[%s4567_s9 + $0x1a48] sm:$0xff] %vm1698_vm1, %v2971_v30 }
 0x29d   : > { %4018 = vst.msk [vmem:[%s4567_s9 + $0x1a58] sm:$0xff] %vm1698_vm1, %v2971_v30  ;;  %v2650_v30 = vperm.slane %v1293_v44, 5 }
 0x29e   : > { %3235 = vst [vmem:[%s4567_s9 + $0x1e0] sm:$0xff] %v1787_v53 }
 0x29f   : > { %3237 = vst [vmem:[%s4567_s9 + $0x1f0] sm:$0xff] %v1787_v53  ;;  %v2820_v53 = vperm.slane %v1293_v44, 6 }
 0x2a0   : > { %3347 = vst [vmem:[%s4567_s9 + $0x560] sm:$0xff] %v1957_v54 }
 0x2a1   : > { %3349 = vst [vmem:[%s4567_s9 + $0x570] sm:$0xff] %v1957_v54  ;;  %v1313_v54 = vadd.f32 %v1312_v52, %v495_v51 }
 0x2a2   : > { %3459 = vst [vmem:[%s4567_s9 + $0x8e0] sm:$0xff] %v2127_v56 }
 0x2a3   : > { %3461 = vst [vmem:[%s4567_s9 + $0x8f0] sm:$0xff] %v2127_v56  ;;  %v2990_v56 = vperm.slane %v1293_v44, 7  ;;  %v2145_v59 = vperm.slane %v1313_v54, 2  ;;  %v2315_v60 = vperm.slane %v1313_v54, 3  ;;  %v1412_v44 = vpop.f32.mrf.mxu1 }
 0x2a4   : > { %3571 = vst [vmem:[%s4567_s9 + $0xc60] sm:$0xff] %v2297_v57 }
 0x2a5   : > { %3573 = vst [vmem:[%s4567_s9 + $0xc70] sm:$0xff] %v2297_v57  ;;  %v1805_v57 = vperm.slane %v1313_v54, 0 }
 0x2a6   : > { %3683 = vst [vmem:[%s4567_s9 + $0xfe0] sm:$0xff] %v2467_v58 }
 0x2a7   : > { %3685 = vst [vmem:[%s4567_s9 + $0xff0] sm:$0xff] %v2467_v58  ;;  %v1975_v58 = vperm.slane %v1313_v54, 1 }
 0x2a8   : > { %3795 = vst [vmem:[%s4567_s9 + $0x1360] sm:$0xff] %v2637_v61 }
 0x2a9   : > { %3797 = vst [vmem:[%s4567_s9 + $0x1370] sm:$0xff] %v2637_v61  ;;  %v2485_v61 = vperm.slane %v1313_v54, 4 }
 0x2aa   : > { %3907 = vst [vmem:[%s4567_s9 + $0x16e0] sm:$0xff] %v2807_v62 }
 0x2ab   : > { %3909 = vst [vmem:[%s4567_s9 + $0x16f0] sm:$0xff] %v2807_v62  ;;  %v496_v62 = vperm.slane %v5346_v3, 5 }
 0x2ac   : > { %4019 = vst [vmem:[%s4567_s9 + $0x1a60] sm:$0xff] %v2977_v0 }
 0x2ad   : > { %4021 = vst [vmem:[%s4567_s9 + $0x1a70] sm:$0xff] %v2977_v0  ;;  %v2655_v0 = vperm.slane %v1313_v54, 5 }
 0x2ae   : > { %3236 = vst.msk [vmem:[%s4567_s9 + $0x1e8] sm:$0xff] %vm1698_vm1, %v1788_v12 }
 0x2af   : > { %3238 = vst.msk [vmem:[%s4567_s9 + $0x1f8] sm:$0xff] %vm1698_vm1, %v1788_v12  ;;  %v2825_v12 = vperm.slane %v1313_v54, 6 }
 0x2b0   : > { %3348 = vst.msk [vmem:[%s4567_s9 + $0x568] sm:$0xff] %vm1698_vm1, %v1958_v1 }
 0x2b1   : > { %3350 = vst.msk [vmem:[%s4567_s9 + $0x578] sm:$0xff] %vm1698_vm1, %v1958_v1  ;;  %v1333_v1 = vadd.f32 %v1332_v63, %v496_v62 }
 0x2b2   : > { %3460 = vst.msk [vmem:[%s4567_s9 + $0x8e8] sm:$0xff] %vm1698_vm1, %v2128_v2 }
 0x2b3   : > { %3462 = vst.msk [vmem:[%s4567_s9 + $0x8f8] sm:$0xff] %vm1698_vm1, %v2128_v2  ;;  %v2995_v2 = vperm.slane %v1313_v54, 7  ;;  %v2146_v6 = vperm.slane %v1333_v1, 2  ;;  %v2316_v7 = vperm.slane %v1333_v1, 3  ;;  %v1432_v54 = vpop.f32.mrf.mxu2 }
 0x2b4   : > { %3572 = vst.msk [vmem:[%s4567_s9 + $0xc68] sm:$0xff] %vm1698_vm1, %v2298_v4 }
 0x2b5   : > { %3574 = vst.msk [vmem:[%s4567_s9 + $0xc78] sm:$0xff] %vm1698_vm1, %v2298_v4  ;;  %v1806_v4 = vperm.slane %v1333_v1, 0 }
 0x2b6   : > { %3684 = vst.msk [vmem:[%s4567_s9 + $0xfe8] sm:$0xff] %vm1698_vm1, %v2468_v5 }
 0x2b7   : > { %3686 = vst.msk [vmem:[%s4567_s9 + $0xff8] sm:$0xff] %vm1698_vm1, %v2468_v5  ;;  %v1976_v5 = vperm.slane %v1333_v1, 1 }
 0x2b8   : > { %3796 = vst.msk [vmem:[%s4567_s9 + $0x1368] sm:$0xff] %vm1698_vm1, %v2638_v8 }
 0x2b9   : > { %3798 = vst.msk [vmem:[%s4567_s9 + $0x1378] sm:$0xff] %vm1698_vm1, %v2638_v8  ;;  %v2486_v8 = vperm.slane %v1333_v1, 4 }
 0x2ba   : > { %3908 = vst.msk [vmem:[%s4567_s9 + $0x16e8] sm:$0xff] %vm1698_vm1, %v2808_v9 }
 0x2bb   : > { %3910 = vst.msk [vmem:[%s4567_s9 + $0x16f8] sm:$0xff] %vm1698_vm1, %v2808_v9  ;;  %v497_v9 = vperm.slane %v5346_v3, 6 }
 0x2bc   : > { %4020 = vst.msk [vmem:[%s4567_s9 + $0x1a68] sm:$0xff] %vm1698_vm1, %v2978_v11 }
 0x2bd   : > { %4022 = vst.msk [vmem:[%s4567_s9 + $0x1a78] sm:$0xff] %vm1698_vm1, %v2978_v11  ;;  %v2656_v11 = vperm.slane %v1333_v1, 5 }
 0x2be   : > { %3239 = vst [vmem:[%s4567_s9 + $0x200] sm:$0xff] %v1793_v13 }
 0x2bf   : > { %3241 = vst [vmem:[%s4567_s9 + $0x210] sm:$0xff] %v1793_v13  ;;  %v2826_v13 = vperm.slane %v1333_v1, 6 }
 0x2c0   : > { %3351 = vst [vmem:[%s4567_s9 + $0x580] sm:$0xff] %v1963_v14 }
 0x2c1   : > { %3353 = vst [vmem:[%s4567_s9 + $0x590] sm:$0xff] %v1963_v14  ;;  %v1353_v14 = vadd.f32 %v1352_v10, %v497_v9 }
 0x2c2   : > { %3463 = vst [vmem:[%s4567_s9 + $0x900] sm:$0xff] %v2133_v55 }
 0x2c3   : > { %3465 = vst [vmem:[%s4567_s9 + $0x910] sm:$0xff] %v2133_v55  ;;  %v2996_v55 = vperm.slane %v1333_v1, 7  ;;  %v2151_v18 = vperm.slane %v1353_v14, 2  ;;  %v2321_v19 = vperm.slane %v1353_v14, 3  ;;  %v1452_v1 = vpop.f32.mrf.mxu3 }
 0x2c4   : > { %3575 = vst [vmem:[%s4567_s9 + $0xc80] sm:$0xff] %v2303_v15 }
 0x2c5   : > { %3577 = vst [vmem:[%s4567_s9 + $0xc90] sm:$0xff] %v2303_v15  ;;  %v1811_v15 = vperm.slane %v1353_v14, 0 }
 0x2c6   : > { %3687 = vst [vmem:[%s4567_s9 + $0x1000] sm:$0xff] %v2473_v16 }
 0x2c7   : > { %3689 = vst [vmem:[%s4567_s9 + $0x1010] sm:$0xff] %v2473_v16  ;;  %v1981_v16 = vperm.slane %v1353_v14, 1 }
 0x2c8   : > { %3799 = vst [vmem:[%s4567_s9 + $0x1380] sm:$0xff] %v2643_v20 }
 0x2c9   : > { %3801 = vst [vmem:[%s4567_s9 + $0x1390] sm:$0xff] %v2643_v20  ;;  %v2491_v20 = vperm.slane %v1353_v14, 4 }
 0x2ca   : > { %3911 = vst [vmem:[%s4567_s9 + $0x1700] sm:$0xff] %v2813_v21 }
 0x2cb   : > { %3913 = vst [vmem:[%s4567_s9 + $0x1710] sm:$0xff] %v2813_v21  ;;  %v498_v21 = vperm.slane %v5346_v3, 7 }
 0x2cc   : > { %4023 = vst [vmem:[%s4567_s9 + $0x1a80] sm:$0xff] %v2983_v23 }
 0x2cd   : > { %4025 = vst [vmem:[%s4567_s9 + $0x1a90] sm:$0xff] %v2983_v23  ;;  %v2661_v23 = vperm.slane %v1353_v14, 5 }
 0x2ce   : > { %3240 = vst.msk [vmem:[%s4567_s9 + $0x208] sm:$0xff] %vm1698_vm1, %v1794_v24 }
 0x2cf   : > { %3242 = vst.msk [vmem:[%s4567_s9 + $0x218] sm:$0xff] %vm1698_vm1, %v1794_v24  ;;  %v2831_v24 = vperm.slane %v1353_v14, 6 }
 0x2d0   : > { %3352 = vst.msk [vmem:[%s4567_s9 + $0x588] sm:$0xff] %vm1698_vm1, %v1964_v25 }
 0x2d1   : > { %3354 = vst.msk [vmem:[%s4567_s9 + $0x598] sm:$0xff] %vm1698_vm1, %v1964_v25  ;;  %v1373_v25 = vadd.f32 %v1372_v22, %v498_v21 }
 0x2d2   : > { %3464 = vst.msk [vmem:[%s4567_s9 + $0x908] sm:$0xff] %vm1698_vm1, %v2134_v26 }
 0x2d3   : > { %3466 = vst.msk [vmem:[%s4567_s9 + $0x918] sm:$0xff] %vm1698_vm1, %v2134_v26  ;;  %v3001_v26 = vperm.slane %v1353_v14, 7  ;;  %v1812_v3 = vperm.slane %v1373_v25, 0  ;;  %v2322_v31 = vperm.slane %v1373_v25, 3  ;;  %v1472_v14 = vpop.f32.mrf.mxu0 }
 0x2d4   : > { %3576 = vst.msk [vmem:[%s4567_s9 + $0xc88] sm:$0xff] %vm1698_vm1, %v2304_v27 }
 0x2d5   : > { %3578 = vst.msk [vmem:[%s4567_s9 + $0xc98] sm:$0xff] %vm1698_vm1, %v2304_v27  ;;  %v1982_v27 = vperm.slane %v1373_v25, 1 }
 0x2d6   : > { %3688 = vst.msk [vmem:[%s4567_s9 + $0x1008] sm:$0xff] %vm1698_vm1, %v2474_v28 }
 0x2d7   : > { %3690 = vst.msk [vmem:[%s4567_s9 + $0x1018] sm:$0xff] %vm1698_vm1, %v2474_v28  ;;  %v2152_v28 = vperm.slane %v1373_v25, 2 }
 0x2d8   : > { %3800 = vst.msk [vmem:[%s4567_s9 + $0x1388] sm:$0xff] %vm1698_vm1, %v2644_v32 }
 0x2d9   : > { %3802 = vst.msk [vmem:[%s4567_s9 + $0x1398] sm:$0xff] %vm1698_vm1, %v2644_v32  ;;  %v2492_v32 = vperm.slane %v1373_v25, 4 }
 0x2da   : > { %3912 = vst.msk [vmem:[%s4567_s9 + $0x1708] sm:$0xff] %vm1698_vm1, %v2814_v33 }
 0x2db   : > { %3914 = vst.msk [vmem:[%s4567_s9 + $0x1718] sm:$0xff] %vm1698_vm1, %v2814_v33  ;;  %v499_v33 = vperm.slane %v5548_v29, 0 }
 0x2dc   : > { %4024 = vst.msk [vmem:[%s4567_s9 + $0x1a88] sm:$0xff] %vm1698_vm1, %v2984_v35 }
 0x2dd   : > { %4026 = vst.msk [vmem:[%s4567_s9 + $0x1a98] sm:$0xff] %vm1698_vm1, %v2984_v35  ;;  %v2662_v35 = vperm.slane %v1373_v25, 5 }
 0x2de   : > { %3243 = vst [vmem:[%s4567_s9 + $0x220] sm:$0xff] %v1799_v36 }
 0x2df   : > { %3245 = vst [vmem:[%s4567_s9 + $0x230] sm:$0xff] %v1799_v36  ;;  %v2832_v36 = vperm.slane %v1373_v25, 6 }
 0x2e0   : > { %3355 = vst [vmem:[%s4567_s9 + $0x5a0] sm:$0xff] %v1969_v37 }
 0x2e1   : > { %3357 = vst [vmem:[%s4567_s9 + $0x5b0] sm:$0xff] %v1969_v37  ;;  %v1393_v37 = vadd.f32 %v1392_v34, %v499_v33 }
 0x2e2   : > { %3467 = vst [vmem:[%s4567_s9 + $0x920] sm:$0xff] %v2139_v38 }
 0x2e3   : > { %3469 = vst [vmem:[%s4567_s9 + $0x930] sm:$0xff] %v2139_v38  ;;  %v3002_v38 = vperm.slane %v1373_v25, 7  ;;  %v2157_v17 = vperm.slane %v1393_v37, 2  ;;  %v2327_v41 = vperm.slane %v1393_v37, 3  ;;  %v1492_v25 = vpop.f32.mrf.mxu1 }
 0x2e4   : > { %3579 = vst [vmem:[%s4567_s9 + $0xca0] sm:$0xff] %v2309_v39 }
 0x2e5   : > { %3581 = vst [vmem:[%s4567_s9 + $0xcb0] sm:$0xff] %v2309_v39  ;;  %v1817_v39 = vperm.slane %v1393_v37, 0 }
 0x2e6   : > { %3691 = vst [vmem:[%s4567_s9 + $0x1020] sm:$0xff] %v2479_v40 }
 0x2e7   : > { %3693 = vst [vmem:[%s4567_s9 + $0x1030] sm:$0xff] %v2479_v40  ;;  %v1987_v40 = vperm.slane %v1393_v37, 1 }
 0x2e8   : > { %3803 = vst [vmem:[%s4567_s9 + $0x13a0] sm:$0xff] %v2649_v42 }
 0x2e9   : > { %3805 = vst [vmem:[%s4567_s9 + $0x13b0] sm:$0xff] %v2649_v42  ;;  %v2497_v42 = vperm.slane %v1393_v37, 4 }
 0x2ea   : > { %3915 = vst [vmem:[%s4567_s9 + $0x1720] sm:$0xff] %v2819_v43 }
 0x2eb   : > { %3917 = vst [vmem:[%s4567_s9 + $0x1730] sm:$0xff] %v2819_v43  ;;  %v500_v43 = vperm.slane %v5548_v29, 1 }
 0x2ec   : > { %4027 = vst [vmem:[%s4567_s9 + $0x1aa0] sm:$0xff] %v2989_v45 }
 0x2ed   : > { %4029 = vst [vmem:[%s4567_s9 + $0x1ab0] sm:$0xff] %v2989_v45  ;;  %v2667_v45 = vperm.slane %v1393_v37, 5 }
 0x2ee   : > { %3244 = vst.msk [vmem:[%s4567_s9 + $0x228] sm:$0xff] %vm1698_vm1, %v1800_v46 }
 0x2ef   : > { %3246 = vst.msk [vmem:[%s4567_s9 + $0x238] sm:$0xff] %vm1698_vm1, %v1800_v46  ;;  %v2837_v46 = vperm.slane %v1393_v37, 6 }
 0x2f0   : > { %3356 = vst.msk [vmem:[%s4567_s9 + $0x5a8] sm:$0xff] %vm1698_vm1, %v1970_v47 }
 0x2f1   : > { %3358 = vst.msk [vmem:[%s4567_s9 + $0x5b8] sm:$0xff] %vm1698_vm1, %v1970_v47  ;;  %v1413_v47 = vadd.f32 %v1412_v44, %v500_v43 }
 0x2f2   : > { %3468 = vst.msk [vmem:[%s4567_s9 + $0x928] sm:$0xff] %vm1698_vm1, %v2140_v48 }
 0x2f3   : > { %3470 = vst.msk [vmem:[%s4567_s9 + $0x938] sm:$0xff] %vm1698_vm1, %v2140_v48  ;;  %v3007_v48 = vperm.slane %v1393_v37, 7  ;;  %v2158_v51 = vperm.slane %v1413_v47, 2  ;;  %v2328_v52 = vperm.slane %v1413_v47, 3  ;;  %v1512_v37 = vpop.f32.mrf.mxu2 }
 0x2f4   : > { %3580 = vst.msk [vmem:[%s4567_s9 + $0xca8] sm:$0xff] %vm1698_vm1, %v2310_v49 }
 0x2f5   : > { %3582 = vst.msk [vmem:[%s4567_s9 + $0xcb8] sm:$0xff] %vm1698_vm1, %v2310_v49  ;;  %v1818_v49 = vperm.slane %v1413_v47, 0 }
 0x2f6   : > { %3692 = vst.msk [vmem:[%s4567_s9 + $0x1028] sm:$0xff] %vm1698_vm1, %v2480_v50 }
 0x2f7   : > { %3694 = vst.msk [vmem:[%s4567_s9 + $0x1038] sm:$0xff] %vm1698_vm1, %v2480_v50  ;;  %v1988_v50 = vperm.slane %v1413_v47, 1 }
 0x2f8   : > { %3804 = vst.msk [vmem:[%s4567_s9 + $0x13a8] sm:$0xff] %vm1698_vm1, %v2650_v30 }
 0x2f9   : > { %3806 = vst.msk [vmem:[%s4567_s9 + $0x13b8] sm:$0xff] %vm1698_vm1, %v2650_v30  ;;  %v2498_v30 = vperm.slane %v1413_v47, 4 }
 0x2fa   : > { %3916 = vst.msk [vmem:[%s4567_s9 + $0x1728] sm:$0xff] %vm1698_vm1, %v2820_v53 }
 0x2fb   : > { %3918 = vst.msk [vmem:[%s4567_s9 + $0x1738] sm:$0xff] %vm1698_vm1, %v2820_v53  ;;  %v501_v53 = vperm.slane %v5548_v29, 2 }
 0x2fc   : > { %4028 = vst.msk [vmem:[%s4567_s9 + $0x1aa8] sm:$0xff] %vm1698_vm1, %v2990_v56 }
 0x2fd   : > { %4030 = vst.msk [vmem:[%s4567_s9 + $0x1ab8] sm:$0xff] %vm1698_vm1, %v2990_v56  ;;  %v2668_v56 = vperm.slane %v1413_v47, 5 }
 0x2fe   : > { %3247 = vst [vmem:[%s4567_s9 + $0x240] sm:$0xff] %v1805_v57 }
 0x2ff   : > { %3249 = vst [vmem:[%s4567_s9 + $0x250] sm:$0xff] %v1805_v57  ;;  %v2838_v57 = vperm.slane %v1413_v47, 6 }
 0x300   : > { %3359 = vst [vmem:[%s4567_s9 + $0x5c0] sm:$0xff] %v1975_v58 }
 0x301   : > { %3361 = vst [vmem:[%s4567_s9 + $0x5d0] sm:$0xff] %v1975_v58  ;;  %v1433_v58 = vadd.f32 %v1432_v54, %v501_v53  ;;  %v5750_v53 = vld [vmem:[#allocation7 + $0x30] sm:$0xff] }
 0x302   : > { %3471 = vst [vmem:[%s4567_s9 + $0x940] sm:$0xff] %v2145_v59 }
 0x303   : > { %3473 = vst [vmem:[%s4567_s9 + $0x950] sm:$0xff] %v2145_v59  ;;  %v3008_v59 = vperm.slane %v1413_v47, 7  ;;  %v2163_v62 = vperm.slane %v1433_v58, 2  ;;  %v2333_v63 = vperm.slane %v1433_v58, 3  ;;  %v1532_v47 = vpop.f32.mrf.mxu3 }
 0x304   : > { %3583 = vst [vmem:[%s4567_s9 + $0xcc0] sm:$0xff] %v2315_v60 }
 0x305   : > { %3585 = vst [vmem:[%s4567_s9 + $0xcd0] sm:$0xff] %v2315_v60  ;;  %v1823_v60 = vperm.slane %v1433_v58, 0 }
 0x306   : > { %3695 = vst [vmem:[%s4567_s9 + $0x1040] sm:$0xff] %v2485_v61 }
 0x307   : > { %3697 = vst [vmem:[%s4567_s9 + $0x1050] sm:$0xff] %v2485_v61  ;;  %v1993_v61 = vperm.slane %v1433_v58, 1 }
 0x308   : > { %3807 = vst [vmem:[%s4567_s9 + $0x13c0] sm:$0xff] %v2655_v0 }
 0x309   : > { %3809 = vst [vmem:[%s4567_s9 + $0x13d0] sm:$0xff] %v2655_v0  ;;  %v2503_v0 = vperm.slane %v1433_v58, 4 }
 0x30a   : > { %3919 = vst [vmem:[%s4567_s9 + $0x1740] sm:$0xff] %v2825_v12 }
 0x30b   : > { %3921 = vst [vmem:[%s4567_s9 + $0x1750] sm:$0xff] %v2825_v12  ;;  %v502_v12 = vperm.slane %v5548_v29, 3 }
 0x30c   : > { %4031 = vst [vmem:[%s4567_s9 + $0x1ac0] sm:$0xff] %v2995_v2 }
 0x30d   : > { %4033 = vst [vmem:[%s4567_s9 + $0x1ad0] sm:$0xff] %v2995_v2  ;;  %v2673_v2 = vperm.slane %v1433_v58, 5 }
 0x30e   : > { %3248 = vst.msk [vmem:[%s4567_s9 + $0x248] sm:$0xff] %vm1698_vm1, %v1806_v4 }
 0x30f   : > { %3250 = vst.msk [vmem:[%s4567_s9 + $0x258] sm:$0xff] %vm1698_vm1, %v1806_v4  ;;  %v2843_v4 = vperm.slane %v1433_v58, 6 }
 0x310   : > { %3360 = vst.msk [vmem:[%s4567_s9 + $0x5c8] sm:$0xff] %vm1698_vm1, %v1976_v5 }
 0x311   : > { %3362 = vst.msk [vmem:[%s4567_s9 + $0x5d8] sm:$0xff] %vm1698_vm1, %v1976_v5  ;;  %v1453_v5 = vadd.f32 %v1452_v1, %v502_v12 }
 0x312   : > { %3472 = vst.msk [vmem:[%s4567_s9 + $0x948] sm:$0xff] %vm1698_vm1, %v2146_v6 }
 0x313   : > { %3474 = vst.msk [vmem:[%s4567_s9 + $0x958] sm:$0xff] %vm1698_vm1, %v2146_v6  ;;  %v3013_v6 = vperm.slane %v1433_v58, 7  ;;  %v2164_v9 = vperm.slane %v1453_v5, 2  ;;  %v2334_v10 = vperm.slane %v1453_v5, 3  ;;  %v1552_v58 = vpop.f32.mrf.mxu0 }
 0x314   : > { %3584 = vst.msk [vmem:[%s4567_s9 + $0xcc8] sm:$0xff] %vm1698_vm1, %v2316_v7 }
 0x315   : > { %3586 = vst.msk [vmem:[%s4567_s9 + $0xcd8] sm:$0xff] %vm1698_vm1, %v2316_v7  ;;  %v1824_v7 = vperm.slane %v1453_v5, 0 }
 0x316   : > { %3696 = vst.msk [vmem:[%s4567_s9 + $0x1048] sm:$0xff] %vm1698_vm1, %v2486_v8 }
 0x317   : > { %3698 = vst.msk [vmem:[%s4567_s9 + $0x1058] sm:$0xff] %vm1698_vm1, %v2486_v8  ;;  %v1994_v8 = vperm.slane %v1453_v5, 1 }
 0x318   : > { %3808 = vst.msk [vmem:[%s4567_s9 + $0x13c8] sm:$0xff] %vm1698_vm1, %v2656_v11 }
 0x319   : > { %3810 = vst.msk [vmem:[%s4567_s9 + $0x13d8] sm:$0xff] %vm1698_vm1, %v2656_v11  ;;  %v2504_v11 = vperm.slane %v1453_v5, 4 }
 0x31a   : > { %3920 = vst.msk [vmem:[%s4567_s9 + $0x1748] sm:$0xff] %vm1698_vm1, %v2826_v13 }
 0x31b   : > { %3922 = vst.msk [vmem:[%s4567_s9 + $0x1758] sm:$0xff] %vm1698_vm1, %v2826_v13  ;;  %v503_v13 = vperm.slane %v5548_v29, 4 }
 0x31c   : > { %4032 = vst.msk [vmem:[%s4567_s9 + $0x1ac8] sm:$0xff] %vm1698_vm1, %v2996_v55 }
 0x31d   : > { %4034 = vst.msk [vmem:[%s4567_s9 + $0x1ad8] sm:$0xff] %vm1698_vm1, %v2996_v55  ;;  %v2674_v55 = vperm.slane %v1453_v5, 5 }
 0x31e   : > { %3251 = vst [vmem:[%s4567_s9 + $0x260] sm:$0xff] %v1811_v15 }
 0x31f   : > { %3253 = vst [vmem:[%s4567_s9 + $0x270] sm:$0xff] %v1811_v15  ;;  %v2844_v15 = vperm.slane %v1453_v5, 6 }
 0x320   : > { %3363 = vst [vmem:[%s4567_s9 + $0x5e0] sm:$0xff] %v1981_v16 }
 0x321   : > { %3365 = vst [vmem:[%s4567_s9 + $0x5f0] sm:$0xff] %v1981_v16  ;;  %v1473_v16 = vadd.f32 %v1472_v14, %v503_v13 }
 0x322   : > { %3475 = vst [vmem:[%s4567_s9 + $0x960] sm:$0xff] %v2151_v18 }
 0x323   : > { %3477 = vst [vmem:[%s4567_s9 + $0x970] sm:$0xff] %v2151_v18  ;;  %v3014_v18 = vperm.slane %v1453_v5, 7  ;;  %v2169_v21 = vperm.slane %v1473_v16, 2  ;;  %v2339_v22 = vperm.slane %v1473_v16, 3  ;;  %v1572_v5 = vpop.f32.mrf.mxu1 }
 0x324   : > { %3587 = vst [vmem:[%s4567_s9 + $0xce0] sm:$0xff] %v2321_v19 }
 0x325   : > { %3589 = vst [vmem:[%s4567_s9 + $0xcf0] sm:$0xff] %v2321_v19  ;;  %v1829_v19 = vperm.slane %v1473_v16, 0 }
 0x326   : > { %3699 = vst [vmem:[%s4567_s9 + $0x1060] sm:$0xff] %v2491_v20 }
 0x327   : > { %3701 = vst [vmem:[%s4567_s9 + $0x1070] sm:$0xff] %v2491_v20  ;;  %v1999_v20 = vperm.slane %v1473_v16, 1 }
 0x328   : > { %3811 = vst [vmem:[%s4567_s9 + $0x13e0] sm:$0xff] %v2661_v23 }
 0x329   : > { %3813 = vst [vmem:[%s4567_s9 + $0x13f0] sm:$0xff] %v2661_v23  ;;  %v2509_v23 = vperm.slane %v1473_v16, 4 }
 0x32a   : > { %3923 = vst [vmem:[%s4567_s9 + $0x1760] sm:$0xff] %v2831_v24 }
 0x32b   : > { %3925 = vst [vmem:[%s4567_s9 + $0x1770] sm:$0xff] %v2831_v24  ;;  %v504_v24 = vperm.slane %v5548_v29, 5 }
 0x32c   : > { %4035 = vst [vmem:[%s4567_s9 + $0x1ae0] sm:$0xff] %v3001_v26 }
 0x32d   : > { %4037 = vst [vmem:[%s4567_s9 + $0x1af0] sm:$0xff] %v3001_v26  ;;  %v2679_v26 = vperm.slane %v1473_v16, 5 }
 0x32e   : > { %3252 = vst.msk [vmem:[%s4567_s9 + $0x268] sm:$0xff] %vm1698_vm1, %v1812_v3 }
 0x32f   : > { %3254 = vst.msk [vmem:[%s4567_s9 + $0x278] sm:$0xff] %vm1698_vm1, %v1812_v3  ;;  %v2849_v3 = vperm.slane %v1473_v16, 6 }
 0x330   : > { %3364 = vst.msk [vmem:[%s4567_s9 + $0x5e8] sm:$0xff] %vm1698_vm1, %v1982_v27 }
 0x331   : > { %3366 = vst.msk [vmem:[%s4567_s9 + $0x5f8] sm:$0xff] %vm1698_vm1, %v1982_v27  ;;  %v1493_v27 = vadd.f32 %v1492_v25, %v504_v24 }
 0x332   : > { %3476 = vst.msk [vmem:[%s4567_s9 + $0x968] sm:$0xff] %vm1698_vm1, %v2152_v28 }
 0x333   : > { %3478 = vst.msk [vmem:[%s4567_s9 + $0x978] sm:$0xff] %vm1698_vm1, %v2152_v28  ;;  %v3019_v28 = vperm.slane %v1473_v16, 7  ;;  %v2170_v33 = vperm.slane %v1493_v27, 2  ;;  %v2340_v34 = vperm.slane %v1493_v27, 3  ;;  %v1592_v16 = vpop.f32.mrf.mxu2 }
 0x334   : > { %3588 = vst.msk [vmem:[%s4567_s9 + $0xce8] sm:$0xff] %vm1698_vm1, %v2322_v31 }
 0x335   : > { %3590 = vst.msk [vmem:[%s4567_s9 + $0xcf8] sm:$0xff] %vm1698_vm1, %v2322_v31  ;;  %v1830_v31 = vperm.slane %v1493_v27, 0 }
 0x336   : > { %3700 = vst.msk [vmem:[%s4567_s9 + $0x1068] sm:$0xff] %vm1698_vm1, %v2492_v32 }
 0x337   : > { %3702 = vst.msk [vmem:[%s4567_s9 + $0x1078] sm:$0xff] %vm1698_vm1, %v2492_v32  ;;  %v2000_v32 = vperm.slane %v1493_v27, 1 }
 0x338   : > { %3812 = vst.msk [vmem:[%s4567_s9 + $0x13e8] sm:$0xff] %vm1698_vm1, %v2662_v35 }
 0x339   : > { %3814 = vst.msk [vmem:[%s4567_s9 + $0x13f8] sm:$0xff] %vm1698_vm1, %v2662_v35  ;;  %v2510_v35 = vperm.slane %v1493_v27, 4 }
 0x33a   : > { %3924 = vst.msk [vmem:[%s4567_s9 + $0x1768] sm:$0xff] %vm1698_vm1, %v2832_v36 }
 0x33b   : > { %3926 = vst.msk [vmem:[%s4567_s9 + $0x1778] sm:$0xff] %vm1698_vm1, %v2832_v36  ;;  %v505_v36 = vperm.slane %v5548_v29, 6 }
 0x33c   : > { %4036 = vst.msk [vmem:[%s4567_s9 + $0x1ae8] sm:$0xff] %vm1698_vm1, %v3002_v38 }
 0x33d   : > { %4038 = vst.msk [vmem:[%s4567_s9 + $0x1af8] sm:$0xff] %vm1698_vm1, %v3002_v38  ;;  %v2680_v38 = vperm.slane %v1493_v27, 5 }
 0x33e   : > { %3255 = vst [vmem:[%s4567_s9 + $0x280] sm:$0xff] %v1817_v39 }
 0x33f   : > { %3257 = vst [vmem:[%s4567_s9 + $0x290] sm:$0xff] %v1817_v39  ;;  %v2850_v39 = vperm.slane %v1493_v27, 6 }
 0x340   : > { %3367 = vst [vmem:[%s4567_s9 + $0x600] sm:$0xff] %v1987_v40 }
 0x341   : > { %3369 = vst [vmem:[%s4567_s9 + $0x610] sm:$0xff] %v1987_v40  ;;  %v1513_v40 = vadd.f32 %v1512_v37, %v505_v36 }
 0x342   : > { %3479 = vst [vmem:[%s4567_s9 + $0x980] sm:$0xff] %v2157_v17 }
 0x343   : > { %3481 = vst [vmem:[%s4567_s9 + $0x990] sm:$0xff] %v2157_v17  ;;  %v3020_v17 = vperm.slane %v1493_v27, 7  ;;  %v2175_v43 = vperm.slane %v1513_v40, 2  ;;  %v2345_v44 = vperm.slane %v1513_v40, 3  ;;  %v1612_v27 = vpop.f32.mrf.mxu3 }
 0x344   : > { %3591 = vst [vmem:[%s4567_s9 + $0xd00] sm:$0xff] %v2327_v41 }
 0x345   : > { %3593 = vst [vmem:[%s4567_s9 + $0xd10] sm:$0xff] %v2327_v41  ;;  %v1835_v41 = vperm.slane %v1513_v40, 0 }
 0x346   : > { %3703 = vst [vmem:[%s4567_s9 + $0x1080] sm:$0xff] %v2497_v42 }
 0x347   : > { %3705 = vst [vmem:[%s4567_s9 + $0x1090] sm:$0xff] %v2497_v42  ;;  %v2005_v42 = vperm.slane %v1513_v40, 1 }
 0x348   : > { %3815 = vst [vmem:[%s4567_s9 + $0x1400] sm:$0xff] %v2667_v45 }
 0x349   : > { %3817 = vst [vmem:[%s4567_s9 + $0x1410] sm:$0xff] %v2667_v45  ;;  %v2515_v45 = vperm.slane %v1513_v40, 4 }
 0x34a   : > { %3927 = vst [vmem:[%s4567_s9 + $0x1780] sm:$0xff] %v2837_v46 }
 0x34b   : > { %3929 = vst [vmem:[%s4567_s9 + $0x1790] sm:$0xff] %v2837_v46  ;;  %v506_v46 = vperm.slane %v5548_v29, 7 }
 0x34c   : > { %4039 = vst [vmem:[%s4567_s9 + $0x1b00] sm:$0xff] %v3007_v48 }
 0x34d   : > { %4041 = vst [vmem:[%s4567_s9 + $0x1b10] sm:$0xff] %v3007_v48  ;;  %v2685_v48 = vperm.slane %v1513_v40, 5 }
 0x34e   : > { %3256 = vst.msk [vmem:[%s4567_s9 + $0x288] sm:$0xff] %vm1698_vm1, %v1818_v49 }
 0x34f   : > { %3258 = vst.msk [vmem:[%s4567_s9 + $0x298] sm:$0xff] %vm1698_vm1, %v1818_v49  ;;  %v2855_v49 = vperm.slane %v1513_v40, 6 }
 0x350   : > { %3368 = vst.msk [vmem:[%s4567_s9 + $0x608] sm:$0xff] %vm1698_vm1, %v1988_v50 }
 0x351   : > { %3370 = vst.msk [vmem:[%s4567_s9 + $0x618] sm:$0xff] %vm1698_vm1, %v1988_v50  ;;  %v1533_v50 = vadd.f32 %v1532_v47, %v506_v46 }
 0x352   : > { %3480 = vst.msk [vmem:[%s4567_s9 + $0x988] sm:$0xff] %vm1698_vm1, %v2158_v51 }
 0x353   : > { %3482 = vst.msk [vmem:[%s4567_s9 + $0x998] sm:$0xff] %vm1698_vm1, %v2158_v51  ;;  %v3025_v51 = vperm.slane %v1513_v40, 7  ;;  %v1836_v29 = vperm.slane %v1533_v50, 0  ;;  %v2346_v54 = vperm.slane %v1533_v50, 3  ;;  %v1632_v40 = vpop.f32.mrf.mxu0 }
 0x354   : > { %3592 = vst.msk [vmem:[%s4567_s9 + $0xd08] sm:$0xff] %vm1698_vm1, %v2328_v52 }
 0x355   : > { %3594 = vst.msk [vmem:[%s4567_s9 + $0xd18] sm:$0xff] %vm1698_vm1, %v2328_v52  ;;  %v2006_v52 = vperm.slane %v1533_v50, 1 }
 0x356   : > { %3704 = vst.msk [vmem:[%s4567_s9 + $0x1088] sm:$0xff] %vm1698_vm1, %v2498_v30 }
 0x357   : > { %3706 = vst.msk [vmem:[%s4567_s9 + $0x1098] sm:$0xff] %vm1698_vm1, %v2498_v30  ;;  %v2176_v30 = vperm.slane %v1533_v50, 2 }
 0x358   : > { %3816 = vst.msk [vmem:[%s4567_s9 + $0x1408] sm:$0xff] %vm1698_vm1, %v2668_v56 }
 0x359   : > { %3818 = vst.msk [vmem:[%s4567_s9 + $0x1418] sm:$0xff] %vm1698_vm1, %v2668_v56  ;;  %v2516_v56 = vperm.slane %v1533_v50, 4 }
 0x35a   : > { %3928 = vst.msk [vmem:[%s4567_s9 + $0x1788] sm:$0xff] %vm1698_vm1, %v2838_v57 }
 0x35b   : > { %3930 = vst.msk [vmem:[%s4567_s9 + $0x1798] sm:$0xff] %vm1698_vm1, %v2838_v57  ;;  %v507_v57 = vperm.slane %v5750_v53, 0 }
 0x35c   : > { %4040 = vst.msk [vmem:[%s4567_s9 + $0x1b08] sm:$0xff] %vm1698_vm1, %v3008_v59 }
 0x35d   : > { %4042 = vst.msk [vmem:[%s4567_s9 + $0x1b18] sm:$0xff] %vm1698_vm1, %v3008_v59  ;;  %v2686_v59 = vperm.slane %v1533_v50, 5 }
 0x35e   : > { %3259 = vst [vmem:[%s4567_s9 + $0x2a0] sm:$0xff] %v1823_v60 }
 0x35f   : > { %3261 = vst [vmem:[%s4567_s9 + $0x2b0] sm:$0xff] %v1823_v60  ;;  %v2856_v60 = vperm.slane %v1533_v50, 6 }
 0x360   : > { %3371 = vst [vmem:[%s4567_s9 + $0x620] sm:$0xff] %v1993_v61 }
 0x361   : > { %3373 = vst [vmem:[%s4567_s9 + $0x630] sm:$0xff] %v1993_v61  ;;  %v1553_v61 = vadd.f32 %v1552_v58, %v507_v57 }
 0x362   : > { %3483 = vst [vmem:[%s4567_s9 + $0x9a0] sm:$0xff] %v2163_v62 }
 0x363   : > { %3485 = vst [vmem:[%s4567_s9 + $0x9b0] sm:$0xff] %v2163_v62  ;;  %v3026_v62 = vperm.slane %v1533_v50, 7  ;;  %v2181_v12 = vperm.slane %v1553_v61, 2  ;;  %v2351_v1 = vperm.slane %v1553_v61, 3  ;;  %v1652_v50 = vpop.f32.mrf.mxu1 }
 0x364   : > { %3595 = vst [vmem:[%s4567_s9 + $0xd20] sm:$0xff] %v2333_v63 }
 0x365   : > { %3597 = vst [vmem:[%s4567_s9 + $0xd30] sm:$0xff] %v2333_v63  ;;  %v1841_v63 = vperm.slane %v1553_v61, 0 }
 0x366   : > { %3707 = vst [vmem:[%s4567_s9 + $0x10a0] sm:$0xff] %v2503_v0 }
 0x367   : > { %3709 = vst [vmem:[%s4567_s9 + $0x10b0] sm:$0xff] %v2503_v0  ;;  %v2011_v0 = vperm.slane %v1553_v61, 1 }
 0x368   : > { %3819 = vst [vmem:[%s4567_s9 + $0x1420] sm:$0xff] %v2673_v2 }
 0x369   : > { %3821 = vst [vmem:[%s4567_s9 + $0x1430] sm:$0xff] %v2673_v2  ;;  %v2521_v2 = vperm.slane %v1553_v61, 4 }
 0x36a   : > { %3931 = vst [vmem:[%s4567_s9 + $0x17a0] sm:$0xff] %v2843_v4 }
 0x36b   : > { %3933 = vst [vmem:[%s4567_s9 + $0x17b0] sm:$0xff] %v2843_v4  ;;  %v508_v4 = vperm.slane %v5750_v53, 1 }
 0x36c   : > { %4043 = vst [vmem:[%s4567_s9 + $0x1b20] sm:$0xff] %v3013_v6 }
 0x36d   : > { %4045 = vst [vmem:[%s4567_s9 + $0x1b30] sm:$0xff] %v3013_v6  ;;  %v2691_v6 = vperm.slane %v1553_v61, 5 }
 0x36e   : > { %3260 = vst.msk [vmem:[%s4567_s9 + $0x2a8] sm:$0xff] %vm1698_vm1, %v1824_v7 }
 0x36f   : > { %3262 = vst.msk [vmem:[%s4567_s9 + $0x2b8] sm:$0xff] %vm1698_vm1, %v1824_v7  ;;  %v2861_v7 = vperm.slane %v1553_v61, 6 }
 0x370   : > { %3372 = vst.msk [vmem:[%s4567_s9 + $0x628] sm:$0xff] %vm1698_vm1, %v1994_v8 }
 0x371   : > { %3374 = vst.msk [vmem:[%s4567_s9 + $0x638] sm:$0xff] %vm1698_vm1, %v1994_v8  ;;  %v1573_v8 = vadd.f32 %v1572_v5, %v508_v4 }
 0x372   : > { %3484 = vst.msk [vmem:[%s4567_s9 + $0x9a8] sm:$0xff] %vm1698_vm1, %v2164_v9 }
 0x373   : > { %3486 = vst.msk [vmem:[%s4567_s9 + $0x9b8] sm:$0xff] %vm1698_vm1, %v2164_v9  ;;  %v3031_v9 = vperm.slane %v1553_v61, 7  ;;  %v2182_v13 = vperm.slane %v1573_v8, 2  ;;  %v2352_v14 = vperm.slane %v1573_v8, 3  ;;  %v1672_v61 = vpop.f32.mrf.mxu2 }
 0x374   : > { %3596 = vst.msk [vmem:[%s4567_s9 + $0xd28] sm:$0xff] %vm1698_vm1, %v2334_v10 }
 0x375   : > { %3598 = vst.msk [vmem:[%s4567_s9 + $0xd38] sm:$0xff] %vm1698_vm1, %v2334_v10  ;;  %v1842_v10 = vperm.slane %v1573_v8, 0 }
 0x376   : > { %3708 = vst.msk [vmem:[%s4567_s9 + $0x10a8] sm:$0xff] %vm1698_vm1, %v2504_v11 }
 0x377   : > { %3710 = vst.msk [vmem:[%s4567_s9 + $0x10b8] sm:$0xff] %vm1698_vm1, %v2504_v11  ;;  %v2012_v11 = vperm.slane %v1573_v8, 1 }
 0x378   : > { %3820 = vst.msk [vmem:[%s4567_s9 + $0x1428] sm:$0xff] %vm1698_vm1, %v2674_v55 }
 0x379   : > { %3822 = vst.msk [vmem:[%s4567_s9 + $0x1438] sm:$0xff] %vm1698_vm1, %v2674_v55  ;;  %v2522_v55 = vperm.slane %v1573_v8, 4 }
 0x37a   : > { %3932 = vst.msk [vmem:[%s4567_s9 + $0x17a8] sm:$0xff] %vm1698_vm1, %v2844_v15 }
 0x37b   : > { %3934 = vst.msk [vmem:[%s4567_s9 + $0x17b8] sm:$0xff] %vm1698_vm1, %v2844_v15  ;;  %v509_v15 = vperm.slane %v5750_v53, 2 }
 0x37c   : > { %4044 = vst.msk [vmem:[%s4567_s9 + $0x1b28] sm:$0xff] %vm1698_vm1, %v3014_v18 }
 0x37d   : > { %4046 = vst.msk [vmem:[%s4567_s9 + $0x1b38] sm:$0xff] %vm1698_vm1, %v3014_v18  ;;  %v2692_v18 = vperm.slane %v1573_v8, 5 }
 0x37e   : > { %3263 = vst [vmem:[%s4567_s9 + $0x2c0] sm:$0xff] %v1829_v19 }
 0x37f   : > { %3265 = vst [vmem:[%s4567_s9 + $0x2d0] sm:$0xff] %v1829_v19  ;;  %v2862_v19 = vperm.slane %v1573_v8, 6 }
 0x380   : > { %3375 = vst [vmem:[%s4567_s9 + $0x640] sm:$0xff] %v1999_v20 }
 0x381   : > { %3377 = vst [vmem:[%s4567_s9 + $0x650] sm:$0xff] %v1999_v20  ;;  %v1593_v20 = vadd.f32 %v1592_v16, %v509_v15 }
 0x382   : > { %3487 = vst [vmem:[%s4567_s9 + $0x9c0] sm:$0xff] %v2169_v21 }
 0x383   : > { %3489 = vst [vmem:[%s4567_s9 + $0x9d0] sm:$0xff] %v2169_v21  ;;  %v3032_v21 = vperm.slane %v1573_v8, 7  ;;  %v2187_v24 = vperm.slane %v1593_v20, 2  ;;  %v2357_v25 = vperm.slane %v1593_v20, 3  ;;  %v1692_v8 = vpop.f32.mrf.mxu3 }
 0x384   : > { %3599 = vst [vmem:[%s4567_s9 + $0xd40] sm:$0xff] %v2339_v22 }
 0x385   : > { %3601 = vst [vmem:[%s4567_s9 + $0xd50] sm:$0xff] %v2339_v22  ;;  %v1847_v22 = vperm.slane %v1593_v20, 0 }
 0x386   : > { %3711 = vst [vmem:[%s4567_s9 + $0x10c0] sm:$0xff] %v2509_v23 }
 0x387   : > { %3713 = vst [vmem:[%s4567_s9 + $0x10d0] sm:$0xff] %v2509_v23  ;;  %v2017_v23 = vperm.slane %v1593_v20, 1 }
 0x388   : > { %3823 = vst [vmem:[%s4567_s9 + $0x1440] sm:$0xff] %v2679_v26 }
 0x389   : > { %3825 = vst [vmem:[%s4567_s9 + $0x1450] sm:$0xff] %v2679_v26  ;;  %v2527_v26 = vperm.slane %v1593_v20, 4 }
 0x38a   : > { %3935 = vst [vmem:[%s4567_s9 + $0x17c0] sm:$0xff] %v2849_v3 }
 0x38b   : > { %3937 = vst [vmem:[%s4567_s9 + $0x17d0] sm:$0xff] %v2849_v3  ;;  %v510_v3 = vperm.slane %v5750_v53, 3 }
 0x38c   : > { %4047 = vst [vmem:[%s4567_s9 + $0x1b40] sm:$0xff] %v3019_v28 }
 0x38d   : > { %4049 = vst [vmem:[%s4567_s9 + $0x1b50] sm:$0xff] %v3019_v28  ;;  %v2697_v28 = vperm.slane %v1593_v20, 5 }
 0x38e   : > { %3264 = vst.msk [vmem:[%s4567_s9 + $0x2c8] sm:$0xff] %vm1698_vm1, %v1830_v31 }
 0x38f   : > { %3266 = vst.msk [vmem:[%s4567_s9 + $0x2d8] sm:$0xff] %vm1698_vm1, %v1830_v31  ;;  %v2867_v31 = vperm.slane %v1593_v20, 6 }
 0x390   : > { %3376 = vst.msk [vmem:[%s4567_s9 + $0x648] sm:$0xff] %vm1698_vm1, %v2000_v32 }
 0x391   : > { %3378 = vst.msk [vmem:[%s4567_s9 + $0x658] sm:$0xff] %vm1698_vm1, %v2000_v32  ;;  %v1613_v32 = vadd.f32 %v1612_v27, %v510_v3 }
 0x392   : > { %3488 = vst.msk [vmem:[%s4567_s9 + $0x9c8] sm:$0xff] %vm1698_vm1, %v2170_v33 }
 0x393   : > { %3490 = vst.msk [vmem:[%s4567_s9 + $0x9d8] sm:$0xff] %vm1698_vm1, %v2170_v33  ;;  %v3037_v33 = vperm.slane %v1593_v20, 7  ;;  %v2188_v36 = vperm.slane %v1613_v32, 2  ;;  %v2358_v37 = vperm.slane %v1613_v32, 3 }
 0x394   : > { %3600 = vst.msk [vmem:[%s4567_s9 + $0xd48] sm:$0xff] %vm1698_vm1, %v2340_v34 }
 0x395   : > { %3602 = vst.msk [vmem:[%s4567_s9 + $0xd58] sm:$0xff] %vm1698_vm1, %v2340_v34  ;;  %v1848_v34 = vperm.slane %v1613_v32, 0 }
 0x396   : > { %3712 = vst.msk [vmem:[%s4567_s9 + $0x10c8] sm:$0xff] %vm1698_vm1, %v2510_v35 }
 0x397   : > { %3714 = vst.msk [vmem:[%s4567_s9 + $0x10d8] sm:$0xff] %vm1698_vm1, %v2510_v35  ;;  %v2018_v35 = vperm.slane %v1613_v32, 1 }
 0x398   : > { %3824 = vst.msk [vmem:[%s4567_s9 + $0x1448] sm:$0xff] %vm1698_vm1, %v2680_v38 }
 0x399   : > { %3826 = vst.msk [vmem:[%s4567_s9 + $0x1458] sm:$0xff] %vm1698_vm1, %v2680_v38  ;;  %v2528_v38 = vperm.slane %v1613_v32, 4 }
 0x39a   : > { %3936 = vst.msk [vmem:[%s4567_s9 + $0x17c8] sm:$0xff] %vm1698_vm1, %v2850_v39 }
 0x39b   : > { %3938 = vst.msk [vmem:[%s4567_s9 + $0x17d8] sm:$0xff] %vm1698_vm1, %v2850_v39  ;;  %v511_v39 = vperm.slane %v5750_v53, 4 }
 0x39c   : > { %4048 = vst.msk [vmem:[%s4567_s9 + $0x1b48] sm:$0xff] %vm1698_vm1, %v3020_v17 }
 0x39d   : > { %4050 = vst.msk [vmem:[%s4567_s9 + $0x1b58] sm:$0xff] %vm1698_vm1, %v3020_v17  ;;  %v2698_v17 = vperm.slane %v1613_v32, 5 }
 0x39e   : > { %3267 = vst [vmem:[%s4567_s9 + $0x2e0] sm:$0xff] %v1835_v41 }
 0x39f   : > { %3269 = vst [vmem:[%s4567_s9 + $0x2f0] sm:$0xff] %v1835_v41  ;;  %v2868_v41 = vperm.slane %v1613_v32, 6 }
 0x3a0   : > { %3379 = vst [vmem:[%s4567_s9 + $0x660] sm:$0xff] %v2005_v42 }
 0x3a1   : > { %3381 = vst [vmem:[%s4567_s9 + $0x670] sm:$0xff] %v2005_v42  ;;  %v1633_v42 = vadd.f32 %v1632_v40, %v511_v39 }
 0x3a2   : > { %3491 = vst [vmem:[%s4567_s9 + $0x9e0] sm:$0xff] %v2175_v43 }
 0x3a3   : > { %3493 = vst [vmem:[%s4567_s9 + $0x9f0] sm:$0xff] %v2175_v43  ;;  %v3038_v43 = vperm.slane %v1613_v32, 7  ;;  %v2193_v46 = vperm.slane %v1633_v42, 2  ;;  %v2363_v47 = vperm.slane %v1633_v42, 3 }
 0x3a4   : > { %3603 = vst [vmem:[%s4567_s9 + $0xd60] sm:$0xff] %v2345_v44 }
 0x3a5   : > { %3605 = vst [vmem:[%s4567_s9 + $0xd70] sm:$0xff] %v2345_v44  ;;  %v1853_v44 = vperm.slane %v1633_v42, 0 }
 0x3a6   : > { %3715 = vst [vmem:[%s4567_s9 + $0x10e0] sm:$0xff] %v2515_v45 }
 0x3a7   : > { %3717 = vst [vmem:[%s4567_s9 + $0x10f0] sm:$0xff] %v2515_v45  ;;  %v2023_v45 = vperm.slane %v1633_v42, 1 }
 0x3a8   : > { %3827 = vst [vmem:[%s4567_s9 + $0x1460] sm:$0xff] %v2685_v48 }
 0x3a9   : > { %3829 = vst [vmem:[%s4567_s9 + $0x1470] sm:$0xff] %v2685_v48  ;;  %v2533_v48 = vperm.slane %v1633_v42, 4 }
 0x3aa   : > { %3939 = vst [vmem:[%s4567_s9 + $0x17e0] sm:$0xff] %v2855_v49 }
 0x3ab   : > { %3941 = vst [vmem:[%s4567_s9 + $0x17f0] sm:$0xff] %v2855_v49  ;;  %v512_v49 = vperm.slane %v5750_v53, 5 }
 0x3ac   : > { %4051 = vst [vmem:[%s4567_s9 + $0x1b60] sm:$0xff] %v3025_v51 }
 0x3ad   : > { %4053 = vst [vmem:[%s4567_s9 + $0x1b70] sm:$0xff] %v3025_v51  ;;  %v2703_v51 = vperm.slane %v1633_v42, 5 }
 0x3ae   : > { %3268 = vst.msk [vmem:[%s4567_s9 + $0x2e8] sm:$0xff] %vm1698_vm1, %v1836_v29 }
 0x3af   : > { %3270 = vst.msk [vmem:[%s4567_s9 + $0x2f8] sm:$0xff] %vm1698_vm1, %v1836_v29  ;;  %v2873_v29 = vperm.slane %v1633_v42, 6 }
 0x3b0   : > { %3380 = vst.msk [vmem:[%s4567_s9 + $0x668] sm:$0xff] %vm1698_vm1, %v2006_v52 }
 0x3b1   : > { %3382 = vst.msk [vmem:[%s4567_s9 + $0x678] sm:$0xff] %vm1698_vm1, %v2006_v52  ;;  %v1653_v52 = vadd.f32 %v1652_v50, %v512_v49 }
 0x3b2   : > { %3492 = vst.msk [vmem:[%s4567_s9 + $0x9e8] sm:$0xff] %vm1698_vm1, %v2176_v30 }
 0x3b3   : > { %3494 = vst.msk [vmem:[%s4567_s9 + $0x9f8] sm:$0xff] %vm1698_vm1, %v2176_v30  ;;  %v3043_v30 = vperm.slane %v1633_v42, 7  ;;  %v2194_v57 = vperm.slane %v1653_v52, 2  ;;  %v2364_v58 = vperm.slane %v1653_v52, 3 }
 0x3b4   : > { %3604 = vst.msk [vmem:[%s4567_s9 + $0xd68] sm:$0xff] %vm1698_vm1, %v2346_v54 }
 0x3b5   : > { %3606 = vst.msk [vmem:[%s4567_s9 + $0xd78] sm:$0xff] %vm1698_vm1, %v2346_v54  ;;  %v1854_v54 = vperm.slane %v1653_v52, 0 }
 0x3b6   : > { %3716 = vst.msk [vmem:[%s4567_s9 + $0x10e8] sm:$0xff] %vm1698_vm1, %v2516_v56 }
 0x3b7   : > { %3718 = vst.msk [vmem:[%s4567_s9 + $0x10f8] sm:$0xff] %vm1698_vm1, %v2516_v56  ;;  %v2024_v56 = vperm.slane %v1653_v52, 1 }
 0x3b8   : > { %3828 = vst.msk [vmem:[%s4567_s9 + $0x1468] sm:$0xff] %vm1698_vm1, %v2686_v59 }
 0x3b9   : > { %3830 = vst.msk [vmem:[%s4567_s9 + $0x1478] sm:$0xff] %vm1698_vm1, %v2686_v59  ;;  %v2534_v59 = vperm.slane %v1653_v52, 4 }
 0x3ba   : > { %3940 = vst.msk [vmem:[%s4567_s9 + $0x17e8] sm:$0xff] %vm1698_vm1, %v2856_v60 }
 0x3bb   : > { %3942 = vst.msk [vmem:[%s4567_s9 + $0x17f8] sm:$0xff] %vm1698_vm1, %v2856_v60  ;;  %v513_v60 = vperm.slane %v5750_v53, 6 }
 0x3bc   : > { %4052 = vst.msk [vmem:[%s4567_s9 + $0x1b68] sm:$0xff] %vm1698_vm1, %v3026_v62 }
 0x3bd   : > { %4054 = vst.msk [vmem:[%s4567_s9 + $0x1b78] sm:$0xff] %vm1698_vm1, %v3026_v62  ;;  %v2704_v62 = vperm.slane %v1653_v52, 5 }
 0x3be   : > { %3271 = vst [vmem:[%s4567_s9 + $0x300] sm:$0xff] %v1841_v63 }
 0x3bf   : > { %3273 = vst [vmem:[%s4567_s9 + $0x310] sm:$0xff] %v1841_v63  ;;  %v2874_v63 = vperm.slane %v1653_v52, 6 }
 0x3c0   : > { %3383 = vst [vmem:[%s4567_s9 + $0x680] sm:$0xff] %v2011_v0 }
 0x3c1   : > { %3385 = vst [vmem:[%s4567_s9 + $0x690] sm:$0xff] %v2011_v0  ;;  %v1673_v0 = vadd.f32 %v1672_v61, %v513_v60 }
 0x3c2   : > { %3495 = vst [vmem:[%s4567_s9 + $0xa00] sm:$0xff] %v2181_v12 }
 0x3c3   : > { %3497 = vst [vmem:[%s4567_s9 + $0xa10] sm:$0xff] %v2181_v12  ;;  %v3044_v12 = vperm.slane %v1653_v52, 7  ;;  %v2199_v4 = vperm.slane %v1673_v0, 2  ;;  %v2369_v5 = vperm.slane %v1673_v0, 3 }
 0x3c4   : > { %3607 = vst [vmem:[%s4567_s9 + $0xd80] sm:$0xff] %v2351_v1 }
 0x3c5   : > { %3609 = vst [vmem:[%s4567_s9 + $0xd90] sm:$0xff] %v2351_v1  ;;  %v1859_v1 = vperm.slane %v1673_v0, 0 }
 0x3c6   : > { %3719 = vst [vmem:[%s4567_s9 + $0x1100] sm:$0xff] %v2521_v2 }
 0x3c7   : > { %3721 = vst [vmem:[%s4567_s9 + $0x1110] sm:$0xff] %v2521_v2  ;;  %v2029_v2 = vperm.slane %v1673_v0, 1 }
 0x3c8   : > { %3831 = vst [vmem:[%s4567_s9 + $0x1480] sm:$0xff] %v2691_v6 }
 0x3c9   : > { %3833 = vst [vmem:[%s4567_s9 + $0x1490] sm:$0xff] %v2691_v6  ;;  %v2539_v6 = vperm.slane %v1673_v0, 4 }
 0x3ca   : > { %3943 = vst [vmem:[%s4567_s9 + $0x1800] sm:$0xff] %v2861_v7 }
 0x3cb   : > { %3945 = vst [vmem:[%s4567_s9 + $0x1810] sm:$0xff] %v2861_v7  ;;  %v514_v7 = vperm.slane %v5750_v53, 7 }
 0x3cc   : > { %4055 = vst [vmem:[%s4567_s9 + $0x1b80] sm:$0xff] %v3031_v9 }
 0x3cd   : > { %4057 = vst [vmem:[%s4567_s9 + $0x1b90] sm:$0xff] %v3031_v9  ;;  %v2709_v9 = vperm.slane %v1673_v0, 5 }
 0x3ce   : > { %3272 = vst.msk [vmem:[%s4567_s9 + $0x308] sm:$0xff] %vm1698_vm1, %v1842_v10 }
 0x3cf   : > { %3274 = vst.msk [vmem:[%s4567_s9 + $0x318] sm:$0xff] %vm1698_vm1, %v1842_v10  ;;  %v2879_v10 = vperm.slane %v1673_v0, 6 }
 0x3d0   : > { %3384 = vst.msk [vmem:[%s4567_s9 + $0x688] sm:$0xff] %vm1698_vm1, %v2012_v11 }
 0x3d1   : > { %3386 = vst.msk [vmem:[%s4567_s9 + $0x698] sm:$0xff] %vm1698_vm1, %v2012_v11  ;;  %v1693_v11 = vadd.f32 %v1692_v8, %v514_v7 }
 0x3d2   : > { %3496 = vst.msk [vmem:[%s4567_s9 + $0xa08] sm:$0xff] %vm1698_vm1, %v2182_v13 }
 0x3d3   : > { %3498 = vst.msk [vmem:[%s4567_s9 + $0xa18] sm:$0xff] %vm1698_vm1, %v2182_v13  ;;  %v3049_v13 = vperm.slane %v1673_v0, 7  ;;  %v1860_v53 = vperm.slane %v1693_v11, 0  ;;  %v2370_v15 = vperm.slane %v1693_v11, 3  ;;  %v2540_v16 = vperm.slane %v1693_v11, 4 }
 0x3d4   : > { %3608 = vst.msk [vmem:[%s4567_s9 + $0xd88] sm:$0xff] %vm1698_vm1, %v2352_v14  ;;  %v3050_v20 = vperm.slane %v1693_v11, 7 }
 0x3d5   : > { %3610 = vst.msk [vmem:[%s4567_s9 + $0xd98] sm:$0xff] %vm1698_vm1, %v2352_v14  ;;  %v2030_v14 = vperm.slane %v1693_v11, 1 }
 0x3d6   : > { %3720 = vst.msk [vmem:[%s4567_s9 + $0x1108] sm:$0xff] %vm1698_vm1, %v2522_v55 }
 0x3d7   : > { %3722 = vst.msk [vmem:[%s4567_s9 + $0x1118] sm:$0xff] %vm1698_vm1, %v2522_v55  ;;  %v2200_v55 = vperm.slane %v1693_v11, 2 }
 0x3d8   : > { %3832 = vst.msk [vmem:[%s4567_s9 + $0x1488] sm:$0xff] %vm1698_vm1, %v2692_v18 }
 0x3d9   : > { %3834 = vst.msk [vmem:[%s4567_s9 + $0x1498] sm:$0xff] %vm1698_vm1, %v2692_v18  ;;  %v2710_v18 = vperm.slane %v1693_v11, 5 }
 0x3da   : > { %3944 = vst.msk [vmem:[%s4567_s9 + $0x1808] sm:$0xff] %vm1698_vm1, %v2862_v19 }
 0x3db   : > { %3946 = vst.msk [vmem:[%s4567_s9 + $0x1818] sm:$0xff] %vm1698_vm1, %v2862_v19  ;;  %v2880_v19 = vperm.slane %v1693_v11, 6 }
 0x3dc   : > { %4056 = vst.msk [vmem:[%s4567_s9 + $0x1b88] sm:$0xff] %vm1698_vm1, %v3032_v21 }
 0x3dd   : > { %4058 = vst.msk [vmem:[%s4567_s9 + $0x1b98] sm:$0xff] %vm1698_vm1, %v3032_v21 }
 0x3de   : > { %3275 = vst [vmem:[%s4567_s9 + $0x320] sm:$0xff] %v1847_v22 }
 0x3df   : > { %3277 = vst [vmem:[%s4567_s9 + $0x330] sm:$0xff] %v1847_v22 }
 0x3e0   : > { %3387 = vst [vmem:[%s4567_s9 + $0x6a0] sm:$0xff] %v2017_v23 }
 0x3e1   : > { %3389 = vst [vmem:[%s4567_s9 + $0x6b0] sm:$0xff] %v2017_v23 }
 0x3e2   : > { %3499 = vst [vmem:[%s4567_s9 + $0xa20] sm:$0xff] %v2187_v24 }
 0x3e3   : > { %3501 = vst [vmem:[%s4567_s9 + $0xa30] sm:$0xff] %v2187_v24 }
 0x3e4   : > { %3611 = vst [vmem:[%s4567_s9 + $0xda0] sm:$0xff] %v2357_v25 }
 0x3e5   : > { %3613 = vst [vmem:[%s4567_s9 + $0xdb0] sm:$0xff] %v2357_v25 }
 0x3e6   : > { %3723 = vst [vmem:[%s4567_s9 + $0x1120] sm:$0xff] %v2527_v26 }
 0x3e7   : > { %3725 = vst [vmem:[%s4567_s9 + $0x1130] sm:$0xff] %v2527_v26 }
 0x3e8   : > { %3835 = vst [vmem:[%s4567_s9 + $0x14a0] sm:$0xff] %v2697_v28 }
 0x3e9   : > { %3837 = vst [vmem:[%s4567_s9 + $0x14b0] sm:$0xff] %v2697_v28 }
 0x3ea   : > { %3947 = vst [vmem:[%s4567_s9 + $0x1820] sm:$0xff] %v2867_v31 }
 0x3eb   : > { %3949 = vst [vmem:[%s4567_s9 + $0x1830] sm:$0xff] %v2867_v31 }
 0x3ec   : > { %4059 = vst [vmem:[%s4567_s9 + $0x1ba0] sm:$0xff] %v3037_v33 }
 0x3ed   : > { %4061 = vst [vmem:[%s4567_s9 + $0x1bb0] sm:$0xff] %v3037_v33 }
 0x3ee   : > { %3276 = vst.msk [vmem:[%s4567_s9 + $0x328] sm:$0xff] %vm1698_vm1, %v1848_v34 }
 0x3ef   : > { %3278 = vst.msk [vmem:[%s4567_s9 + $0x338] sm:$0xff] %vm1698_vm1, %v1848_v34 }
 0x3f0   : > { %3388 = vst.msk [vmem:[%s4567_s9 + $0x6a8] sm:$0xff] %vm1698_vm1, %v2018_v35 }
 0x3f1   : > { %3390 = vst.msk [vmem:[%s4567_s9 + $0x6b8] sm:$0xff] %vm1698_vm1, %v2018_v35 }
 0x3f2   : > { %3500 = vst.msk [vmem:[%s4567_s9 + $0xa28] sm:$0xff] %vm1698_vm1, %v2188_v36 }
 0x3f3   : > { %3502 = vst.msk [vmem:[%s4567_s9 + $0xa38] sm:$0xff] %vm1698_vm1, %v2188_v36 }
 0x3f4   : > { %3612 = vst.msk [vmem:[%s4567_s9 + $0xda8] sm:$0xff] %vm1698_vm1, %v2358_v37 }
 0x3f5   : > { %3614 = vst.msk [vmem:[%s4567_s9 + $0xdb8] sm:$0xff] %vm1698_vm1, %v2358_v37 }
 0x3f6   : > { %3724 = vst.msk [vmem:[%s4567_s9 + $0x1128] sm:$0xff] %vm1698_vm1, %v2528_v38 }
 0x3f7   : > { %3726 = vst.msk [vmem:[%s4567_s9 + $0x1138] sm:$0xff] %vm1698_vm1, %v2528_v38 }
 0x3f8   : > { %3836 = vst.msk [vmem:[%s4567_s9 + $0x14a8] sm:$0xff] %vm1698_vm1, %v2698_v17 }
 0x3f9   : > { %3838 = vst.msk [vmem:[%s4567_s9 + $0x14b8] sm:$0xff] %vm1698_vm1, %v2698_v17 }
 0x3fa   : > { %3948 = vst.msk [vmem:[%s4567_s9 + $0x1828] sm:$0xff] %vm1698_vm1, %v2868_v41 }
 0x3fb   : > { %3950 = vst.msk [vmem:[%s4567_s9 + $0x1838] sm:$0xff] %vm1698_vm1, %v2868_v41 }
 0x3fc   : > { %4060 = vst.msk [vmem:[%s4567_s9 + $0x1ba8] sm:$0xff] %vm1698_vm1, %v3038_v43 }
 0x3fd   : > { %4062 = vst.msk [vmem:[%s4567_s9 + $0x1bb8] sm:$0xff] %vm1698_vm1, %v3038_v43 }
 0x3fe   : > { %3279 = vst [vmem:[%s4567_s9 + $0x340] sm:$0xff] %v1853_v44 }
 0x3ff   : > { %3281 = vst [vmem:[%s4567_s9 + $0x350] sm:$0xff] %v1853_v44 }
 0x400   : > { %3391 = vst [vmem:[%s4567_s9 + $0x6c0] sm:$0xff] %v2023_v45 }
 0x401   : > { %3393 = vst [vmem:[%s4567_s9 + $0x6d0] sm:$0xff] %v2023_v45 }
 0x402   : > { %3503 = vst [vmem:[%s4567_s9 + $0xa40] sm:$0xff] %v2193_v46 }
 0x403   : > { %3505 = vst [vmem:[%s4567_s9 + $0xa50] sm:$0xff] %v2193_v46 }
 0x404   : > { %3615 = vst [vmem:[%s4567_s9 + $0xdc0] sm:$0xff] %v2363_v47 }
 0x405   : > { %3617 = vst [vmem:[%s4567_s9 + $0xdd0] sm:$0xff] %v2363_v47 }
 0x406   : > { %3727 = vst [vmem:[%s4567_s9 + $0x1140] sm:$0xff] %v2533_v48 }
 0x407   : > { %3729 = vst [vmem:[%s4567_s9 + $0x1150] sm:$0xff] %v2533_v48 }
 0x408   : > { %3839 = vst [vmem:[%s4567_s9 + $0x14c0] sm:$0xff] %v2703_v51 }
 0x409   : > { %3841 = vst [vmem:[%s4567_s9 + $0x14d0] sm:$0xff] %v2703_v51 }
 0x40a   : > { %3951 = vst [vmem:[%s4567_s9 + $0x1840] sm:$0xff] %v2873_v29 }
 0x40b   : > { %3953 = vst [vmem:[%s4567_s9 + $0x1850] sm:$0xff] %v2873_v29 }
 0x40c   : > { %4063 = vst [vmem:[%s4567_s9 + $0x1bc0] sm:$0xff] %v3043_v30 }
 0x40d   : > { %4065 = vst [vmem:[%s4567_s9 + $0x1bd0] sm:$0xff] %v3043_v30 }
 0x40e   : > { %3280 = vst.msk [vmem:[%s4567_s9 + $0x348] sm:$0xff] %vm1698_vm1, %v1854_v54 }
 0x40f   : > { %3282 = vst.msk [vmem:[%s4567_s9 + $0x358] sm:$0xff] %vm1698_vm1, %v1854_v54 }
 0x410   : > { %3392 = vst.msk [vmem:[%s4567_s9 + $0x6c8] sm:$0xff] %vm1698_vm1, %v2024_v56 }
 0x411   : > { %3394 = vst.msk [vmem:[%s4567_s9 + $0x6d8] sm:$0xff] %vm1698_vm1, %v2024_v56 }
 0x412   : > { %3504 = vst.msk [vmem:[%s4567_s9 + $0xa48] sm:$0xff] %vm1698_vm1, %v2194_v57 }
 0x413   : > { %3506 = vst.msk [vmem:[%s4567_s9 + $0xa58] sm:$0xff] %vm1698_vm1, %v2194_v57 }
 0x414   : > { %3616 = vst.msk [vmem:[%s4567_s9 + $0xdc8] sm:$0xff] %vm1698_vm1, %v2364_v58 }
 0x415   : > { %3618 = vst.msk [vmem:[%s4567_s9 + $0xdd8] sm:$0xff] %vm1698_vm1, %v2364_v58 }
 0x416   : > { %3728 = vst.msk [vmem:[%s4567_s9 + $0x1148] sm:$0xff] %vm1698_vm1, %v2534_v59 }
 0x417   : > { %3730 = vst.msk [vmem:[%s4567_s9 + $0x1158] sm:$0xff] %vm1698_vm1, %v2534_v59 }
 0x418   : > { %3840 = vst.msk [vmem:[%s4567_s9 + $0x14c8] sm:$0xff] %vm1698_vm1, %v2704_v62 }
 0x419   : > { %3842 = vst.msk [vmem:[%s4567_s9 + $0x14d8] sm:$0xff] %vm1698_vm1, %v2704_v62 }
 0x41a   : > { %3952 = vst.msk [vmem:[%s4567_s9 + $0x1848] sm:$0xff] %vm1698_vm1, %v2874_v63 }
 0x41b   : > { %3954 = vst.msk [vmem:[%s4567_s9 + $0x1858] sm:$0xff] %vm1698_vm1, %v2874_v63 }
 0x41c   : > { %4064 = vst.msk [vmem:[%s4567_s9 + $0x1bc8] sm:$0xff] %vm1698_vm1, %v3044_v12 }
 0x41d   : > { %4066 = vst.msk [vmem:[%s4567_s9 + $0x1bd8] sm:$0xff] %vm1698_vm1, %v3044_v12 }
 0x41e   : > { %3283 = vst [vmem:[%s4567_s9 + $0x360] sm:$0xff] %v1859_v1 }
 0x41f   : > { %3285 = vst [vmem:[%s4567_s9 + $0x370] sm:$0xff] %v1859_v1 }
 0x420   : > { %3395 = vst [vmem:[%s4567_s9 + $0x6e0] sm:$0xff] %v2029_v2 }
 0x421   : > { %3397 = vst [vmem:[%s4567_s9 + $0x6f0] sm:$0xff] %v2029_v2 }
 0x422   : > { %3507 = vst [vmem:[%s4567_s9 + $0xa60] sm:$0xff] %v2199_v4 }
 0x423   : > { %3509 = vst [vmem:[%s4567_s9 + $0xa70] sm:$0xff] %v2199_v4 }
 0x424   : > { %3619 = vst [vmem:[%s4567_s9 + $0xde0] sm:$0xff] %v2369_v5 }
 0x425   : > { %3621 = vst [vmem:[%s4567_s9 + $0xdf0] sm:$0xff] %v2369_v5 }
 0x426   : > { %3731 = vst [vmem:[%s4567_s9 + $0x1160] sm:$0xff] %v2539_v6 }
 0x427   : > { %3733 = vst [vmem:[%s4567_s9 + $0x1170] sm:$0xff] %v2539_v6 }
 0x428   : > { %3843 = vst [vmem:[%s4567_s9 + $0x14e0] sm:$0xff] %v2709_v9 }
 0x429   : > { %3845 = vst [vmem:[%s4567_s9 + $0x14f0] sm:$0xff] %v2709_v9 }
 0x42a   : > { %3955 = vst [vmem:[%s4567_s9 + $0x1860] sm:$0xff] %v2879_v10 }
 0x42b   : > { %3957 = vst [vmem:[%s4567_s9 + $0x1870] sm:$0xff] %v2879_v10 }
 0x42c   : > { %4067 = vst [vmem:[%s4567_s9 + $0x1be0] sm:$0xff] %v3049_v13 }
 0x42d   : > { %4069 = vst [vmem:[%s4567_s9 + $0x1bf0] sm:$0xff] %v3049_v13 }
 0x42e   : > { %3284 = vst.msk [vmem:[%s4567_s9 + $0x368] sm:$0xff] %vm1698_vm1, %v1860_v53 }
 0x42f   : > { %3286 = vst.msk [vmem:[%s4567_s9 + $0x378] sm:$0xff] %vm1698_vm1, %v1860_v53 }
 0x430   : > { %3396 = vst.msk [vmem:[%s4567_s9 + $0x6e8] sm:$0xff] %vm1698_vm1, %v2030_v14 }
 0x431   : > { %3398 = vst.msk [vmem:[%s4567_s9 + $0x6f8] sm:$0xff] %vm1698_vm1, %v2030_v14 }
 0x432   : > { %3508 = vst.msk [vmem:[%s4567_s9 + $0xa68] sm:$0xff] %vm1698_vm1, %v2200_v55 }
 0x433   : > { %3510 = vst.msk [vmem:[%s4567_s9 + $0xa78] sm:$0xff] %vm1698_vm1, %v2200_v55 }
 0x434   : > { %3620 = vst.msk [vmem:[%s4567_s9 + $0xde8] sm:$0xff] %vm1698_vm1, %v2370_v15 }
 0x435   : > { %3622 = vst.msk [vmem:[%s4567_s9 + $0xdf8] sm:$0xff] %vm1698_vm1, %v2370_v15 }
 0x436   : > { %3732 = vst.msk [vmem:[%s4567_s9 + $0x1168] sm:$0xff] %vm1698_vm1, %v2540_v16 }
 0x437   : > { %3734 = vst.msk [vmem:[%s4567_s9 + $0x1178] sm:$0xff] %vm1698_vm1, %v2540_v16 }
 0x438   : > { %3844 = vst.msk [vmem:[%s4567_s9 + $0x14e8] sm:$0xff] %vm1698_vm1, %v2710_v18 }
 0x439   : > { %3846 = vst.msk [vmem:[%s4567_s9 + $0x14f8] sm:$0xff] %vm1698_vm1, %v2710_v18 }
 0x43a   : > { %3956 = vst.msk [vmem:[%s4567_s9 + $0x1868] sm:$0xff] %vm1698_vm1, %v2880_v19 }
 0x43b   : > { %3958 = vst.msk [vmem:[%s4567_s9 + $0x1878] sm:$0xff] %vm1698_vm1, %v2880_v19 }
 0x43c   : > { %4068 = vst.msk [vmem:[%s4567_s9 + $0x1be8] sm:$0xff] %vm1698_vm1, %v3050_v20 }
 0x43d   : > { %4070 = vst.msk [vmem:[%s4567_s9 + $0x1bf8] sm:$0xff] %vm1698_vm1, %v3050_v20 }
 0x43e   : > { %4266 = shalt.err (!%p4263_p9)
}
 0x43f   : > { %s4315_s10 = smov 256   ;;  %s4316_s22 = smov 16  }
 0x440   : > { %4088 = dma.vmem_to_hbm [thread:$0]  (%p4406_p4), %s3070_s19, 114688, %s3072_s28, %s3056_s29, %s4315_s10, %s4315_s10, %s4316_s22  }
 0x441 PF: > { %s3086_s23 = sand.u32 1, %s4297_s12   ;;  %p6024_p10 = scmp.ge.s32.totalorder %s4309_s15, 2 }
 0x442   : > { %s3087_s20 = scalar_lea.sflag [#allocation4], %s3086_s23 }
 0x443   : > { %p4102_p13 = pnand %p6024_p10, %p4410_p6 }
 0x445   : > { %p4103_p11 = pneg %p4102_p13 }
 0x447   : > { %4292 = dma.done.wait (%p4103_p11), %s3087_s20, 114688  }
 0x448   : > { %4294 = vsyncadd (%p4103_p11), %s3087_s20, 4294852608  ;;  %p17_p0 = scmp.ge.s32.totalorder %s4380_s4, 4   ;;  %s6025_s12 = smov %s4301_s13 }
 0x449   : > { %s6026_s13 = smov %s4305_s14  ;;  %s6027_s14 = smov %s4391_s7 }
 0x44a   : > { %s6028_s15 = smov %s4380_s4  ;;  %19 = sbr.rel (!%p17_p0) target bundleno = 6 (0x6), region = 100 }
 0x44f   :  { %3093 = vsyncpa [#allocation3], 1 }
 0x450   :  { %3095 = vsyncpa [#allocation3 + $0x1], 1 }
 0x451   :  { %3096 = vsyncpa [#allocation6], 1 }
 0x452   :  { %3097 = vsyncpa [#allocation4], 1 }
 0x453   :  { %3099 = vsyncpa [#allocation4 + $0x1], 1 }

</bundles_post_ra>
